<compile_context>
chip_gen: v7x
topology: tpu7x:2x2x1
jax: 0.10.0
libtpu: 0.0.40
codegen_flags: <defaults>
</compile_context>

<pallas_src>
import functools

import jax
import jax.numpy as jnp
from jax import lax
from jax.experimental import pallas as pl
from jax.experimental.pallas import tpu as pltpu


def encoder_block_kernel(x_ref, w1_ref, b1_ref, w2t_ref, b2_ref, o_ref):
    # x_ref  : (Nb, H, W)         f32 VMEM   (Cin == 1, squeezed in the wrapper)
    # w1_ref : (9, C)             f32 VMEM   conv1 weights, taps flattened (kh*3+kw, cout)
    # b1_ref : (1, C)             f32 VMEM
    # w2t_ref: (C, 9*C)           f32 VMEM   conv2 weights, transposed im2col form
    # b2_ref : (C, 1)             f32 VMEM
    # o_ref  : (Nb, C, Ho2*Wo2)   f32 VMEM   channel-major (== NCHW rows), lane-dense
    Nb, H, W = x_ref.shape
    C = w1_ref.shape[1]
    Ho1, Wo1 = H - 2, W - 2
    Ho2, Wo2 = Ho1 - 2, Wo1 - 2
    HW2 = Ho2 * Wo2

    x = x_ref[...]                                        # (Nb, H, W)

    # ---- conv1 (3x3 valid, Cin=1) + bias + ReLU, on the VPU ------------------
    # 9 broadcast multiply-adds; no MXU pushes with K=1.  Static unroll is fine
    # at this size.
    # TODO(synk): at real U-Net sizes use lax.fori_loop(..., unroll=True) and a
    # VMEM scratch accumulator to bound vreg live ranges.
    acc1 = jnp.zeros((Nb, Ho1, Wo1, C), jnp.float32)
    for kh in range(3):
        for kw in range(3):
            xs = x[:, kh:kh + Ho1, kw:kw + Wo1]           # (Nb, Ho1, Wo1)
            acc1 = acc1 + xs[..., None] * w1_ref[kh * 3 + kw]
    h1 = jnp.maximum(acc1 + b1_ref[0], 0.0)               # (Nb, Ho1, Wo1, C)

    # ---- conv2 (3x3 valid) as ONE im2col matmul on the MXU -------------------
    # patches[m, (kh*3+kw)*C + c] = h1[n, oh+kh, ow+kw, c],  m = (n, oh, ow)
    cols = []
    for kh in range(3):
        for kw in range(3):
            cols.append(h1[:, kh:kh + Ho2, kw:kw + Wo2, :])   # (Nb, Ho2, Wo2, C)
    patches = jnp.concatenate(cols, axis=-1)                  # (Nb, Ho2, Wo2, 9C)
    patches = patches.reshape(Nb * HW2, 9 * C)                # (M2, K), K = 9C = 288

    # NT matmul (both operands contract their last dim): (C, K) x (M2, K) -> (C, M2).
    # Output is channel-major, so no result transpose is needed before the store.
    acc2 = lax.dot_general(
        w2t_ref[...], patches,
        dimension_numbers=(((1,), (1,)), ((), ())),
        preferred_element_type=jnp.float32)                   # (C, M2)
    h2 = jnp.maximum(acc2 + b2_ref[...], 0.0)                 # (C, M2), bias is (C,1)

    # ---- channel-major, lane-dense store (already the NCHW layout) -----------
    for n in range(Nb):                                       # Nb is small, static
        o_ref[n] = h2[:, n * HW2:(n + 1) * HW2].astype(o_ref.dtype)


@functools.partial(jax.jit, static_argnames=("batch_block",))
def encoder_block_pallas(x_nchw, w1, b1, w2, b2, *, batch_block=None):
    """x_nchw: (N, 1, H, W) f32; w1: (3,3,1,C) HWIO; w2: (3,3,C,C) HWIO.

    Returns (N, C, H-4, W-4) f32, matching the PyTorch module (use_bn=False).
    """
    N, Cin, H, W = x_nchw.shape
    # TODO(synk): Cin > 1 would use an im2col K=9*Cin matmul for conv1 (like conv2);
    # the module default in_channels=1 is what is implemented here.
    assert Cin == 1, "kernel specializes the module default in_channels=1"
    C = w1.shape[3]
    Ho, Wo = H - 4, W - 4

    if batch_block is None:
        # Stack images into one matmul per grid step, but keep >= 2 steps so a
        # v7x chip (2 TensorCores) shards the batch; v5e/v6e just loop.
        batch_block = N // 2 if (N % 2 == 0 and N >= 2) else 1
    assert N % batch_block == 0
    grid = (N // batch_block,)

    # Layout glue (tiny, weight-side / metadata-only, plain XLA):
    x3 = x_nchw.reshape(N, H, W)                # squeeze Cin=1 -> no input transpose
    w1r = w1.reshape(9, C)                      # (tap, cout)
    w2t = jnp.transpose(w2.reshape(9 * C, C))   # (cout, tap*cin): NT-matmul LHS
    b1r = b1.reshape(1, C)
    b2r = b2.reshape(C, 1)

    flops = 2 * N * (9 * Cin * C * (H - 2) * (W - 2) + 9 * C * C * Ho * Wo)
    bytes_accessed = 4 * (x3.size + w1r.size + w2t.size + b1r.size + b2r.size
                          + N * C * Ho * Wo)

    out = pl.pallas_call(
        encoder_block_kernel,
        out_shape=jax.ShapeDtypeStruct((N, C, Ho * Wo), x_nchw.dtype),
        grid_spec=pltpu.PrefetchScalarGridSpec(
            num_scalar_prefetch=0,
            grid=grid,
            in_specs=[
                pl.BlockSpec((batch_block, H, W), lambda i: (i, 0, 0)),
                pl.BlockSpec((9, C), lambda i: (0, 0)),
                pl.BlockSpec((1, C), lambda i: (0, 0)),
                pl.BlockSpec((C, 9 * C), lambda i: (0, 0)),
                pl.BlockSpec((C, 1), lambda i: (0, 0)),
            ],
            out_specs=pl.BlockSpec((batch_block, C, Ho * Wo),
                                   lambda i: (i, 0, 0)),
        ),
        compiler_params=pltpu.CompilerParams(
            dimension_semantics=("parallel",),
        ),
        cost_estimate=pl.CostEstimate(flops=flops, transcendentals=0,
                                      bytes_accessed=bytes_accessed),
    )(x3, w1r, b1r, w2t, b2r)

    # (N, C, Ho*Wo) -> (N, C, Ho, Wo): pure minor-dim split, no data movement.
    return out.reshape(N, C, Ho, Wo)


def _reference(x_nchw, w1, b1, w2, b2):
    """Pure-JAX reference of the PyTorch forward (use_bn=False)."""
    dn = ("NCHW", "HWIO", "NCHW")
    h = lax.conv_general_dilated(x_nchw, w1, (1, 1), "VALID",
                                 dimension_numbers=dn)
    h = jnp.maximum(h + b1.reshape(1, -1, 1, 1), 0.0)
    h = lax.conv_general_dilated(h, w2, (1, 1), "VALID",
                                 dimension_numbers=dn)
    h = jnp.maximum(h + b2.reshape(1, -1, 1, 1), 0.0)
    return h


if __name__ == "__main__":
    # Module config (small): filter_num=32, in_channels=1, use_bn=False.
    N, Cin, H, W = 4, 1, 16, 16
    C = 32

    key = jax.random.PRNGKey(0)
    k_x, k_w1, k_b1, k_w2, k_b2 = jax.random.split(key, 5)

    x = jax.random.normal(k_x, (N, Cin, H, W), jnp.float32)

    # Deterministic Kaiming-uniform-like init (matches PyTorch Conv2d shapes, HWIO).
    fan1 = Cin * 3 * 3
    fan2 = C * 3 * 3
    w1 = jax.random.uniform(k_w1, (3, 3, Cin, C), jnp.float32,
                            -1.0 / jnp.sqrt(fan1), 1.0 / jnp.sqrt(fan1))
    b1 = jax.random.uniform(k_b1, (C,), jnp.float32,
                            -1.0 / jnp.sqrt(fan1), 1.0 / jnp.sqrt(fan1))
    w2 = jax.random.uniform(k_w2, (3, 3, C, C), jnp.float32,
                            -1.0 / jnp.sqrt(fan2), 1.0 / jnp.sqrt(fan2))
    b2 = jax.random.uniform(k_b2, (C,), jnp.float32,
                            -1.0 / jnp.sqrt(fan2), 1.0 / jnp.sqrt(fan2))

    out = jax.block_until_ready(encoder_block_pallas(x, w1, b1, w2, b2))
    ref = jax.block_until_ready(_reference(x, w1, b1, w2, b2))

    assert out.shape == (N, C, H - 4, W - 4), out.shape
    max_err = float(jnp.max(jnp.abs(out - ref)))
    assert jnp.allclose(out, ref, atol=1e-4, rtol=1e-4), max_err

    print("KERNEL_OK")
</pallas_src>

<mosaic_0001>
module attributes {stable_mosaic.version = 11 : i64} {
  func.func @encoder_block_kernel(%arg0: i32, %arg1: memref<2x16x16xf32, #tpu.memory_space<vmem>>, %arg2: memref<9x32xf32, #tpu.memory_space<vmem>>, %arg3: memref<1x32xf32, #tpu.memory_space<vmem>>, %arg4: memref<32x288xf32, #tpu.memory_space<vmem>>, %arg5: memref<32x1xf32, #tpu.memory_space<vmem>>, %arg6: memref<2x32x144xf32, #tpu.memory_space<vmem>>) attributes {dimension_semantics = [#tpu.dimension_semantics<parallel>], iteration_bounds = array<i64: 2>, scalar_prefetch = 0 : i64, scratch_operands = 0 : i64, tpu.core_type = #tpu.core_type<tc>, window_params = [{transform_indices = @transform_0, window_bounds = array<i64: 2, 16, 16>}, {pipeline_mode = #tpu.pipeline_mode<synchronous>, transform_indices = @transform_1, window_bounds = array<i64: 9, 32>}, {pipeline_mode = #tpu.pipeline_mode<synchronous>, transform_indices = @transform_2, window_bounds = array<i64: 1, 32>}, {pipeline_mode = #tpu.pipeline_mode<synchronous>, transform_indices = @transform_3, window_bounds = array<i64: 32, 288>}, {pipeline_mode = #tpu.pipeline_mode<synchronous>, transform_indices = @transform_4, window_bounds = array<i64: 32, 1>}, {transform_indices = @transform_5, window_bounds = array<i64: 2, 32, 144>}]} {
    %c0 = arith.constant 0 : index
    %c0_0 = arith.constant 0 : index
    %c0_1 = arith.constant 0 : index
    %0 = vector.load %arg1[%c0, %c0_0, %c0_1] : memref<2x16x16xf32, #tpu.memory_space<vmem>>, vector<2x16x16xf32>
    %cst = arith.constant 0.000000e+00 : f32
    %1 = vector.broadcast %cst : f32 to vector<2x14x14x32xf32>
    %2 = vector.extract_strided_slice %0 {offsets = [0, 0, 0], sizes = [2, 14, 14], strides = [1, 1, 1]} : vector<2x16x16xf32> to vector<2x14x14xf32>
    %3 = vector.shape_cast %2 : vector<2x14x14xf32> to vector<2x14x14x1xf32>
    %c0_2 = arith.constant 0 : index
    %c0_3 = arith.constant 0 : index
    %4 = vector.load %arg2[%c0_2, %c0_3] : memref<9x32xf32, #tpu.memory_space<vmem>>, vector<1x32xf32>
    %5 = vector.shape_cast %4 : vector<1x32xf32> to vector<32xf32>
    %6 = vector.shape_cast %5 : vector<32xf32> to vector<1x1x1x32xf32>
    %7 = vector.broadcast %3 : vector<2x14x14x1xf32> to vector<2x14x14x32xf32>
    %8 = vector.broadcast %6 : vector<1x1x1x32xf32> to vector<2x14x14x32xf32>
    %9 = arith.mulf %7, %8 : vector<2x14x14x32xf32>
    %10 = arith.addf %1, %9 : vector<2x14x14x32xf32>
    %11 = vector.extract_strided_slice %0 {offsets = [0, 0, 1], sizes = [2, 14, 14], strides = [1, 1, 1]} : vector<2x16x16xf32> to vector<2x14x14xf32>
    %12 = vector.shape_cast %11 : vector<2x14x14xf32> to vector<2x14x14x1xf32>
    %c1 = arith.constant 1 : index
    %c0_4 = arith.constant 0 : index
    %13 = vector.load %arg2[%c1, %c0_4] : memref<9x32xf32, #tpu.memory_space<vmem>>, vector<1x32xf32>
    %14 = vector.shape_cast %13 : vector<1x32xf32> to vector<32xf32>
    %15 = vector.shape_cast %14 : vector<32xf32> to vector<1x1x1x32xf32>
    %16 = vector.broadcast %12 : vector<2x14x14x1xf32> to vector<2x14x14x32xf32>
    %17 = vector.broadcast %15 : vector<1x1x1x32xf32> to vector<2x14x14x32xf32>
    %18 = arith.mulf %16, %17 : vector<2x14x14x32xf32>
    %19 = arith.addf %10, %18 : vector<2x14x14x32xf32>
    %20 = vector.extract_strided_slice %0 {offsets = [0, 0, 2], sizes = [2, 14, 14], strides = [1, 1, 1]} : vector<2x16x16xf32> to vector<2x14x14xf32>
    %21 = vector.shape_cast %20 : vector<2x14x14xf32> to vector<2x14x14x1xf32>
    %c2 = arith.constant 2 : index
    %c0_5 = arith.constant 0 : index
    %22 = vector.load %arg2[%c2, %c0_5] : memref<9x32xf32, #tpu.memory_space<vmem>>, vector<1x32xf32>
    %23 = vector.shape_cast %22 : vector<1x32xf32> to vector<32xf32>
    %24 = vector.shape_cast %23 : vector<32xf32> to vector<1x1x1x32xf32>
    %25 = vector.broadcast %21 : vector<2x14x14x1xf32> to vector<2x14x14x32xf32>
    %26 = vector.broadcast %24 : vector<1x1x1x32xf32> to vector<2x14x14x32xf32>
    %27 = arith.mulf %25, %26 : vector<2x14x14x32xf32>
    %28 = arith.addf %19, %27 : vector<2x14x14x32xf32>
    %29 = vector.extract_strided_slice %0 {offsets = [0, 1, 0], sizes = [2, 14, 14], strides = [1, 1, 1]} : vector<2x16x16xf32> to vector<2x14x14xf32>
    %30 = vector.shape_cast %29 : vector<2x14x14xf32> to vector<2x14x14x1xf32>
    %c3 = arith.constant 3 : index
    %c0_6 = arith.constant 0 : index
    %31 = vector.load %arg2[%c3, %c0_6] : memref<9x32xf32, #tpu.memory_space<vmem>>, vector<1x32xf32>
    %32 = vector.shape_cast %31 : vector<1x32xf32> to vector<32xf32>
    %33 = vector.shape_cast %32 : vector<32xf32> to vector<1x1x1x32xf32>
    %34 = vector.broadcast %30 : vector<2x14x14x1xf32> to vector<2x14x14x32xf32>
    %35 = vector.broadcast %33 : vector<1x1x1x32xf32> to vector<2x14x14x32xf32>
    %36 = arith.mulf %34, %35 : vector<2x14x14x32xf32>
    %37 = arith.addf %28, %36 : vector<2x14x14x32xf32>
    %38 = vector.extract_strided_slice %0 {offsets = [0, 1, 1], sizes = [2, 14, 14], strides = [1, 1, 1]} : vector<2x16x16xf32> to vector<2x14x14xf32>
    %39 = vector.shape_cast %38 : vector<2x14x14xf32> to vector<2x14x14x1xf32>
    %c4 = arith.constant 4 : index
    %c0_7 = arith.constant 0 : index
    %40 = vector.load %arg2[%c4, %c0_7] : memref<9x32xf32, #tpu.memory_space<vmem>>, vector<1x32xf32>
    %41 = vector.shape_cast %40 : vector<1x32xf32> to vector<32xf32>
    %42 = vector.shape_cast %41 : vector<32xf32> to vector<1x1x1x32xf32>
    %43 = vector.broadcast %39 : vector<2x14x14x1xf32> to vector<2x14x14x32xf32>
    %44 = vector.broadcast %42 : vector<1x1x1x32xf32> to vector<2x14x14x32xf32>
    %45 = arith.mulf %43, %44 : vector<2x14x14x32xf32>
    %46 = arith.addf %37, %45 : vector<2x14x14x32xf32>
    %47 = vector.extract_strided_slice %0 {offsets = [0, 1, 2], sizes = [2, 14, 14], strides = [1, 1, 1]} : vector<2x16x16xf32> to vector<2x14x14xf32>
    %48 = vector.shape_cast %47 : vector<2x14x14xf32> to vector<2x14x14x1xf32>
    %c5 = arith.constant 5 : index
    %c0_8 = arith.constant 0 : index
    %49 = vector.load %arg2[%c5, %c0_8] : memref<9x32xf32, #tpu.memory_space<vmem>>, vector<1x32xf32>
    %50 = vector.shape_cast %49 : vector<1x32xf32> to vector<32xf32>
    %51 = vector.shape_cast %50 : vector<32xf32> to vector<1x1x1x32xf32>
    %52 = vector.broadcast %48 : vector<2x14x14x1xf32> to vector<2x14x14x32xf32>
    %53 = vector.broadcast %51 : vector<1x1x1x32xf32> to vector<2x14x14x32xf32>
    %54 = arith.mulf %52, %53 : vector<2x14x14x32xf32>
    %55 = arith.addf %46, %54 : vector<2x14x14x32xf32>
    %56 = vector.extract_strided_slice %0 {offsets = [0, 2, 0], sizes = [2, 14, 14], strides = [1, 1, 1]} : vector<2x16x16xf32> to vector<2x14x14xf32>
    %57 = vector.shape_cast %56 : vector<2x14x14xf32> to vector<2x14x14x1xf32>
    %c6 = arith.constant 6 : index
    %c0_9 = arith.constant 0 : index
    %58 = vector.load %arg2[%c6, %c0_9] : memref<9x32xf32, #tpu.memory_space<vmem>>, vector<1x32xf32>
    %59 = vector.shape_cast %58 : vector<1x32xf32> to vector<32xf32>
    %60 = vector.shape_cast %59 : vector<32xf32> to vector<1x1x1x32xf32>
    %61 = vector.broadcast %57 : vector<2x14x14x1xf32> to vector<2x14x14x32xf32>
    %62 = vector.broadcast %60 : vector<1x1x1x32xf32> to vector<2x14x14x32xf32>
    %63 = arith.mulf %61, %62 : vector<2x14x14x32xf32>
    %64 = arith.addf %55, %63 : vector<2x14x14x32xf32>
    %65 = vector.extract_strided_slice %0 {offsets = [0, 2, 1], sizes = [2, 14, 14], strides = [1, 1, 1]} : vector<2x16x16xf32> to vector<2x14x14xf32>
    %66 = vector.shape_cast %65 : vector<2x14x14xf32> to vector<2x14x14x1xf32>
    %c7 = arith.constant 7 : index
    %c0_10 = arith.constant 0 : index
    %67 = vector.load %arg2[%c7, %c0_10] : memref<9x32xf32, #tpu.memory_space<vmem>>, vector<1x32xf32>
    %68 = vector.shape_cast %67 : vector<1x32xf32> to vector<32xf32>
    %69 = vector.shape_cast %68 : vector<32xf32> to vector<1x1x1x32xf32>
    %70 = vector.broadcast %66 : vector<2x14x14x1xf32> to vector<2x14x14x32xf32>
    %71 = vector.broadcast %69 : vector<1x1x1x32xf32> to vector<2x14x14x32xf32>
    %72 = arith.mulf %70, %71 : vector<2x14x14x32xf32>
    %73 = arith.addf %64, %72 : vector<2x14x14x32xf32>
    %74 = vector.extract_strided_slice %0 {offsets = [0, 2, 2], sizes = [2, 14, 14], strides = [1, 1, 1]} : vector<2x16x16xf32> to vector<2x14x14xf32>
    %75 = vector.shape_cast %74 : vector<2x14x14xf32> to vector<2x14x14x1xf32>
    %c8 = arith.constant 8 : index
    %c0_11 = arith.constant 0 : index
    %76 = vector.load %arg2[%c8, %c0_11] : memref<9x32xf32, #tpu.memory_space<vmem>>, vector<1x32xf32>
    %77 = vector.shape_cast %76 : vector<1x32xf32> to vector<32xf32>
    %78 = vector.shape_cast %77 : vector<32xf32> to vector<1x1x1x32xf32>
    %79 = vector.broadcast %75 : vector<2x14x14x1xf32> to vector<2x14x14x32xf32>
    %80 = vector.broadcast %78 : vector<1x1x1x32xf32> to vector<2x14x14x32xf32>
    %81 = arith.mulf %79, %80 : vector<2x14x14x32xf32>
    %82 = arith.addf %73, %81 : vector<2x14x14x32xf32>
    %c0_12 = arith.constant 0 : index
    %c0_13 = arith.constant 0 : index
    %83 = vector.load %arg3[%c0_12, %c0_13] : memref<1x32xf32, #tpu.memory_space<vmem>>, vector<1x32xf32>
    %84 = vector.shape_cast %83 : vector<1x32xf32> to vector<32xf32>
    %85 = vector.shape_cast %84 : vector<32xf32> to vector<1x1x1x32xf32>
    %86 = vector.broadcast %85 : vector<1x1x1x32xf32> to vector<2x14x14x32xf32>
    %87 = arith.addf %82, %86 : vector<2x14x14x32xf32>
    %cst_14 = arith.constant 0.000000e+00 : f32
    %88 = vector.broadcast %cst_14 : f32 to vector<2x14x14x32xf32>
    %89 = arith.maximumf %87, %88 : vector<2x14x14x32xf32>
    %90 = vector.extract_strided_slice %89 {offsets = [0, 0, 0, 0], sizes = [2, 12, 12, 32], strides = [1, 1, 1, 1]} : vector<2x14x14x32xf32> to vector<2x12x12x32xf32>
    %91 = vector.extract_strided_slice %89 {offsets = [0, 0, 1, 0], sizes = [2, 12, 12, 32], strides = [1, 1, 1, 1]} : vector<2x14x14x32xf32> to vector<2x12x12x32xf32>
    %92 = vector.extract_strided_slice %89 {offsets = [0, 0, 2, 0], sizes = [2, 12, 12, 32], strides = [1, 1, 1, 1]} : vector<2x14x14x32xf32> to vector<2x12x12x32xf32>
    %93 = vector.extract_strided_slice %89 {offsets = [0, 1, 0, 0], sizes = [2, 12, 12, 32], strides = [1, 1, 1, 1]} : vector<2x14x14x32xf32> to vector<2x12x12x32xf32>
    %94 = vector.extract_strided_slice %89 {offsets = [0, 1, 1, 0], sizes = [2, 12, 12, 32], strides = [1, 1, 1, 1]} : vector<2x14x14x32xf32> to vector<2x12x12x32xf32>
    %95 = vector.extract_strided_slice %89 {offsets = [0, 1, 2, 0], sizes = [2, 12, 12, 32], strides = [1, 1, 1, 1]} : vector<2x14x14x32xf32> to vector<2x12x12x32xf32>
    %96 = vector.extract_strided_slice %89 {offsets = [0, 2, 0, 0], sizes = [2, 12, 12, 32], strides = [1, 1, 1, 1]} : vector<2x14x14x32xf32> to vector<2x12x12x32xf32>
    %97 = vector.extract_strided_slice %89 {offsets = [0, 2, 1, 0], sizes = [2, 12, 12, 32], strides = [1, 1, 1, 1]} : vector<2x14x14x32xf32> to vector<2x12x12x32xf32>
    %98 = vector.extract_strided_slice %89 {offsets = [0, 2, 2, 0], sizes = [2, 12, 12, 32], strides = [1, 1, 1, 1]} : vector<2x14x14x32xf32> to vector<2x12x12x32xf32>
    %99 = tpu.concatenate %90, %91, %92, %93, %94, %95, %96, %97, %98 in 3 : vector<2x12x12x32xf32>, vector<2x12x12x32xf32>, vector<2x12x12x32xf32>, vector<2x12x12x32xf32>, vector<2x12x12x32xf32>, vector<2x12x12x32xf32>, vector<2x12x12x32xf32>, vector<2x12x12x32xf32>, vector<2x12x12x32xf32> -> vector<2x12x12x288xf32>
    %100 = vector.shape_cast %99 : vector<2x12x12x288xf32> to vector<288x288xf32>
    %c0_15 = arith.constant 0 : index
    %c0_16 = arith.constant 0 : index
    %101 = vector.load %arg4[%c0_15, %c0_16] : memref<32x288xf32, #tpu.memory_space<vmem>>, vector<32x288xf32>
    %cst_17 = arith.constant dense<0.000000e+00> : vector<32x288xf32>
    %102 = tpu.matmul %101, %100, %cst_17 {dimension_numbers = #tpu.dot_dimension_numbers<[1], [1], [0], [0], [0, 0, 1, 0], [], []>} : vector<32x288xf32>, vector<288x288xf32>, vector<32x288xf32> -> vector<32x288xf32>
    %c0_18 = arith.constant 0 : index
    %c0_19 = arith.constant 0 : index
    %103 = vector.load %arg5[%c0_18, %c0_19] : memref<32x1xf32, #tpu.memory_space<vmem>>, vector<32x1xf32>
    %104 = vector.broadcast %103 : vector<32x1xf32> to vector<32x288xf32>
    %105 = arith.addf %102, %104 : vector<32x288xf32>
    %cst_20 = arith.constant 0.000000e+00 : f32
    %106 = vector.broadcast %cst_20 : f32 to vector<32x288xf32>
    %107 = arith.maximumf %105, %106 : vector<32x288xf32>
    %108 = vector.extract_strided_slice %107 {offsets = [0, 0], sizes = [32, 144], strides = [1, 1]} : vector<32x288xf32> to vector<32x144xf32>
    %c0_21 = arith.constant 0 : index
    %c0_22 = arith.constant 0 : index
    %c0_23 = arith.constant 0 : index
    %109 = vector.load %arg6[%c0_21, %c0_22, %c0_23] : memref<2x32x144xf32, #tpu.memory_space<vmem>>, vector<1x32x144xf32>
    %110 = vector.shape_cast %109 : vector<1x32x144xf32> to vector<32x144xf32>
    %111 = vector.shape_cast %108 : vector<32x144xf32> to vector<1x32x144xf32>
    tpu.vector_store %arg6[%c0_21, %c0_22, %c0_23], %111 {strides = array<i32>} : memref<2x32x144xf32, #tpu.memory_space<vmem>>, vector<1x32x144xf32>,
    %112 = vector.extract_strided_slice %107 {offsets = [0, 144], sizes = [32, 144], strides = [1, 1]} : vector<32x288xf32> to vector<32x144xf32>
    %c1_24 = arith.constant 1 : index
    %c0_25 = arith.constant 0 : index
    %c0_26 = arith.constant 0 : index
    %113 = vector.load %arg6[%c1_24, %c0_25, %c0_26] : memref<2x32x144xf32, #tpu.memory_space<vmem>>, vector<1x32x144xf32>
    %114 = vector.shape_cast %113 : vector<1x32x144xf32> to vector<32x144xf32>
    %115 = vector.shape_cast %112 : vector<32x144xf32> to vector<1x32x144xf32>
    tpu.vector_store %arg6[%c1_24, %c0_25, %c0_26], %115 {strides = array<i32>} : memref<2x32x144xf32, #tpu.memory_space<vmem>>, vector<1x32x144xf32>,
    return
  }
  func.func @transform_0(%arg0: i32) -> (i32, i32, i32) {
    %c0_i32 = arith.constant 0 : i32
    %c0_i32_0 = arith.constant 0 : i32
    %c0_i32_1 = arith.constant 0 : i32
    return %arg0, %c0_i32, %c0_i32_0 : i32, i32, i32
  }
  func.func @transform_1(%arg0: i32) -> (i32, i32) {
    %c0_i32 = arith.constant 0 : i32
    %c0_i32_0 = arith.constant 0 : i32
    %c0_i32_1 = arith.constant 0 : i32
    return %c0_i32, %c0_i32_0 : i32, i32
  }
  func.func @transform_2(%arg0: i32) -> (i32, i32) {
    %c0_i32 = arith.constant 0 : i32
    %c0_i32_0 = arith.constant 0 : i32
    %c0_i32_1 = arith.constant 0 : i32
    return %c0_i32, %c0_i32_0 : i32, i32
  }
  func.func @transform_3(%arg0: i32) -> (i32, i32) {
    %c0_i32 = arith.constant 0 : i32
    %c0_i32_0 = arith.constant 0 : i32
    %c0_i32_1 = arith.constant 0 : i32
    return %c0_i32, %c0_i32_0 : i32, i32
  }
  func.func @transform_4(%arg0: i32) -> (i32, i32) {
    %c0_i32 = arith.constant 0 : i32
    %c0_i32_0 = arith.constant 0 : i32
    %c0_i32_1 = arith.constant 0 : i32
    return %c0_i32, %c0_i32_0 : i32, i32
  }
  func.func @transform_5(%arg0: i32) -> (i32, i32, i32) {
    %c0_i32 = arith.constant 0 : i32
    %c0_i32_0 = arith.constant 0 : i32
    %c0_i32_1 = arith.constant 0 : i32
    return %arg0, %c0_i32, %c0_i32_0 : i32, i32, i32
  }
}

</mosaic_0001>

<bundles_post_ra>
// kernel: encoder_block_pallas.1
= control target key start
LH: loop header
LB: loop body
LE: loop exit
PB: predicated region body
PF: predicated region fallthrough
CT: control target
= control target key end

     0   :  { %s5255_s18 = smov 0   ;;  %s9957_s0 = inlined_call_operand.vmem [shape: f32[4,16,16], index: 0, kind: input, shape index: {}]   ;;  %s9958_s1 = inlined_call_operand.vmem [shape: f32[9,32], index: 1, kind: input, shape index: {}]   ;;  %s9959_s2 = inlined_call_operand.vmem [shape: f32[1,32], index: 2, kind: input, shape index: {}]   ;;  %s9960_s3 = inlined_call_operand.vmem [shape: f32[32,288], index: 3, kind: input, shape index: {}]   ;;  %s9961_s4 = inlined_call_operand.vmem [shape: f32[32,1], index: 4, kind: input, shape index: {}]   ;;  %s9962_s5 = inlined_call_operand.vmem [shape: f32[4,32,144], index: 5, kind: output, shape index: {}]  }
   0x1 LB: > { %s4667_s19 = sadd.s32 4294967295, %s5218_s18   ;;  %p4671_p0 = scmp.ge.s32.totalorder %s5218_s18, 1  ;;  %s5218_s18 = sphi %s5255_s18, %s15_s18  }
   0x2   : > { %p189_p1 = scmp.lt.s32.totalorder %s5218_s18, 3 }
   0x4   : > { %p190_p2 = pnand %p4671_p0, %p189_p1 }
   0x6   : > { %193 = sbr.rel (%p190_p2) target bundleno = 1492 (0x5d4), region = 40 }
   0xd   : > { %s4672_s20 = sshll.u32 %s4667_s19, 1  ;;  %v237_v0 = vlaneseq  ;;  %vm2321_vm0 = vcmask 1046528   ;;  %s5220_s22 = smov 32   ;;  %vm2538_vm1 = vcmask 1045504   ;;  %vm3411_vm2 = vcmask 261120  }
   0xe   : > { %p220_p3 = scmp.lt.s32.totalorder %s4672_s20, 3  ;;  %s5221_s19 = smov 64   ;;  %vm8371_vm3 = vmpackc.low %vm3411_vm2, %vm3411_vm2  ;;  %vm3460_vm4 = vcmask 523264   ;;  %vm3509_vm5 = vcmask 785408   ;;  %vm4555_vm6 = vcmask 130048   ;;  %vm4587_vm7 = vcmask 916480  }
   0xf   : > { %v238_v1 = vshrl.u32 %v237_v0, 7 }
  0x10   : > { %s11358_s20 = smov (!%p220_p3, %s4672_s20), 3 }
  0x11   : > { %v5265_v2 = vsub.s32 1, %v238_v1  ;;  %v5267_v3 = vsub.s32 0, %v238_v1  ;;  %s4790_s21 = sshll.u32 %s11358_s20, 4  ;;  %v5284_v7 = vsub.s32 2, %v238_v1  ;;  %v5291_v9 = vsub.s32 3, %v238_v1  ;;  %s4791_s7 = sshll.u32 %s11358_s20, 6 }
  0x12   : > { %s5273_s24 = scalar_lea.vmem %s9957_s0, %s4790_s21  ;;  %v5298_v11 = vsub.s32 4, %v238_v1  ;;  %v5305_v13 = vsub.s32 5, %v238_v1  ;;  %v5312_v15 = vsub.s32 6, %v238_v1  ;;  %v5319_v17 = vsub.s32 7, %v238_v1  ;;  %s5222_s21 = smov 96  }
  0x13   : > { %v233_v4 = vld [vmem:[%s5273_s24] sm:$0xff]  ;;  %v5327_v19 = vld [vmem:[%s5273_s24 + $0x8] sm:$0xff]  ;;  %v235_v26 = vld [vmem:[%s5273_s24 + $0x10] sm:$0xff]  ;;  %s5224_s20 = smov 112  }
  0x14   : > { %v5277_v5 = vrot.slane %v233_v4, %v5265_v2  ;;  %v5280_v6 = vrot.slane %v233_v4, %v5267_v3  ;;  %v5289_v8 = vrot.slane %v233_v4, %v5284_v7  ;;  %v5296_v10 = vrot.slane %v233_v4, %v5291_v9  ;;  %10321 = vst [vmem:[#allocation2_spill] sm:$0xff] %v5312_v15  ;;  %v5407_v35 = vld [vmem:[%s5273_s24 + $0x18] sm:$0xff] }
  0x15   : > { %v5303_v12 = vrot.slane %v233_v4, %v5298_v11  ;;  %v5310_v14 = vrot.slane %v233_v4, %v5305_v13  ;;  %v5317_v16 = vrot.slane %v233_v4, %v5312_v15  ;;  %10322 = vst [vmem:[#allocation3_spill] sm:$0xff] %v5319_v17  ;;  %v5324_v18 = vrot.slane %v233_v4, %v5319_v17 }
  0x16   : > { %253 = vbcast.lane.b32.xlu1 %v5277_v5, 256  ;;  %242 = vbcast.lane.b32.xlu0 %v5280_v6, 256  ;;  %10323 = vst [vmem:[#allocation4_spill] sm:$0xff] %v5327_v19  ;;  %v5333_v20 = vrot.slane %v5327_v19, %v5267_v3  ;;  %v5339_v21 = vrot.slane %v5327_v19, %v5265_v2  ;;  %10331 = vst [vmem:[#allocation12_spill] sm:$0xff] %v5407_v35 }
  0x17   : > { %v5345_v22 = vrot.slane %v5327_v19, %v5284_v7  ;;  %v5351_v23 = vrot.slane %v5327_v19, %v5291_v9  ;;  %v5357_v24 = vrot.slane %v5327_v19, %v5298_v11  ;;  %v5363_v25 = vrot.slane %v5327_v19, %v5305_v13 }
  0x18   : > { %v5369_v27 = vrot.slane %v235_v26, %v5267_v3  ;;  %v5374_v28 = vrot.slane %v235_v26, %v5265_v2  ;;  %v5379_v29 = vrot.slane %v235_v26, %v5284_v7  ;;  %v5384_v30 = vrot.slane %v235_v26, %v5291_v9 }
  0x19   : > { %v5389_v31 = vrot.slane %v235_v26, %v5298_v11  ;;  %v5394_v32 = vrot.slane %v235_v26, %v5305_v13  ;;  %v5399_v33 = vrot.slane %v235_v26, %v5312_v15  ;;  %v5404_v34 = vrot.slane %v235_v26, %v5319_v17 }
  0x1a   : > { %257 = vbcast.lane.b32.xlu1 %v5277_v5, 264  ;;  %246 = vbcast.lane.b32.xlu0 %v5280_v6, 264  ;;  %10324 = vst [vmem:[#allocation5_spill] sm:$0xff] %v5374_v28  ;;  %10325 = vst [vmem:[#allocation6_spill] sm:$0xff] %v5379_v29  ;;  %v5413_v36 = vrot.slane %v5407_v35, %v5267_v3  ;;  %v5419_v37 = vrot.slane %v5407_v35, %v5265_v2 }
  0x1b   : > { %10326 = vst [vmem:[#allocation7_spill] sm:$0xff] %v5384_v30  ;;  %10327 = vst [vmem:[#allocation8_spill] sm:$0xff] %v5389_v31  ;;  %v5425_v38 = vrot.slane %v5407_v35, %v5284_v7  ;;  %v5431_v39 = vrot.slane %v5407_v35, %v5291_v9  ;;  %v5437_v40 = vrot.slane %v5407_v35, %v5298_v11 }
  0x1c   : > { %10328 = vst [vmem:[#allocation9_spill] sm:$0xff] %v5394_v32  ;;  %10329 = vst [vmem:[#allocation10_spill] sm:$0xff] %v5399_v33  ;;  %v5443_v41 = vrot.slane %v5407_v35, %v5305_v13 }
  0x1d   : > { %10330 = vst [vmem:[#allocation11_spill] sm:$0xff] %v5404_v34  ;;  %10332 = vst [vmem:[#allocation13_spill] sm:$0xff] %v5413_v36 }
  0x1e   : > { %268 = vbcast.lane.b32.xlu1 %v5289_v8, 264  ;;  %264 = vbcast.lane.b32.xlu0 %v5289_v8, 256  ;;  %10333 = vst [vmem:[#allocation14_spill] sm:$0xff] %v5419_v37  ;;  %10334 = vst [vmem:[#allocation15_spill] sm:$0xff] %v5425_v38 }
  0x1f   : > { %10335 = vst [vmem:[#allocation16_spill] sm:$0xff] %v5431_v39  ;;  %10336 = vst [vmem:[#allocation17_spill] sm:$0xff] %v5437_v40 }
  0x20   : > { %10337 = vst [vmem:[#allocation18_spill] sm:$0xff] %v5443_v41 }
  0x22   : > { %279 = vbcast.lane.b32.xlu1 %v5296_v10, 264  ;;  %275 = vbcast.lane.b32.xlu0 %v5296_v10, 256 }
  0x26   : > { %290 = vbcast.lane.b32.xlu1 %v5303_v12, 264  ;;  %286 = vbcast.lane.b32.xlu0 %v5303_v12, 256 }
  0x2a   : > { %301 = vbcast.lane.b32.xlu1 %v5310_v14, 264  ;;  %297 = vbcast.lane.b32.xlu0 %v5310_v14, 256 }
  0x2e   : > { %312 = vbcast.lane.b32.xlu1 %v5317_v16, 264  ;;  %308 = vbcast.lane.b32.xlu0 %v5317_v16, 256 }
  0x32   : > { %323 = vbcast.lane.b32.xlu1 %v5324_v18, 264  ;;  %319 = vbcast.lane.b32.xlu0 %v5324_v18, 256 }
  0x36   : > { %334 = vbcast.lane.b32.xlu1 %v5333_v20, 264  ;;  %330 = vbcast.lane.b32.xlu0 %v5333_v20, 256 }
  0x3a   : > { %345 = vbcast.lane.b32.xlu1 %v5339_v21, 264  ;;  %341 = vbcast.lane.b32.xlu0 %v5339_v21, 256 }
  0x3e   : > { %356 = vbcast.lane.b32.xlu1 %v5345_v22, 264  ;;  %352 = vbcast.lane.b32.xlu0 %v5345_v22, 256 }
  0x42   : > { %367 = vbcast.lane.b32.xlu1 %v5351_v23, 264  ;;  %363 = vbcast.lane.b32.xlu0 %v5351_v23, 256 }
  0x46   : > { %378 = vbcast.lane.b32.xlu1 %v5357_v24, 264  ;;  %374 = vbcast.lane.b32.xlu0 %v5357_v24, 256 }
  0x4a   : > { %389 = vbcast.lane.b32.xlu1 %v5363_v25, 264  ;;  %385 = vbcast.lane.b32.xlu0 %v5363_v25, 256 }
  0x4e   : > { %400 = vbcast.lane.b32.xlu1 %v5369_v27, 264  ;;  %396 = vbcast.lane.b32.xlu0 %v5369_v27, 256 }
  0x52   : > { %411 = vbcast.lane.b32.xlu1 %v5374_v28, 264  ;;  %407 = vbcast.lane.b32.xlu0 %v5374_v28, 256 }
  0x56   : > { %422 = vbcast.lane.b32.xlu1 %v5379_v29, 264  ;;  %418 = vbcast.lane.b32.xlu0 %v5379_v29, 256 }
  0x5a   : > { %433 = vbcast.lane.b32.xlu1 %v5384_v30, 264  ;;  %429 = vbcast.lane.b32.xlu0 %v5384_v30, 256 }
  0x5e   : > { %444 = vbcast.lane.b32.xlu1 %v5389_v31, 264  ;;  %440 = vbcast.lane.b32.xlu0 %v5389_v31, 256 }
  0x62   : > { %455 = vbcast.lane.b32.xlu1 %v5394_v32, 264  ;;  %451 = vbcast.lane.b32.xlu0 %v5394_v32, 256 }
  0x66   : > { %466 = vbcast.lane.b32.xlu1 %v5399_v33, 264  ;;  %462 = vbcast.lane.b32.xlu0 %v5399_v33, 256 }
  0x6a   : > { %477 = vbcast.lane.b32.xlu1 %v5404_v34, 264  ;;  %473 = vbcast.lane.b32.xlu0 %v5404_v34, 256 }
  0x6e   : > { %488 = vbcast.lane.b32.xlu1 %v5413_v36, 264  ;;  %484 = vbcast.lane.b32.xlu0 %v5413_v36, 256 }
  0x72   : > { %499 = vbcast.lane.b32.xlu1 %v5419_v37, 264  ;;  %495 = vbcast.lane.b32.xlu0 %v5419_v37, 256 }
  0x76   : > { %510 = vbcast.lane.b32.xlu1 %v5425_v38, 264  ;;  %506 = vbcast.lane.b32.xlu0 %v5425_v38, 256 }
  0x7a   : > { %521 = vbcast.lane.b32.xlu1 %v5431_v39, 264  ;;  %517 = vbcast.lane.b32.xlu0 %v5431_v39, 256 }
  0x7e   : > { %532 = vbcast.lane.b32.xlu1 %v5437_v40, 264  ;;  %528 = vbcast.lane.b32.xlu0 %v5437_v40, 256 }
  0x82   : > { %543 = vbcast.lane.b32.xlu1 %v5443_v41, 264  ;;  %539 = vbcast.lane.b32.xlu0 %v5443_v41, 256 }
  0x86   : > { %668 = vbcast.lane.b32.xlu1 %v5280_v6, 265  ;;  %664 = vbcast.lane.b32.xlu0 %v5280_v6, 257 }
  0x88   : > { %v5449_v42 = vpop.permute.xlu1 %253  ;;  %v5451_v43 = vpop.permute.xlu0 %242 }
  0x8a   : > { %676 = vbcast.lane.b32.xlu1 %v5277_v5, 265  ;;  %672 = vbcast.lane.b32.xlu0 %v5277_v5, 257 }
  0x8c   : > { %v5455_v44 = vpop.permute.xlu1 %257  ;;  %v5457_v45 = vpop.permute.xlu0 %246 }
  0x8e   : > { %684 = vbcast.lane.b32.xlu1 %v5289_v8, 265  ;;  %680 = vbcast.lane.b32.xlu0 %v5289_v8, 257 }
  0x90   : > { %v5461_v46 = vpop.permute.xlu1 %268  ;;  %v5463_v47 = vpop.permute.xlu0 %264 }
  0x92   : > { %692 = vbcast.lane.b32.xlu1 %v5296_v10, 265  ;;  %688 = vbcast.lane.b32.xlu0 %v5296_v10, 257 }
  0x94   : > { %v5467_v48 = vpop.permute.xlu1 %279  ;;  %v5469_v49 = vpop.permute.xlu0 %275 }
  0x96   : > { %700 = vbcast.lane.b32.xlu1 %v5303_v12, 265  ;;  %696 = vbcast.lane.b32.xlu0 %v5303_v12, 257 }
  0x98   : > { %v5473_v50 = vpop.permute.xlu1 %290  ;;  %v5475_v51 = vpop.permute.xlu0 %286 }
  0x9a   : > { %708 = vbcast.lane.b32.xlu1 %v5310_v14, 265  ;;  %704 = vbcast.lane.b32.xlu0 %v5310_v14, 257 }
  0x9c   : > { %v5479_v52 = vpop.permute.xlu1 %301  ;;  %v5481_v53 = vpop.permute.xlu0 %297 }
  0x9e   : > { %716 = vbcast.lane.b32.xlu1 %v5317_v16, 265  ;;  %712 = vbcast.lane.b32.xlu0 %v5317_v16, 257 }
  0xa0   : > { %v5485_v54 = vpop.permute.xlu1 %312  ;;  %v5487_v55 = vpop.permute.xlu0 %308 }
  0xa2   : > { %724 = vbcast.lane.b32.xlu1 %v5324_v18, 265  ;;  %720 = vbcast.lane.b32.xlu0 %v5324_v18, 257 }
  0xa4   : > { %v5491_v56 = vpop.permute.xlu1 %323  ;;  %v5493_v57 = vpop.permute.xlu0 %319 }
  0xa6   : > { %732 = vbcast.lane.b32.xlu1 %v5333_v20, 265  ;;  %728 = vbcast.lane.b32.xlu0 %v5333_v20, 257 }
  0xa8   : > { %v5497_v58 = vpop.permute.xlu1 %334  ;;  %v5499_v59 = vpop.permute.xlu0 %330 }
  0xaa   : > { %740 = vbcast.lane.b32.xlu1 %v5339_v21, 265  ;;  %736 = vbcast.lane.b32.xlu0 %v5339_v21, 257 }
  0xac   : > { %v5503_v60 = vpop.permute.xlu1 %345  ;;  %v5505_v61 = vpop.permute.xlu0 %341 }
  0xae   : > { %748 = vbcast.lane.b32.xlu1 %v5345_v22, 265  ;;  %744 = vbcast.lane.b32.xlu0 %v5345_v22, 257 }
  0xb0   : > { %v5509_v62 = vpop.permute.xlu1 %356  ;;  %v5511_v63 = vpop.permute.xlu0 %352 }
  0xb2   : > { %756 = vbcast.lane.b32.xlu1 %v5351_v23, 265  ;;  %752 = vbcast.lane.b32.xlu0 %v5351_v23, 257 }
  0xb4   : > { %v5515_v0 = vpop.permute.xlu1 %367  ;;  %v5517_v1 = vpop.permute.xlu0 %363 }
  0xb6   : > { %764 = vbcast.lane.b32.xlu1 %v5357_v24, 265  ;;  %760 = vbcast.lane.b32.xlu0 %v5357_v24, 257 }
  0xb8   : > { %v5521_v2 = vpop.permute.xlu1 %378  ;;  %v5523_v3 = vpop.permute.xlu0 %374 }
  0xb9   : > { %10338 = vst [vmem:[#allocation19_spill] sm:$0xff] %v5521_v2  ;;  %10339 = vst [vmem:[#allocation20_spill] sm:$0xff] %v5523_v3 }
  0xba   : > { %772 = vbcast.lane.b32.xlu1 %v5363_v25, 265  ;;  %768 = vbcast.lane.b32.xlu0 %v5363_v25, 257 }
  0xbc   : > { %v5527_v4 = vpop.permute.xlu1 %389  ;;  %v5529_v7 = vpop.permute.xlu0 %385 }
  0xbd   : > { %10340 = vst [vmem:[#allocation21_spill] sm:$0xff] %v5527_v4  ;;  %10341 = vst [vmem:[#allocation22_spill] sm:$0xff] %v5529_v7 }
  0xbe   : > { %780 = vbcast.lane.b32.xlu1 %v5369_v27, 265  ;;  %776 = vbcast.lane.b32.xlu0 %v5369_v27, 257 }
  0xc0   : > { %v5533_v9 = vpop.permute.xlu1 %400  ;;  %v5535_v11 = vpop.permute.xlu0 %396 }
  0xc2   : > { %788 = vbcast.lane.b32.xlu1 %v5374_v28, 265  ;;  %784 = vbcast.lane.b32.xlu0 %v5374_v28, 257 }
  0xc4   : > { %v5539_v13 = vpop.permute.xlu1 %411  ;;  %v5541_v26 = vpop.permute.xlu0 %407 }
  0xc5   : > { %10342 = vst [vmem:[#allocation23_spill] sm:$0xff] %v5541_v26 }
  0xc6   : > { %796 = vbcast.lane.b32.xlu1 %v5379_v29, 265  ;;  %792 = vbcast.lane.b32.xlu0 %v5379_v29, 257 }
  0xc8   : > { %v5545_v17 = vpop.permute.xlu1 %422  ;;  %v5547_v35 = vpop.permute.xlu0 %418 }
  0xc9   : > { %10343 = vst [vmem:[#allocation24_spill] sm:$0xff] %v5547_v35 }
  0xca   : > { %804 = vbcast.lane.b32.xlu1 %v5384_v30, 265  ;;  %800 = vbcast.lane.b32.xlu0 %v5384_v30, 257 }
  0xcc   : > { %v5551_v19 = vpop.permute.xlu1 %433  ;;  %v5553_v15 = vpop.permute.xlu0 %429 }
  0xcd   : > { %10344 = vst [vmem:[#allocation25_spill] sm:$0xff] %v5553_v15 }
  0xce   : > { %812 = vbcast.lane.b32.xlu1 %v5389_v31, 265  ;;  %808 = vbcast.lane.b32.xlu0 %v5389_v31, 257 }
  0xd0   : > { %v5557_v26 = vpop.permute.xlu1 %444  ;;  %v5559_v28 = vpop.permute.xlu0 %440 }
  0xd1   : > { %10345 = vst [vmem:[#allocation26_spill] sm:$0xff] %v5559_v28 }
  0xd2   : > { %820 = vbcast.lane.b32.xlu1 %v5394_v32, 265  ;;  %816 = vbcast.lane.b32.xlu0 %v5394_v32, 257 }
  0xd4   : > { %v5563_v29 = vpop.permute.xlu1 %455  ;;  %v5565_v35 = vpop.permute.xlu0 %451 }
  0xd5   : > { %10346 = vst [vmem:[#allocation27_spill] sm:$0xff] %v5565_v35 }
  0xd6   : > { %828 = vbcast.lane.b32.xlu1 %v5399_v33, 265  ;;  %824 = vbcast.lane.b32.xlu0 %v5399_v33, 257 }
  0xd8   : > { %v5569_v30 = vpop.permute.xlu1 %466  ;;  %v5571_v15 = vpop.permute.xlu0 %462 }
  0xd9   : > { %10347 = vst [vmem:[#allocation28_spill] sm:$0xff] %v5571_v15 }
  0xda   : > { %836 = vbcast.lane.b32.xlu1 %v5404_v34, 265  ;;  %832 = vbcast.lane.b32.xlu0 %v5404_v34, 257 }
  0xdc   : > { %v5575_v31 = vpop.permute.xlu1 %477  ;;  %v5577_v28 = vpop.permute.xlu0 %473 }
  0xdd   : > { %10348 = vst [vmem:[#allocation29_spill] sm:$0xff] %v5577_v28 }
  0xde   : > { %844 = vbcast.lane.b32.xlu1 %v5413_v36, 265  ;;  %840 = vbcast.lane.b32.xlu0 %v5413_v36, 257 }
  0xe0   : > { %v5581_v32 = vpop.permute.xlu1 %488  ;;  %v5583_v35 = vpop.permute.xlu0 %484 }
  0xe1   : > { %10349 = vst [vmem:[#allocation30_spill] sm:$0xff] %v5583_v35 }
  0xe2   : > { %852 = vbcast.lane.b32.xlu1 %v5419_v37, 265  ;;  %848 = vbcast.lane.b32.xlu0 %v5419_v37, 257 }
  0xe4   : > { %v5587_v33 = vpop.permute.xlu1 %499  ;;  %v5589_v15 = vpop.permute.xlu0 %495 }
  0xe5   : > { %10350 = vst [vmem:[#allocation31_spill] sm:$0xff] %v5589_v15 }
  0xe6   : > { %860 = vbcast.lane.b32.xlu1 %v5425_v38, 265  ;;  %856 = vbcast.lane.b32.xlu0 %v5425_v38, 257 }
  0xe8   : > { %v5593_v34 = vpop.permute.xlu1 %510  ;;  %v5595_v28 = vpop.permute.xlu0 %506 }
  0xe9   : > { %10351 = vst [vmem:[#allocation32_spill] sm:$0xff] %v5595_v28 }
  0xea   : > { %868 = vbcast.lane.b32.xlu1 %v5431_v39, 265  ;;  %864 = vbcast.lane.b32.xlu0 %v5431_v39, 257 }
  0xec   : > { %v5599_v36 = vpop.permute.xlu1 %521  ;;  %v5601_v35 = vpop.permute.xlu0 %517 }
  0xed   : > { %10352 = vst [vmem:[#allocation33_spill] sm:$0xff] %v5601_v35 }
  0xee   : > { %876 = vbcast.lane.b32.xlu1 %v5437_v40, 265  ;;  %872 = vbcast.lane.b32.xlu0 %v5437_v40, 257 }
  0xf0   : > { %v5605_v37 = vpop.permute.xlu1 %532  ;;  %v5607_v15 = vpop.permute.xlu0 %528 }
  0xf1   : > { %10353 = vst [vmem:[#allocation34_spill] sm:$0xff] %v5605_v37  ;;  %10354 = vst [vmem:[#allocation35_spill] sm:$0xff] %v5607_v15 }
  0xf2   : > { %884 = vbcast.lane.b32.xlu1 %v5443_v41, 265  ;;  %880 = vbcast.lane.b32.xlu0 %v5443_v41, 257 }
  0xf4   : > { %v5611_v38 = vpop.permute.xlu1 %543  ;;  %v5613_v28 = vpop.permute.xlu0 %539 }
  0xf5   : > { %10355 = vst [vmem:[#allocation36_spill] sm:$0xff] %v5611_v38  ;;  %10356 = vst [vmem:[#allocation37_spill] sm:$0xff] %v5613_v28 }
  0xf6   : > { %1009 = vbcast.lane.b32.xlu1 %v5280_v6, 266  ;;  %1005 = vbcast.lane.b32.xlu0 %v5280_v6, 258 }
  0xf8   : > { %v5617_v39 = vpop.permute.xlu1 %668  ;;  %v5619_v35 = vpop.permute.xlu0 %664 }
  0xfa   : > { %1017 = vbcast.lane.b32.xlu1 %v5277_v5, 266  ;;  %1013 = vbcast.lane.b32.xlu0 %v5277_v5, 258 }
  0xfc   : > { %v5623_v40 = vpop.permute.xlu1 %676  ;;  %v5625_v15 = vpop.permute.xlu0 %672 }
  0xfe   : > { %1025 = vbcast.lane.b32.xlu1 %v5289_v8, 266  ;;  %1021 = vbcast.lane.b32.xlu0 %v5289_v8, 258 }
 0x100   : > { %v5629_v41 = vpop.permute.xlu1 %684  ;;  %v5631_v28 = vpop.permute.xlu0 %680 }
 0x101   : > { %10357 = vst [vmem:[#allocation38_spill] sm:$0xff] %v5631_v28 }
 0x102   : > { %1033 = vbcast.lane.b32.xlu1 %v5296_v10, 266  ;;  %1029 = vbcast.lane.b32.xlu0 %v5296_v10, 258 }
 0x104   : > { %v5635_v6 = vpop.permute.xlu1 %692  ;;  %v5637_v38 = vpop.permute.xlu0 %688 }
 0x105   : > { %10358 = vst [vmem:[#allocation39_spill] sm:$0xff] %v5637_v38 }
 0x106   : > { %1041 = vbcast.lane.b32.xlu1 %v5303_v12, 266  ;;  %1037 = vbcast.lane.b32.xlu0 %v5303_v12, 258 }
 0x108   : > { %v5641_v5 = vpop.permute.xlu1 %700  ;;  %v5643_v37 = vpop.permute.xlu0 %696 }
 0x109   : > { %10359 = vst [vmem:[#allocation40_spill] sm:$0xff] %v5643_v37 }
 0x10a   : > { %1049 = vbcast.lane.b32.xlu1 %v5310_v14, 266  ;;  %1045 = vbcast.lane.b32.xlu0 %v5310_v14, 258 }
 0x10c   : > { %v5647_v8 = vpop.permute.xlu1 %708  ;;  %v5649_v28 = vpop.permute.xlu0 %704 }
 0x10d   : > { %10360 = vst [vmem:[#allocation41_spill] sm:$0xff] %v5649_v28 }
 0x10e   : > { %1057 = vbcast.lane.b32.xlu1 %v5317_v16, 266  ;;  %1053 = vbcast.lane.b32.xlu0 %v5317_v16, 258  ;;  %v5674_v16 = vld [vmem:[%s9958_s1] ss:$0 sm:$0xff] }
 0x110   : > { %v5653_v10 = vpop.permute.xlu1 %716  ;;  %v5655_v38 = vpop.permute.xlu0 %712 }
 0x111   : > { %10361 = vst [vmem:[#allocation42_spill] sm:$0xff] %v5653_v10  ;;  %10362 = vst [vmem:[#allocation43_spill] sm:$0xff] %v5655_v38  ;;  %v5714_v38 = vmul.f32 %v5674_v16, %v5457_v45  ;;  %v5734_v45 = vmul.f32 %v5674_v16, %v5463_v47 }
 0x112   : > { %1065 = vbcast.lane.b32.xlu1 %v5324_v18, 266  ;;  %1061 = vbcast.lane.b32.xlu0 %v5324_v18, 258  ;;  %v5679_v18 = vld [vmem:[%s9958_s1 + $0x3] ss:$0 sm:$0xff] }
 0x114   : > { %v5659_v12 = vpop.permute.xlu1 %724  ;;  %v5661_v37 = vpop.permute.xlu0 %720 }
 0x115   : > { %10363 = vst [vmem:[#allocation44_spill] sm:$0xff] %v5659_v12  ;;  %10364 = vst [vmem:[#allocation45_spill] sm:$0xff] %v5661_v37  ;;  %v5710_v12 = vmul.f32 %v5679_v18, %v5455_v44 }
 0x116   : > { %1073 = vbcast.lane.b32.xlu1 %v5333_v20, 266  ;;  %1069 = vbcast.lane.b32.xlu0 %v5333_v20, 258 }
 0x117   : > { %10370 = vst [vmem:[#allocation51_spill] sm:$0xff] %v5710_v12  ;;  %v5738_v12 = vmul.f32 %v5679_v18, %v5463_v47 }
 0x118   : > { %v5665_v14 = vpop.permute.xlu1 %732  ;;  %v5667_v28 = vpop.permute.xlu0 %728 }
 0x119   : > { %10365 = vst [vmem:[#allocation46_spill] sm:$0xff] %v5665_v14  ;;  %10366 = vst [vmem:[#allocation47_spill] sm:$0xff] %v5667_v28  ;;  %v5688_v28 = vld [vmem:[%s9958_s1 + $0x6] ss:$0 sm:$0xff]  ;;  %v5698_v14 = vmul.f32 %v5679_v18, %v5449_v42 }
 0x11a   : > { %1081 = vbcast.lane.b32.xlu1 %v5339_v21, 266  ;;  %1077 = vbcast.lane.b32.xlu0 %v5339_v21, 258  ;;  %v5692_v21 = vmul.f32 %v5674_v16, %v5449_v42  ;;  %v5722_v42 = vmul.f32 %v5679_v18, %v5461_v46  ;;  %10374 = vst [vmem:[#allocation55_spill] sm:$0xff] %v5738_v12 }
 0x11b   : > { %10369 = vst [vmem:[#allocation50_spill] sm:$0xff] %v5698_v14  ;;  %v5742_v10 = vmul.f32 %v5688_v28, %v5463_v47  ;;  %v5764_v47 = vmul.f32 %v5679_v18, %v5469_v49 }
 0x11c   : > { %v5681_v37 = vpop.permute.xlu1 %740  ;;  %v5683_v20 = vpop.permute.xlu0 %736  ;;  %10371 = vst [vmem:[#allocation52_spill] sm:$0xff] %v5722_v42  ;;  %v5754_v42 = vmul.f32 %v5688_v28, %v5467_v48 }
 0x11d   : > { %10367 = vst [vmem:[#allocation48_spill] sm:$0xff] %v5681_v37  ;;  %10368 = vst [vmem:[#allocation49_spill] sm:$0xff] %v5683_v20  ;;  %v5702_v20 = vmul.f32 %v5674_v16, %v5451_v43  ;;  %v5706_v37 = vmul.f32 %v5674_v16, %v5455_v44  ;;  %v5726_v43 = vmul.f32 %v5688_v28, %v5461_v46 }
 0x11e   : > { %1089 = vbcast.lane.b32.xlu1 %v5345_v22, 266  ;;  %1085 = vbcast.lane.b32.xlu0 %v5345_v22, 258  ;;  %v5718_v22 = vmul.f32 %v5674_v16, %v5461_v46  ;;  %10375 = vst [vmem:[#allocation56_spill] sm:$0xff] %v5742_v10  ;;  %v5746_v46 = vmul.f32 %v5674_v16, %v5467_v48  ;;  %10377 = vst [vmem:[#allocation58_spill] sm:$0xff] %v5754_v42 }
 0x11f   : > { %10372 = vst [vmem:[#allocation53_spill] sm:$0xff] %v5726_v43  ;;  %v5750_v43 = vmul.f32 %v5679_v18, %v5467_v48  ;;  %10378 = vst [vmem:[#allocation59_spill] sm:$0xff] %v5764_v47  ;;  %v5768_v10 = vmul.f32 %v5688_v28, %v5469_v49  ;;  %v5772_v48 = vmul.f32 %v5674_v16, %v5473_v50 }
 0x120   : > { %v5728_v14 = vpop.permute.xlu1 %748  ;;  %v5730_v44 = vpop.permute.xlu0 %744  ;;  %v5776_v42 = vmul.f32 %v5679_v18, %v5473_v50 }
 0x121   : > { %10373 = vst [vmem:[#allocation54_spill] sm:$0xff] %v5730_v44  ;;  %10376 = vst [vmem:[#allocation57_spill] sm:$0xff] %v5750_v43  ;;  %v5758_v44 = vmul.f32 %v5674_v16, %v5469_v49  ;;  %v5780_v43 = vmul.f32 %v5688_v28, %v5473_v50  ;;  %v5788_v49 = vmul.f32 %v5679_v18, %v5475_v51 }
 0x122   : > { %1097 = vbcast.lane.b32.xlu1 %v5351_v23, 266  ;;  %1093 = vbcast.lane.b32.xlu0 %v5351_v23, 258  ;;  %10379 = vst [vmem:[#allocation60_spill] sm:$0xff] %v5768_v10  ;;  %10380 = vst [vmem:[#allocation61_spill] sm:$0xff] %v5776_v42  ;;  %v5784_v23 = vmul.f32 %v5674_v16, %v5475_v51  ;;  %v5792_v10 = vmul.f32 %v5688_v28, %v5475_v51 }
 0x123   : > { %10381 = vst [vmem:[#allocation62_spill] sm:$0xff] %v5780_v43  ;;  %10382 = vst [vmem:[#allocation63_spill] sm:$0xff] %v5788_v49  ;;  %v5800_v50 = vmul.f32 %v5674_v16, %v5479_v52  ;;  %v5804_v43 = vmul.f32 %v5679_v18, %v5479_v52  ;;  %v5808_v42 = vmul.f32 %v5688_v28, %v5479_v52 }
 0x124   : > { %10383 = vst [vmem:[#allocation64_spill] sm:$0xff] %v5792_v10  ;;  %v5794_v47 = vpop.permute.xlu1 %756  ;;  %v5796_v12 = vpop.permute.xlu0 %752  ;;  %v5812_v51 = vmul.f32 %v5674_v16, %v5481_v53  ;;  %v5816_v10 = vmul.f32 %v5679_v18, %v5481_v53  ;;  %v5820_v49 = vmul.f32 %v5688_v28, %v5481_v53  ;;  %v5830_v52 = vmul.f32 %v5679_v18, %v5485_v54 }
 0x125   : > { %10384 = vst [vmem:[#allocation65_spill] sm:$0xff] %v5796_v12  ;;  %10385 = vst [vmem:[#allocation66_spill] sm:$0xff] %v5804_v43  ;;  %v5824_v12 = vmul.f32 %v5674_v16, %v5485_v54  ;;  %v5838_v53 = vmul.f32 %v5674_v16, %v5487_v55 }
 0x126   : > { %10386 = vst [vmem:[#allocation67_spill] sm:$0xff] %v5808_v42  ;;  %10387 = vst [vmem:[#allocation68_spill] sm:$0xff] %v5816_v10  ;;  %1105 = vbcast.lane.b32.xlu1 %v5357_v24, 266  ;;  %1101 = vbcast.lane.b32.xlu0 %v5357_v24, 258  ;;  %v5834_v42 = vmul.f32 %v5688_v28, %v5485_v54  ;;  %v5846_v10 = vmul.f32 %v5688_v28, %v5487_v55 }
 0x127   : > { %10388 = vst [vmem:[#allocation69_spill] sm:$0xff] %v5820_v49  ;;  %10389 = vst [vmem:[#allocation70_spill] sm:$0xff] %v5830_v52  ;;  %v5842_v49 = vmul.f32 %v5679_v18, %v5487_v55  ;;  %v5850_v24 = vmul.f32 %v5674_v16, %v5491_v56  ;;  %v5854_v54 = vmul.f32 %v5679_v18, %v5491_v56 }
 0x128   : > { %10390 = vst [vmem:[#allocation71_spill] sm:$0xff] %v5834_v42  ;;  %10392 = vst [vmem:[#allocation73_spill] sm:$0xff] %v5846_v10  ;;  %v5858_v42 = vmul.f32 %v5688_v28, %v5491_v56  ;;  %v5860_v52 = vpop.permute.xlu1 %764  ;;  %v5862_v43 = vpop.permute.xlu0 %760  ;;  %v5866_v55 = vmul.f32 %v5674_v16, %v5493_v57  ;;  %v5870_v10 = vmul.f32 %v5679_v18, %v5493_v57 }
 0x129   : > { %10391 = vst [vmem:[#allocation72_spill] sm:$0xff] %v5842_v49  ;;  %10393 = vst [vmem:[#allocation74_spill] sm:$0xff] %v5854_v54  ;;  %v5874_v49 = vmul.f32 %v5688_v28, %v5493_v57  ;;  %v5878_v56 = vmul.f32 %v5674_v16, %v5497_v58  ;;  %v5886_v54 = vmul.f32 %v5688_v28, %v5497_v58 }
 0x12a   : > { %10394 = vst [vmem:[#allocation75_spill] sm:$0xff] %v5858_v42  ;;  %10395 = vst [vmem:[#allocation76_spill] sm:$0xff] %v5860_v52  ;;  %v5882_v42 = vmul.f32 %v5679_v18, %v5497_v58  ;;  %1113 = vbcast.lane.b32.xlu1 %v5363_v25, 266  ;;  %1109 = vbcast.lane.b32.xlu0 %v5363_v25, 258  ;;  %v5896_v57 = vmul.f32 %v5679_v18, %v5499_v59 }
 0x12b   : > { %10396 = vst [vmem:[#allocation77_spill] sm:$0xff] %v5862_v43  ;;  %10397 = vst [vmem:[#allocation78_spill] sm:$0xff] %v5870_v10  ;;  %v5890_v43 = vmul.f32 %v5674_v16, %v5499_v59  ;;  %v5904_v58 = vmul.f32 %v5674_v16, %v5503_v60  ;;  %v5916_v25 = vmul.f32 %v5674_v16, %v5505_v61 }
 0x12c   : > { %10398 = vst [vmem:[#allocation79_spill] sm:$0xff] %v5874_v49  ;;  %10399 = vst [vmem:[#allocation80_spill] sm:$0xff] %v5882_v42  ;;  %v5900_v49 = vmul.f32 %v5688_v28, %v5499_v59  ;;  %v5912_v42 = vmul.f32 %v5688_v28, %v5503_v60  ;;  %v5920_v59 = vmul.f32 %v5679_v18, %v5505_v61  ;;  %v5928_v10 = vpop.permute.xlu0 %768 }
 0x12d   : > { %10400 = vst [vmem:[#allocation81_spill] sm:$0xff] %v5886_v54  ;;  %10401 = vst [vmem:[#allocation82_spill] sm:$0xff] %v5896_v57  ;;  %v5908_v54 = vmul.f32 %v5679_v18, %v5503_v60  ;;  %v5926_v57 = vpop.permute.xlu1 %772  ;;  %v5932_v60 = vmul.f32 %v5674_v16, %v5509_v62 }
 0x12e   : > { %10402 = vst [vmem:[#allocation83_spill] sm:$0xff] %v5900_v49  ;;  %10404 = vst [vmem:[#allocation85_spill] sm:$0xff] %v5912_v42  ;;  %v5924_v49 = vmul.f32 %v5688_v28, %v5505_v61  ;;  %v5936_v42 = vmul.f32 %v5679_v18, %v5509_v62  ;;  %v5944_v61 = vmul.f32 %v5674_v16, %v5511_v63  ;;  %1121 = vbcast.lane.b32.xlu1 %v5369_v27, 266 }
 0x12f   : > { %10403 = vst [vmem:[#allocation84_spill] sm:$0xff] %v5908_v54  ;;  %10405 = vst [vmem:[#allocation86_spill] sm:$0xff] %v5920_v59  ;;  %v5940_v54 = vmul.f32 %v5688_v28, %v5509_v62  ;;  %v5952_v59 = vmul.f32 %v5688_v28, %v5511_v63  ;;  %1117 = vbcast.lane.b32.xlu0 %v5369_v27, 258  ;;  %v5962_v62 = vmul.f32 %v5679_v18, %v5515_v0 }
 0x130   : > { %10406 = vst [vmem:[#allocation87_spill] sm:$0xff] %v5924_v49  ;;  %10407 = vst [vmem:[#allocation88_spill] sm:$0xff] %v5926_v57  ;;  %v5948_v49 = vmul.f32 %v5679_v18, %v5511_v63  ;;  %v5970_v63 = vmul.f32 %v5674_v16, %v5517_v1  ;;  %v5982_v27 = vmul.f32 %v5679_v18, %v5521_v2 }
 0x131   : > { %10408 = vst [vmem:[#allocation89_spill] sm:$0xff] %v5928_v10  ;;  %10409 = vst [vmem:[#allocation90_spill] sm:$0xff] %v5936_v42  ;;  %v5956_v10 = vmul.f32 %v5674_v16, %v5515_v0  ;;  %v5994_v42 = vpop.permute.xlu0 %776 }
 0x132   : > { %10410 = vst [vmem:[#allocation91_spill] sm:$0xff] %v5940_v54  ;;  %10411 = vst [vmem:[#allocation92_spill] sm:$0xff] %v5948_v49  ;;  %v5966_v54 = vmul.f32 %v5688_v28, %v5515_v0  ;;  %v5978_v49 = vmul.f32 %v5688_v28, %v5517_v1  ;;  %v5986_v0 = vmul.f32 %v5688_v28, %v5521_v2 }
 0x133   : > { %10412 = vst [vmem:[#allocation93_spill] sm:$0xff] %v5952_v59  ;;  %10413 = vst [vmem:[#allocation94_spill] sm:$0xff] %v5962_v62  ;;  %v5974_v59 = vmul.f32 %v5679_v18, %v5517_v1  ;;  %v5992_v62 = vpop.permute.xlu1 %780  ;;  %v5998_v1 = vmul.f32 %v5688_v28, %v5523_v3  ;;  %v6006_v2 = vmul.f32 %v5688_v28, %v5529_v7  ;;  %v10425_v7 = vld [vmem:[#allocation23_spill] sm:$0xff] }
 0x134   : > { %10414 = vst [vmem:[#allocation95_spill] sm:$0xff] %v5966_v54  ;;  %10416 = vst [vmem:[#allocation97_spill] sm:$0xff] %v5978_v49  ;;  %v5990_v54 = vmul.f32 %v5679_v18, %v5523_v3  ;;  %v6002_v49 = vmul.f32 %v5688_v28, %v5527_v4  ;;  %v6018_v3 = vmul.f32 %v5674_v16, %v5539_v13 }
 0x135   : > { %10415 = vst [vmem:[#allocation96_spill] sm:$0xff] %v5974_v59  ;;  %10417 = vst [vmem:[#allocation98_spill] sm:$0xff] %v5982_v27  ;;  %v6022_v4 = vmul.f32 %v5679_v18, %v5539_v13  ;;  %v6040_v13 = vmul.f32 %v5679_v18, %v5545_v17  ;;  %v6060_v59 = vpop.permute.xlu0 %784 }
 0x136   : > { %10418 = vst [vmem:[#allocation99_spill] sm:$0xff] %v5986_v0  ;;  %10419 = vst [vmem:[#allocation100_spill] sm:$0xff] %v5990_v54  ;;  %v6010_v0 = vmul.f32 %v5674_v16, %v5533_v9  ;;  %v6014_v54 = vmul.f32 %v5674_v16, %v5535_v11  ;;  %v6028_v9 = vmul.f32 %v5674_v16, %v10425_v7 }
 0x137   : > { %10420 = vst [vmem:[#allocation101_spill] sm:$0xff] %v5998_v1  ;;  %10421 = vst [vmem:[#allocation102_spill] sm:$0xff] %v6002_v49  ;;  %v10424_v49 = vld [vmem:[#allocation5_spill] sm:$0xff]  ;;  %v6032_v11 = vmul.f32 %v5679_v18, %v10425_v7  ;;  %v6058_v27 = vpop.permute.xlu1 %788 }
 0x138   : > { %10422 = vst [vmem:[#allocation103_spill] sm:$0xff] %v6006_v2  ;;  %10423 = vst [vmem:[#allocation104_spill] sm:$0xff] %v6022_v4  ;;  %1129 = vbcast.lane.b32.xlu1 %v10424_v49, 266  ;;  %1125 = vbcast.lane.b32.xlu0 %v10424_v49, 258  ;;  %v6036_v2 = vmul.f32 %v5674_v16, %v5545_v17  ;;  %v6044_v4 = vmul.f32 %v5688_v28, %v5545_v17  ;;  %v10431_v49 = vld [vmem:[#allocation24_spill] sm:$0xff] }
 0x139   : > { %10426 = vst [vmem:[#allocation5_spill] sm:$0xff] %v6028_v9  ;;  %10427 = vst [vmem:[#allocation23_spill] sm:$0xff] %v6032_v11  ;;  %v6048_v1 = vmul.f32 %v5674_v16, %v10431_v49  ;;  %v6052_v7 = vmul.f32 %v5679_v18, %v10431_v49  ;;  %v6056_v11 = vmul.f32 %v5688_v28, %v10431_v49 }
 0x13a   : > { %10428 = vst [vmem:[#allocation105_spill] sm:$0xff] %v6036_v2  ;;  %10429 = vst [vmem:[#allocation106_spill] sm:$0xff] %v6040_v13  ;;  %v6064_v17 = vmul.f32 %v5674_v16, %v5551_v19  ;;  %v6072_v13 = vmul.f32 %v5688_v28, %v5551_v19 }
 0x13b   : > { %10430 = vst [vmem:[#allocation107_spill] sm:$0xff] %v6044_v4  ;;  %10432 = vst [vmem:[#allocation24_spill] sm:$0xff] %v6048_v1  ;;  %v6068_v4 = vmul.f32 %v5679_v18, %v5551_v19  ;;  %v6094_v19 = vmul.f32 %v5679_v18, %v5557_v26 }
 0x13c   : > { %10433 = vst [vmem:[#allocation108_spill] sm:$0xff] %v6052_v7  ;;  %10434 = vst [vmem:[#allocation109_spill] sm:$0xff] %v6056_v11  ;;  %v10438_v7 = vld [vmem:[#allocation25_spill] sm:$0xff] }
 0x13d   : > { %10435 = vst [vmem:[#allocation110_spill] sm:$0xff] %v6064_v17  ;;  %10436 = vst [vmem:[#allocation111_spill] sm:$0xff] %v6068_v4  ;;  %v6076_v49 = vmul.f32 %v5674_v16, %v10438_v7  ;;  %v6080_v11 = vmul.f32 %v5679_v18, %v10438_v7  ;;  %v6084_v1 = vmul.f32 %v5688_v28, %v10438_v7  ;;  %v10443_v4 = vld [vmem:[#allocation6_spill] sm:$0xff] }
 0x13e   : > { %10437 = vst [vmem:[#allocation112_spill] sm:$0xff] %v6072_v13  ;;  %v6088_v17 = vmul.f32 %v5674_v16, %v5557_v26  ;;  %1137 = vbcast.lane.b32.xlu1 %v10443_v4, 266  ;;  %1133 = vbcast.lane.b32.xlu0 %v10443_v4, 258  ;;  %10444 = vst [vmem:[#allocation6_spill] sm:$0xff] %v6094_v19  ;;  %v6098_v13 = vmul.f32 %v5688_v28, %v5557_v26  ;;  %v6124_v19 = vpop.permute.xlu1 %796 }
 0x13f   : > { %10439 = vst [vmem:[#allocation25_spill] sm:$0xff] %v6076_v49  ;;  %10440 = vst [vmem:[#allocation113_spill] sm:$0xff] %v6080_v11  ;;  %v10446_v11 = vld [vmem:[#allocation26_spill] sm:$0xff]  ;;  %v6114_v4 = vmul.f32 %v5674_v16, %v5563_v29  ;;  %v6118_v26 = vmul.f32 %v5679_v18, %v5563_v29 }
 0x140   : > { %10441 = vst [vmem:[#allocation114_spill] sm:$0xff] %v6084_v1  ;;  %10442 = vst [vmem:[#allocation115_spill] sm:$0xff] %v6088_v17  ;;  %v6102_v7 = vmul.f32 %v5674_v16, %v10446_v11  ;;  %v6106_v1 = vmul.f32 %v5679_v18, %v10446_v11  ;;  %v6110_v17 = vmul.f32 %v5688_v28, %v10446_v11 }
 0x141   : > { %10445 = vst [vmem:[#allocation116_spill] sm:$0xff] %v6098_v13  ;;  %10450 = vst [vmem:[#allocation119_spill] sm:$0xff] %v6114_v4  ;;  %v6122_v13 = vmul.f32 %v5688_v28, %v5563_v29  ;;  %v6142_v29 = vmul.f32 %v5674_v16, %v5569_v30 }
 0x142   : > { %10447 = vst [vmem:[#allocation26_spill] sm:$0xff] %v6102_v7  ;;  %10448 = vst [vmem:[#allocation117_spill] sm:$0xff] %v6106_v1  ;;  %v6126_v7 = vpop.permute.xlu0 %792  ;;  %v10453_v1 = vld [vmem:[#allocation27_spill] sm:$0xff] }
 0x143   : > { %10449 = vst [vmem:[#allocation118_spill] sm:$0xff] %v6110_v17  ;;  %10451 = vst [vmem:[#allocation120_spill] sm:$0xff] %v6118_v26  ;;  %v6130_v11 = vmul.f32 %v5674_v16, %v10453_v1  ;;  %v6134_v17 = vmul.f32 %v5679_v18, %v10453_v1  ;;  %v6138_v4 = vmul.f32 %v5688_v28, %v10453_v1 }
 0x144   : > { %10452 = vst [vmem:[#allocation121_spill] sm:$0xff] %v6122_v13  ;;  %10457 = vst [vmem:[#allocation124_spill] sm:$0xff] %v6142_v29  ;;  %v6146_v13 = vmul.f32 %v5679_v18, %v5569_v30  ;;  %v6150_v26 = vmul.f32 %v5688_v28, %v5569_v30  ;;  %v6168_v30 = vmul.f32 %v5674_v16, %v5575_v31 }
 0x145   : > { %10454 = vst [vmem:[#allocation27_spill] sm:$0xff] %v6130_v11  ;;  %10455 = vst [vmem:[#allocation122_spill] sm:$0xff] %v6134_v17  ;;  %v10460_v11 = vld [vmem:[#allocation28_spill] sm:$0xff]  ;;  %v10462_v17 = vld [vmem:[#allocation7_spill] sm:$0xff] }
 0x146   : > { %10456 = vst [vmem:[#allocation123_spill] sm:$0xff] %v6138_v4  ;;  %10458 = vst [vmem:[#allocation125_spill] sm:$0xff] %v6146_v13  ;;  %v6154_v49 = vmul.f32 %v5674_v16, %v10460_v11  ;;  %1145 = vbcast.lane.b32.xlu1 %v10462_v17, 266  ;;  %1141 = vbcast.lane.b32.xlu0 %v10462_v17, 258  ;;  %v6160_v1 = vmul.f32 %v5679_v18, %v10460_v11  ;;  %v10468_v17 = vld [vmem:[#allocation29_spill] sm:$0xff] }
 0x147   : > { %10459 = vst [vmem:[#allocation126_spill] sm:$0xff] %v6150_v26  ;;  %v6164_v4 = vmul.f32 %v5688_v28, %v10460_v11  ;;  %10465 = vst [vmem:[#allocation128_spill] sm:$0xff] %v6168_v30  ;;  %v6172_v26 = vmul.f32 %v5679_v18, %v5575_v31  ;;  %v6176_v13 = vmul.f32 %v5688_v28, %v5575_v31  ;;  %v6192_v30 = vpop.permute.xlu0 %800 }
 0x148   : > { %10461 = vst [vmem:[#allocation28_spill] sm:$0xff] %v6154_v49  ;;  %10463 = vst [vmem:[#allocation7_spill] sm:$0xff] %v6160_v1  ;;  %v6180_v49 = vmul.f32 %v5674_v16, %v10468_v17  ;;  %v6184_v11 = vmul.f32 %v5679_v18, %v10468_v17  ;;  %v6190_v1 = vpop.permute.xlu1 %804  ;;  %v6196_v31 = vmul.f32 %v5674_v16, %v5581_v32 }
 0x149   : > { %10464 = vst [vmem:[#allocation127_spill] sm:$0xff] %v6164_v4  ;;  %10466 = vst [vmem:[#allocation129_spill] sm:$0xff] %v6172_v26  ;;  %v6188_v4 = vmul.f32 %v5688_v28, %v10468_v17  ;;  %v6204_v26 = vmul.f32 %v5688_v28, %v5581_v32 }
 0x14a   : > { %10467 = vst [vmem:[#allocation130_spill] sm:$0xff] %v6176_v13  ;;  %10469 = vst [vmem:[#allocation29_spill] sm:$0xff] %v6180_v49  ;;  %v6200_v13 = vmul.f32 %v5679_v18, %v5581_v32  ;;  %v6226_v32 = vmul.f32 %v5679_v18, %v5587_v33 }
 0x14b   : > { %10470 = vst [vmem:[#allocation131_spill] sm:$0xff] %v6184_v11  ;;  %10471 = vst [vmem:[#allocation132_spill] sm:$0xff] %v6188_v4  ;;  %v10477_v11 = vld [vmem:[#allocation30_spill] sm:$0xff] }
 0x14c   : > { %10472 = vst [vmem:[#allocation133_spill] sm:$0xff] %v6190_v1  ;;  %10473 = vst [vmem:[#allocation134_spill] sm:$0xff] %v6192_v30  ;;  %v6208_v17 = vmul.f32 %v5674_v16, %v10477_v11  ;;  %v6212_v4 = vmul.f32 %v5679_v18, %v10477_v11  ;;  %v6216_v49 = vmul.f32 %v5688_v28, %v10477_v11  ;;  %v10519_v30 = vld [vmem:[#allocation36_spill] sm:$0xff] }
 0x14d   : > { %10474 = vst [vmem:[#allocation135_spill] sm:$0xff] %v6196_v31  ;;  %10475 = vst [vmem:[#allocation136_spill] sm:$0xff] %v6200_v13  ;;  %v6220_v31 = vmul.f32 %v5674_v16, %v5587_v33  ;;  %v10482_v13 = vld [vmem:[#allocation8_spill] sm:$0xff] }
 0x14e   : > { %10476 = vst [vmem:[#allocation137_spill] sm:$0xff] %v6204_v26  ;;  %10478 = vst [vmem:[#allocation30_spill] sm:$0xff] %v6208_v17  ;;  %1153 = vbcast.lane.b32.xlu1 %v10482_v13, 266  ;;  %1149 = vbcast.lane.b32.xlu0 %v10482_v13, 258  ;;  %v6230_v26 = vmul.f32 %v5688_v28, %v5587_v33  ;;  %v6246_v13 = vmul.f32 %v5674_v16, %v5593_v34  ;;  %v10497_v17 = vld [vmem:[#allocation32_spill] sm:$0xff] }
 0x14f   : > { %10479 = vst [vmem:[#allocation138_spill] sm:$0xff] %v6212_v4  ;;  %10480 = vst [vmem:[#allocation139_spill] sm:$0xff] %v6216_v49  ;;  %v10485_v4 = vld [vmem:[#allocation31_spill] sm:$0xff]  ;;  %v6250_v33 = vmul.f32 %v5679_v18, %v5593_v34  ;;  %v6275_v29 = vmul.f32 %v5679_v18, %v10497_v17 }
 0x150   : > { %10481 = vst [vmem:[#allocation140_spill] sm:$0xff] %v6220_v31  ;;  %10483 = vst [vmem:[#allocation8_spill] sm:$0xff] %v6226_v32  ;;  %v6234_v11 = vmul.f32 %v5674_v16, %v10485_v4  ;;  %v6238_v49 = vmul.f32 %v5679_v18, %v10485_v4  ;;  %v6242_v31 = vmul.f32 %v5688_v28, %v10485_v4  ;;  %v6257_v32 = vpop.permute.xlu1 %812  ;;  %v10494_v4 = vld [vmem:[#allocation4_spill] sm:$0xff] }
 0x151   : > { %10484 = vst [vmem:[#allocation141_spill] sm:$0xff] %v6230_v26  ;;  %10489 = vst [vmem:[#allocation144_spill] sm:$0xff] %v6246_v13  ;;  %v6255_v26 = vld [vmem:[%s9958_s1 + $0x1] ss:$0 sm:$0xff]  ;;  %v6267_v13 = vmul.f32 %v5688_v28, %v5593_v34  ;;  %v6287_v34 = vmul.f32 %v5679_v18, %v5599_v36 }
 0x152   : > { %10486 = vst [vmem:[#allocation31_spill] sm:$0xff] %v6234_v11  ;;  %10487 = vst [vmem:[#allocation142_spill] sm:$0xff] %v6238_v49  ;;  %v6259_v49 = vpop.permute.xlu0 %808  ;;  %v10493_v11 = vld [vmem:[#allocation2_spill] sm:$0xff] }
 0x153   : > { %10488 = vst [vmem:[#allocation143_spill] sm:$0xff] %v6242_v31  ;;  %10490 = vst [vmem:[#allocation145_spill] sm:$0xff] %v6250_v33  ;;  %v6263_v31 = vrot.slane %v10494_v4, %v10493_v11  ;;  %v6271_v33 = vmul.f32 %v5674_v16, %v10497_v17 }
 0x154   : > { %10491 = vst [vmem:[#allocation146_spill] sm:$0xff] %v6257_v32  ;;  %10492 = vst [vmem:[#allocation147_spill] sm:$0xff] %v6259_v49  ;;  %v6279_v32 = vmul.f32 %v5688_v28, %v10497_v17  ;;  %v6283_v49 = vmul.f32 %v5674_v16, %v5599_v36  ;;  %v6297_v17 = vmul.f32 %v5688_v28, %v5599_v36  ;;  %v6318_v36 = vld [vmem:[%s9958_s1 + $0x4] ss:$0 sm:$0xff] }
 0x155   : > { %10495 = vst [vmem:[#allocation2_spill] sm:$0xff] %v6263_v31  ;;  %10496 = vst [vmem:[#allocation4_spill] sm:$0xff] %v6267_v13  ;;  %v10503_v13 = vld [vmem:[#allocation9_spill] sm:$0xff] }
 0x156   : > { %10498 = vst [vmem:[#allocation32_spill] sm:$0xff] %v6271_v33  ;;  %10499 = vst [vmem:[#allocation148_spill] sm:$0xff] %v6275_v29  ;;  %1161 = vbcast.lane.b32.xlu1 %v10503_v13, 266  ;;  %1157 = vbcast.lane.b32.xlu0 %v10503_v13, 258  ;;  %v10504_v33 = vld [vmem:[#allocation12_spill] sm:$0xff] }
 0x157   : > { %10500 = vst [vmem:[#allocation149_spill] sm:$0xff] %v6279_v32  ;;  %10501 = vst [vmem:[#allocation150_spill] sm:$0xff] %v6283_v49  ;;  %v6293_v31 = vrot.slane %v10504_v33, %v10493_v11  ;;  %v10507_v32 = vld [vmem:[#allocation33_spill] sm:$0xff]  ;;  %v892_v49 = vmul.f32 %v6255_v26, %v5617_v39  ;;  %v893_v39 = vmul.f32 %v6255_v26, %v5625_v15 }
 0x158   : > { %10502 = vst [vmem:[#allocation151_spill] sm:$0xff] %v6287_v34  ;;  %10506 = vst [vmem:[#allocation12_spill] sm:$0xff] %v6297_v17  ;;  %v6301_v29 = vmul.f32 %v5674_v16, %v10507_v32  ;;  %v891_v34 = vmul.f32 %v6255_v26, %v5619_v35  ;;  %v6309_v13 = vmul.f32 %v5679_v18, %v10507_v32  ;;  %v6324_v35 = vpop.permute.xlu1 %820  ;;  %v6326_v17 = vpop.permute.xlu0 %816 }
 0x159   : > { %10505 = vst [vmem:[#allocation9_spill] sm:$0xff] %v6293_v31  ;;  %v6313_v11 = vmul.f32 %v5688_v28, %v10507_v32  ;;  %v894_v16 = vmul.f32 %v6255_v26, %v5623_v40  ;;  %10511 = vst [vmem:[#allocation154_spill] sm:$0xff] %v6324_v35  ;;  %v6346_v35 = vmul.f32 %v5688_v28, %v10519_v30 }
 0x15a   : > { %10508 = vst [vmem:[#allocation33_spill] sm:$0xff] %v6301_v29  ;;  %10509 = vst [vmem:[#allocation152_spill] sm:$0xff] %v6309_v13  ;;  %v10513_v13 = vld [vmem:[#allocation34_spill] sm:$0xff]  ;;  %v6364_v30 = vadd.f32 %v892_v49, %v5714_v38  ;;  %v6377_v1 = vadd.f32 %v893_v39, %v5692_v21  ;;  %v898_v38 = vmul.f32 %v6255_v26, %v5635_v6 }
 0x15b   : > { %10510 = vst [vmem:[#allocation153_spill] sm:$0xff] %v6313_v11  ;;  %10512 = vst [vmem:[#allocation155_spill] sm:$0xff] %v6326_v17  ;;  %v6330_v29 = vmul.f32 %v5679_v18, %v10513_v13  ;;  %v6334_v32 = vmul.f32 %v5688_v28, %v10513_v13  ;;  %v10516_v11 = vld [vmem:[#allocation35_spill] sm:$0xff]  ;;  %v896_v13 = vmul.f32 %v6255_v26, %v5629_v41 }
 0x15c   : > { %v6338_v31 = vmul.f32 %v5679_v18, %v10516_v11  ;;  %v6342_v2 = vmul.f32 %v5688_v28, %v10516_v11  ;;  %10520 = vst [vmem:[#allocation160_spill] sm:$0xff] %v6346_v35  ;;  %v10523_v11 = vld [vmem:[#allocation37_spill] sm:$0xff]  ;;  %v6367_v35 = vadd.f32 %v891_v34, %v5702_v20  ;;  %v6371_v17 = vmul.f32 %v6318_v36, %v5623_v40  ;;  %v6385_v49 = vpop.permute.xlu1 %828  ;;  %v6387_v20 = vpop.permute.xlu0 %824 }
 0x15d   : > { %10514 = vst [vmem:[#allocation156_spill] sm:$0xff] %v6330_v29  ;;  %10515 = vst [vmem:[#allocation157_spill] sm:$0xff] %v6334_v32  ;;  %v6351_v29 = vld [vmem:[%s9958_s1 + $0x7] ss:$0 sm:$0xff]  ;;  %v6374_v9 = vadd.f32 %v894_v16, %v5706_v37  ;;  %v6391_v40 = vmul.f32 %v6318_v36, %v5629_v41  ;;  %v6404_v34 = vadd.f32 %v896_v13, %v5718_v22 }
 0x15e   : > { %10517 = vst [vmem:[#allocation158_spill] sm:$0xff] %v6338_v31  ;;  %10518 = vst [vmem:[#allocation159_spill] sm:$0xff] %v6342_v2  ;;  %v10521_v32 = vld [vmem:[#allocation38_spill] sm:$0xff]  ;;  %v6361_v2 = vmul.f32 %v5688_v28, %v10523_v11  ;;  %v6381_v28 = vmul.f32 %v6318_v36, %v5625_v15  ;;  %v6395_v37 = vmul.f32 %v6351_v29, %v5629_v41  ;;  %v10526_v15 = vld [vmem:[#allocation39_spill] sm:$0xff] }
 0x15f   : > { %v895_v18 = vmul.f32 %v6255_v26, %v10521_v32  ;;  %v10522_v31 = vld [vmem:[#allocation10_spill] sm:$0xff]  ;;  %v6399_v21 = vmul.f32 %v6318_v36, %v10521_v32  ;;  %v6411_v39 = vmul.f32 %v6351_v29, %v10521_v32  ;;  %v10528_v11 = vld [vmem:[#allocation11_spill] sm:$0xff]  ;;  %v6417_v41 = vmul.f32 %v6318_v36, %v5635_v6 }
 0x160   : > { %1169 = vbcast.lane.b32.xlu1 %v10522_v31, 266  ;;  %1165 = vbcast.lane.b32.xlu0 %v10522_v31, 258  ;;  %10524 = vst [vmem:[#allocation38_spill] sm:$0xff] %v6361_v2  ;;  %10525 = vst [vmem:[#allocation10_spill] sm:$0xff] %v6395_v37  ;;  %v897_v31 = vmul.f32 %v6255_v26, %v10526_v15  ;;  %v6421_v2 = vmul.f32 %v6351_v29, %v5635_v6  ;;  %v6440_v6 = vpop.permute.xlu0 %832 }
 0x161   : > { %v6407_v16 = vadd.f32 %v895_v18, %v5734_v45  ;;  %10527 = vst [vmem:[#allocation39_spill] sm:$0xff] %v6411_v39  ;;  %10529 = vst [vmem:[#allocation11_spill] sm:$0xff] %v6417_v41  ;;  %v900_v22 = vmul.f32 %v6255_v26, %v5641_v5  ;;  %v10531_v45 = vld [vmem:[#allocation40_spill] sm:$0xff]  ;;  %v6428_v32 = vadd.f32 %v898_v38, %v5746_v46  ;;  %v6438_v39 = vpop.permute.xlu1 %836 }
 0x162   : > { %10530 = vst [vmem:[#allocation161_spill] sm:$0xff] %v6421_v2  ;;  %v899_v13 = vmul.f32 %v6255_v26, %v10531_v45  ;;  %v6436_v18 = vmul.f32 %v6351_v29, %v10526_v15  ;;  %v10534_v2 = vld [vmem:[#allocation3_spill] sm:$0xff]  ;;  %v6447_v41 = vadd.f32 %v897_v31, %v5758_v44  ;;  %v6451_v46 = vmul.f32 %v6318_v36, %v5641_v5  ;;  %v10541_v31 = vld [vmem:[#allocation13_spill] sm:$0xff] }
 0x163   : > { %v6444_v37 = vrot.slane %v10494_v4, %v10534_v2  ;;  %v902_v38 = vmul.f32 %v6255_v26, %v5647_v8  ;;  %v6463_v4 = vmul.f32 %v6318_v36, %v10531_v45  ;;  %v6467_v44 = vmul.f32 %v6351_v29, %v10531_v45 }
 0x164   : > { %1177 = vbcast.lane.b32.xlu1 %v10528_v11, 266  ;;  %1173 = vbcast.lane.b32.xlu0 %v10528_v11, 258  ;;  %v6432_v11 = vmul.f32 %v6318_v36, %v10526_v15  ;;  %10533 = vst [vmem:[#allocation162_spill] sm:$0xff] %v6436_v18  ;;  %10535 = vst [vmem:[#allocation3_spill] sm:$0xff] %v6447_v41  ;;  %v10537_v15 = vld [vmem:[#allocation41_spill] sm:$0xff]  ;;  %v6475_v41 = vadd.f32 %v899_v13, %v5784_v23  ;;  %v10547_v23 = vld [vmem:[#allocation43_spill] sm:$0xff] }
 0x165   : > { %10536 = vst [vmem:[#allocation163_spill] sm:$0xff] %v6451_v46  ;;  %v901_v18 = vmul.f32 %v6255_v26, %v10537_v15  ;;  %10539 = vst [vmem:[#allocation164_spill] sm:$0xff] %v6463_v4  ;;  %v6472_v46 = vadd.f32 %v900_v22, %v5772_v48  ;;  %v6481_v4 = vrot.slane %v10504_v33, %v10534_v2  ;;  %v6497_v13 = vpop.permute.xlu1 %844 }
 0x166   : > { %10532 = vst [vmem:[#allocation40_spill] sm:$0xff] %v6432_v11  ;;  %v6459_v11 = vmul.f32 %v6351_v29, %v5641_v5  ;;  %10540 = vst [vmem:[#allocation165_spill] sm:$0xff] %v6467_v44  ;;  %v10543_v5 = vld [vmem:[#allocation42_spill] sm:$0xff]  ;;  %v6485_v45 = vmul.f32 %v6318_v36, %v5647_v8  ;;  %v6493_v48 = vmul.f32 %v6318_v36, %v10537_v15  ;;  %v6499_v44 = vpop.permute.xlu0 %840 }
 0x167   : > { %10542 = vst [vmem:[#allocation13_spill] sm:$0xff] %v6475_v41  ;;  %v903_v22 = vmul.f32 %v6255_v26, %v10547_v23  ;;  %v6502_v2 = vadd.f32 %v902_v38, %v5800_v50  ;;  %v6505_v33 = vadd.f32 %v901_v18, %v5812_v51  ;;  %v6519_v41 = vmul.f32 %v6351_v29, %v10543_v5  ;;  %v10552_v50 = vld [vmem:[#allocation45_spill] sm:$0xff]  ;;  %v10553_v51 = vld [vmem:[#allocation14_spill] sm:$0xff] }
 0x168   : > { %10538 = vst [vmem:[#allocation41_spill] sm:$0xff] %v6459_v11  ;;  %1185 = vbcast.lane.b32.xlu1 %v10541_v31, 266  ;;  %1181 = vbcast.lane.b32.xlu0 %v10541_v31, 258  ;;  %v904_v11 = vmul.f32 %v6255_v26, %v10543_v5  ;;  %10544 = vst [vmem:[#allocation42_spill] sm:$0xff] %v6485_v45  ;;  %v6489_v31 = vmul.f32 %v6351_v29, %v5647_v8 }
 0x169   : > { %10546 = vst [vmem:[#allocation167_spill] sm:$0xff] %v6493_v48  ;;  %v6509_v8 = vmul.f32 %v6351_v29, %v10537_v15  ;;  %v6515_v45 = vmul.f32 %v6318_v36, %v10543_v5  ;;  %10551 = vst [vmem:[#allocation168_spill] sm:$0xff] %v6519_v41  ;;  %v905_v38 = vmul.f32 %v6255_v26, %v10552_v50  ;;  %v10557_v5 = vld [vmem:[#allocation46_spill] sm:$0xff] }
 0x16a   : > { %10545 = vst [vmem:[#allocation166_spill] sm:$0xff] %v6489_v31  ;;  %v10549_v31 = vld [vmem:[#allocation44_spill] sm:$0xff]  ;;  %v6526_v18 = vadd.f32 %v904_v11, %v5824_v12  ;;  %v6530_v15 = vmul.f32 %v6318_v36, %v10547_v23  ;;  %v908_v41 = vmul.f32 %v6255_v26, %v10557_v5  ;;  %v10561_v11 = vld [vmem:[#allocation47_spill] sm:$0xff] }
 0x16b   : > { %10548 = vst [vmem:[#allocation43_spill] sm:$0xff] %v6509_v8  ;;  %v906_v48 = vmul.f32 %v6255_v26, %v10549_v31  ;;  %10550 = vst [vmem:[#allocation44_spill] sm:$0xff] %v6515_v45  ;;  %v6534_v8 = vmul.f32 %v6351_v29, %v10547_v23  ;;  %v6539_v45 = vadd.f32 %v903_v22, %v5838_v53  ;;  %v6553_v23 = vpop.permute.xlu0 %848 }
 0x16c   : > { %1193 = vbcast.lane.b32.xlu1 %v10553_v51, 266  ;;  %1189 = vbcast.lane.b32.xlu0 %v10553_v51, 258  ;;  %10554 = vst [vmem:[#allocation45_spill] sm:$0xff] %v6526_v18  ;;  %10555 = vst [vmem:[#allocation14_spill] sm:$0xff] %v6530_v15  ;;  %v6543_v51 = vmul.f32 %v6318_v36, %v10549_v31  ;;  %v6547_v12 = vmul.f32 %v6351_v29, %v10549_v31  ;;  %v6551_v18 = vpop.permute.xlu1 %852  ;;  %v10564_v31 = vld [vmem:[#allocation48_spill] sm:$0xff] }
 0x16d   : > { %10556 = vst [vmem:[#allocation169_spill] sm:$0xff] %v6534_v8  ;;  %10558 = vst [vmem:[#allocation46_spill] sm:$0xff] %v6539_v45  ;;  %v907_v15 = vmul.f32 %v6255_v26, %v10561_v11  ;;  %v6556_v8 = vadd.f32 %v906_v48, %v5850_v24  ;;  %v6560_v53 = vmul.f32 %v6318_v36, %v10552_v50  ;;  %v10566_v24 = vld [vmem:[#allocation49_spill] sm:$0xff] }
 0x16e   : > { %10559 = vst [vmem:[#allocation170_spill] sm:$0xff] %v6543_v51  ;;  %10560 = vst [vmem:[#allocation171_spill] sm:$0xff] %v6547_v12  ;;  %v6564_v22 = vmul.f32 %v6351_v29, %v10552_v50  ;;  %v910_v12 = vmul.f32 %v6255_v26, %v10564_v31  ;;  %v6569_v51 = vadd.f32 %v905_v38, %v5866_v55 }
 0x16f   : > { %10562 = vst [vmem:[#allocation47_spill] sm:$0xff] %v6556_v8  ;;  %v6573_v45 = vmul.f32 %v6318_v36, %v10557_v5  ;;  %v909_v48 = vmul.f32 %v6255_v26, %v10566_v24  ;;  %v10567_v8 = vld [vmem:[#allocation15_spill] sm:$0xff]  ;;  %v6580_v50 = vadd.f32 %v908_v41, %v5878_v56  ;;  %v6588_v55 = vmul.f32 %v6318_v36, %v10561_v11  ;;  %v10573_v41 = vld [vmem:[#allocation54_spill] sm:$0xff] }
 0x170   : > { %10563 = vst [vmem:[#allocation172_spill] sm:$0xff] %v6564_v22  ;;  %1201 = vbcast.lane.b32.xlu1 %v10567_v8, 266  ;;  %1197 = vbcast.lane.b32.xlu0 %v10567_v8, 258  ;;  %v6584_v22 = vmul.f32 %v6351_v29, %v10557_v5  ;;  %v6592_v38 = vmul.f32 %v6351_v29, %v10561_v11 }
 0x171   : > { %10565 = vst [vmem:[#allocation48_spill] sm:$0xff] %v6573_v45  ;;  %10569 = vst [vmem:[#allocation15_spill] sm:$0xff] %v6588_v55  ;;  %v6595_v45 = vadd.f32 %v907_v15, %v5890_v43  ;;  %v6599_v8 = vmul.f32 %v6318_v36, %v10564_v31  ;;  %v912_v56 = vmul.f32 %v6255_v26, %v5728_v14  ;;  %v6607_v55 = vpop.permute.xlu0 %856 }
 0x172   : > { %10568 = vst [vmem:[#allocation49_spill] sm:$0xff] %v6584_v22  ;;  %10570 = vst [vmem:[#allocation173_spill] sm:$0xff] %v6592_v38  ;;  %v911_v5 = vmul.f32 %v6255_v26, %v10573_v41  ;;  %v6605_v22 = vpop.permute.xlu1 %860  ;;  %v6610_v11 = vadd.f32 %v910_v12, %v5904_v58  ;;  %v6614_v43 = vmul.f32 %v6351_v29, %v10564_v31  ;;  %v10576_v58 = vld [vmem:[#allocation65_spill] sm:$0xff] }
 0x173   : > { %10571 = vst [vmem:[#allocation174_spill] sm:$0xff] %v6595_v45  ;;  %10572 = vst [vmem:[#allocation175_spill] sm:$0xff] %v6599_v8  ;;  %v6618_v15 = vmul.f32 %v6318_v36, %v10566_v24  ;;  %v6622_v38 = vmul.f32 %v6351_v29, %v10566_v24  ;;  %v6625_v8 = vadd.f32 %v909_v48, %v5916_v25 }
 0x174   : > { %10574 = vst [vmem:[#allocation54_spill] sm:$0xff] %v6610_v11  ;;  %v914_v45 = vmul.f32 %v6255_v26, %v5794_v47  ;;  %v913_v12 = vmul.f32 %v6255_v26, %v10576_v58  ;;  %v10577_v11 = vld [vmem:[#allocation16_spill] sm:$0xff]  ;;  %v6635_v31 = vmul.f32 %v6318_v36, %v5728_v14  ;;  %v6639_v24 = vmul.f32 %v6351_v29, %v5728_v14 }
 0x175   : > { %10575 = vst [vmem:[#allocation176_spill] sm:$0xff] %v6622_v38  ;;  %1209 = vbcast.lane.b32.xlu1 %v10577_v11, 266  ;;  %1205 = vbcast.lane.b32.xlu0 %v10577_v11, 258  ;;  %v6643_v25 = vmul.f32 %v6318_v36, %v10573_v41  ;;  %v6647_v48 = vmul.f32 %v6351_v29, %v10573_v41 }
 0x176   : > { %10578 = vst [vmem:[#allocation65_spill] sm:$0xff] %v6635_v31  ;;  %10579 = vst [vmem:[#allocation16_spill] sm:$0xff] %v6639_v24  ;;  %v6650_v38 = vadd.f32 %v912_v56, %v5932_v60  ;;  %v6653_v11 = vadd.f32 %v911_v5, %v5944_v61  ;;  %v6657_v31 = vmul.f32 %v6318_v36, %v5794_v47  ;;  %v6663_v24 = vpop.permute.xlu1 %868 }
 0x177   : > { %10580 = vst [vmem:[#allocation177_spill] sm:$0xff] %v6643_v25  ;;  %10581 = vst [vmem:[#allocation178_spill] sm:$0xff] %v6647_v48  ;;  %v6661_v14 = vmul.f32 %v6351_v29, %v5794_v47  ;;  %v6665_v25 = vpop.permute.xlu0 %864  ;;  %v6669_v41 = vmul.f32 %v6318_v36, %v10576_v58  ;;  %v6673_v60 = vmul.f32 %v6351_v29, %v10576_v58  ;;  %v10585_v48 = vld [vmem:[#allocation17_spill] sm:$0xff] }
 0x178   : > { %10583 = vst [vmem:[#allocation180_spill] sm:$0xff] %v6665_v25  ;;  %v920_v61 = vmul.f32 %v6255_v26, %v5992_v62  ;;  %v919_v56 = vmul.f32 %v6255_v26, %v5994_v42  ;;  %v6680_v47 = vadd.f32 %v914_v45, %v5956_v10  ;;  %v6683_v5 = vadd.f32 %v913_v12, %v5970_v63  ;;  %v10588_v10 = vld [vmem:[#allocation77_spill] sm:$0xff] }
 0x179   : > { %10582 = vst [vmem:[#allocation179_spill] sm:$0xff] %v6661_v14  ;;  %10584 = vst [vmem:[#allocation181_spill] sm:$0xff] %v6673_v60  ;;  %v922_v14 = vmul.f32 %v6255_v26, %v6058_v27  ;;  %1217 = vbcast.lane.b32.xlu1 %v10585_v48, 266  ;;  %1213 = vbcast.lane.b32.xlu0 %v10585_v48, 258  ;;  %v6691_v58 = vmul.f32 %v6318_v36, %v5860_v52  ;;  %v10592_v48 = vld [vmem:[#allocation89_spill] sm:$0xff] }
 0x17a   : > { %v6695_v42 = vmul.f32 %v6351_v29, %v5860_v52  ;;  %v6699_v62 = vmul.f32 %v6318_v36, %v10588_v10  ;;  %v921_v63 = vmul.f32 %v6255_v26, %v6060_v59  ;;  %v6705_v45 = vmul.f32 %v6351_v29, %v10588_v10 }
 0x17b   : > { %10586 = vst [vmem:[#allocation17_spill] sm:$0xff] %v6691_v58  ;;  %v6709_v12 = vmul.f32 %v6351_v29, %v5926_v57  ;;  %v6713_v60 = vmul.f32 %v6351_v29, %v10592_v48  ;;  %v924_v52 = vmul.f32 %v6255_v26, %v6124_v19  ;;  %v6722_v58 = vadd.f32 %v920_v61, %v6010_v0  ;;  %v10601_v61 = vld [vmem:[#allocation18_spill] sm:$0xff] }
 0x17c   : > { %10587 = vst [vmem:[#allocation182_spill] sm:$0xff] %v6695_v42  ;;  %10589 = vst [vmem:[#allocation183_spill] sm:$0xff] %v6699_v62  ;;  %v6717_v42 = vpop.permute.xlu1 %876  ;;  %v6719_v62 = vpop.permute.xlu0 %872  ;;  %v6725_v10 = vadd.f32 %v919_v56, %v6014_v54  ;;  %v6729_v57 = vmul.f32 %v6318_v36, %v6058_v27  ;;  %v923_v48 = vmul.f32 %v6255_v26, %v6126_v7  ;;  %v10602_v54 = vld [vmem:[#allocation5_spill] sm:$0xff] }
 0x17d   : > { %10590 = vst [vmem:[#allocation184_spill] sm:$0xff] %v6705_v45  ;;  %10591 = vst [vmem:[#allocation185_spill] sm:$0xff] %v6709_v12  ;;  %v6738_v12 = vmul.f32 %v6318_v36, %v6060_v59  ;;  %v10600_v45 = vld [vmem:[#allocation133_spill] sm:$0xff]  ;;  %1225 = vbcast.lane.b32.xlu1 %v10601_v61, 266  ;;  %1221 = vbcast.lane.b32.xlu0 %v10601_v61, 258  ;;  %v6745_v27 = vadd.f32 %v921_v63, %v10602_v54  ;;  %v10606_v59 = vld [vmem:[#allocation134_spill] sm:$0xff] }
 0x17e   : > { %10593 = vst [vmem:[#allocation186_spill] sm:$0xff] %v6713_v60  ;;  %10594 = vst [vmem:[#allocation187_spill] sm:$0xff] %v6717_v42  ;;  %v6734_v60 = vadd.f32 %v922_v14, %v6018_v3  ;;  %v926_v0 = vmul.f32 %v6255_v26, %v10600_v45  ;;  %v6749_v56 = vmul.f32 %v6318_v36, %v6124_v19  ;;  %v10611_v54 = vld [vmem:[#allocation146_spill] sm:$0xff] }
 0x17f   : > { %10595 = vst [vmem:[#allocation188_spill] sm:$0xff] %v6719_v62  ;;  %10596 = vst [vmem:[#allocation189_spill] sm:$0xff] %v6725_v10  ;;  %v6753_v3 = vmul.f32 %v6351_v29, %v6124_v19  ;;  %v925_v14 = vmul.f32 %v6255_v26, %v10606_v59  ;;  %v6762_v61 = vmul.f32 %v6318_v36, %v6126_v7 }
 0x180   : > { %10597 = vst [vmem:[#allocation190_spill] sm:$0xff] %v6729_v57  ;;  %10598 = vst [vmem:[#allocation191_spill] sm:$0xff] %v6734_v60  ;;  %v6766_v63 = vmul.f32 %v6351_v29, %v6126_v7  ;;  %v6772_v19 = vpop.permute.xlu0 %880  ;;  %v10618_v7 = vld [vmem:[#allocation147_spill] sm:$0xff] }
 0x181   : > { %10599 = vst [vmem:[#allocation192_spill] sm:$0xff] %v6738_v12  ;;  %10603 = vst [vmem:[#allocation133_spill] sm:$0xff] %v6745_v27  ;;  %v10607_v12 = vld [vmem:[#allocation105_spill] sm:$0xff]  ;;  %v6770_v27 = vpop.permute.xlu1 %884 }
 0x182   : > { %10604 = vst [vmem:[#allocation18_spill] sm:$0xff] %v6749_v56  ;;  %10605 = vst [vmem:[#allocation5_spill] sm:$0xff] %v6753_v3  ;;  %v6758_v57 = vadd.f32 %v924_v52, %v10607_v12  ;;  %v928_v56 = vmul.f32 %v6255_v26, %v10611_v54  ;;  %v10614_v3 = vld [vmem:[#allocation24_spill] sm:$0xff]  ;;  %v6779_v52 = vmul.f32 %v6318_v36, %v10600_v45 }
 0x183   : > { %10609 = vst [vmem:[#allocation105_spill] sm:$0xff] %v6762_v61  ;;  %10610 = vst [vmem:[#allocation193_spill] sm:$0xff] %v6766_v63  ;;  %v6775_v60 = vadd.f32 %v923_v48, %v10614_v3  ;;  %v6783_v12 = vmul.f32 %v6351_v29, %v10600_v45  ;;  %v927_v63 = vmul.f32 %v6255_v26, %v10618_v7  ;;  %v10619_v61 = vld [vmem:[#allocation110_spill] sm:$0xff] }
 0x184   : > { %10608 = vst [vmem:[#allocation134_spill] sm:$0xff] %v6758_v57  ;;  %10612 = vst [vmem:[#allocation146_spill] sm:$0xff] %v6770_v27  ;;  %v6788_v57 = vadd.f32 %v926_v0, %v10619_v61  ;;  %v6796_v48 = vmul.f32 %v6351_v29, %v10606_v59  ;;  %v10623_v3 = vld [vmem:[#allocation2_spill] sm:$0xff]  ;;  %v10624_v27 = vld [vmem:[#allocation25_spill] sm:$0xff]  ;;  %v6810_v61 = vmul.f32 %v6318_v36, %v10611_v54 }
 0x185   : > { %10613 = vst [vmem:[#allocation194_spill] sm:$0xff] %v6772_v19  ;;  %10615 = vst [vmem:[#allocation24_spill] sm:$0xff] %v6775_v60  ;;  %v6792_v19 = vmul.f32 %v6318_v36, %v10606_v59  ;;  %1353 = vbcast.lane.b32.xlu1 %v10623_v3, 264  ;;  %1349 = vbcast.lane.b32.xlu0 %v10623_v3, 256  ;;  %v6803_v45 = vld [vmem:[%s9958_s1 + $0x2] ss:$0 sm:$0xff]  ;;  %v6806_v0 = vadd.f32 %v925_v14, %v10624_v27 }
 0x186   : > { %10616 = vst [vmem:[#allocation195_spill] sm:$0xff] %v6779_v52  ;;  %10617 = vst [vmem:[#allocation196_spill] sm:$0xff] %v6783_v12  ;;  %v6814_v59 = vmul.f32 %v6351_v29, %v10611_v54  ;;  %v6827_v27 = vmul.f32 %v6351_v29, %v10618_v7  ;;  %v10633_v14 = vld [vmem:[#allocation155_spill] sm:$0xff]  ;;  %v1006_v54 = vpop.permute.xlu0 %1005 }
 0x187   : > { %10620 = vst [vmem:[#allocation147_spill] sm:$0xff] %v6788_v57  ;;  %10621 = vst [vmem:[#allocation110_spill] sm:$0xff] %v6792_v19  ;;  %v10629_v19 = vld [vmem:[#allocation115_spill] sm:$0xff]  ;;  %v6823_v57 = vmul.f32 %v6318_v36, %v10618_v7 }
 0x188   : > { %10622 = vst [vmem:[#allocation197_spill] sm:$0xff] %v6796_v48  ;;  %10625 = vst [vmem:[#allocation2_spill] sm:$0xff] %v6806_v0  ;;  %v10628_v48 = vld [vmem:[#allocation154_spill] sm:$0xff]  ;;  %v6819_v52 = vadd.f32 %v928_v56, %v10629_v19  ;;  %v1010_v0 = vpop.permute.xlu1 %1009 }
 0x189   : > { %10626 = vst [vmem:[#allocation25_spill] sm:$0xff] %v6810_v61  ;;  %10627 = vst [vmem:[#allocation198_spill] sm:$0xff] %v6814_v59  ;;  %v930_v12 = vmul.f32 %v6255_v26, %v10628_v48  ;;  %v929_v61 = vmul.f32 %v6255_v26, %v10633_v14  ;;  %v10634_v59 = vld [vmem:[#allocation26_spill] sm:$0xff]  ;;  %v6836_v56 = vmul.f32 %v6318_v36, %v10628_v48 }
 0x18a   : > { %10630 = vst [vmem:[#allocation154_spill] sm:$0xff] %v6819_v52  ;;  %10631 = vst [vmem:[#allocation115_spill] sm:$0xff] %v6823_v57  ;;  %v6832_v60 = vadd.f32 %v927_v63, %v10634_v59  ;;  %v1233_v19 = vmul.f32 %v6803_v45, %v1010_v0  ;;  %v1232_v57 = vmul.f32 %v6803_v45, %v1006_v54  ;;  %v10639_v59 = vld [vmem:[#allocation9_spill] sm:$0xff] }
 0x18b   : > { %10632 = vst [vmem:[#allocation199_spill] sm:$0xff] %v6827_v27  ;;  %10636 = vst [vmem:[#allocation26_spill] sm:$0xff] %v6836_v56  ;;  %v6842_v7 = vmul.f32 %v6351_v29, %v10628_v48  ;;  %v6846_v27 = vmul.f32 %v6318_v36, %v10633_v14  ;;  %v932_v63 = vmul.f32 %v6255_v26, %v6385_v49  ;;  %1364 = vbcast.lane.b32.xlu1 %v10639_v59, 264  ;;  %v10640_v56 = vld [vmem:[#allocation119_spill] sm:$0xff] }
 0x18c   : > { %10635 = vst [vmem:[#allocation155_spill] sm:$0xff] %v6832_v60  ;;  %1360 = vbcast.lane.b32.xlu0 %v10639_v59, 256  ;;  %v6853_v60 = vadd.f32 %v930_v12, %v10640_v56  ;;  %v6857_v0 = vmul.f32 %v6351_v29, %v10633_v14  ;;  %v931_v48 = vmul.f32 %v6255_v26, %v6387_v20  ;;  %v1018_v56 = vpop.permute.xlu1 %1017 }
 0x18d   : > { %10637 = vst [vmem:[#allocation200_spill] sm:$0xff] %v6842_v7  ;;  %10638 = vst [vmem:[#allocation201_spill] sm:$0xff] %v6846_v27  ;;  %v1289_v54 = vadd.f32 %v1233_v19, %v6364_v30  ;;  %v10643_v27 = vld [vmem:[#allocation27_spill] sm:$0xff]  ;;  %v6867_v52 = vmul.f32 %v6318_v36, %v6385_v49  ;;  %v6871_v12 = vmul.f32 %v6351_v29, %v6385_v49  ;;  %v10649_v49 = vld [vmem:[#allocation124_spill] sm:$0xff] }
 0x18e   : > { %10641 = vst [vmem:[#allocation9_spill] sm:$0xff] %v6853_v60  ;;  %10642 = vst [vmem:[#allocation119_spill] sm:$0xff] %v6857_v0  ;;  %v6863_v7 = vadd.f32 %v929_v61, %v10643_v27  ;;  %v934_v14 = vmul.f32 %v6255_v26, %v6438_v39  ;;  %v1014_v0 = vpop.permute.xlu0 %1013  ;;  %v6877_v60 = vmul.f32 %v6318_v36, %v6387_v20 }
 0x18f   : > { %10645 = vst [vmem:[#allocation202_spill] sm:$0xff] %v6867_v52  ;;  %10646 = vst [vmem:[#allocation203_spill] sm:$0xff] %v6871_v12  ;;  %v6881_v30 = vmul.f32 %v6351_v29, %v6387_v20  ;;  %v933_v61 = vmul.f32 %v6255_v26, %v6440_v6  ;;  %v1288_v27 = vadd.f32 %v1232_v57, %v6367_v35  ;;  %v10651_v12 = vld [vmem:[#allocation51_spill] sm:$0xff]  ;;  %1489 = vbcast.lane.b32.xlu1 %v10623_v3, 265 }
 0x190   : > { %10644 = vst [vmem:[#allocation27_spill] sm:$0xff] %v6863_v7  ;;  %10647 = vst [vmem:[#allocation204_spill] sm:$0xff] %v6877_v60  ;;  %v6887_v19 = vadd.f32 %v932_v63, %v10649_v49  ;;  %v1428_v52 = vadd.f32 %v10651_v12, %v1289_v54  ;;  %v1235_v7 = vmul.f32 %v6803_v45, %v1018_v56  ;;  %1485 = vbcast.lane.b32.xlu0 %v10623_v3, 257  ;;  %v10652_v60 = vld [vmem:[#allocation28_spill] sm:$0xff]  ;;  %v6918_v49 = vpop.permute.xlu1 %1025 }
 0x191   : > { %10648 = vst [vmem:[#allocation205_spill] sm:$0xff] %v6881_v30  ;;  %v6894_v10 = vadd.f32 %v931_v48, %v10652_v60  ;;  %v6898_v20 = vmul.f32 %v6318_v36, %v6438_v39  ;;  %v936_v57 = vmul.f32 %v6255_v26, %v6497_v13  ;;  %v1234_v35 = vmul.f32 %v6803_v45, %v1014_v0  ;;  %v10655_v63 = vld [vmem:[#allocation128_spill] sm:$0xff] }
 0x192   : > { %10650 = vst [vmem:[#allocation124_spill] sm:$0xff] %v6887_v19  ;;  %v6904_v54 = vadd.f32 %v934_v14, %v10655_v63  ;;  %v6908_v12 = vmul.f32 %v6351_v29, %v6438_v39  ;;  %v6912_v60 = vmul.f32 %v6318_v36, %v6440_v6  ;;  %v6916_v48 = vmul.f32 %v6351_v29, %v6440_v6  ;;  %v6920_v30 = vpop.permute.xlu0 %1021  ;;  %v10662_v39 = vld [vmem:[#allocation50_spill] sm:$0xff]  ;;  %v10770_v19 = vld [vmem:[#allocation175_spill] sm:$0xff] }
 0x193   : > { %10653 = vst [vmem:[#allocation51_spill] sm:$0xff] %v6894_v10  ;;  %10654 = vst [vmem:[#allocation28_spill] sm:$0xff] %v6898_v20  ;;  %v10660_v20 = vld [vmem:[#allocation29_spill] sm:$0xff]  ;;  %v935_v14 = vmul.f32 %v6255_v26, %v6499_v44  ;;  %v1427_v63 = vadd.f32 %v10662_v39, %v1288_v27  ;;  %v1237_v6 = vmul.f32 %v6803_v45, %v6918_v49  ;;  %1497 = vbcast.lane.b32.xlu1 %v10639_v59, 265  ;;  %v10665_v39 = vld [vmem:[#allocation135_spill] sm:$0xff] }
 0x194   : > { %10656 = vst [vmem:[#allocation128_spill] sm:$0xff] %v6904_v54  ;;  %10657 = vst [vmem:[#allocation206_spill] sm:$0xff] %v6908_v12  ;;  %v6923_v10 = vadd.f32 %v933_v61, %v10660_v20  ;;  %v6941_v61 = vmul.f32 %v6351_v29, %v6497_v13  ;;  %v1291_v20 = vadd.f32 %v1235_v7, %v6374_v9  ;;  %1493 = vbcast.lane.b32.xlu0 %v10639_v59, 257 }
 0x195   : > { %10658 = vst [vmem:[#allocation207_spill] sm:$0xff] %v6912_v60  ;;  %10659 = vst [vmem:[#allocation208_spill] sm:$0xff] %v6916_v48  ;;  %v6931_v60 = vld [vmem:[%s9958_s1 + $0x5] ss:$0 sm:$0xff]  ;;  %v6937_v48 = vmul.f32 %v6318_v36, %v6497_v13  ;;  %v1561_v27 = vadd.f32 %v6371_v17, %v1428_v52  ;;  %v6947_v12 = vadd.f32 %v936_v57, %v10665_v39  ;;  %v6965_v57 = vpop.permute.xlu1 %1033 }
 0x196   : > { %10661 = vst [vmem:[#allocation29_spill] sm:$0xff] %v6923_v10  ;;  %10664 = vst [vmem:[#allocation209_spill] sm:$0xff] %v6941_v61  ;;  %v6951_v10 = vmul.f32 %v6318_v36, %v6499_v44  ;;  %v1290_v13 = vadd.f32 %v1234_v35, %v6377_v1  ;;  %v938_v9 = vmul.f32 %v6255_v26, %v6551_v18  ;;  %v6967_v39 = vpop.permute.xlu0 %1029 }
 0x197   : > { %10663 = vst [vmem:[#allocation50_spill] sm:$0xff] %v6937_v48  ;;  %10666 = vst [vmem:[#allocation135_spill] sm:$0xff] %v6947_v12  ;;  %v6955_v48 = vmul.f32 %v6351_v29, %v6499_v44  ;;  %v937_v17 = vmul.f32 %v6255_v26, %v6553_v23  ;;  %v1638_v52 = vmul.f32 %v6931_v60, %v1018_v56  ;;  %v10669_v44 = vld [vmem:[#allocation30_spill] sm:$0xff]  ;;  %v10674_v56 = vld [vmem:[#allocation52_spill] sm:$0xff]  ;;  %1622 = vbcast.lane.b32.xlu1 %v10623_v3, 266 }
 0x198   : > { %10667 = vst [vmem:[#allocation210_spill] sm:$0xff] %v6951_v10  ;;  %v1293_v7 = vadd.f32 %v1237_v6, %v6404_v34  ;;  %v6974_v1 = vmul.f32 %v6318_v36, %v6551_v18  ;;  %v6978_v35 = vmul.f32 %v6351_v29, %v6551_v18  ;;  %v1560_v61 = vadd.f32 %v6381_v28, %v1427_v63 }
 0x199   : > { %10668 = vst [vmem:[#allocation211_spill] sm:$0xff] %v6955_v48  ;;  %v6970_v48 = vadd.f32 %v935_v14, %v10669_v44  ;;  %v6983_v34 = vmul.f32 %v6318_v36, %v6553_v23  ;;  %v1430_v6 = vadd.f32 %v10674_v56, %v1291_v20  ;;  %v1694_v10 = vadd.f32 %v1638_v52, %v1561_v27  ;;  %v10678_v27 = vld [vmem:[#allocation31_spill] sm:$0xff]  ;;  %v7007_v12 = vpop.permute.xlu1 %1041 }
 0x19a   : > { %10671 = vst [vmem:[#allocation212_spill] sm:$0xff] %v6974_v1  ;;  %10672 = vst [vmem:[#allocation213_spill] sm:$0xff] %v6978_v35  ;;  %v1236_v14 = vmul.f32 %v6803_v45, %v6920_v30  ;;  %v940_v44 = vmul.f32 %v6255_v26, %v6605_v22  ;;  %v939_v18 = vmul.f32 %v6255_v26, %v6607_v55  ;;  %v10675_v35 = vld [vmem:[#allocation55_spill] sm:$0xff]  ;;  %1618 = vbcast.lane.b32.xlu0 %v10623_v3, 258  ;;  %v10681_v1 = vld [vmem:[#allocation57_spill] sm:$0xff]  ;;  %v7009_v54 = vpop.permute.xlu0 %1037 }
 0x19b   : > { %10670 = vst [vmem:[#allocation30_spill] sm:$0xff] %v6970_v48  ;;  %10673 = vst [vmem:[#allocation214_spill] sm:$0xff] %v6983_v34  ;;  %v1429_v28 = vadd.f32 %v10675_v35, %v1290_v13  ;;  %v1637_v63 = vmul.f32 %v6931_v60, %v1014_v0  ;;  %v10676_v34 = vld [vmem:[#allocation140_spill] sm:$0xff]  ;;  %v7000_v52 = vadd.f32 %v937_v17, %v10678_v27  ;;  %1630 = vbcast.lane.b32.xlu1 %v10639_v59, 266 }
 0x19c   : > { %v6997_v20 = vadd.f32 %v938_v9, %v10676_v34  ;;  %v7004_v56 = vmul.f32 %v6351_v29, %v6553_v23  ;;  %v1432_v48 = vadd.f32 %v10681_v1, %v1293_v7  ;;  %v7013_v0 = vmul.f32 %v6318_v36, %v6605_v22  ;;  %v10686_v7 = vld [vmem:[#allocation53_spill] sm:$0xff]  ;;  %v10687_v34 = vld [vmem:[#allocation144_spill] sm:$0xff] }
 0x19d   : > { %10679 = vst [vmem:[#allocation55_spill] sm:$0xff] %v7000_v52  ;;  %v7017_v3 = vmul.f32 %v6351_v29, %v6605_v22  ;;  %v7021_v13 = vmul.f32 %v6318_v36, %v6607_v55  ;;  %v1693_v23 = vadd.f32 %v1637_v63, %v1560_v61  ;;  %v7025_v9 = vmul.f32 %v6351_v29, %v6607_v55  ;;  %v10689_v27 = vld [vmem:[#allocation32_spill] sm:$0xff] }
 0x19e   : > { %10677 = vst [vmem:[#allocation52_spill] sm:$0xff] %v6997_v20  ;;  %10680 = vst [vmem:[#allocation140_spill] sm:$0xff] %v7004_v56  ;;  %v1563_v17 = vadd.f32 %v6391_v40, %v1430_v6  ;;  %v1833_v1 = vadd.f32 %v10686_v7, %v1694_v10  ;;  %v1292_v35 = vadd.f32 %v1236_v14, %v6407_v16  ;;  %1626 = vbcast.lane.b32.xlu0 %v10639_v59, 258  ;;  %v10692_v6 = vld [vmem:[#allocation11_spill] sm:$0xff]  ;;  %v10705_v56 = vld [vmem:[#allocation40_spill] sm:$0xff] }
 0x19f   : > { %10682 = vst [vmem:[#allocation31_spill] sm:$0xff] %v7013_v0  ;;  %10683 = vst [vmem:[#allocation57_spill] sm:$0xff] %v7017_v3  ;;  %v7032_v22 = vadd.f32 %v940_v44, %v10687_v34  ;;  %v7035_v3 = vadd.f32 %v939_v18, %v10689_v27  ;;  %v1562_v61 = vadd.f32 %v6399_v21, %v1429_v28  ;;  %v7050_v44 = vpop.permute.xlu1 %1049  ;;  %v7052_v21 = vpop.permute.xlu0 %1045  ;;  %v10694_v28 = vld [vmem:[#allocation56_spill] sm:$0xff]  ;;  %v7064_v7 = vld [vmem:[%s9958_s1 + $0x8] ss:$0 sm:$0xff]  ;;  %1758 = vbcast.lane.b32.xlu1 %v6444_v37, 264 }
 0x1a0   : > { %10684 = vst [vmem:[#allocation215_spill] sm:$0xff] %v7021_v13  ;;  %10685 = vst [vmem:[#allocation216_spill] sm:$0xff] %v7025_v9  ;;  %v1239_v55 = vmul.f32 %v6803_v45, %v6965_v57  ;;  %v942_v40 = vmul.f32 %v6255_v26, %v6663_v24  ;;  %v7045_v16 = vmul.f32 %v6318_v36, %v6663_v24  ;;  %v10695_v34 = vld [vmem:[#allocation10_spill] sm:$0xff]  ;;  %v10696_v9 = vld [vmem:[#allocation59_spill] sm:$0xff] }
 0x1a1   : > { %10688 = vst [vmem:[#allocation53_spill] sm:$0xff] %v7032_v22  ;;  %10690 = vst [vmem:[#allocation144_spill] sm:$0xff] %v7035_v3  ;;  %v1640_v10 = vmul.f32 %v6931_v60, %v6918_v49  ;;  %v1565_v14 = vadd.f32 %v10692_v6, %v1432_v48  ;;  %v7056_v18 = vmul.f32 %v6351_v29, %v6663_v24  ;;  %v10703_v0 = vld [vmem:[#allocation39_spill] sm:$0xff] }
 0x1a2   : > { %10691 = vst [vmem:[#allocation32_spill] sm:$0xff] %v7045_v16  ;;  %v941_v59 = vmul.f32 %v6255_v26, %v6665_v25  ;;  %v1832_v63 = vadd.f32 %v10694_v28, %v1693_v23  ;;  %v1639_v48 = vmul.f32 %v6931_v60, %v6920_v30  ;;  %v1966_v27 = vadd.f32 %v10695_v34, %v1833_v1 }
 0x1a3   : > { %10693 = vst [vmem:[#allocation11_spill] sm:$0xff] %v7056_v18  ;;  %v1696_v6 = vadd.f32 %v1640_v10, %v1563_v17  ;;  %v1431_v13 = vadd.f32 %v10696_v9, %v1292_v35  ;;  %v1642_v24 = vmul.f32 %v6931_v60, %v6965_v57  ;;  %v1295_v23 = vadd.f32 %v1239_v55, %v6428_v32  ;;  %v7087_v32 = vpop.permute.xlu1 %1057  ;;  %v10698_v55 = vld [vmem:[#allocation150_spill] sm:$0xff] }
 0x1a4   : > { %v1695_v26 = vadd.f32 %v1639_v48, %v1562_v61  ;;  %v1238_v28 = vmul.f32 %v6803_v45, %v6967_v39  ;;  %v1241_v18 = vmul.f32 %v6803_v45, %v7007_v12  ;;  %1754 = vbcast.lane.b32.xlu0 %v6444_v37, 256  ;;  %v7081_v17 = vmul.f32 %v6318_v36, %v6665_v25  ;;  %v7089_v61 = vpop.permute.xlu0 %1053  ;;  %v10700_v48 = vld [vmem:[#allocation33_spill] sm:$0xff] }
 0x1a5   : > { %v2043_v9 = vmul.f32 %v7064_v7, %v6918_v49  ;;  %v1698_v1 = vadd.f32 %v1642_v24, %v1565_v14  ;;  %v1240_v35 = vmul.f32 %v6803_v45, %v7009_v54  ;;  %v7092_v10 = vadd.f32 %v942_v40, %v10698_v55  ;;  %v10704_v14 = vld [vmem:[#allocation58_spill] sm:$0xff]  ;;  %1769 = vbcast.lane.b32.xlu1 %v6481_v4, 264 }
 0x1a6   : > { %10697 = vst [vmem:[#allocation56_spill] sm:$0xff] %v7081_v17  ;;  %v7095_v34 = vadd.f32 %v941_v59, %v10700_v48  ;;  %v7099_v25 = vmul.f32 %v6318_v36, %v6717_v42  ;;  %v1965_v49 = vadd.f32 %v10703_v0, %v1832_v63  ;;  %v1835_v24 = vadd.f32 %v10704_v14, %v1696_v6  ;;  %v7110_v40 = vld [vmem:[%s9959_s2] ss:$0 sm:$0xff]  ;;  %v10706_v59 = vld [vmem:[#allocation60_spill] sm:$0xff]  ;;  %v10707_v48 = vld [vmem:[#allocation61_spill] sm:$0xff] }
 0x1a7   : > { %10699 = vst [vmem:[#allocation10_spill] sm:$0xff] %v7092_v10  ;;  %v2099_v17 = vadd.f32 %v2043_v9, %v1966_v27  ;;  %v2042_v16 = vmul.f32 %v7064_v7, %v6920_v30  ;;  %v1564_v3 = vadd.f32 %v10705_v56, %v1431_v13  ;;  %v1834_v55 = vadd.f32 %v10706_v59, %v1695_v26  ;;  %v10708_v0 = vld [vmem:[#allocation3_spill] sm:$0xff]  ;;  %v10709_v30 = vld [vmem:[#allocation62_spill] sm:$0xff]  ;;  %v10710_v13 = vld [vmem:[#allocation13_spill] sm:$0xff] }
 0x1a8   : > { %10701 = vst [vmem:[#allocation59_spill] sm:$0xff] %v7095_v34  ;;  %10702 = vst [vmem:[#allocation150_spill] sm:$0xff] %v7099_v25  ;;  %v1434_v25 = vadd.f32 %v10707_v48, %v1295_v23  ;;  %v1294_v63 = vadd.f32 %v1238_v28, %v10708_v0  ;;  %v1297_v27 = vadd.f32 %v1241_v18, %v6472_v46  ;;  %1765 = vbcast.lane.b32.xlu0 %v6481_v4, 256  ;;  %v7123_v34 = vpop.permute.xlu1 %1065  ;;  %v7125_v26 = vpop.permute.xlu0 %1061  ;;  %v10714_v59 = vld [vmem:[#allocation161_spill] sm:$0xff] }
 0x1a9   : > { %v1837_v6 = vadd.f32 %v10709_v30, %v1698_v1  ;;  %v1641_v56 = vmul.f32 %v6931_v60, %v6967_v39  ;;  %v1296_v9 = vadd.f32 %v1240_v35, %v10710_v13  ;;  %v1243_v14 = vmul.f32 %v6803_v45, %v7050_v44  ;;  %1894 = vbcast.lane.b32.xlu1 %v6444_v37, 265  ;;  %v10715_v30 = vld [vmem:[#allocation162_spill] sm:$0xff] }
 0x1aa   : > { %v7129_v23 = vmul.f32 %v6351_v29, %v6717_v42  ;;  %v7133_v46 = vmul.f32 %v6318_v36, %v6719_v62  ;;  %v2098_v18 = vadd.f32 %v2042_v16, %v1965_v49  ;;  %v1242_v28 = vmul.f32 %v6803_v45, %v7052_v21  ;;  %v10716_v42 = vld [vmem:[#allocation63_spill] sm:$0xff]  ;;  %v10718_v49 = vld [vmem:[#allocation66_spill] sm:$0xff] }
 0x1ab   : > { %v7139_v1 = vmul.f32 %v6351_v29, %v6719_v62  ;;  %v2162_v35 = vadd.f32 %v7110_v40, %v2099_v17  ;;  %v1968_v48 = vadd.f32 %v10714_v59, %v1835_v24  ;;  %v1697_v0 = vadd.f32 %v1641_v56, %v1564_v3  ;;  %v10719_v62 = vld [vmem:[#allocation41_spill] sm:$0xff] }
 0x1ac   : > { %10711 = vst [vmem:[#allocation33_spill] sm:$0xff] %v7129_v23  ;;  %10712 = vst [vmem:[#allocation39_spill] sm:$0xff] %v7133_v46  ;;  %v1967_v13 = vadd.f32 %v10715_v30, %v1834_v55  ;;  %v1433_v36 = vadd.f32 %v10716_v42, %v1294_v63  ;;  %v10717_v23 = vld [vmem:[#allocation163_spill] sm:$0xff]  ;;  %v1436_v46 = vadd.f32 %v10718_v49, %v1297_v27  ;;  %1890 = vbcast.lane.b32.xlu0 %v6444_v37, 257  ;;  %v7154_v56 = vpop.permute.xlu1 %1073  ;;  %v7156_v55 = vpop.permute.xlu0 %1069 }
 0x1ad   : > { %10713 = vst [vmem:[#allocation58_spill] sm:$0xff] %v7139_v1  ;;  %v1567_v16 = vadd.f32 %v10717_v23, %v1434_v25  ;;  %v2045_v29 = vmul.f32 %v7064_v7, %v6965_v57  ;;  %v1970_v17 = vadd.f32 %v10719_v62, %v1837_v6  ;;  %v10720_v1 = vld [vmem:[#allocation68_spill] sm:$0xff]  ;;  %v1299_v3 = vadd.f32 %v1243_v14, %v6502_v2 }
 0x1ae   : > { %v1435_v24 = vadd.f32 %v10720_v1, %v1296_v9  ;;  %v2161_v42 = vadd.f32 %v7110_v40, %v2098_v18  ;;  %v2044_v25 = vmul.f32 %v7064_v7, %v6967_v39  ;;  %v1644_v63 = vmul.f32 %v6931_v60, %v7007_v12  ;;  %v10722_v6 = vld [vmem:[#allocation64_spill] sm:$0xff]  ;;  %1902 = vbcast.lane.b32.xlu1 %v6481_v4, 265  ;;  %v10724_v39 = vld [vmem:[#allocation42_spill] sm:$0xff] }
 0x1af   : > { %v1298_v57 = vadd.f32 %v1242_v28, %v6505_v33  ;;  %v7164_v27 = vmax.f32 %v2162_v35, 0.0  ;;  %v2101_v62 = vadd.f32 %v2045_v29, %v1968_v48  ;;  %v1836_v9 = vadd.f32 %v10722_v6, %v1697_v0  ;;  %v10723_v18 = vld [vmem:[#allocation164_spill] sm:$0xff]  ;;  %v10725_v33 = vld [vmem:[#allocation70_spill] sm:$0xff]  ;;  %v10726_v35 = vld [vmem:[#allocation167_spill] sm:$0xff] }
 0x1b0   : > { %v2047_v2 = vmul.f32 %v7064_v7, %v7007_v12  ;;  %v2100_v14 = vadd.f32 %v2044_v25, %v1967_v13  ;;  %v1700_v23 = vadd.f32 %v1644_v63, %v1567_v16  ;;  %v1566_v1 = vadd.f32 %v10723_v18, %v1433_v36  ;;  %1898 = vbcast.lane.b32.xlu0 %v6481_v4, 257  ;;  %v7177_v49 = vpop.permute.xlu1 %1081  ;;  %v7179_v12 = vpop.permute.xlu0 %1077  ;;  %v10727_v36 = vld [vmem:[#allocation72_spill] sm:$0xff] }
 0x1b1   : > { %10721 = vst [vmem:[#allocation40_spill] sm:$0xff] %v7164_v27  ;;  %v1569_v59 = vadd.f32 %v10724_v39, %v1436_v46  ;;  %v1438_v28 = vadd.f32 %v10725_v33, %v1299_v3  ;;  %v1568_v48 = vadd.f32 %v10726_v35, %v1435_v24  ;;  %v1245_v0 = vmul.f32 %v6803_v45, %v7087_v32  ;;  %v10729_v24 = vld [vmem:[#allocation165_spill] sm:$0xff]  ;;  %v10731_v33 = vld [vmem:[#allocation44_spill] sm:$0xff] }
 0x1b2   : > { %v2103_v30 = vadd.f32 %v2047_v2, %v1970_v17  ;;  %v1643_v13 = vmul.f32 %v6931_v60, %v7009_v54  ;;  %v1646_v46 = vmul.f32 %v6931_v60, %v7050_v44  ;;  %v1437_v16 = vadd.f32 %v10727_v36, %v1298_v57  ;;  %2027 = vbcast.lane.b32.xlu1 %v6444_v37, 266  ;;  %v10730_v2 = vld [vmem:[#allocation67_spill] sm:$0xff]  ;;  %v10732_v36 = vld [vmem:[#allocation45_spill] sm:$0xff] }
 0x1b3   : > { %v1244_v29 = vmul.f32 %v6803_v45, %v7089_v61  ;;  %v7188_v17 = vmax.f32 %v2161_v42, 0.0  ;;  %v1969_v3 = vadd.f32 %v10729_v24, %v1836_v9  ;;  %v1645_v25 = vmul.f32 %v6931_v60, %v7052_v21 }
 0x1b4   : > { %v1247_v63 = vmul.f32 %v6803_v45, %v7123_v34  ;;  %v2164_v6 = vadd.f32 %v7110_v40, %v2101_v62  ;;  %v1839_v18 = vadd.f32 %v10730_v2, %v1700_v23  ;;  %v1699_v57 = vadd.f32 %v1643_v13, %v1566_v1  ;;  %2023 = vbcast.lane.b32.xlu0 %v6444_v37, 258  ;;  %v7203_v10 = vpop.permute.xlu1 %1089  ;;  %v7205_v52 = vpop.permute.xlu0 %1085  ;;  %v10733_v1 = vld [vmem:[#allocation14_spill] sm:$0xff] }
 0x1b5   : > { %10728 = vst [vmem:[#allocation60_spill] sm:$0xff] %v7188_v17  ;;  %v1702_v39 = vadd.f32 %v1646_v46, %v1569_v59  ;;  %v2046_v42 = vmul.f32 %v7064_v7, %v7009_v54  ;;  %v1701_v9 = vadd.f32 %v1645_v25, %v1568_v48  ;;  %v1571_v35 = vadd.f32 %v10731_v33, %v1438_v28  ;;  %v10734_v13 = vld [vmem:[#allocation46_spill] sm:$0xff]  ;;  %v10735_v48 = vld [vmem:[#allocation47_spill] sm:$0xff]  ;;  %v10736_v25 = vld [vmem:[#allocation69_spill] sm:$0xff] }
 0x1b6   : > { %v1301_v24 = vadd.f32 %v1245_v0, %v10732_v36  ;;  %v2163_v62 = vadd.f32 %v7110_v40, %v2100_v14  ;;  %v2166_v23 = vadd.f32 %v7110_v40, %v2103_v30  ;;  %v1570_v59 = vadd.f32 %v10733_v1, %v1437_v16  ;;  %2035 = vbcast.lane.b32.xlu1 %v6481_v4, 266  ;;  %v10737_v14 = vld [vmem:[#allocation166_spill] sm:$0xff]  ;;  %v10738_v30 = vld [vmem:[#allocation71_spill] sm:$0xff] }
 0x1b7   : > { %v1300_v37 = vadd.f32 %v1244_v29, %v10734_v13  ;;  %v2102_v46 = vadd.f32 %v2046_v42, %v1969_v3  ;;  %v1648_v54 = vmul.f32 %v6931_v60, %v7087_v32  ;;  %v1303_v28 = vadd.f32 %v1247_v63, %v10735_v48  ;;  %v10740_v3 = vld [vmem:[#allocation73_spill] sm:$0xff]  ;;  %v10741_v42 = vld [vmem:[#allocation74_spill] sm:$0xff] }
 0x1b8   : > { %v1246_v0 = vmul.f32 %v6803_v45, %v7125_v26  ;;  %v1838_v2 = vadd.f32 %v10736_v25, %v1699_v57  ;;  %v1972_v33 = vadd.f32 %v10737_v14, %v1839_v18  ;;  %v1841_v36 = vadd.f32 %v10738_v30, %v1702_v39  ;;  %2031 = vbcast.lane.b32.xlu0 %v6481_v4, 258  ;;  %v7227_v48 = vpop.permute.xlu1 %1097  ;;  %v7229_v20 = vpop.permute.xlu0 %1093  ;;  %v10743_v39 = vld [vmem:[#allocation78_spill] sm:$0xff] }
 0x1b9   : > { %v1647_v16 = vmul.f32 %v6931_v60, %v7089_v61  ;;  %v7223_v29 = vmax.f32 %v2164_v6, 0.0  ;;  %v1840_v63 = vadd.f32 %v10740_v3, %v1701_v9  ;;  %v1440_v1 = vadd.f32 %v10741_v42, %v1301_v24  ;;  %v10745_v9 = vld [vmem:[#allocation80_spill] sm:$0xff] }
 0x1ba   : > { %v1704_v13 = vadd.f32 %v1648_v54, %v1571_v35  ;;  %v7231_v57 = vmax.f32 %v2163_v62, 0.0  ;;  %v2049_v18 = vmul.f32 %v7064_v7, %v7050_v44  ;;  %v1439_v25 = vadd.f32 %v10743_v39, %v1300_v37  ;;  %v10746_v54 = vld [vmem:[#allocation43_spill] sm:$0xff]  ;;  %v10747_v42 = vld [vmem:[#allocation168_spill] sm:$0xff]  ;;  %v10749_v37 = vld [vmem:[#allocation169_spill] sm:$0xff] }
 0x1bb   : > { %10739 = vst [vmem:[#allocation61_spill] sm:$0xff] %v7223_v29  ;;  %v1703_v14 = vadd.f32 %v1647_v16, %v1570_v59  ;;  %v7236_v4 = vmax.f32 %v2166_v23, 0.0  ;;  %v2165_v6 = vadd.f32 %v7110_v40, %v2102_v46  ;;  %v1442_v30 = vadd.f32 %v10745_v9, %v1303_v28  ;;  %v10748_v59 = vld [vmem:[#allocation75_spill] sm:$0xff]  ;;  %v10750_v46 = vld [vmem:[#allocation170_spill] sm:$0xff] }
 0x1bc   : > { %10742 = vst [vmem:[#allocation3_spill] sm:$0xff] %v7231_v57  ;;  %v1302_v35 = vadd.f32 %v1246_v0, %v6569_v51  ;;  %v2105_v24 = vadd.f32 %v2049_v18, %v1972_v33  ;;  %v1971_v3 = vadd.f32 %v10746_v54, %v1838_v2  ;;  %v1974_v62 = vadd.f32 %v10747_v42, %v1841_v36  ;;  %v7250_v28 = vpop.permute.xlu1 %1105  ;;  %v7252_v51 = vpop.permute.xlu0 %1101  ;;  %v10752_v2 = vld [vmem:[#allocation79_spill] sm:$0xff] }
 0x1bd   : > { %10744 = vst [vmem:[#allocation62_spill] sm:$0xff] %v7236_v4  ;;  %v1249_v22 = vmul.f32 %v6803_v45, %v7154_v56  ;;  %v2048_v44 = vmul.f32 %v7064_v7, %v7052_v21  ;;  %v1843_v23 = vadd.f32 %v10748_v59, %v1704_v13  ;;  %v1973_v16 = vadd.f32 %v10749_v37, %v1840_v63  ;;  %v10753_v63 = vld [vmem:[#allocation82_spill] sm:$0xff]  ;;  %v10755_v37 = vld [vmem:[#allocation171_spill] sm:$0xff] }
 0x1be   : > { %v1573_v39 = vadd.f32 %v10750_v46, %v1440_v1  ;;  %10751 = vst [vmem:[#allocation13_spill] sm:$0xff] %v7252_v51  ;;  %v2051_v0 = vmul.f32 %v7064_v7, %v7087_v32  ;;  %v1842_v33 = vadd.f32 %v10752_v2, %v1703_v14  ;;  %v2050_v36 = vmul.f32 %v7064_v7, %v7089_v61  ;;  %v10754_v1 = vld [vmem:[#allocation48_spill] sm:$0xff] }
 0x1bf   : > { %v1572_v21 = vadd.f32 %v6560_v53, %v1439_v25  ;;  %v1650_v13 = vmul.f32 %v6931_v60, %v7123_v34  ;;  %v1441_v18 = vadd.f32 %v10753_v63, %v1302_v35  ;;  %v1575_v9 = vadd.f32 %v10754_v1, %v1442_v30  ;;  %v10761_v1 = vld [vmem:[#allocation84_spill] sm:$0xff] }
 0x1c0   : > { %v1248_v54 = vmul.f32 %v6803_v45, %v7156_v55  ;;  %v2104_v42 = vadd.f32 %v2048_v44, %v1971_v3  ;;  %v2107_v59 = vadd.f32 %v2051_v0, %v1974_v62  ;;  %v1649_v32 = vmul.f32 %v6931_v60, %v7125_v26  ;;  %v7272_v35 = vpop.permute.xlu1 %1113  ;;  %v7274_v30 = vpop.permute.xlu0 %1109  ;;  %v10758_v62 = vld [vmem:[#allocation172_spill] sm:$0xff] }
 0x1c1   : > { %v1305_v14 = vadd.f32 %v1249_v22, %v6580_v50  ;;  %v2106_v61 = vadd.f32 %v2050_v36, %v1973_v16  ;;  %v1976_v53 = vadd.f32 %v10755_v37, %v1843_v23  ;;  %v1706_v25 = vadd.f32 %v1650_v13, %v1573_v39  ;;  %10756 = vst [vmem:[#allocation161_spill] sm:$0xff] %v7272_v35  ;;  %v10759_v22 = vld [vmem:[#allocation15_spill] sm:$0xff]  ;;  %v10760_v23 = vld [vmem:[#allocation174_spill] sm:$0xff]  ;;  %v10781_v35 = vld [vmem:[#allocation92_spill] sm:$0xff] }
 0x1c2   : > { %v1652_v46 = vmul.f32 %v6931_v60, %v7154_v56  ;;  %10757 = vst [vmem:[#allocation162_spill] sm:$0xff] %v7274_v30  ;;  %v2168_v2 = vadd.f32 %v7110_v40, %v2105_v24  ;;  %v2053_v3 = vmul.f32 %v7064_v7, %v7123_v34  ;;  %v1975_v44 = vadd.f32 %v10758_v62, %v1842_v33 }
 0x1c3   : > { %v1705_v0 = vadd.f32 %v1649_v32, %v1572_v21  ;;  %v1574_v16 = vadd.f32 %v10759_v22, %v1441_v18  ;;  %v1304_v39 = vadd.f32 %v1248_v54, %v10760_v23  ;;  %v1251_v36 = vmul.f32 %v6803_v45, %v7177_v49  ;;  %v10762_v21 = vld [vmem:[#allocation81_spill] sm:$0xff] }
 0x1c4   : > { %v1708_v50 = vadd.f32 %v1652_v46, %v1575_v9  ;;  %v2167_v13 = vadd.f32 %v7110_v40, %v2104_v42  ;;  %v2170_v63 = vadd.f32 %v7110_v40, %v2107_v59  ;;  %v2052_v24 = vmul.f32 %v7064_v7, %v7125_v26  ;;  %v7293_v54 = vpop.permute.xlu1 %1121  ;;  %v7295_v37 = vpop.permute.xlu0 %1117  ;;  %v10764_v46 = vld [vmem:[#allocation83_spill] sm:$0xff] }
 0x1c5   : > { %v1444_v34 = vadd.f32 %v10761_v1, %v1305_v14  ;;  %v2169_v33 = vadd.f32 %v7110_v40, %v2106_v61  ;;  %v1845_v9 = vadd.f32 %v10762_v21, %v1706_v25  ;;  %v2109_v32 = vadd.f32 %v2053_v3, %v1976_v53  ;;  %v10765_v14 = vld [vmem:[#allocation85_spill] sm:$0xff]  ;;  %v10766_v61 = vld [vmem:[#allocation86_spill] sm:$0xff] }
 0x1c6   : > { %v1651_v18 = vmul.f32 %v6931_v60, %v7156_v55  ;;  %v7297_v42 = vmax.f32 %v2165_v6, 0.0  ;;  %v7299_v59 = vmax.f32 %v2168_v2, 0.0  ;;  %v1844_v26 = vadd.f32 %v10764_v46, %v1705_v0  ;;  %v10767_v53 = vld [vmem:[#allocation54_spill] sm:$0xff]  ;;  %v10772_v0 = vld [vmem:[#allocation49_spill] sm:$0xff] }
 0x1c7   : > { %v2108_v62 = vadd.f32 %v2052_v24, %v1975_v44  ;;  %v1847_v22 = vadd.f32 %v10765_v14, %v1708_v50  ;;  %v1443_v23 = vadd.f32 %v10766_v61, %v1304_v39  ;;  %v1307_v3 = vadd.f32 %v1251_v36, %v10767_v53 }
 0x1c8   : > { %10763 = vst [vmem:[#allocation63_spill] sm:$0xff] %v7299_v59  ;;  %v1707_v25 = vadd.f32 %v1651_v18, %v1574_v16  ;;  %v7305_v1 = vmax.f32 %v2167_v13, 0.0  ;;  %v7307_v21 = vmax.f32 %v2170_v63, 0.0  ;;  %v1577_v30 = vadd.f32 %v10770_v19, %v1444_v34  ;;  %v7318_v39 = vpop.permute.xlu1 %1129  ;;  %v7320_v36 = vpop.permute.xlu0 %1125  ;;  %v10773_v19 = vld [vmem:[#allocation173_spill] sm:$0xff]  ;;  %v10775_v18 = vld [vmem:[#allocation90_spill] sm:$0xff] }
 0x1c9   : > { %v1250_v6 = vmul.f32 %v6803_v45, %v7179_v12  ;;  %v7312_v2 = vmax.f32 %v2169_v33, 0.0  ;;  %v2172_v44 = vadd.f32 %v7110_v40, %v2109_v32  ;;  %v1978_v50 = vadd.f32 %v10772_v0, %v1845_v9  ;;  %v10774_v33 = vld [vmem:[#allocation87_spill] sm:$0xff] }
 0x1ca   : > { %10768 = vst [vmem:[#allocation163_spill] sm:$0xff] %v7305_v1  ;;  %10769 = vst [vmem:[#allocation66_spill] sm:$0xff] %v7307_v21  ;;  %v1253_v16 = vmul.f32 %v6803_v45, %v7203_v10  ;;  %v2171_v13 = vadd.f32 %v7110_v40, %v2108_v62  ;;  %v1977_v63 = vadd.f32 %v10773_v19, %v1844_v26 }
 0x1cb   : > { %10771 = vst [vmem:[#allocation41_spill] sm:$0xff] %v7312_v2  ;;  %v1654_v24 = vmul.f32 %v6931_v60, %v7177_v49  ;;  %v1252_v34 = vmul.f32 %v6803_v45, %v7205_v52  ;;  %v1846_v9 = vadd.f32 %v10774_v33, %v1707_v25  ;;  %v1980_v32 = vadd.f32 %v6614_v43, %v1847_v22  ;;  %v10780_v33 = vld [vmem:[#allocation91_spill] sm:$0xff] }
 0x1cc   : > { %v1446_v46 = vadd.f32 %v10775_v18, %v1307_v3  ;;  %v1576_v14 = vadd.f32 %v6618_v15, %v1443_v23  ;;  %v2055_v61 = vmul.f32 %v7064_v7, %v7154_v56  ;;  %v2054_v26 = vmul.f32 %v7064_v7, %v7156_v55  ;;  %v7344_v15 = vpop.permute.xlu1 %1137  ;;  %v7346_v23 = vpop.permute.xlu0 %1133 }
 0x1cd   : > { %v1710_v62 = vadd.f32 %v1654_v24, %v1577_v30  ;;  %v1306_v53 = vadd.f32 %v1250_v6, %v6625_v8  ;;  %v7337_v0 = vmax.f32 %v2172_v44, 0.0  ;;  %v2057_v25 = vmul.f32 %v7064_v7, %v7177_v49  ;;  %v10778_v6 = vld [vmem:[#allocation176_spill] sm:$0xff]  ;;  %v10779_v49 = vld [vmem:[#allocation65_spill] sm:$0xff] }
 0x1ce   : > { %v1653_v43 = vmul.f32 %v6931_v60, %v7179_v12  ;;  %v1309_v22 = vadd.f32 %v1253_v16, %v6650_v38  ;;  %v7348_v56 = vmax.f32 %v2171_v13, 0.0  ;;  %v2111_v55 = vadd.f32 %v2055_v61, %v1978_v50  ;;  %v10782_v50 = vld [vmem:[#allocation94_spill] sm:$0xff] }
 0x1cf   : > { %10776 = vst [vmem:[#allocation68_spill] sm:$0xff] %v7337_v0  ;;  %v2110_v30 = vadd.f32 %v2054_v26, %v1977_v63  ;;  %v1308_v8 = vadd.f32 %v1252_v34, %v6653_v11  ;;  %v2113_v3 = vadd.f32 %v2057_v25, %v1980_v32  ;;  %v1979_v44 = vadd.f32 %v10778_v6, %v1846_v9  ;;  %v10786_v6 = vld [vmem:[#allocation177_spill] sm:$0xff] }
 0x1d0   : > { %10777 = vst [vmem:[#allocation64_spill] sm:$0xff] %v7348_v56  ;;  %v1709_v19 = vadd.f32 %v1653_v43, %v1576_v14  ;;  %v1579_v24 = vadd.f32 %v10779_v49, %v1446_v46  ;;  %v1849_v18 = vadd.f32 %v10780_v33, %v1710_v62  ;;  %v1445_v38 = vadd.f32 %v10781_v35, %v1306_v53  ;;  %v7365_v32 = vpop.permute.xlu1 %1145  ;;  %v7367_v46 = vpop.permute.xlu0 %1141  ;;  %v10783_v35 = vld [vmem:[#allocation96_spill] sm:$0xff]  ;;  %v10785_v53 = vld [vmem:[#allocation93_spill] sm:$0xff] }
 0x1d1   : > { %v2056_v16 = vmul.f32 %v7064_v7, %v7179_v12  ;;  %v1255_v13 = vmul.f32 %v6803_v45, %v7227_v48  ;;  %v1448_v63 = vadd.f32 %v10782_v50, %v1309_v22  ;;  %v1656_v11 = vmul.f32 %v6931_v60, %v7203_v10 }
 0x1d2   : > { %v1254_v34 = vmul.f32 %v6803_v45, %v7229_v20  ;;  %v2323_v9 = vrot.slane %v7164_v27, 1  ;;  %v1447_v14 = vadd.f32 %v10783_v35, %v1308_v8  ;;  %v2322_v12 = vrot.slane %v7188_v17, 1 }
 0x1d3   : > { %v2328_v61 = vrot.slane %v7297_v42, 1  ;;  %v7373_v26 = vrot.slane %v7236_v4, 1  ;;  %v2174_v62 = vadd.f32 %v7110_v40, %v2111_v55  ;;  %v1848_v25 = vadd.f32 %v10785_v53, %v1709_v19 }
 0x1d4   : > { %v2112_v43 = vadd.f32 %v2056_v16, %v1979_v44  ;;  %v1712_v22 = vadd.f32 %v1656_v11, %v1579_v24  ;;  %2396 = vrot.lane.b32.xlu1 %v2323_v9, %s5220_s22  ;;  %v1578_v49 = vadd.f32 %v10786_v6, %v1445_v38  ;;  %v1311_v8 = vadd.f32 %v1255_v13, %v6680_v47  ;;  %v7389_v24 = vpop.permute.xlu1 %1153  ;;  %v7391_v16 = vpop.permute.xlu0 %1149  ;;  %v10788_v38 = vld [vmem:[#allocation16_spill] sm:$0xff] }
 0x1d5   : > { %10784 = vst [vmem:[#allocation164_spill] sm:$0xff] %v7373_v26  ;;  %v2324_v33 = vsel %vm2321_vm0, %v2322_v12, %v2323_v9  ;;  %v7383_v50 = vsel %vm2321_vm0, %v2328_v61, %v7373_v26  ;;  %v2173_v35 = vadd.f32 %v7110_v40, %v2110_v30  ;;  %v1581_v55 = vadd.f32 %v6657_v31, %v1448_v63  ;;  %v10789_v31 = vld [vmem:[#allocation95_spill] sm:$0xff] }
 0x1d6   : > { %10787 = vst [vmem:[#allocation42_spill] sm:$0xff] %v7383_v50  ;;  %v1310_v44 = vadd.f32 %v1254_v34, %v6683_v5  ;;  %v5015_v19 = vpack.i.bf16 %v7383_v50, %v2324_v33  ;;  %v2176_v47 = vadd.f32 %v7110_v40, %v2113_v3  ;;  %v1982_v13 = vadd.f32 %v10788_v38, %v1849_v18  ;;  %v10790_v5 = vld [vmem:[#allocation178_spill] sm:$0xff] }
 0x1d7   : > { %v1655_v11 = vmul.f32 %v6931_v60, %v7205_v52  ;;  %v1580_v9 = vadd.f32 %v6669_v41, %v1447_v14  ;;  %v2175_v30 = vadd.f32 %v7110_v40, %v2112_v43  ;;  %v1851_v63 = vadd.f32 %v10789_v31, %v1712_v22  ;;  %v10791_v3 = vld [vmem:[#allocation98_spill] sm:$0xff]  ;;  %v10793_v43 = vld [vmem:[#allocation100_spill] sm:$0xff] }
 0x1d8   : > { %v1981_v34 = vadd.f32 %v10790_v5, %v1848_v25  ;;  %v1658_v12 = vmul.f32 %v6931_v60, %v7227_v48  ;;  %5016 = vrot.lane.b32.xlu0 %v5015_v19, %s5220_s22  ;;  %v1450_v53 = vadd.f32 %v10791_v3, %v1311_v8  ;;  %v1657_v18 = vmul.f32 %v6931_v60, %v7229_v20  ;;  %v7414_v33 = vpop.permute.xlu1 %1161  ;;  %v7416_v19 = vpop.permute.xlu0 %1157 }
 0x1d9   : > { %v1711_v61 = vadd.f32 %v1655_v11, %v1578_v49  ;;  %v7408_v6 = vrot.slane %v7223_v29, 1  ;;  %v2059_v41 = vmul.f32 %v7064_v7, %v7203_v10  ;;  %v1449_v25 = vadd.f32 %v10793_v43, %v1310_v44  ;;  %v10801_v43 = vld [vmem:[#allocation17_spill] sm:$0xff] }
 0x1da   : > { %v1714_v14 = vadd.f32 %v1658_v12, %v1581_v55  ;;  %v2325_v22 = vrot.slane %v7231_v57, 1  ;;  %v7418_v49 = vmax.f32 %v2174_v62, 0.0  ;;  %v7420_v8 = vmax.f32 %v2173_v35, 0.0  ;;  %v10799_v62 = vld [vmem:[#allocation97_spill] sm:$0xff]  ;;  %v10800_v12 = vld [vmem:[#allocation179_spill] sm:$0xff] }
 0x1db   : > { %10792 = vst [vmem:[#allocation70_spill] sm:$0xff] %v7408_v6  ;;  %v2058_v38 = vmul.f32 %v7064_v7, %v7205_v52  ;;  %v1713_v11 = vadd.f32 %v1657_v18, %v1580_v9  ;;  %2400 = vrot.lane.b32.xlu1 %v7408_v6, %s5220_s22  ;;  %v7426_v10 = vmax.f32 %v2176_v47, 0.0  ;;  %v7428_v55 = vmax.f32 %v2175_v30, 0.0  ;;  %v10802_v9 = vld [vmem:[#allocation99_spill] sm:$0xff]  ;;  %v10880_v29 = vld [vmem:[#allocation125_spill] sm:$0xff] }
 0x1dc   : > { %10794 = vst [vmem:[#allocation167_spill] sm:$0xff] %v7418_v49  ;;  %10795 = vst [vmem:[#allocation72_spill] sm:$0xff] %v7420_v8  ;;  %v2115_v44 = vadd.f32 %v2059_v41, %v1982_v13  ;;  %v7432_v31 = vsel %vm2321_vm0, %v2325_v22, %v7408_v6  ;;  %v1850_v5 = vadd.f32 %v10799_v62, %v1711_v61  ;;  %v10803_v13 = vld [vmem:[#allocation183_spill] sm:$0xff]  ;;  %v2331_v41 = vrot.slane %v7305_v1, 1  ;;  %v7444_v22 = vpop.permute.xlu0 %1165  ;;  %v10804_v61 = vld [vmem:[#allocation101_spill] sm:$0xff] }
 0x1dd   : > { %10796 = vst [vmem:[#allocation165_spill] sm:$0xff] %v7426_v10  ;;  %10797 = vst [vmem:[#allocation67_spill] sm:$0xff] %v7428_v55  ;;  %v2114_v35 = vadd.f32 %v2058_v38, %v1981_v34  ;;  %v1984_v3 = vadd.f32 %v10800_v12, %v1851_v63  ;;  %v1583_v52 = vadd.f32 %v10801_v43, %v1450_v53  ;;  %2398 = vrot.lane.b32.xlu0 %v7432_v31, %s5220_s22  ;;  %v7454_v38 = vpop.permute.xlu1 %1169  ;;  %v10850_v1 = vld [vmem:[#allocation2_spill] sm:$0xff] }
 0x1de   : > { %10798 = vst [vmem:[#allocation44_spill] sm:$0xff] %v7432_v31  ;;  %v1853_v47 = vadd.f32 %v10802_v9, %v1714_v14  ;;  %v2061_v30 = vmul.f32 %v7064_v7, %v7227_v48  ;;  %v1582_v18 = vadd.f32 %v10803_v13, %v1449_v25  ;;  %v1852_v34 = vadd.f32 %v10804_v61, %v1713_v11  ;;  %v10808_v61 = vld [vmem:[#allocation189_spill] sm:$0xff] }
 0x1df   : > { %v1660_v63 = vmul.f32 %v6931_v60, %v7250_v28  ;;  %v7450_v53 = vrot.slane %v7299_v59, 1  ;;  %v1261_v14 = vmul.f32 %v6803_v45, %v7293_v54  ;;  %v1659_v48 = vmul.f32 %v6931_v60, %v7252_v51 }
 0x1e0   : > { %v1260_v25 = vmul.f32 %v6803_v45, %v7295_v37  ;;  %v2334_v62 = vrot.slane %v7312_v2, 1  ;;  %v7462_v11 = vrot.slane %v7307_v21, 1  ;;  %v2340_v9 = vrot.slane %v7420_v8, 1  ;;  %v10823_v21 = vld [vmem:[#allocation185_spill] sm:$0xff] }
 0x1e1   : > { %10805 = vst [vmem:[#allocation45_spill] sm:$0xff] %v7450_v53  ;;  %v1716_v12 = vadd.f32 %v1660_v63, %v1583_v52  ;;  %2404 = vrot.lane.b32.xlu0 %v7373_v26, %s5220_s22  ;;  %v7468_v54 = vsel %vm2321_vm0, %v2331_v41, %v7450_v53  ;;  %v1317_v43 = vadd.f32 %v1261_v14, %v6722_v58  ;;  %v7477_v52 = vrot.slane %v7418_v49, 1  ;;  %v10810_v41 = vld [vmem:[#allocation181_spill] sm:$0xff]  ;;  %v10811_v14 = vld [vmem:[#allocation104_spill] sm:$0xff] }
 0x1e2   : > { %10806 = vst [vmem:[#allocation14_spill] sm:$0xff] %v7462_v11  ;;  %10807 = vst [vmem:[#allocation46_spill] sm:$0xff] %v7468_v54  ;;  %v2178_v13 = vadd.f32 %v7110_v40, %v2115_v44  ;;  %v1715_v37 = vadd.f32 %v1659_v48, %v1582_v18  ;;  %2406 = vrot.lane.b32.xlu1 %v7468_v54, %s5220_s22  ;;  %v1316_v31 = vadd.f32 %v1260_v25, %v10808_v61  ;;  %v10812_v44 = vld [vmem:[#allocation23_spill] sm:$0xff]  ;;  %v7493_v61 = vpop.permute.xlu0 %1173 }
 0x1e3   : > { %10809 = vst [vmem:[#allocation47_spill] sm:$0xff] %v7477_v52  ;;  %v2177_v63 = vadd.f32 %v7110_v40, %v2114_v35  ;;  %v2117_v6 = vadd.f32 %v2061_v30, %v1984_v3  ;;  %v1983_v50 = vadd.f32 %v10810_v41, %v1850_v5  ;;  %v1263_v58 = vmul.f32 %v6803_v45, %v7318_v39  ;;  %v10815_v35 = vld [vmem:[#allocation182_spill] sm:$0xff]  ;;  %v10817_v41 = vld [vmem:[#allocation184_spill] sm:$0xff] }
 0x1e4   : > { %v1456_v26 = vadd.f32 %v10811_v14, %v1317_v43  ;;  %v1455_v18 = vadd.f32 %v10812_v44, %v1316_v31  ;;  %v7487_v48 = vsel %vm2321_vm0, %v2334_v62, %v7462_v11  ;;  %v7491_v25 = vsel %vm2321_vm0, %v2340_v9, %v7477_v52  ;;  %v10816_v5 = vld [vmem:[#allocation102_spill] sm:$0xff]  ;;  %v7502_v62 = vpop.permute.xlu1 %1177  ;;  %v10818_v9 = vld [vmem:[#allocation103_spill] sm:$0xff] }
 0x1e5   : > { %10813 = vst [vmem:[#allocation69_spill] sm:$0xff] %v7487_v48  ;;  %10814 = vst [vmem:[#allocation166_spill] sm:$0xff] %v7491_v25  ;;  %v1986_v3 = vadd.f32 %v10815_v35, %v1853_v47  ;;  %v1855_v30 = vadd.f32 %v10816_v5, %v1716_v12  ;;  %v1985_v54 = vadd.f32 %v10817_v41, %v1852_v34  ;;  %2408 = vrot.lane.b32.xlu0 %v7450_v53, %s5220_s22  ;;  %v10820_v35 = vld [vmem:[#allocation191_spill] sm:$0xff]  ;;  %v10822_v53 = vld [vmem:[#allocation192_spill] sm:$0xff] }
 0x1e6   : > { %v5020_v31 = vpack.i.bf16 %v7491_v25, %v7487_v48  ;;  %v2060_v43 = vmul.f32 %v7064_v7, %v7229_v20  ;;  %v1854_v14 = vadd.f32 %v10818_v9, %v1715_v37  ;;  %v2337_v44 = vrot.slane %v7348_v56, 1  ;;  %v10821_v9 = vld [vmem:[#allocation190_spill] sm:$0xff] }
 0x1e7   : > { %v7509_v47 = vrot.slane %v7337_v0, 1  ;;  %v2063_v34 = vmul.f32 %v7064_v7, %v7250_v28  ;;  %v2062_v12 = vmul.f32 %v7064_v7, %v7252_v51  ;;  %v1319_v5 = vadd.f32 %v1263_v58, %v10820_v35  ;;  %v10835_v51 = vld [vmem:[#allocation108_spill] sm:$0xff] }
 0x1e8   : > { %5021 = vrot.lane.b32.xlu1 %v5020_v31, %s5220_s22  ;;  %v1262_v20 = vmul.f32 %v6803_v45, %v7320_v36  ;;  %v2180_v37 = vadd.f32 %v7110_v40, %v2117_v6  ;;  %v2116_v41 = vadd.f32 %v2060_v43, %v1983_v50  ;;  %v1589_v25 = vadd.f32 %v10821_v9, %v1456_v26  ;;  %v10824_v31 = vld [vmem:[#allocation186_spill] sm:$0xff] }
 0x1e9   : > { %10819 = vst [vmem:[#allocation71_spill] sm:$0xff] %v7509_v47  ;;  %v1588_v48 = vadd.f32 %v10822_v53, %v1455_v18  ;;  %v2119_v0 = vadd.f32 %v2063_v34, %v1986_v3  ;;  %v2118_v56 = vadd.f32 %v2062_v12, %v1985_v54  ;;  %v1988_v2 = vadd.f32 %v10823_v21, %v1855_v30  ;;  %v7536_v53 = vpop.permute.xlu0 %1181  ;;  %v10826_v21 = vld [vmem:[#allocation161_spill] sm:$0xff]  ;;  %v10827_v18 = vld [vmem:[#allocation106_spill] sm:$0xff] }
 0x1ea   : > { %2412 = vrot.lane.b32.xlu0 %v7462_v11, %s5220_s22  ;;  %v1265_v58 = vmul.f32 %v6803_v45, %v7344_v15  ;;  %v1987_v35 = vadd.f32 %v10824_v31, %v1854_v14  ;;  %v1666_v6 = vmul.f32 %v6931_v60, %v7318_v39  ;;  %v1665_v26 = vmul.f32 %v6931_v60, %v7320_v36  ;;  %v10828_v30 = vld [vmem:[#allocation133_spill] sm:$0xff]  ;;  %v7546_v36 = vpop.permute.xlu1 %1185  ;;  %v10829_v14 = vld [vmem:[#allocation162_spill] sm:$0xff] }
 0x1eb   : > { %v7534_v50 = vsel %vm2321_vm0, %v2337_v44, %v7509_v47  ;;  %v2065_v54 = vmul.f32 %v7064_v7, %v10826_v21  ;;  %v1458_v3 = vadd.f32 %v10827_v18, %v1319_v5  ;;  %v1318_v43 = vadd.f32 %v1262_v20, %v10828_v30  ;;  %v10831_v18 = vld [vmem:[#allocation134_spill] sm:$0xff] }
 0x1ec   : > { %10825 = vst [vmem:[#allocation73_spill] sm:$0xff] %v7534_v50  ;;  %2414 = vrot.lane.b32.xlu1 %v7534_v50, %s5220_s22  ;;  %v1264_v39 = vmul.f32 %v6803_v45, %v7346_v23  ;;  %v2064_v44 = vmul.f32 %v7064_v7, %v10829_v14  ;;  %v1722_v34 = vadd.f32 %v1666_v6, %v1589_v25  ;;  %v7552_v31 = vmax.f32 %v2178_v13, 0.0 }
 0x1ed   : > { %v1721_v12 = vadd.f32 %v1665_v26, %v1588_v48  ;;  %v1267_v9 = vmul.f32 %v6803_v45, %v7365_v32  ;;  %v2179_v5 = vadd.f32 %v7110_v40, %v2116_v41  ;;  %v2182_v20 = vadd.f32 %v7110_v40, %v2119_v0  ;;  %v10834_v26 = vld [vmem:[#allocation18_spill] sm:$0xff]  ;;  %v10836_v41 = vld [vmem:[#allocation24_spill] sm:$0xff]  ;;  %v10837_v0 = vld [vmem:[#allocation107_spill] sm:$0xff] }
 0x1ee   : > { %10830 = vst [vmem:[#allocation74_spill] sm:$0xff] %v7552_v31  ;;  %v1321_v30 = vadd.f32 %v1265_v58, %v10831_v18  ;;  %2416 = vrot.lane.b32.xlu0 %v7509_v47, %s5220_s22  ;;  %v7559_v11 = vmax.f32 %v2177_v63, 0.0  ;;  %v2181_v50 = vadd.f32 %v7110_v40, %v2118_v56  ;;  %v2121_v25 = vadd.f32 %v2065_v54, %v1988_v2  ;;  %v10838_v18 = vld [vmem:[#allocation109_spill] sm:$0xff]  ;;  %v10839_v47 = vld [vmem:[#allocation147_spill] sm:$0xff]  ;;  %v7574_v56 = vpop.permute.xlu0 %1189 }
 0x1ef   : > { %v2120_v48 = vadd.f32 %v2064_v44, %v1987_v35  ;;  %v7562_v6 = vmax.f32 %v2180_v37, 0.0  ;;  %v1591_v13 = vadd.f32 %v10834_v26, %v1458_v3  ;;  %v1457_v49 = vadd.f32 %v10835_v51, %v1318_v43  ;;  %v10842_v51 = vld [vmem:[#allocation111_spill] sm:$0xff]  ;;  %v7583_v43 = vpop.permute.xlu1 %1193 }
 0x1f0   : > { %10832 = vst [vmem:[#allocation78_spill] sm:$0xff] %v7559_v11  ;;  %v1320_v8 = vadd.f32 %v1264_v39, %v10836_v41  ;;  %2420 = vrot.lane.b32.xlu1 %v7477_v52, %s5220_s22  ;;  %v1861_v58 = vadd.f32 %v10837_v0, %v1722_v34  ;;  %v1860_v63 = vadd.f32 %v10838_v18, %v1721_v12  ;;  %v7576_v37 = vmax.f32 %v2179_v5, 0.0  ;;  %v10845_v12 = vld [vmem:[#allocation105_spill] sm:$0xff] }
 0x1f1   : > { %10833 = vst [vmem:[#allocation80_spill] sm:$0xff] %v7562_v6  ;;  %v1323_v59 = vadd.f32 %v1267_v9, %v10839_v47  ;;  %v1266_v2 = vmul.f32 %v6803_v45, %v7367_v46  ;;  %v7578_v35 = vmax.f32 %v2182_v20, 0.0  ;;  %v1460_v54 = vadd.f32 %v10842_v51, %v1321_v30  ;;  %v10846_v20 = vld [vmem:[#allocation113_spill] sm:$0xff] }
 0x1f2   : > { %10840 = vst [vmem:[#allocation43_spill] sm:$0xff] %v7576_v37  ;;  %v1668_v3 = vmul.f32 %v6931_v60, %v7344_v15  ;;  %v7585_v39 = vmax.f32 %v2181_v50, 0.0  ;;  %v2184_v47 = vadd.f32 %v7110_v40, %v2121_v25  ;;  %v2183_v44 = vadd.f32 %v7110_v40, %v2120_v48  ;;  %v10847_v41 = vld [vmem:[#allocation5_spill] sm:$0xff]  ;;  %v10849_v50 = vld [vmem:[#allocation6_spill] sm:$0xff] }
 0x1f3   : > { %10841 = vst [vmem:[#allocation168_spill] sm:$0xff] %v7578_v35  ;;  %v7590_v34 = vrot.slane %v7426_v10, 1  ;;  %v1590_v9 = vadd.f32 %v10845_v12, %v1457_v49  ;;  %v1459_v26 = vadd.f32 %v10846_v20, %v1320_v8  ;;  %v2343_v30 = vrot.slane %v7428_v55, 1  ;;  %v10848_v18 = vld [vmem:[#allocation193_spill] sm:$0xff]  ;;  %v10851_v49 = vld [vmem:[#allocation195_spill] sm:$0xff]  ;;  %v10859_v10 = vld [vmem:[#allocation154_spill] sm:$0xff] }
 0x1f4   : > { %10843 = vst [vmem:[#allocation75_spill] sm:$0xff] %v7585_v39  ;;  %v1724_v5 = vadd.f32 %v1668_v3, %v1591_v13  ;;  %v1994_v0 = vadd.f32 %v10847_v41, %v1861_v58  ;;  %v1993_v51 = vadd.f32 %v10848_v18, %v1860_v63  ;;  %v1462_v52 = vadd.f32 %v10849_v50, %v1323_v59  ;;  %v10855_v3 = vld [vmem:[#allocation112_spill] sm:$0xff]  ;;  %v10857_v18 = vld [vmem:[#allocation117_spill] sm:$0xff] }
 0x1f5   : > { %10844 = vst [vmem:[#allocation169_spill] sm:$0xff] %v7590_v34  ;;  %v1322_v25 = vadd.f32 %v1266_v2, %v10850_v1  ;;  %2424 = vrot.lane.b32.xlu1 %v7590_v34, %s5220_s22  ;;  %v1667_v48 = vmul.f32 %v6931_v60, %v7346_v23  ;;  %v1593_v13 = vadd.f32 %v10851_v49, %v1460_v54  ;;  %v7610_v63 = vmax.f32 %v2184_v47, 0.0  ;;  %v7620_v54 = vpop.permute.xlu0 %1197  ;;  %v10856_v47 = vld [vmem:[#allocation110_spill] sm:$0xff] }
 0x1f6   : > { %v7606_v8 = vsel %vm2321_vm0, %v2343_v30, %v7590_v34  ;;  %v1269_v58 = vmul.f32 %v6803_v45, %v7389_v24  ;;  %v7612_v59 = vmax.f32 %v2183_v44, 0.0  ;;  %v2071_v1 = vmul.f32 %v7064_v7, %v7344_v15  ;;  %v7626_v30 = vpop.permute.xlu1 %1201 }
 0x1f7   : > { %10852 = vst [vmem:[#allocation170_spill] sm:$0xff] %v7606_v8  ;;  %10853 = vst [vmem:[#allocation79_spill] sm:$0xff] %v7610_v63  ;;  %v2070_v2 = vmul.f32 %v7064_v7, %v7346_v23  ;;  %2422 = vrot.lane.b32.xlu0 %v7606_v8, %s5220_s22  ;;  %v1863_v12 = vadd.f32 %v10855_v3, %v1724_v5  ;;  %v1723_v20 = vadd.f32 %v1667_v48, %v1590_v9  ;;  %v10858_v23 = vld [vmem:[#allocation25_spill] sm:$0xff]  ;;  %v10861_v48 = vld [vmem:[#allocation114_spill] sm:$0xff] }
 0x1f8   : > { %10854 = vst [vmem:[#allocation82_spill] sm:$0xff] %v7612_v59  ;;  %v1670_v45 = vmul.f32 %v6931_v60, %v7365_v32  ;;  %v1592_v44 = vadd.f32 %v10856_v47, %v1459_v26  ;;  %v2127_v41 = vadd.f32 %v2071_v1, %v1994_v0  ;;  %v1461_v50 = vadd.f32 %v10857_v18, %v1322_v25  ;;  %v7641_v0 = vld [vmem:[%s9958_s1 + $0x2] ss:$0 sm:$0xff]  ;;  %v10863_v3 = vld [vmem:[#allocation196_spill] sm:$0xff]  ;;  %v10864_v18 = vld [vmem:[#allocation115_spill] sm:$0xff] }
 0x1f9   : > { %v2126_v15 = vadd.f32 %v2070_v2, %v1993_v51  ;;  %v1595_v49 = vadd.f32 %v10858_v23, %v1462_v52  ;;  %v1669_v8 = vmul.f32 %v6931_v60, %v7367_v46  ;;  %v1325_v5 = vadd.f32 %v1269_v58, %v10859_v10 }
 0x1fa   : > { %v1726_v34 = vadd.f32 %v1670_v45, %v1593_v13  ;;  %v7634_v9 = vrot.slane %v7552_v31, 1  ;;  %v1672_v26 = vmul.f32 %v6931_v60, %v7389_v24  ;;  %v1268_v52 = vmul.f32 %v7641_v0, %v7391_v16 }
 0x1fb   : > { %v2346_v51 = vrot.slane %v7559_v11, 1  ;;  %v2352_v25 = vrot.slane %v7585_v39, 1  ;;  %v1862_v10 = vadd.f32 %v10861_v48, %v1723_v20  ;;  %v2073_v13 = vmul.f32 %v7064_v7, %v7365_v32  ;;  %v7658_v39 = vpop.permute.xlu0 %1205  ;;  %v10865_v20 = vld [vmem:[#allocation120_spill] sm:$0xff] }
 0x1fc   : > { %10860 = vst [vmem:[#allocation48_spill] sm:$0xff] %v7634_v9  ;;  %v1725_v58 = vadd.f32 %v1669_v8, %v1592_v44  ;;  %2428 = vrot.lane.b32.xlu1 %v7634_v9, %s5220_s22  ;;  %v7653_v1 = vrot.slane %v7578_v35, 1  ;;  %v2190_v2 = vadd.f32 %v7110_v40, %v2127_v41  ;;  %v1996_v45 = vadd.f32 %v10863_v3, %v1863_v12  ;;  %v7671_v41 = vpop.permute.xlu1 %1209 }
 0x1fd   : > { %v1728_v47 = vadd.f32 %v1672_v26, %v1595_v49  ;;  %v1594_v23 = vadd.f32 %v10864_v18, %v1461_v50  ;;  %v1464_v48 = vadd.f32 %v10865_v20, %v1325_v5  ;;  %v7663_v32 = vsel %vm2321_vm0, %v2346_v51, %v7634_v9  ;;  %v10868_v50 = vld [vmem:[#allocation116_spill] sm:$0xff]  ;;  %v10869_v26 = vld [vmem:[#allocation155_spill] sm:$0xff]  ;;  %v10870_v51 = vld [vmem:[#allocation118_spill] sm:$0xff] }
 0x1fe   : > { %10862 = vst [vmem:[#allocation171_spill] sm:$0xff] %v7653_v1  ;;  %10866 = vst [vmem:[#allocation172_spill] sm:$0xff] %v7663_v32  ;;  %v7667_v8 = vsel %vm2321_vm0, %v2352_v25, %v7653_v1  ;;  %v1271_v44 = vmul.f32 %v7641_v0, %v7414_v33  ;;  %v2189_v12 = vadd.f32 %v7110_v40, %v2126_v15  ;;  %v10871_v20 = vld [vmem:[#allocation9_spill] sm:$0xff]  ;;  %v7684_v31 = vmax.f32 %v2190_v2, 0.0  ;;  %v10879_v2 = vld [vmem:[#allocation122_spill] sm:$0xff] }
 0x1ff   : > { %10867 = vst [vmem:[#allocation15_spill] sm:$0xff] %v7667_v8  ;;  %v1865_v49 = vadd.f32 %v10868_v50, %v1726_v34  ;;  %v1324_v3 = vadd.f32 %v1268_v52, %v10869_v26  ;;  %v5025_v5 = vpack.i.bf16 %v7667_v8, %v7663_v32  ;;  %v1864_v18 = vadd.f32 %v10870_v51, %v1725_v58  ;;  %v10873_v15 = vld [vmem:[#allocation197_spill] sm:$0xff]  ;;  %v10878_v8 = vld [vmem:[#allocation198_spill] sm:$0xff] }
 0x200   : > { %v1671_v25 = vmul.f32 %v6931_v60, %v7391_v16  ;;  %v1327_v9 = vadd.f32 %v1271_v44, %v10871_v20  ;;  %v1270_v35 = vmul.f32 %v7641_v0, %v7416_v19  ;;  %10872 = vst [vmem:[#allocation174_spill] sm:$0xff] %v7684_v31  ;;  %v1995_v11 = vadd.f32 %v10873_v15, %v1862_v10  ;;  %v10875_v58 = vld [vmem:[#allocation121_spill] sm:$0xff]  ;;  %v10876_v60 = vld [vmem:[#allocation26_spill] sm:$0xff]  ;;  %v10877_v44 = vld [vmem:[#allocation27_spill] sm:$0xff]  ;;  %v7702_v15 = vpop.permute.xlu0 %1213 }
 0x201   : > { %5026 = vrot.lane.b32.xlu0 %v5025_v5, %s5220_s22  ;;  %v7689_v34 = vrot.slane %v7562_v6, 1  ;;  %v2349_v52 = vrot.slane %v7576_v37, 1  ;;  %v1867_v50 = vadd.f32 %v10875_v58, %v1728_v47  ;;  %v1597_v51 = vadd.f32 %v10876_v60, %v1464_v48  ;;  %10881 = vst [vmem:[#allocation81_spill] sm:$0xff] %v7702_v15  ;;  %v10889_v6 = vld [vmem:[#allocation201_spill] sm:$0xff] }
 0x202   : > { %v1727_v26 = vadd.f32 %v1671_v25, %v1594_v23  ;;  %v1326_v20 = vadd.f32 %v1270_v35, %v10877_v44  ;;  %v1998_v32 = vadd.f32 %v10878_v8, %v1865_v49  ;;  %v1463_v55 = vadd.f32 %v10879_v2, %v1324_v3  ;;  %v10882_v23 = vld [vmem:[#allocation199_spill] sm:$0xff]  ;;  %v7708_v35 = vld [vmem:[%s9958_s1 + $0x5] ss:$0 sm:$0xff]  ;;  %v10888_v2 = vld [vmem:[#allocation124_spill] sm:$0xff] }
 0x203   : > { %10874 = vst [vmem:[#allocation84_spill] sm:$0xff] %v7689_v34  ;;  %v1466_v10 = vadd.f32 %v10880_v29, %v1327_v9  ;;  %2432 = vrot.lane.b32.xlu1 %v7689_v34, %s5220_s22  ;;  %v1273_v5 = vmul.f32 %v7641_v0, %v7454_v38  ;;  %v2129_v47 = vadd.f32 %v2073_v13, %v1996_v45  ;;  %v7716_v9 = vpop.permute.xlu1 %1217  ;;  %v10885_v49 = vld [vmem:[#allocation7_spill] sm:$0xff] }
 0x204   : > { %v1997_v25 = vadd.f32 %v10882_v23, %v1864_v18  ;;  %v1674_v48 = vmul.f32 %v7708_v35, %v7414_v33  ;;  %v7714_v29 = vsel %vm2321_vm0, %v2349_v52, %v7689_v34  ;;  %10884 = vst [vmem:[#allocation85_spill] sm:$0xff] %v7716_v9  ;;  %v2072_v8 = vmul.f32 %v7064_v7, %v7367_v46  ;;  %v10886_v18 = vld [vmem:[#allocation123_spill] sm:$0xff]  ;;  %v10887_v52 = vld [vmem:[#allocation200_spill] sm:$0xff] }
 0x205   : > { %10883 = vst [vmem:[#allocation83_spill] sm:$0xff] %v7714_v29  ;;  %v2075_v13 = vmul.f32 %v7064_v7, %v7389_v24  ;;  %v2074_v45 = vmul.f32 %v7064_v7, %v7391_v16  ;;  %v1465_v3 = vadd.f32 %v10885_v49, %v1326_v20  ;;  %2430 = vrot.lane.b32.xlu0 %v7714_v29, %s5220_s22  ;;  %v10890_v24 = vld [vmem:[#allocation202_spill] sm:$0xff] }
 0x206   : > { %v1866_v58 = vadd.f32 %v10886_v18, %v1727_v26  ;;  %v2000_v60 = vadd.f32 %v10887_v52, %v1867_v50  ;;  %v1730_v44 = vadd.f32 %v1674_v48, %v1597_v51  ;;  %v1329_v23 = vadd.f32 %v1273_v5, %v10888_v2  ;;  %v10891_v51 = vld [vmem:[#allocation204_spill] sm:$0xff] }
 0x207   : > { %v2128_v34 = vadd.f32 %v2072_v8, %v1995_v11  ;;  %v2131_v46 = vadd.f32 %v2075_v13, %v1998_v32  ;;  %v1596_v37 = vadd.f32 %v10889_v6, %v1463_v55  ;;  %v1599_v57 = vadd.f32 %v10890_v24, %v1466_v10  ;;  %v10894_v32 = vld [vmem:[#allocation126_spill] sm:$0xff]  ;;  %v10896_v8 = vld [vmem:[#allocation129_spill] sm:$0xff] }
 0x208   : > { %v2130_v4 = vadd.f32 %v2074_v45, %v1997_v25  ;;  %v2077_v16 = vmul.f32 %v7064_v7, %v7414_v33  ;;  %v1673_v20 = vmul.f32 %v7708_v35, %v7416_v19  ;;  %v1272_v26 = vmul.f32 %v7641_v0, %v7444_v22  ;;  %v7747_v33 = vpop.permute.xlu0 %1221  ;;  %v10895_v25 = vld [vmem:[#allocation119_spill] sm:$0xff]  ;;  %v7752_v45 = vpop.permute.xlu1 %1225 }
 0x209   : > { %v1676_v50 = vmul.f32 %v7708_v35, %v7454_v38  ;;  %v1598_v11 = vadd.f32 %v10891_v51, %v1465_v3  ;;  %2436 = vrot.lane.b32.xlu0 %v7653_v1, %s5220_s22  ;;  %v2355_v55 = vrot.slane %v7612_v59, 1  ;;  %v7745_v6 = vrot.slane %v7610_v63, 1  ;;  %10893 = vst [vmem:[#allocation54_spill] sm:$0xff] %v7747_v33  ;;  %10897 = vst [vmem:[#allocation175_spill] sm:$0xff] %v7752_v45  ;;  %v10902_v51 = vld [vmem:[#allocation127_spill] sm:$0xff]  ;;  %v10969_v59 = vld [vmem:[#allocation150_spill] sm:$0xff] }
 0x20a   : > { %v1869_v10 = vadd.f32 %v10894_v32, %v1730_v44  ;;  %v2133_v5 = vadd.f32 %v2077_v16, %v2000_v60  ;;  %v1999_v48 = vadd.f32 %v10895_v25, %v1866_v58  ;;  %v1468_v13 = vadd.f32 %v10896_v8, %v1329_v23  ;;  %v10900_v60 = vld [vmem:[#allocation51_spill] sm:$0xff] }
 0x20b   : > { %10892 = vst [vmem:[#allocation86_spill] sm:$0xff] %v7745_v6  ;;  %v1729_v49 = vadd.f32 %v1673_v20, %v1596_v37  ;;  %v1732_v3 = vadd.f32 %v1676_v50, %v1599_v57  ;;  %v1675_v18 = vmul.f32 %v7708_v35, %v7444_v22  ;;  %v7758_v52 = vsel %vm2321_vm0, %v2355_v55, %v7745_v6  ;;  %v10903_v32 = vld [vmem:[#allocation203_spill] sm:$0xff] }
 0x20c   : > { %10898 = vst [vmem:[#allocation49_spill] sm:$0xff] %v7758_v52  ;;  %v7760_v2 = vmax.f32 %v2189_v12, 0.0  ;;  %v2192_v44 = vadd.f32 %v7110_v40, %v2129_v47  ;;  %v1328_v24 = vadd.f32 %v1272_v26, %v10900_v60  ;;  %2438 = vrot.lane.b32.xlu1 %v7758_v52, %s5220_s22  ;;  %v1275_v37 = vmul.f32 %v7641_v0, %v7502_v62  ;;  %v10901_v26 = vld [vmem:[#allocation28_spill] sm:$0xff]  ;;  %v7782_v25 = vpop.permute.xlu0 %1349  ;;  %v10967_v52 = vld [vmem:[#allocation59_spill] sm:$0xff] }
 0x20d   : > { %v2191_v57 = vadd.f32 %v7110_v40, %v2128_v34  ;;  %v2076_v58 = vmul.f32 %v7064_v7, %v7416_v19  ;;  %v1731_v23 = vadd.f32 %v1675_v18, %v1598_v11  ;;  %v1274_v12 = vmul.f32 %v7641_v0, %v7493_v61  ;;  %2440 = vrot.lane.b32.xlu0 %v7745_v6, %s5220_s22  ;;  %v10904_v19 = vld [vmem:[#allocation130_spill] sm:$0xff]  ;;  %v10906_v18 = vld [vmem:[#allocation131_spill] sm:$0xff] }
 0x20e   : > { %10899 = vst [vmem:[#allocation173_spill] sm:$0xff] %v7760_v2  ;;  %v2194_v47 = vadd.f32 %v7110_v40, %v2131_v46  ;;  %v2193_v16 = vadd.f32 %v7110_v40, %v2130_v4  ;;  %v2196_v20 = vadd.f32 %v7110_v40, %v2133_v5  ;;  %v1601_v50 = vadd.f32 %v10901_v26, %v1468_v13  ;;  %v10907_v46 = vld [vmem:[#allocation128_spill] sm:$0xff]  ;;  %v7790_v5 = vpop.permute.xlu1 %1353 }
 0x20f   : > { %v1868_v34 = vadd.f32 %v10902_v51, %v1729_v49  ;;  %v2132_v55 = vadd.f32 %v2076_v58, %v1999_v48  ;;  %v2002_v7 = vadd.f32 %v10903_v32, %v1869_v10  ;;  %v1871_v11 = vadd.f32 %v10904_v19, %v1732_v3  ;;  %v7797_v10 = vld [vmem:[%s9958_s1 + $0x8] ss:$0 sm:$0xff]  ;;  %v10909_v49 = vld [vmem:[#allocation132_spill] sm:$0xff]  ;;  %v10914_v19 = vld [vmem:[#allocation205_spill] sm:$0xff] }
 0x210   : > { %v7784_v8 = vmax.f32 %v2192_v44, 0.0  ;;  %v1467_v60 = vadd.f32 %v10906_v18, %v1328_v24  ;;  %v1331_v6 = vadd.f32 %v1275_v37, %v10907_v46  ;;  %v1678_v4 = vmul.f32 %v7708_v35, %v7502_v62  ;;  %v10910_v44 = vld [vmem:[#allocation29_spill] sm:$0xff]  ;;  %v10915_v46 = vld [vmem:[#allocation206_spill] sm:$0xff] }
 0x211   : > { %v7792_v13 = vmax.f32 %v2191_v57, 0.0  ;;  %v2079_v48 = vmul.f32 %v7797_v10, %v7454_v38  ;;  %v1870_v3 = vadd.f32 %v10909_v49, %v1731_v23  ;;  %v1330_v24 = vadd.f32 %v1274_v12, %v10910_v44  ;;  %v10916_v23 = vld [vmem:[#allocation136_spill] sm:$0xff] }
 0x212   : > { %10905 = vst [vmem:[#allocation87_spill] sm:$0xff] %v7784_v8  ;;  %v7803_v37 = vmax.f32 %v2194_v47, 0.0  ;;  %v7805_v58 = vmax.f32 %v2193_v16, 0.0  ;;  %v7807_v26 = vmax.f32 %v2196_v20, 0.0  ;;  %v1734_v57 = vadd.f32 %v1678_v4, %v1601_v50  ;;  %v10917_v47 = vld [vmem:[#allocation207_spill] sm:$0xff]  ;;  %v10918_v20 = vld [vmem:[#allocation208_spill] sm:$0xff] }
 0x213   : > { %10908 = vst [vmem:[#allocation90_spill] sm:$0xff] %v7792_v13  ;;  %v2195_v51 = vadd.f32 %v7110_v40, %v2132_v55  ;;  %v2135_v32 = vadd.f32 %v2079_v48, %v2002_v7  ;;  %v2001_v18 = vadd.f32 %v10914_v19, %v1868_v34  ;;  %v2004_v1 = vadd.f32 %v10915_v46, %v1871_v11  ;;  %v10919_v50 = vld [vmem:[#allocation138_spill] sm:$0xff]  ;;  %v7823_v55 = vpop.permute.xlu0 %1360  ;;  %v10921_v7 = vld [vmem:[#allocation137_spill] sm:$0xff] }
 0x214   : > { %10911 = vst [vmem:[#allocation176_spill] sm:$0xff] %v7803_v37  ;;  %10912 = vst [vmem:[#allocation65_spill] sm:$0xff] %v7805_v58  ;;  %v2078_v38 = vmul.f32 %v7797_v10, %v7444_v22  ;;  %v1470_v49 = vadd.f32 %v10916_v23, %v1331_v6  ;;  %v2081_v12 = vmul.f32 %v7797_v10, %v7502_v62  ;;  %v2359_v34 = vrot.slane %v7684_v31, 1  ;;  %v10925_v23 = vld [vmem:[#allocation50_spill] sm:$0xff]  ;;  %v10944_v31 = vld [vmem:[#allocation212_spill] sm:$0xff] }
 0x215   : > { %10913 = vst [vmem:[#allocation91_spill] sm:$0xff] %v7807_v26  ;;  %v1600_v16 = vadd.f32 %v10917_v47, %v1467_v60  ;;  %v2003_v44 = vadd.f32 %v10918_v20, %v1870_v3  ;;  %v1469_v4 = vadd.f32 %v10919_v50, %v1330_v24  ;;  %v1277_v40 = vmul.f32 %v7641_v0, %v7546_v36  ;;  %v7830_v60 = vpop.permute.xlu1 %1364  ;;  %v10926_v50 = vld [vmem:[#allocation135_spill] sm:$0xff] }
 0x216   : > { %10920 = vst [vmem:[#allocation92_spill] sm:$0xff] %v7823_v55  ;;  %v1873_v22 = vadd.f32 %v10921_v7, %v1734_v57  ;;  %v1677_v6 = vmul.f32 %v7708_v35, %v7493_v61  ;;  %v2358_v62 = vrot.slane %v7760_v2, 1  ;;  %v2364_v11 = vrot.slane %v7805_v58, 1  ;;  %10922 = vst [vmem:[#allocation94_spill] sm:$0xff] %v7830_v60  ;;  %2444 = vrot.lane.b32.xlu0 %v2359_v34, %s5220_s22 }
 0x217   : > { %v7832_v48 = vmax.f32 %v2195_v51, 0.0  ;;  %v2134_v3 = vadd.f32 %v2078_v38, %v2001_v18  ;;  %v2137_v24 = vadd.f32 %v2081_v12, %v2004_v1  ;;  %v7836_v19 = vrot.slane %v7803_v37, 1  ;;  %v10927_v51 = vld [vmem:[#allocation210_spill] sm:$0xff]  ;;  %v10930_v12 = vld [vmem:[#allocation209_spill] sm:$0xff] }
 0x218   : > { %v1733_v46 = vadd.f32 %v1677_v6, %v1600_v16  ;;  %v2080_v57 = vmul.f32 %v7797_v10, %v7493_v61  ;;  %v1603_v47 = vadd.f32 %v10925_v23, %v1470_v49  ;;  %v1276_v20 = vmul.f32 %v7641_v0, %v7536_v53  ;;  %v7853_v38 = vld [vmem:[%s9959_s2] ss:$0 sm:$0xff]  ;;  %v10931_v23 = vld [vmem:[#allocation139_spill] sm:$0xff] }
 0x219   : > { %10923 = vst [vmem:[#allocation96_spill] sm:$0xff] %v7832_v48  ;;  %10924 = vst [vmem:[#allocation93_spill] sm:$0xff] %v7836_v19  ;;  %v1333_v7 = vadd.f32 %v1277_v40, %v10926_v50  ;;  %v1602_v55 = vadd.f32 %v10927_v51, %v1469_v4  ;;  %v2360_v1 = vsel %vm2321_vm0, %v2358_v62, %v2359_v34  ;;  %v2361_v60 = vrot.slane %v7792_v13, 1 }
 0x21a   : > { %v7848_v18 = vsel %vm2321_vm0, %v2364_v11, %v7836_v19  ;;  %10929 = vst [vmem:[#allocation16_spill] sm:$0xff] %v7853_v38  ;;  %v2198_v61 = vadd.f32 %v7853_v38, %v2135_v32  ;;  %v2136_v49 = vadd.f32 %v2080_v57, %v2003_v44  ;;  %v2006_v16 = vadd.f32 %v10930_v12, %v1873_v22  ;;  %v7864_v11 = vpop.permute.xlu0 %1485  ;;  %v10932_v44 = vld [vmem:[#allocation30_spill] sm:$0xff]  ;;  %v10934_v57 = vld [vmem:[#allocation8_spill] sm:$0xff] }
 0x21b   : > { %10928 = vst [vmem:[#allocation177_spill] sm:$0xff] %v7848_v18  ;;  %v5030_v40 = vpack.i.bf16 %v7848_v18, %v2360_v1  ;;  %v2197_v4 = vadd.f32 %v7853_v38, %v2134_v3  ;;  %v2200_v34 = vadd.f32 %v7853_v38, %v2137_v24  ;;  %v1680_v6 = vmul.f32 %v7708_v35, %v7546_v36  ;;  %v7874_v24 = vpop.permute.xlu1 %1489  ;;  %v10943_v18 = vld [vmem:[#allocation143_spill] sm:$0xff] }
 0x21c   : > { %v1679_v62 = vmul.f32 %v7708_v35, %v7536_v53  ;;  %v1872_v50 = vadd.f32 %v10931_v23, %v1733_v46  ;;  %v2083_v32 = vmul.f32 %v7797_v10, %v7546_v36  ;;  %v1332_v22 = vadd.f32 %v1276_v20, %v10932_v44 }
 0x21d   : > { %5031 = vrot.lane.b32.xlu1 %v5030_v40, %s5220_s22  ;;  %v7872_v3 = vrot.slane %v7784_v8, 1  ;;  %v1472_v51 = vadd.f32 %v10934_v57, %v1333_v7  ;;  %v1736_v1 = vadd.f32 %v1680_v6, %v1603_v47  ;;  %v2199_v46 = vadd.f32 %v7853_v38, %v2136_v49  ;;  %v10939_v49 = vld [vmem:[#allocation211_spill] sm:$0xff]  ;;  %v10940_v6 = vld [vmem:[#allocation142_spill] sm:$0xff]  ;;  %v10955_v8 = vld [vmem:[#allocation140_spill] sm:$0xff] }
 0x21e   : > { %v1735_v12 = vadd.f32 %v1679_v62, %v1602_v55  ;;  %v2139_v23 = vadd.f32 %v2083_v32, %v2006_v16  ;;  %v1279_v36 = vmul.f32 %v7641_v0, %v7583_v43  ;;  %v1281_v20 = vmul.f32 %v7641_v0, %v7626_v30 }
 0x21f   : > { %10933 = vst [vmem:[#allocation95_spill] sm:$0xff] %v7872_v3  ;;  %2448 = vrot.lane.b32.xlu0 %v7872_v3, %s5220_s22  ;;  %v7885_v40 = vmax.f32 %v2198_v61, 0.0  ;;  %v7887_v44 = vmax.f32 %v2197_v4, 0.0  ;;  %v1278_v55 = vmul.f32 %v7641_v0, %v7574_v56  ;;  %v7893_v47 = vsel %vm2321_vm0, %v2361_v60, %v7872_v3  ;;  %v10941_v61 = vld [vmem:[#allocation53_spill] sm:$0xff] }
 0x220   : > { %10937 = vst [vmem:[#allocation100_spill] sm:$0xff] %v7893_v47  ;;  %v7895_v7 = vmax.f32 %v2200_v34, 0.0  ;;  %v2005_v16 = vadd.f32 %v10939_v49, %v1872_v50  ;;  %v1471_v62 = vadd.f32 %v10940_v6, %v1332_v22  ;;  %v1337_v32 = vadd.f32 %v1281_v20, %v10941_v61  ;;  %v10942_v4 = vld [vmem:[#allocation141_spill] sm:$0xff]  ;;  %v7907_v34 = vpop.permute.xlu0 %1493  ;;  %v10947_v49 = vld [vmem:[#allocation52_spill] sm:$0xff]  ;;  %v7915_v6 = vpop.permute.xlu1 %1497 }
 0x221   : > { %10935 = vst [vmem:[#allocation178_spill] sm:$0xff] %v7885_v40  ;;  %10936 = vst [vmem:[#allocation98_spill] sm:$0xff] %v7887_v44  ;;  %2446 = vrot.lane.b32.xlu1 %v7893_v47, %s5220_s22  ;;  %v1875_v57 = vadd.f32 %v10942_v4, %v1736_v1  ;;  %v1874_v2 = vadd.f32 %v10943_v18, %v1735_v12  ;;  %v1605_v13 = vadd.f32 %v10944_v31, %v1472_v51  ;;  %v10949_v31 = vld [vmem:[#allocation55_spill] sm:$0xff]  ;;  %v10951_v61 = vld [vmem:[#allocation144_spill] sm:$0xff] }
 0x222   : > { %10938 = vst [vmem:[#allocation97_spill] sm:$0xff] %v7895_v7  ;;  %v1280_v60 = vmul.f32 %v7641_v0, %v7620_v54  ;;  %10945 = vst [vmem:[#allocation179_spill] sm:$0xff] %v7907_v34  ;;  %v7909_v3 = vmax.f32 %v2199_v46, 0.0  ;;  %v2202_v50 = vadd.f32 %v7853_v38, %v2139_v23  ;;  %v2082_v22 = vmul.f32 %v7797_v10, %v7536_v53  ;;  %v10950_v1 = vld [vmem:[#allocation151_spill] sm:$0xff]  ;;  %v10952_v47 = vld [vmem:[#allocation214_spill] sm:$0xff] }
 0x223   : > { %v1335_v20 = vadd.f32 %v1279_v36, %v10947_v49  ;;  %10948 = vst [vmem:[#allocation99_spill] sm:$0xff] %v7915_v6  ;;  %v1682_v18 = vmul.f32 %v7708_v35, %v7583_v43  ;;  %v1334_v51 = vadd.f32 %v1278_v55, %v10949_v31  ;;  %v1476_v12 = vadd.f32 %v10950_v1, %v1337_v32  ;;  %v10954_v36 = vld [vmem:[#allocation213_spill] sm:$0xff]  ;;  %v10956_v31 = vld [vmem:[#allocation152_spill] sm:$0xff] }
 0x224   : > { %10946 = vst [vmem:[#allocation17_spill] sm:$0xff] %v7909_v3  ;;  %v1336_v4 = vadd.f32 %v1280_v60, %v10951_v61  ;;  %v2138_v46 = vadd.f32 %v2082_v22, %v2005_v16  ;;  %v1604_v34 = vadd.f32 %v10952_v47, %v1471_v62  ;;  %v2367_v53 = vrot.slane %v7832_v48, 1  ;;  %v10957_v1 = vld [vmem:[#allocation145_spill] sm:$0xff] }
 0x225   : > { %2452 = vrot.lane.b32.xlu1 %v7836_v19, %s5220_s22  ;;  %v7927_v23 = vrot.slane %v7807_v26, 1  ;;  %v2008_v49 = vadd.f32 %v10954_v36, %v1875_v57  ;;  %v1738_v6 = vadd.f32 %v1682_v18, %v1605_v13  ;;  %v2007_v55 = vadd.f32 %v10955_v8, %v1874_v2  ;;  %v10959_v13 = vld [vmem:[#allocation148_spill] sm:$0xff]  ;;  %v7949_v18 = vpop.permute.xlu0 %1618 }
 0x226   : > { %v1475_v32 = vadd.f32 %v10956_v31, %v1336_v4  ;;  %v1474_v60 = vadd.f32 %v10957_v1, %v1335_v20  ;;  %v1681_v47 = vmul.f32 %v7708_v35, %v7574_v56  ;;  %v1283_v62 = vmul.f32 %v7641_v0, %v7671_v41  ;;  %v10960_v2 = vld [vmem:[#allocation32_spill] sm:$0xff] }
 0x227   : > { %10953 = vst [vmem:[#allocation183_spill] sm:$0xff] %v7927_v23  ;;  %v7937_v16 = vsel %vm2321_vm0, %v2367_v53, %v7927_v23  ;;  %v2085_v57 = vmul.f32 %v7797_v10, %v7583_v43  ;;  %v1473_v22 = vadd.f32 %v10959_v13, %v1334_v51  ;;  %v1609_v8 = vadd.f32 %v10960_v2, %v1476_v12  ;;  %v10961_v53 = vld [vmem:[#allocation10_spill] sm:$0xff]  ;;  %v10962_v31 = vld [vmem:[#allocation56_spill] sm:$0xff]  ;;  %v7957_v51 = vpop.permute.xlu1 %1622 }
 0x228   : > { %10958 = vst [vmem:[#allocation101_spill] sm:$0xff] %v7937_v16  ;;  %2454 = vrot.lane.b32.xlu0 %v7937_v16, %s5220_s22  ;;  %v1686_v20 = vmul.f32 %v7708_v35, %v7671_v41  ;;  %v1737_v61 = vadd.f32 %v1681_v47, %v1604_v34  ;;  %v2084_v4 = vmul.f32 %v7797_v10, %v7574_v56  ;;  %v10963_v47 = vld [vmem:[#allocation4_spill] sm:$0xff]  ;;  %v10966_v16 = vld [vmem:[#allocation215_spill] sm:$0xff] }
 0x229   : > { %v1339_v36 = vadd.f32 %v1283_v62, %v10961_v53  ;;  %v1608_v43 = vadd.f32 %v10962_v31, %v1475_v32  ;;  %2456 = vrot.lane.b32.xlu1 %v7927_v23, %s5220_s22  ;;  %v2201_v12 = vadd.f32 %v7853_v38, %v2138_v46  ;;  %v2141_v1 = vadd.f32 %v2085_v57, %v2008_v49  ;;  %v10964_v62 = vld [vmem:[#allocation31_spill] sm:$0xff]  ;;  %v10965_v32 = vld [vmem:[#allocation156_spill] sm:$0xff]  ;;  %v10968_v49 = vld [vmem:[#allocation149_spill] sm:$0xff] }
 0x22a   : > { %v1282_v13 = vmul.f32 %v7641_v0, %v7658_v39  ;;  %v1685_v34 = vmul.f32 %v7708_v35, %v7658_v39  ;;  %v1877_v56 = vadd.f32 %v10963_v47, %v1738_v6  ;;  %v2140_v2 = vadd.f32 %v2084_v4, %v2007_v55 }
 0x22b   : > { %v1607_v53 = vadd.f32 %v10964_v62, %v1474_v60  ;;  %v1478_v31 = vadd.f32 %v10965_v32, %v1339_v36  ;;  %v1606_v23 = vadd.f32 %v10966_v16, %v1473_v22  ;;  %v1742_v19 = vadd.f32 %v1686_v20, %v1609_v8  ;;  %v10971_v16 = vld [vmem:[#allocation158_spill] sm:$0xff]  ;;  %v10972_v8 = vld [vmem:[#allocation159_spill] sm:$0xff]  ;;  %v7981_v20 = vpop.permute.xlu0 %1626  ;;  %v10975_v36 = vld [vmem:[#allocation57_spill] sm:$0xff] }
 0x22c   : > { %v1338_v29 = vadd.f32 %v1282_v13, %v10967_v52  ;;  %v1741_v46 = vadd.f32 %v1685_v34, %v1608_v43  ;;  %v1876_v57 = vadd.f32 %v10968_v49, %v1737_v61  ;;  %v1684_v63 = vmul.f32 %v7708_v35, %v7626_v30  ;;  %10973 = vst [vmem:[#allocation181_spill] sm:$0xff] %v7981_v20  ;;  %v7987_v13 = vpop.permute.xlu1 %1630  ;;  %v10977_v34 = vld [vmem:[#allocation157_spill] sm:$0xff]  ;;  %v10978_v62 = vld [vmem:[#allocation39_spill] sm:$0xff] }
 0x22d   : > { %v1611_v26 = vadd.f32 %v10969_v59, %v1478_v31  ;;  %v1688_v6 = vmul.f32 %v7708_v35, %v7716_v9  ;;  %v7975_v55 = vmax.f32 %v2202_v50, 0.0  ;;  %v1683_v60 = vmul.f32 %v7708_v35, %v7620_v54  ;;  %10976 = vst [vmem:[#allocation23_spill] sm:$0xff] %v7987_v13  ;;  %v10994_v20 = vld [vmem:[#allocation11_spill] sm:$0xff] }
 0x22e   : > { %v1477_v22 = vadd.f32 %v10971_v16, %v1338_v29  ;;  %v1880_v52 = vadd.f32 %v10972_v8, %v1741_v46  ;;  %v7983_v61 = vmax.f32 %v2201_v12, 0.0  ;;  %v2204_v4 = vadd.f32 %v7853_v38, %v2141_v1  ;;  %v10979_v46 = vld [vmem:[#allocation216_spill] sm:$0xff]  ;;  %v10985_v8 = vld [vmem:[#allocation33_spill] sm:$0xff] }
 0x22f   : > { %10970 = vst [vmem:[#allocation189_spill] sm:$0xff] %v7975_v55  ;;  %v2010_v59 = vadd.f32 %v10975_v36, %v1877_v56  ;;  %v1740_v43 = vadd.f32 %v1684_v63, %v1607_v53  ;;  %v1739_v50 = vadd.f32 %v1683_v60, %v1606_v23  ;;  %v1881_v47 = vadd.f32 %v10977_v34, %v1742_v19  ;;  %v10980_v56 = vld [vmem:[#allocation58_spill] sm:$0xff]  ;;  %v8017_v34 = vpop.permute.xlu0 %1754 }
 0x230   : > { %10974 = vst [vmem:[#allocation104_spill] sm:$0xff] %v7983_v61  ;;  %v1610_v32 = vadd.f32 %v10978_v62, %v1477_v22  ;;  %v1687_v29 = vmul.f32 %v7708_v35, %v7702_v15  ;;  %v2203_v31 = vadd.f32 %v7853_v38, %v2140_v2  ;;  %v2087_v12 = vmul.f32 %v7797_v10, %v7626_v30 }
 0x231   : > { %v2009_v1 = vadd.f32 %v10979_v46, %v1876_v57  ;;  %v1744_v49 = vadd.f32 %v1688_v6, %v1611_v26  ;;  %v2013_v63 = vadd.f32 %v10980_v56, %v1880_v52  ;;  %v2090_v23 = vmul.f32 %v7797_v10, %v7702_v15  ;;  %v10983_v26 = vld [vmem:[#allocation12_spill] sm:$0xff]  ;;  %v10984_v6 = vld [vmem:[#allocation153_spill] sm:$0xff] }
 0x232   : > { %v8001_v19 = vrot.slane %v7885_v40, 1  ;;  %v2370_v53 = vrot.slane %v7887_v44, 1  ;;  %v2086_v60 = vmul.f32 %v7797_v10, %v7620_v54  ;;  %v1743_v2 = vadd.f32 %v1687_v29, %v1610_v32  ;;  %v10988_v29 = vld [vmem:[#allocation180_spill] sm:$0xff] }
 0x233   : > { %v2376_v16 = vrot.slane %v7983_v61, 1  ;;  %v8008_v30 = vrot.slane %v7975_v55, 1  ;;  %v1879_v57 = vadd.f32 %v10983_v26, %v1740_v43  ;;  %v1878_v22 = vadd.f32 %v10984_v6, %v1739_v50  ;;  %v8027_v50 = vpop.permute.xlu1 %1758  ;;  %v10992_v26 = vld [vmem:[#allocation38_spill] sm:$0xff] }
 0x234   : > { %10981 = vst [vmem:[#allocation182_spill] sm:$0xff] %v8001_v19  ;;  %v2014_v52 = vadd.f32 %v10985_v8, %v1881_v47  ;;  %v2091_v36 = vmul.f32 %v7797_v10, %v7716_v9  ;;  %2460 = vrot.lane.b32.xlu1 %v8001_v19, %s5220_s22  ;;  %v2143_v54 = vadd.f32 %v2087_v12, %v2010_v59  ;;  %v8032_v47 = vld [vmem:[%s9958_s1 + $0x7] ss:$0 sm:$0xff]  ;;  %v10989_v59 = vld [vmem:[#allocation160_spill] sm:$0xff]  ;;  %v8045_v8 = vrot.slane %v7895_v7, 1 }
 0x235   : > { %10982 = vst [vmem:[#allocation102_spill] sm:$0xff] %v8008_v30  ;;  %v2142_v62 = vadd.f32 %v2086_v60, %v2009_v1  ;;  %v8021_v32 = vsel %vm2321_vm0, %v2370_v53, %v8001_v19  ;;  %v8025_v43 = vsel %vm2321_vm0, %v2376_v16, %v8008_v30  ;;  %v1955_v46 = vmul.f32 %v8032_v47, %v10988_v29  ;;  %v10990_v53 = vld [vmem:[#allocation146_spill] sm:$0xff] }
 0x236   : > { %10986 = vst [vmem:[#allocation184_spill] sm:$0xff] %v8021_v32  ;;  %10987 = vst [vmem:[#allocation103_spill] sm:$0xff] %v8025_v43  ;;  %v1883_v12 = vadd.f32 %v10989_v59, %v1744_v49  ;;  %v2146_v1 = vadd.f32 %v2090_v23, %v2013_v63  ;;  %v5035_v56 = vpack.i.bf16 %v8025_v43, %v8021_v32  ;;  %v8041_v16 = vmax.f32 %v2203_v31, 0.0  ;;  %v10995_v63 = vld [vmem:[#allocation194_spill] sm:$0xff]  ;;  %v11013_v43 = vld [vmem:[#allocation89_spill] sm:$0xff] }
 0x237   : > { %v1960_v60 = vmul.f32 %v8032_v47, %v10990_v53  ;;  %v1882_v6 = vadd.f32 %v10992_v26, %v1743_v2  ;;  %10993 = vst [vmem:[#allocation190_spill] sm:$0xff] %v8045_v8  ;;  %v2012_v13 = vadd.f32 %v10994_v20, %v1879_v57  ;;  %v2011_v15 = vadd.f32 %v1955_v46, %v1878_v22  ;;  %v11012_v53 = vld [vmem:[#allocation88_spill] sm:$0xff]  ;;  %v11021_v19 = vld [vmem:[#allocation22_spill] sm:$0xff] }
 0x238   : > { %10991 = vst [vmem:[#allocation191_spill] sm:$0xff] %v8041_v16  ;;  %v2147_v29 = vadd.f32 %v2091_v36, %v2014_v52  ;;  %5036 = vrot.lane.b32.xlu0 %v5035_v56, %s5220_s22  ;;  %v2373_v49 = vrot.slane %v7909_v3, 1  ;;  %v1959_v23 = vmul.f32 %v8032_v47, %v10995_v63  ;;  %v8052_v59 = vmax.f32 %v2204_v4, 0.0  ;;  %2464 = vrot.lane.b32.xlu1 %v8045_v8, %s5220_s22  ;;  %v8063_v36 = vpop.permute.xlu0 %1765 }
 0x239   : > { %v2206_v31 = vadd.f32 %v7853_v38, %v2143_v54  ;;  %v2205_v2 = vadd.f32 %v7853_v38, %v2142_v62  ;;  %v2089_v20 = vmul.f32 %v7797_v10, %v7671_v41  ;;  %v2088_v57 = vmul.f32 %v7797_v10, %v7658_v39  ;;  %10997 = vst [vmem:[#allocation185_spill] sm:$0xff] %v8063_v36  ;;  %v8073_v41 = vpop.permute.xlu1 %1769 }
 0x23a   : > { %10996 = vst [vmem:[#allocation192_spill] sm:$0xff] %v8052_v59  ;;  %v2209_v22 = vadd.f32 %v7853_v38, %v2146_v1  ;;  %v2016_v52 = vadd.f32 %v1960_v60, %v1883_v12  ;;  %v2093_v4 = vmul.f32 %v7797_v10, %v7752_v45  ;;  %v2015_v54 = vadd.f32 %v1959_v23, %v1882_v6 }
 0x23b   : > { %v2092_v62 = vmul.f32 %v7797_v10, %v7747_v33  ;;  %v8071_v46 = vsel %vm2321_vm0, %v2373_v49, %v8045_v8  ;;  %10999 = vst [vmem:[#allocation161_spill] sm:$0xff] %v8073_v41  ;;  %v2145_v56 = vadd.f32 %v2089_v20, %v2012_v13  ;;  %v2144_v39 = vadd.f32 %v2088_v57, %v2011_v15  ;;  %v11006_v57 = vld [vmem:[#allocation76_spill] sm:$0xff] }
 0x23c   : > { %10998 = vst [vmem:[#allocation186_spill] sm:$0xff] %v8071_v46  ;;  %v2210_v1 = vadd.f32 %v7853_v38, %v2147_v29  ;;  %2462 = vrot.lane.b32.xlu0 %v8071_v46, %s5220_s22  ;;  %v2379_v12 = vrot.slane %v8041_v16, 1  ;;  %v8080_v60 = vrot.slane %v8052_v59, 1  ;;  %v8082_v26 = vmax.f32 %v2206_v31, 0.0  ;;  %v8100_v31 = vpop.permute.xlu0 %1890 }
 0x23d   : > { %v8084_v6 = vmax.f32 %v2205_v2, 0.0  ;;  %v8086_v49 = vmax.f32 %v2209_v22, 0.0  ;;  %v2149_v23 = vadd.f32 %v2093_v4, %v2016_v52  ;;  %v2148_v36 = vadd.f32 %v2092_v62, %v2015_v54  ;;  %v8105_v2 = vld [vmem:[%s9958_s1 + $0x1] ss:$0 sm:$0xff]  ;;  %v8109_v52 = vpop.permute.xlu1 %1894  ;;  %v8114_v4 = vld [vmem:[%s9958_s1] ss:$0 sm:$0xff] }
 0x23e   : > { %11000 = vst [vmem:[#allocation106_spill] sm:$0xff] %v8080_v60  ;;  %11001 = vst [vmem:[#allocation133_spill] sm:$0xff] %v8082_v26  ;;  %v8090_v15 = vsel %vm2321_vm0, %v2379_v12, %v8080_v60  ;;  %v2208_v13 = vadd.f32 %v7853_v38, %v2145_v56  ;;  %v2207_v29 = vadd.f32 %v7853_v38, %v2144_v39  ;;  %v8094_v20 = vmax.f32 %v2210_v1, 0.0  ;;  %v11007_v54 = vld [vmem:[#allocation19_spill] sm:$0xff] }
 0x23f   : > { %11002 = vst [vmem:[#allocation162_spill] sm:$0xff] %v8084_v6  ;;  %11003 = vst [vmem:[#allocation134_spill] sm:$0xff] %v8086_v49  ;;  %2470 = vrot.lane.b32.xlu1 %v8090_v15, %s5220_s22  ;;  %v916_v22 = vmul.f32 %v8105_v2, %v11006_v57  ;;  %v575_v62 = vmul.f32 %v8114_v4, %v11007_v54  ;;  %v8119_v56 = vrot.slane %v8082_v26, 1  ;;  %v2382_v39 = vrot.slane %v8084_v6, 1 }
 0x240   : > { %11004 = vst [vmem:[#allocation18_spill] sm:$0xff] %v8090_v15  ;;  %11005 = vst [vmem:[#allocation108_spill] sm:$0xff] %v8094_v20  ;;  %2468 = vrot.lane.b32.xlu0 %v8008_v30, %s5220_s22  ;;  %v1257_v1 = vmul.f32 %v7641_v0, %v7250_v28  ;;  %v2212_v12 = vadd.f32 %v7853_v38, %v2149_v23  ;;  %v2211_v57 = vadd.f32 %v7853_v38, %v2148_v36  ;;  %v11020_v15 = vld [vmem:[#allocation21_spill] sm:$0xff] }
 0x241   : > { %11008 = vst [vmem:[#allocation24_spill] sm:$0xff] %v8119_v56  ;;  %v2388_v41 = vrot.slane %v8086_v49, 1  ;;  %v8127_v33 = vmax.f32 %v2208_v13, 0.0  ;;  %v8129_v45 = vmax.f32 %v2207_v29, 0.0  ;;  %v8134_v54 = vrot.slane %v8094_v20, 1  ;;  %v8148_v29 = vpop.permute.xlu0 %1898  ;;  %v8156_v30 = vpop.permute.xlu1 %1902 }
 0x242   : > { %v972_v63 = vadd.f32 %v916_v22, %v575_v62  ;;  %v918_v28 = vmul.f32 %v8105_v2, %v11012_v53  ;;  %v917_v23 = vmul.f32 %v8105_v2, %v11013_v43  ;;  %v8142_v36 = vsel %vm2321_vm0, %v2382_v39, %v8119_v56  ;;  %11016 = vst [vmem:[#allocation113_spill] sm:$0xff] %v8148_v29 }
 0x243   : > { %11009 = vst [vmem:[#allocation107_spill] sm:$0xff] %v8127_v33  ;;  %11010 = vst [vmem:[#allocation109_spill] sm:$0xff] %v8129_v45  ;;  %v8146_v13 = vsel %vm2321_vm0, %v2388_v41, %v8134_v54  ;;  %v8150_v9 = vmax.f32 %v2212_v12, 0.0  ;;  %v8152_v22 = vmax.f32 %v2211_v57, 0.0  ;;  %v577_v39 = vmul.f32 %v8114_v4, %v11020_v15 }
 0x244   : > { %2472 = vrot.lane.b32.xlu0 %v8080_v60, %s5220_s22  ;;  %11011 = vst [vmem:[#allocation147_spill] sm:$0xff] %v8134_v54  ;;  %11014 = vst [vmem:[#allocation111_spill] sm:$0xff] %v8142_v36  ;;  %v1313_v60 = vadd.f32 %v1257_v1, %v972_v63  ;;  %v5040_v62 = vpack.i.bf16 %v8146_v13, %v8142_v36  ;;  %v576_v46 = vmul.f32 %v8114_v4, %v11021_v19  ;;  %v8171_v1 = vld [vmem:[%s9958_s1 + $0x3] ss:$0 sm:$0xff] }
 0x245   : > { %11015 = vst [vmem:[#allocation105_spill] sm:$0xff] %v8146_v13  ;;  %11017 = vst [vmem:[#allocation5_spill] sm:$0xff] %v8150_v9  ;;  %v8165_v63 = vrot.slane %v8127_v33, 1  ;;  %v2385_v41 = vrot.slane %v8129_v45, 1  ;;  %v1396_v12 = vmul.f32 %v8171_v1, %v11020_v15  ;;  %v1259_v57 = vmul.f32 %v7641_v0, %v10826_v21  ;;  %v8189_v15 = vld [vmem:[%s9958_s1 + $0x4] ss:$0 sm:$0xff] }
 0x246   : > { %11018 = vst [vmem:[#allocation193_spill] sm:$0xff] %v8152_v22  ;;  %11019 = vst [vmem:[#allocation6_spill] sm:$0xff] %v8156_v30  ;;  %v1258_v13 = vmul.f32 %v7641_v0, %v10829_v14  ;;  %5041 = vrot.lane.b32.xlu1 %v5040_v62, %s5220_s22  ;;  %v973_v29 = vadd.f32 %v917_v23, %v576_v46  ;;  %v1398_v36 = vmul.f32 %v8171_v1, %v7790_v5  ;;  %v11029_v33 = vld [vmem:[#allocation61_spill] sm:$0xff] }
 0x247   : > { %11022 = vst [vmem:[#allocation2_spill] sm:$0xff] %v8165_v63  ;;  %v1452_v30 = vadd.f32 %v1396_v12, %v1313_v60  ;;  %v2391_v8 = vrot.slane %v8152_v22, 1  ;;  %v8184_v32 = vrot.slane %v8150_v9, 1  ;;  %v1529_v20 = vmul.f32 %v8189_v15, %v11012_v53  ;;  %v2028_v12 = vpop.permute.xlu1 %2027 }
 0x248   : > { %2476 = vrot.lane.b32.xlu0 %v8119_v56, %s5220_s22  ;;  %v974_v56 = vadd.f32 %v918_v28, %v577_v39  ;;  %v1397_v46 = vmul.f32 %v8171_v1, %v7782_v25  ;;  %v8199_v60 = vsel %vm2321_vm0, %v2385_v41, %v8165_v63  ;;  %v2024_v28 = vpop.permute.xlu0 %2023  ;;  %v1314_v62 = vadd.f32 %v1258_v13, %v973_v29  ;;  %v11026_v29 = vld [vmem:[#allocation62_spill] sm:$0xff] }
 0x249   : > { %11023 = vst [vmem:[#allocation195_spill] sm:$0xff] %v8184_v32  ;;  %11024 = vst [vmem:[#allocation112_spill] sm:$0xff] %v8199_v60  ;;  %v1531_v39 = vmul.f32 %v8189_v15, %v7874_v24  ;;  %v2539_v53 = vrot.slane %v7188_v17, 2  ;;  %v1530_v9 = vmul.f32 %v8189_v15, %v7864_v11  ;;  %v2540_v22 = vrot.slane %v7164_v27, 2 }
 0x24a   : > { %v1315_v23 = vadd.f32 %v1259_v57, %v974_v56  ;;  %2478 = vrot.lane.b32.xlu1 %v8199_v60, %s5220_s22  ;;  %v2545_v41 = vrot.slane %v7297_v42, 2  ;;  %v8212_v13 = vsel %vm2321_vm0, %v2391_v8, %v8184_v32  ;;  %v8215_v57 = vrot.slane %v11026_v29, 2 }
 0x24b   : > { %11025 = vst [vmem:[#allocation110_spill] sm:$0xff] %v8212_v13  ;;  %v1662_v60 = vmul.f32 %v7708_v35, %v10826_v21  ;;  %v1453_v17 = vadd.f32 %v1397_v46, %v1314_v62  ;;  %v1664_v49 = vmul.f32 %v7708_v35, %v7957_v51  ;;  %v1663_v27 = vmul.f32 %v7708_v35, %v7949_v18 }
 0x24c   : > { %2480 = vrot.lane.b32.xlu0 %v8165_v63, %s5220_s22  ;;  %v1585_v63 = vadd.f32 %v1529_v20, %v1452_v30  ;;  %v1454_v56 = vadd.f32 %v1398_v36, %v1315_v23  ;;  %v8228_v30 = vld [vmem:[%s9958_s1 + $0x6] ss:$0 sm:$0xff]  ;;  %v2541_v21 = vsel %vm2538_vm1, %v2539_v53, %v2540_v22  ;;  %v8237_v36 = vsel %vm2538_vm1, %v2545_v41, %v8215_v57  ;;  %v11028_v53 = vld [vmem:[#allocation3_spill] sm:$0xff] }
 0x24d   : > { %v1801_v8 = vmul.f32 %v8228_v30, %v7790_v5  ;;  %v1586_v46 = vadd.f32 %v1530_v9, %v1453_v17  ;;  %v5045_v23 = vpack.i.bf16 %v8237_v36, %v2541_v21  ;;  %v1803_v62 = vmul.f32 %v8228_v30, %v8027_v50  ;;  %v8244_v5 = vpop.permute.xlu0 %2031  ;;  %v8252_v17 = vpop.permute.xlu1 %2035 }
 0x24e   : > { %v1587_v20 = vadd.f32 %v1531_v39, %v1454_v56  ;;  %2484 = vrot.lane.b32.xlu1 %v8134_v54, %s5220_s22  ;;  %11027 = vst [vmem:[#allocation117_spill] sm:$0xff] %v8244_v5  ;;  %v1718_v39 = vadd.f32 %v1662_v60, %v1585_v63  ;;  %v1934_v56 = vmul.f32 %v8032_v47, %v7874_v24  ;;  %v2542_v54 = vrot.slane %v11028_v53, 2 }
 0x24f   : > { %v8250_v41 = vrot.slane %v11029_v33, 2  ;;  %11030 = vst [vmem:[#allocation25_spill] sm:$0xff] %v8252_v17  ;;  %v1719_v21 = vadd.f32 %v1663_v27, %v1586_v46  ;;  %v1935_v50 = vmul.f32 %v8032_v47, %v8100_v31  ;;  %v2067_v24 = vmul.f32 %v7797_v10, %v7957_v51 }
 0x250   : > { %2486 = vrot.lane.b32.xlu0 %v8212_v13, %s5220_s22  ;;  %v1802_v13 = vmul.f32 %v8228_v30, %v8017_v34  ;;  %v1720_v9 = vadd.f32 %v1664_v49, %v1587_v20  ;;  %v1936_v34 = vmul.f32 %v8032_v47, %v8109_v52  ;;  %v1857_v63 = vadd.f32 %v1801_v8, %v1718_v39 }
 0x251   : > { %v8265_v27 = vsel %vm2538_vm1, %v2542_v54, %v8250_v41  ;;  %v2069_v31 = vmul.f32 %v7797_v10, %v2028_v12  ;;  %v2068_v8 = vmul.f32 %v7797_v10, %v2024_v28  ;;  %v8271_v51 = vpop.permute.xlu0 %5016  ;;  %v11033_v54 = vld [vmem:[#allocation163_spill] sm:$0xff]  ;;  %v11035_v12 = vld [vmem:[#allocation72_spill] sm:$0xff] }
 0x252   : > { %2488 = vrot.lane.b32.xlu1 %v8184_v32, %s5220_s22  ;;  %v1859_v60 = vadd.f32 %v1803_v62, %v1720_v9  ;;  %v1858_v5 = vadd.f32 %v1802_v13, %v1719_v21  ;;  %v1990_v49 = vadd.f32 %v1934_v56, %v1857_v63  ;;  %11031 = vst [vmem:[#allocation154_spill] sm:$0xff] %v8271_v51  ;;  %v8274_v13 = vpop.permute.xlu1 %2396  ;;  %v2548_v39 = vrot.slane %v11033_v54, 2  ;;  %v11034_v56 = vld [vmem:[#allocation63_spill] sm:$0xff]  ;;  %v11037_v63 = vld [vmem:[#allocation41_spill] sm:$0xff]  ;;  %v11044_v32 = vld [vmem:[#allocation64_spill] sm:$0xff] }
 0x253   : > { %11032 = vst [vmem:[#allocation114_spill] sm:$0xff] %v8274_v13  ;;  %v8278_v9 = vrot.slane %v11034_v56, 2  ;;  %v11036_v28 = vld [vmem:[#allocation167_spill] sm:$0xff]  ;;  %v8338_v51 = vrot.slane %v7803_v37, 2  ;;  %v2584_v13 = vrot.slane %v7832_v48, 2 }
 0x254   : > { %5046 = vrot.lane.b32.xlu0 %v5045_v23, %s5221_s19  ;;  %v1992_v52 = vadd.f32 %v1936_v34, %v1859_v60  ;;  %v1991_v20 = vadd.f32 %v1935_v50, %v1858_v5  ;;  %v2123_v46 = vadd.f32 %v2067_v24, %v1990_v49  ;;  %v2557_v5 = vrot.slane %v11035_v12, 2  ;;  %v11038_v60 = vld [vmem:[#allocation66_spill] sm:$0xff]  ;;  %v11048_v12 = vld [vmem:[#allocation67_spill] sm:$0xff] }
 0x255   : > { %v8284_v21 = vrot.slane %v11036_v28, 2  ;;  %v2551_v24 = vrot.slane %v11037_v63, 2  ;;  %v8293_v49 = vrot.slane %v11038_v60, 2  ;;  %11047 = vst [vmem:[#allocation9_spill] sm:$0xff] %v8338_v51  ;;  %v2560_v28 = vrot.slane %v11048_v12, 2  ;;  %v11052_v37 = vld [vmem:[#allocation91_spill] sm:$0xff] }
 0x256   : > { %2613 = vrot.lane.b32.xlu1 %v2540_v22, %s5221_s19  ;;  %v2125_v23 = vadd.f32 %v2069_v31, %v1992_v52  ;;  %v2124_v62 = vadd.f32 %v2068_v8, %v1991_v20  ;;  %v2186_v50 = vadd.f32 %v7853_v38, %v2123_v46  ;;  %v8299_v31 = vpop.permute.xlu0 %2398  ;;  %v8301_v8 = vpop.permute.xlu1 %2400 }
 0x257   : > { %11041 = vst [vmem:[#allocation120_spill] sm:$0xff] %v8299_v31  ;;  %11042 = vst [vmem:[#allocation116_spill] sm:$0xff] %v8301_v8  ;;  %v8311_v46 = vsel %vm2538_vm1, %v2557_v5, %v8284_v21  ;;  %v2554_v8 = vrot.slane %v11044_v32, 2  ;;  %v11045_v5 = vld [vmem:[#allocation68_spill] sm:$0xff] }
 0x258   : > { %2615 = vrot.lane.b32.xlu0 %v8265_v27, %s5221_s19  ;;  %v2188_v34 = vadd.f32 %v7853_v38, %v2125_v23  ;;  %v2187_v22 = vadd.f32 %v7853_v38, %v2124_v62  ;;  %v8305_v23 = vsel %vm2538_vm1, %v2548_v39, %v8278_v9  ;;  %v8313_v62 = vmax.f32 %v2186_v50, 0.0 }
 0x259   : > { %v8327_v31 = vrot.slane %v11045_v5, 2  ;;  %v3800_v50 = vcombine.high %v8237_v36, %v8237_v36 }
 0x25a   : > { %2617 = vrot.lane.b32.xlu1 %v8250_v41, %s5221_s19  ;;  %v8295_v52 = vmax.f32 %v2188_v34, 0.0  ;;  %v8297_v20 = vmax.f32 %v2187_v22, 0.0  ;;  %11043 = vst [vmem:[#allocation155_spill] sm:$0xff] %v8313_v62  ;;  %v8319_v34 = vsel %vm2538_vm1, %v2551_v24, %v8293_v49  ;;  %v8333_v24 = vpop.permute.xlu0 %2404  ;;  %v8343_v32 = vpop.permute.xlu1 %2406  ;;  %v8346_v5 = vrot.slane %v8313_v62, 2 }
 0x25b   : > { %v5050_v17 = vpack.i.bf16 %v8311_v46, %v8319_v34  ;;  %11046 = vst [vmem:[#allocation118_spill] sm:$0xff] %v8333_v24  ;;  %11049 = vst [vmem:[#allocation197_spill] sm:$0xff] %v8343_v32  ;;  %v11051_v24 = vld [vmem:[#allocation165_spill] sm:$0xff]  ;;  %v3808_v56 = vcombine.high %v8319_v34, %v8319_v34 }
 0x25c   : > { %2621 = vrot.lane.b32.xlu0 %v8215_v57, %s5221_s19  ;;  %11039 = vst [vmem:[#allocation196_spill] sm:$0xff] %v8295_v52  ;;  %11040 = vst [vmem:[#allocation115_spill] sm:$0xff] %v8297_v20  ;;  %v3405_v22 = vrot.slane %v8297_v20, 2  ;;  %v3406_v39 = vrot.slane %v8295_v52, 2  ;;  %v2581_v52 = vrot.slane %v7805_v58, 2  ;;  %v8349_v38 = vrot.slane %v11051_v24, 2 }
 0x25d   : > { %11050 = vst [vmem:[#allocation121_spill] sm:$0xff] %v8346_v5  ;;  %v8365_v24 = vsel %vm2538_vm1, %v2554_v8, %v8327_v31 }
 0x25e   : > { %2623 = vrot.lane.b32.xlu1 %v8305_v23, %s5221_s19  ;;  %v3407_v20 = vsel %vm2538_vm1, %v3405_v22, %v3406_v39  ;;  %v3935_v22 = vcombine.low %v8215_v57, %v8305_v23  ;;  %v8355_v58 = vsel %vm2538_vm1, %v2581_v52, %v8338_v51  ;;  %v11054_v52 = vmov 0 }
 0x25f   : > { %v3844_v60 = vcombine.high %v3407_v20, %v3407_v20  ;;  %v3980_v48 = vcombine.low %v8346_v5, %v3407_v20  ;;  %v3848_v62 = vcombine.high %v8355_v58, %v8355_v58  ;;  %v11055_v52 = vsel %vm8371_vm3, 4294967295, %v11054_v52  ;;  %v8385_v5 = vpop.permute.xlu0 %2408 }
 0x260   : > { %2625 = vrot.lane.b32.xlu0 %v8278_v9, %s5221_s19  ;;  %11056 = vst [vmem:[#allocation27_spill] sm:$0xff] %v11055_v52  ;;  %v8395_v45 = vsel %vm2538_vm1, %v2560_v28, %v8349_v38  ;;  %v2590_v28 = vrot.slane %v7909_v3, 2  ;;  %v11062_v3 = vld [vmem:[#allocation20_spill] sm:$0xff] }
 0x261   : > { %v3983_v32 = vcombine.low %v3844_v60, %v3406_v39  ;;  %v3986_v8 = vcombine.low %v8355_v58, %v3848_v62 }
 0x262   : > { %5051 = vrot.lane.b32.xlu1 %v5050_v17, %s5221_s19  ;;  %v8358_v17 = vrot.slane %v11052_v37, 2  ;;  %v3932_v37 = vcombine.low %v8237_v36, %v3800_v50  ;;  %v2587_v50 = vrot.slane %v7887_v44, 2 }
 0x263   : > { %v4918_v20 = vpack.c.bf16 %v3983_v32, %v3980_v48  ;;  %v8399_v48 = vpop.permute.xlu1 %5021  ;;  %v3804_v32 = vcombine.high %v8305_v23, %v8305_v23 }
 0x264   : > { %2629 = vrot.lane.b32.xlu0 %v8293_v49, %s5221_s19  ;;  %11053 = vst [vmem:[#allocation26_spill] sm:$0xff] %v8358_v17  ;;  %v8378_v60 = vsel %vm2538_vm1, %v2584_v13, %v8358_v17  ;;  %v4921_v12 = vpack.c.bf16 %v3935_v22, %v3932_v37  ;;  %v8391_v13 = vrot.slane %v7885_v40, 2  ;;  %v11060_v22 = vld [vmem:[#allocation77_spill] sm:$0xff] }
 0x265   : > { %11057 = vst [vmem:[#allocation198_spill] sm:$0xff] %v8378_v60  ;;  %v3989_v39 = vcombine.low %v8338_v51, %v8378_v60  ;;  %4920 = vmatprep.subr.msk.bf16.mxu1 %vm8371_vm3, %v4918_v20  ;;  %v915_v20 = vmul.f32 %v8105_v2, %v11060_v22  ;;  %v574_v2 = vmul.f32 %v8114_v4, %v11062_v3  ;;  %v11063_v22 = vld [vmem:[#allocation13_spill] sm:$0xff] }
 0x266   : > { %2631 = vrot.lane.b32.xlu1 %v8365_v24, %s5221_s19  ;;  %11058 = vst [vmem:[#allocation122_spill] sm:$0xff] %v8391_v13  ;;  %4923 = vmatpush3.bf16.xpose.msk.msra.mxu1 %vm8371_vm3, %v4921_v12  ;;  %v8409_v62 = vsel %vm2538_vm1, %v2587_v50, %v8391_v13  ;;  %v3941_v50 = vcombine.low %v8319_v34, %v3808_v56 }
 0x267   : > { %v4924_v37 = vpack.c.bf16 %v3989_v39, %v3986_v8  ;;  %11059 = vst [vmem:[#allocation125_spill] sm:$0xff] %v8409_v62  ;;  %v3852_v8 = vcombine.high %v8378_v60, %v8378_v60  ;;  %v3856_v12 = vcombine.high %v8409_v62, %v8409_v62  ;;  %v8423_v39 = vrot.slane %v7895_v7, 2  ;;  %v8442_v3 = vpop.permute.xlu1 %2414 }
 0x268   : > { %2633 = vrot.lane.b32.xlu0 %v8327_v31, %s5221_s19  ;;  %v1256_v40 = vmul.f32 %v7641_v0, %v11063_v22  ;;  %v3938_v51 = vcombine.low %v3804_v32, %v8278_v9  ;;  %v971_v56 = vadd.f32 %v915_v20, %v574_v2  ;;  %v3812_v4 = vcombine.high %v8365_v24, %v8365_v24  ;;  %v11069_v2 = vld [vmem:[#allocation164_spill] sm:$0xff] }
 0x269   : > { %4926 = vmatprep.subr.msk.bf16.mxu1 %vm8371_vm3, %v4924_v37  ;;  %11061 = vst [vmem:[#allocation199_spill] sm:$0xff] %v8423_v39  ;;  %v3995_v44 = vcombine.low %v8409_v62, %v3856_v12  ;;  %v8433_v37 = vpop.permute.xlu0 %2412  ;;  %v8438_v7 = vsel %vm2538_vm1, %v2590_v28, %v8423_v39  ;;  %v3992_v0 = vcombine.low %v3852_v8, %v8358_v17  ;;  %v8464_v28 = vrot.slane %v7975_v55, 2  ;;  %v11103_v62 = vld [vmem:[#allocation79_spill] sm:$0xff] }
 0x26a   : > { %2637 = vrot.lane.b32.xlu1 %v8284_v21, %s5221_s19  ;;  %11064 = vst [vmem:[#allocation7_spill] sm:$0xff] %v8433_v37  ;;  %11065 = vst [vmem:[#allocation123_spill] sm:$0xff] %v8438_v7  ;;  %v1312_v12 = vadd.f32 %v1256_v40, %v971_v56  ;;  %v3860_v32 = vcombine.high %v8438_v7, %v8438_v7  ;;  %v5055_v8 = vpack.i.bf16 %v8305_v23, %v8265_v27 }
 0x26b   : > { %v4930_v22 = vpack.c.bf16 %v3995_v44, %v3992_v0  ;;  %v3947_v44 = vcombine.low %v3812_v4, %v8327_v31  ;;  %11067 = vst [vmem:[#allocation124_spill] sm:$0xff] %v8464_v28  ;;  %v2596_v56 = vrot.slane %v8041_v16, 2  ;;  %v8477_v0 = vrot.slane %v8052_v59, 2 }
 0x26c   : > { %2639 = vrot.lane.b32.xlu0 %v8395_v45, %s5221_s19  ;;  %v1528_v4 = vmul.f32 %v8189_v15, %v11013_v43  ;;  %v3998_v27 = vcombine.low %v8391_v13, %v8438_v7  ;;  %v3816_v15 = vcombine.high %v8311_v46, %v8311_v46  ;;  %v11084_v7 = vld [vmem:[#allocation80_spill] sm:$0xff] }
 0x26d   : > { %v8459_v40 = vpop.permute.xlu0 %2416  ;;  %11070 = vst [vmem:[#allocation202_spill] sm:$0xff] %v8477_v0  ;;  %v8557_v16 = vrot.slane %v11084_v7, 2 }
 0x26e   : > { %2965 = vrot.lane.b32.xlu1 %v8250_v41, %s5220_s22  ;;  %v1395_v41 = vmul.f32 %v8171_v1, %v11021_v19  ;;  %11066 = vst [vmem:[#allocation200_spill] sm:$0xff] %v8459_v40  ;;  %v8468_v19 = vpop.permute.xlu1 %2420  ;;  %v4001_v1 = vcombine.low %v3860_v32, %v8423_v39  ;;  %v11072_v32 = vld [vmem:[#allocation78_spill] sm:$0xff]  ;;  %v11160_v40 = vld [vmem:[#allocation40_spill] sm:$0xff] }
 0x26f   : > { %11068 = vst [vmem:[#allocation201_spill] sm:$0xff] %v8468_v19  ;;  %v8626_v19 = vrot.slane %v11103_v62, 2 }
 0x270   : > { %2967 = vrot.lane.b32.xlu0 %v8237_v36, %s5220_s22  ;;  %v4927_v36 = vpack.c.bf16 %v3941_v50, %v3938_v51  ;;  %v2593_v51 = vrot.slane %v7983_v61, 2  ;;  %v1451_v20 = vadd.f32 %v1395_v41, %v1312_v12  ;;  %v3944_v50 = vcombine.low %v8293_v49, %v8365_v24  ;;  %v11073_v61 = vld [vmem:[#allocation74_spill] sm:$0xff] }
 0x271   : > { %v2563_v41 = vrot.slane %v11072_v32, 2  ;;  %v8490_v59 = vrot.slane %v11073_v61, 2  ;;  %v8494_v43 = vpop.permute.xlu0 %2422 }
 0x272   : > { %4929 = vmatpush3.bf16.xpose.msk.msra.mxu1 %vm8371_vm3, %v4927_v36  ;;  %3113 = vrot.lane.b32.xlu1 %v11026_v29, %s5221_s19  ;;  %v4933_v23 = vpack.c.bf16 %v3947_v44, %v3944_v50  ;;  %v8486_v36 = vsel %vm2538_vm1, %v2593_v51, %v8464_v28  ;;  %v1584_v12 = vadd.f32 %v1528_v4, %v1451_v20  ;;  %v2599_v51 = vrot.slane %v8084_v6, 2  ;;  %v11077_v50 = vld [vmem:[#allocation46_spill] sm:$0xff]  ;;  %v8514_v4 = vpop.permute.xlu1 %2424 }
 0x273   : > { %4932 = vmatprep.subr.msk.bf16.mxu1 %vm8371_vm3, %v4930_v22  ;;  %11071 = vst [vmem:[#allocation204_spill] sm:$0xff] %v8486_v36  ;;  %v4936_v22 = vpack.c.bf16 %v4001_v1, %v3998_v27  ;;  %11074 = vst [vmem:[#allocation126_spill] sm:$0xff] %v8494_v43  ;;  %v8502_v44 = vsel %vm2538_vm1, %v2596_v56, %v8477_v0  ;;  %v8506_v20 = vrot.slane %v8082_v26, 2  ;;  %v11083_v26 = vld [vmem:[#allocation43_spill] sm:$0xff]  ;;  %v11153_v43 = vld [vmem:[#allocation48_spill] sm:$0xff] }
 0x274   : > { %3115 = vrot.lane.b32.xlu0 %v11033_v54, %s5221_s19  ;;  %11075 = vst [vmem:[#allocation119_spill] sm:$0xff] %v8502_v44  ;;  %v1800_v1 = vmul.f32 %v8228_v30, %v7782_v25  ;;  %11078 = vst [vmem:[#allocation51_spill] sm:$0xff] %v8514_v4  ;;  %v3864_v56 = vcombine.high %v8486_v36, %v8486_v36  ;;  %v3953_v27 = vcombine.low %v8284_v21, %v8395_v45 }
 0x275   : > { %11076 = vst [vmem:[#allocation129_spill] sm:$0xff] %v8506_v20  ;;  %v4007_v25 = vcombine.low %v8464_v28, %v8502_v44  ;;  %v8528_v30 = vsel %vm2538_vm1, %v2563_v41, %v8490_v59 }
 0x276   : > { %5056 = vrot.lane.b32.xlu1 %v5055_v8, %s5220_s22  ;;  %v1661_v8 = vmul.f32 %v7708_v35, %v10829_v14  ;;  %v5060_v14 = vpack.i.bf16 %v11037_v63, %v7297_v42  ;;  %v4004_v41 = vcombine.low %v8486_v36, %v3864_v56  ;;  %v2566_v56 = vrot.slane %v11083_v26, 2 }
 0x277   : > { %v3868_v36 = vcombine.high %v8502_v44, %v8502_v44 }
 0x278   : > { %3263 = vrot.lane.b32.xlu0 %v11069_v2, %s5222_s21  ;;  %v1717_v35 = vadd.f32 %v1661_v8, %v1584_v12  ;;  %v1933_v12 = vmul.f32 %v8032_v47, %v7864_v11  ;;  %v2066_v8 = vmul.f32 %v7797_v10, %v7949_v18  ;;  %v4942_v11 = vpack.c.bf16 %v4007_v25, %v4004_v41  ;;  %v11085_v18 = vld [vmem:[#allocation109_spill] sm:$0xff]  ;;  %v11086_v25 = vld [vmem:[#allocation107_spill] sm:$0xff] }
 0x279   : > { %v3820_v10 = vcombine.high %v8395_v45, %v8395_v45 }
 0x27a   : > { %4935 = vmatpush3.bf16.xpose.msk.msra.mxu1 %vm8371_vm3, %v4933_v23  ;;  %3265 = vrot.lane.b32.xlu1 %v11077_v50, %s5222_s21  ;;  %v3950_v23 = vcombine.low %v8311_v46, %v3816_v15  ;;  %v1856_v6 = vadd.f32 %v1800_v1, %v1717_v35  ;;  %v11080_v15 = vld [vmem:[#allocation42_spill] sm:$0xff]  ;;  %v3824_v1 = vcombine.high %v8528_v30, %v8528_v30  ;;  %v8551_v35 = vpop.permute.xlu1 %2428 }
 0x27b   : > { %4938 = vmatprep.subr.msk.bf16.mxu1 %vm8371_vm3, %v4936_v22  ;;  %v8534_v22 = vsel %vm2538_vm1, %v2599_v51, %v8506_v20  ;;  %v8547_v51 = vpop.permute.xlu0 %5026  ;;  %11082 = vst [vmem:[#allocation203_spill] sm:$0xff] %v8551_v35 }
 0x27c   : > { %2761 = vrot.lane.b32.xlu0 %v11029_v33, %s5222_s21  ;;  %11079 = vst [vmem:[#allocation28_spill] sm:$0xff] %v8534_v22  ;;  %11081 = vst [vmem:[#allocation127_spill] sm:$0xff] %v8547_v51  ;;  %v4939_v28 = vpack.c.bf16 %v3953_v27, %v3950_v23  ;;  %v3872_v47 = vcombine.high %v8534_v22, %v8534_v22  ;;  %v2602_v27 = vrot.slane %v11085_v18, 2  ;;  %v8567_v23 = vrot.slane %v11086_v25, 2  ;;  %v11102_v51 = vld [vmem:[#allocation82_spill] sm:$0xff] }
 0x27d   : > { %v1989_v41 = vadd.f32 %v1933_v12, %v1856_v6  ;;  %v3959_v55 = vcombine.low %v8528_v30, %v3824_v1  ;;  %v3956_v12 = vcombine.low %v3820_v10, %v8349_v38  ;;  %v11090_v1 = vld [vmem:[#allocation63_spill] sm:$0xff]  ;;  %v2572_v35 = vrot.slane %v11102_v51, 2 }
 0x27e   : > { %2763 = vrot.lane.b32.xlu1 %v7297_v42, %s5222_s21  ;;  %11087 = vst [vmem:[#allocation130_spill] sm:$0xff] %v8567_v23  ;;  %v4013_v39 = vcombine.low %v8534_v22, %v3872_v47  ;;  %v11092_v47 = vld [vmem:[#allocation69_spill] sm:$0xff]  ;;  %v11093_v22 = vld [vmem:[#allocation16_spill] sm:$0xff] }
 0x27f   : > { %v8582_v6 = vpop.permute.xlu0 %2430 }
 0x280   : > { %5061 = vrot.lane.b32.xlu0 %v5060_v14, %s5221_s19  ;;  %v5065_v14 = vpack.i.bf16 %v11028_v53, %v11080_v15  ;;  %11088 = vst [vmem:[#allocation131_spill] sm:$0xff] %v8582_v6 }
 0x282   : > { %4941 = vmatpush3.bf16.xpose.msk.msra.mxu1 %vm8371_vm3, %v4939_v28  ;;  %5066 = vrot.lane.b32.xlu1 %v5065_v14, %s5222_s21  ;;  %v8578_v28 = vsel %vm2538_vm1, %v2566_v56, %v8557_v16  ;;  %v8587_v14 = vsel %vm2538_vm1, %v2602_v27, %v8567_v23  ;;  %v5070_v56 = vpack.i.bf16 %v11033_v54, %v11092_v47 }
 0x283   : > { %4944 = vmatprep.subr.msk.bf16.mxu1 %vm8371_vm3, %v4942_v11  ;;  %11089 = vst [vmem:[#allocation128_spill] sm:$0xff] %v8587_v14  ;;  %v4010_v11 = vcombine.low %v3868_v36, %v8477_v0  ;;  %v3828_v18 = vcombine.high %v8578_v28, %v8578_v28  ;;  %v3876_v27 = vcombine.high %v8587_v14, %v8587_v14  ;;  %v11094_v36 = vld [vmem:[#allocation45_spill] sm:$0xff]  ;;  %v11096_v0 = vld [vmem:[#allocation168_spill] sm:$0xff] }
 0x284   : > { %2969 = vrot.lane.b32.xlu0 %v8215_v57, %s5220_s22  ;;  %v2122_v57 = vadd.f32 %v2066_v8, %v1989_v41  ;;  %v8591_v8 = vpop.permute.xlu1 %2432  ;;  %v4945_v41 = vpack.c.bf16 %v3959_v55, %v3956_v12  ;;  %v11095_v55 = vld [vmem:[#allocation75_spill] sm:$0xff]  ;;  %v8610_v44 = vrot.slane %v11096_v0, 2 }
 0x285   : > { %11091 = vst [vmem:[#allocation132_spill] sm:$0xff] %v8591_v8  ;;  %v4948_v25 = vpack.c.bf16 %v4013_v39, %v4010_v11  ;;  %v2569_v12 = vrot.slane %v11095_v55, 2  ;;  %v8612_v39 = vpop.permute.xlu0 %2436 }
 0x286   : > { %3117 = vrot.lane.b32.xlu1 %v11090_v1, %s5221_s19  ;;  %v2185_v10 = vadd.f32 %v11093_v22, %v2122_v57  ;;  %11097 = vst [vmem:[#allocation29_spill] sm:$0xff] %v8612_v39  ;;  %v3965_v22 = vcombine.low %v3828_v18, %v8557_v16  ;;  %v11098_v57 = vld [vmem:[#allocation134_spill] sm:$0xff]  ;;  %v3962_v18 = vcombine.low %v8490_v59, %v8578_v28  ;;  %v11105_v39 = vld [vmem:[#allocation5_spill] sm:$0xff] }
 0x287   : > { %v2605_v11 = vrot.slane %v11098_v57, 2  ;;  %v11104_v57 = vld [vmem:[#allocation193_spill] sm:$0xff] }
 0x288   : > { %2765 = vrot.lane.b32.xlu0 %v11026_v29, %s5222_s21  ;;  %v8621_v6 = vpop.permute.xlu1 %2438 }
 0x289   : > { %11101 = vst [vmem:[#allocation206_spill] sm:$0xff] %v8621_v6  ;;  %v4951_v6 = vpack.c.bf16 %v3965_v22, %v3962_v18  ;;  %v11113_v18 = vld [vmem:[#allocation121_spill] sm:$0xff] }
 0x28a   : > { %4947 = vmatpush3.bf16.xpose.msk.msra.mxu1 %vm8371_vm3, %v4945_v41  ;;  %3267 = vrot.lane.b32.xlu1 %v11094_v36, %s5222_s21  ;;  %v8619_v41 = vmax.f32 %v2185_v10, 0.0  ;;  %v8634_v10 = vrot.slane %v11105_v39, 2 }
 0x28b   : > { %4950 = vmatprep.subr.msk.bf16.mxu1 %vm8371_vm3, %v4948_v25  ;;  %v4019_v25 = vcombine.low %v3876_v27, %v8567_v23  ;;  %v4016_v27 = vcombine.low %v8506_v20, %v8587_v14  ;;  %v8642_v23 = vsel %vm2538_vm1, %v2569_v12, %v8610_v44  ;;  %v11109_v20 = vld [vmem:[#allocation66_spill] sm:$0xff]  ;;  %v8657_v14 = vpop.permute.xlu0 %2440 }
 0x28c   : > { %5071 = vrot.lane.b32.xlu0 %v5070_v56, %s5222_s21  ;;  %v11099_v56 = vld [vmem:[#allocation108_spill] sm:$0xff]  ;;  %11106 = vst [vmem:[#allocation136_spill] sm:$0xff] %v8634_v10  ;;  %11110 = vst [vmem:[#allocation138_spill] sm:$0xff] %v8657_v14  ;;  %v3832_v12 = vcombine.high %v8642_v23, %v8642_v23 }
 0x28d   : > { %v8617_v8 = vrot.slane %v11099_v56, 2  ;;  %v2608_v56 = vrot.slane %v11104_v57, 2  ;;  %v2957_v57 = vrot.slane %v8619_v41, 2  ;;  %v4954_v39 = vpack.c.bf16 %v4019_v25, %v4016_v27 }
 0x28e   : > { %2977 = vrot.lane.b32.xlu1 %v8293_v49, %s5220_s22  ;;  %v8653_v49 = vsel %vm2538_vm1, %v2572_v35, %v8626_v19 }
 0x28f   : > { %11100 = vst [vmem:[#allocation205_spill] sm:$0xff] %v8617_v8  ;;  %v8649_v13 = vpop.permute.xlu1 %5031  ;;  %v8665_v22 = vsel %vm2538_vm1, %v2608_v56, %v8634_v10  ;;  %v3971_v25 = vcombine.low %v8610_v44, %v8653_v49  ;;  %v8679_v27 = vsel %vm2538_vm1, %v2957_v57, %v11113_v18  ;;  %v11114_v56 = vld [vmem:[#allocation64_spill] sm:$0xff]  ;;  %v3968_v10 = vcombine.low %v8642_v23, %v3832_v12  ;;  %v8689_v14 = vpop.permute.xlu0 %2444  ;;  %v11117_v12 = vld [vmem:[#allocation71_spill] sm:$0xff] }
 0x290   : > { %2975 = vrot.lane.b32.xlu0 %v8319_v34, %s5220_s22  ;;  %v8646_v34 = vsel %vm2538_vm1, %v2605_v11, %v8617_v8  ;;  %11108 = vst [vmem:[#allocation208_spill] sm:$0xff] %v8649_v13  ;;  %11111 = vst [vmem:[#allocation137_spill] sm:$0xff] %v8665_v22  ;;  %v11112_v11 = vld [vmem:[#allocation68_spill] sm:$0xff] }
 0x291   : > { %11107 = vst [vmem:[#allocation207_spill] sm:$0xff] %v8646_v34  ;;  %v3880_v35 = vcombine.high %v8646_v34, %v8646_v34  ;;  %11116 = vst [vmem:[#allocation135_spill] sm:$0xff] %v8689_v14  ;;  %v4957_v17 = vpack.c.bf16 %v3971_v25, %v3968_v10  ;;  %v11120_v25 = vld [vmem:[#allocation73_spill] sm:$0xff] }
 0x292   : > { %4953 = vmatpush3.bf16.xpose.msk.msra.mxu1 %vm8371_vm3, %v4951_v6  ;;  %3125 = vrot.lane.b32.xlu1 %v11112_v11, %s5221_s19  ;;  %v4025_v6 = vcombine.low %v8617_v8, %v8665_v22  ;;  %v3840_v22 = vcombine.high %v8679_v27, %v8679_v27  ;;  %v11148_v8 = vld [vmem:[#allocation84_spill] sm:$0xff] }
 0x293   : > { %4956 = vmatprep.subr.msk.bf16.mxu1 %vm8371_vm3, %v4954_v39  ;;  %v8686_v39 = vpop.permute.xlu1 %2446  ;;  %v4022_v13 = vcombine.low %v8646_v34, %v3880_v35 }
 0x294   : > { %2773 = vrot.lane.b32.xlu0 %v11109_v20, %s5222_s21  ;;  %11115 = vst [vmem:[#allocation50_spill] sm:$0xff] %v8686_v39  ;;  %v3977_v10 = vcombine.low %v8679_v27, %v3840_v22  ;;  %v11121_v22 = vld [vmem:[#allocation14_spill] sm:$0xff] }
 0x295   : > { %v4960_v57 = vpack.c.bf16 %v4025_v6, %v4022_v13  ;;  %v8706_v13 = vpop.permute.xlu0 %2448 }
 0x296   : > { %2973 = vrot.lane.b32.xlu1 %v8278_v9, %s5220_s22  ;;  %v3836_v9 = vcombine.high %v8653_v49, %v8653_v49  ;;  %11119 = vst [vmem:[#allocation209_spill] sm:$0xff] %v8706_v13 }
 0x297   : > { %v8704_v35 = vpop.permute.xlu1 %2452 }
 0x298   : > { %3123 = vrot.lane.b32.xlu0 %v11114_v56, %s5221_s19  ;;  %11118 = vst [vmem:[#allocation210_spill] sm:$0xff] %v8704_v35 }
 0x29a   : > { %4959 = vmatpush3.bf16.xpose.msk.msra.mxu1 %vm8371_vm3, %v4957_v17  ;;  %3275 = vrot.lane.b32.xlu1 %v11117_v12, %s5222_s21  ;;  %v3974_v17 = vcombine.low %v3836_v9, %v8626_v19  ;;  %v8721_v35 = vpop.permute.xlu0 %2454 }
 0x29b   : > { %4962 = vmatprep.subr.msk.bf16.mxu1 %vm8371_vm3, %v4960_v57  ;;  %v8719_v57 = vpop.permute.xlu1 %2456  ;;  %11123 = vst [vmem:[#allocation30_spill] sm:$0xff] %v8721_v35  ;;  %v11129_v35 = vld [vmem:[#allocation47_spill] sm:$0xff] }
 0x29c   : > { %2771 = vrot.lane.b32.xlu0 %v11037_v63, %s5222_s21  ;;  %v4963_v6 = vpack.c.bf16 %v3977_v10, %v3974_v17  ;;  %11122 = vst [vmem:[#allocation139_spill] sm:$0xff] %v8719_v57  ;;  %v11126_v17 = vld [vmem:[#allocation67_spill] sm:$0xff] }
 0x29e   : > { %3121 = vrot.lane.b32.xlu1 %v11109_v20, %s5221_s19 }
 0x2a0   : > { %3273 = vrot.lane.b32.xlu0 %v11120_v25, %s5222_s21  ;;  %v11161_v25 = vld [vmem:[#allocation154_spill] sm:$0xff] }
 0x2a2   : > { %4965 = vmatpush3.bf16.xpose.msk.msra.mxu1 %vm8371_vm3, %v4963_v6  ;;  %3271 = vrot.lane.b32.xlu1 %v11121_v22, %s5222_s21  ;;  %v11127_v6 = vld [vmem:[#allocation167_spill] sm:$0xff] }
 0x2a4   : > { %2769 = vrot.lane.b32.xlu0 %v11090_v1, %s5222_s21 }
 0x2a6   : > { %2981 = vrot.lane.b32.xlu1 %v8327_v31, %s5220_s22  ;;  %v8729_v10 = vpop.permute.xlu1 %2460  ;;  %v11131_v31 = vpack.i.bf16 %v8395_v45, %v8365_v24 }
 0x2a7   : > { %11125 = vst [vmem:[#allocation211_spill] sm:$0xff] %v8729_v10 }
 0x2a8   : > { %2983 = vrot.lane.b32.xlu0 %v8311_v46, %s5220_s22 }
 0x2aa   : > { %v8727_v9 = vpop.permute.xlu0 %5036  ;;  %3129 = vrot.lane.b32.xlu1 %v11127_v6, %s5221_s19  ;;  %v8739_v57 = vpop.permute.xlu1 %2464 }
 0x2ab   : > { %11124 = vst [vmem:[#allocation8_spill] sm:$0xff] %v8727_v9  ;;  %11130 = vst [vmem:[#allocation53_spill] sm:$0xff] %v8739_v57  ;;  %v11133_v9 = vld [vmem:[#allocation170_spill] sm:$0xff] }
 0x2ac   : > { %3131 = vrot.lane.b32.xlu0 %v11126_v17, %s5221_s19 }
 0x2ae   : > { %v8735_v52 = vpop.permute.xlu0 %2462  ;;  %5076 = vrot.lane.b32.xlu1 %v11131_v31, %s5220_s22  ;;  %v11139_v31 = vld [vmem:[#allocation166_spill] sm:$0xff] }
 0x2af   : > { %11128 = vst [vmem:[#allocation142_spill] sm:$0xff] %v8735_v52  ;;  %v11135_v52 = vld [vmem:[#allocation72_spill] sm:$0xff] }
 0x2b0   : > { %3279 = vrot.lane.b32.xlu0 %v11129_v35, %s5222_s21  ;;  %v5080_v13 = vpack.i.bf16 %v11072_v32, %v11135_v52 }
 0x2b1   : > { %v8755_v14 = vpop.permute.xlu1 %2470 }
 0x2b2   : > { %v8745_v46 = vpop.permute.xlu0 %2468  ;;  %3281 = vrot.lane.b32.xlu1 %v11133_v9, %s5222_s21  ;;  %11136 = vst [vmem:[#allocation212_spill] sm:$0xff] %v8755_v14 }
 0x2b3   : > { %11132 = vst [vmem:[#allocation141_spill] sm:$0xff] %v8745_v46  ;;  %v5085_v46 = vpack.i.bf16 %v11114_v56, %v11139_v31 }
 0x2b4   : > { %2777 = vrot.lane.b32.xlu0 %v11112_v11, %s5222_s21  ;;  %v11159_v11 = vld [vmem:[#allocation114_spill] sm:$0xff] }
 0x2b5   : > { %v3413_v60 = vsel %vm3411_vm2, %v11160_v40, %v11159_v11  ;;  %v11163_v11 = vld [vmem:[#allocation70_spill] sm:$0xff] }
 0x2b6   : > { %v8751_v10 = vpop.permute.xlu0 %2472  ;;  %2779 = vrot.lane.b32.xlu1 %v11135_v52, %s5222_s21 }
 0x2b7   : > { %11134 = vst [vmem:[#allocation143_spill] sm:$0xff] %v8751_v10 }
 0x2b8   : > { %5081 = vrot.lane.b32.xlu0 %v5080_v13, %s5221_s19  ;;  %v8762_v24 = vpop.permute.xlu1 %5041  ;;  %v11142_v13 = vld [vmem:[#allocation165_spill] sm:$0xff] }
 0x2b9   : > { %11138 = vst [vmem:[#allocation55_spill] sm:$0xff] %v8762_v24  ;;  %v11144_v24 = vld [vmem:[#allocation172_spill] sm:$0xff] }
 0x2ba   : > { %v8760_v45 = vpop.permute.xlu0 %2476  ;;  %5086 = vrot.lane.b32.xlu1 %v5085_v46, %s5222_s21  ;;  %v5090_v57 = vpack.i.bf16 %v11126_v17, %v11144_v24 }
 0x2bb   : > { %11137 = vst [vmem:[#allocation52_spill] sm:$0xff] %v8760_v45 }
 0x2bc   : > { %2985 = vrot.lane.b32.xlu0 %v8284_v21, %s5220_s22  ;;  %v8771_v14 = vpop.permute.xlu1 %2478  ;;  %v11146_v21 = vld [vmem:[#allocation169_spill] sm:$0xff] }
 0x2bd   : > { %11141 = vst [vmem:[#allocation144_spill] sm:$0xff] %v8771_v14 }
 0x2be   : > { %v8769_v10 = vpop.permute.xlu0 %2480  ;;  %3133 = vrot.lane.b32.xlu1 %v11142_v13, %s5221_s19 }
 0x2bf   : > { %11140 = vst [vmem:[#allocation151_spill] sm:$0xff] %v8769_v10 }
 0x2c0   : > { %2781 = vrot.lane.b32.xlu0 %v11127_v6, %s5222_s21  ;;  %v8781_v39 = vpop.permute.xlu1 %2484 }
 0x2c1   : > { %11145 = vst [vmem:[#allocation213_spill] sm:$0xff] %v8781_v39 }
 0x2c2   : > { %v8777_v45 = vpop.permute.xlu0 %2486  ;;  %3283 = vrot.lane.b32.xlu1 %v11146_v21, %s5222_s21 }
 0x2c3   : > { %11143 = vst [vmem:[#allocation214_spill] sm:$0xff] %v8777_v45 }
 0x2c4   : > { %5091 = vrot.lane.b32.xlu0 %v5090_v57, %s5222_s21  ;;  %v8788_v10 = vpop.permute.xlu1 %2488 }
 0x2c5   : > { %11147 = vst [vmem:[#allocation140_spill] sm:$0xff] %v8788_v10 }
 0x2c6   : > { %v8786_v46 = vpop.permute.xlu0 %5046  ;;  %2993 = vrot.lane.b32.xlu1 %v8490_v59, %s5220_s22 }
 0x2c7   : > { %v5048_v37 = vunpack.i.l.bf16 %v8786_v46 }
 0x2c8   : > { %2641 = vrot.lane.b32.xlu0 %v8349_v38, %s5221_s19  ;;  %v2614_v14 = vpop.permute.xlu1 %2613 }
 0x2ca   : > { %v2616_v45 = vpop.permute.xlu0 %2615  ;;  %2991 = vrot.lane.b32.xlu1 %v8528_v30, %s5220_s22 }
 0x2cc   : > { %3141 = vrot.lane.b32.xlu0 %v11084_v7, %s5221_s19  ;;  %v8800_v39 = vpop.permute.xlu1 %2617 }
 0x2ce   : > { %v8798_v57 = vpop.permute.xlu0 %2621  ;;  %2789 = vrot.lane.b32.xlu1 %v11073_v61, %s5222_s21 }
 0x2d0   : > { %2989 = vrot.lane.b32.xlu0 %v8349_v38, %s5220_s22  ;;  %v8808_v34 = vpop.permute.xlu1 %2623 }
 0x2d2   : > { %v8806_v10 = vpop.permute.xlu0 %2625  ;;  %3139 = vrot.lane.b32.xlu1 %v11083_v26, %s5221_s19 }
 0x2d4   : > { %3291 = vrot.lane.b32.xlu0 %v11148_v8, %s5222_s21  ;;  %v8816_v24 = vpop.permute.xlu1 %5051  ;;  %v11154_v8 = vld [vmem:[#allocation83_spill] sm:$0xff] }
 0x2d5   : > { %11150 = vst [vmem:[#allocation145_spill] sm:$0xff] %v8816_v24  ;;  %v11164_v24 = vld [vmem:[#allocation15_spill] sm:$0xff] }
 0x2d6   : > { %v8814_v6 = vpop.permute.xlu0 %2629  ;;  %2787 = vrot.lane.b32.xlu1 %v11072_v32, %s5222_s21 }
 0x2d7   : > { %11149 = vst [vmem:[#allocation152_spill] sm:$0xff] %v8814_v6  ;;  %v5018_v6 = vunpack.i.l.bf16 %v11161_v25 }
 0x2d8   : > { %3137 = vrot.lane.b32.xlu0 %v11073_v61, %s5221_s19  ;;  %v8824_v17 = vpop.permute.xlu1 %2631 }
 0x2d9   : > { %11152 = vst [vmem:[#allocation32_spill] sm:$0xff] %v8824_v17 }
 0x2da   : > { %v8822_v38 = vpop.permute.xlu0 %2633  ;;  %3289 = vrot.lane.b32.xlu1 %v11154_v8, %s5222_s21 }
 0x2db   : > { %11151 = vst [vmem:[#allocation148_spill] sm:$0xff] %v8822_v38  ;;  %v11157_v38 = vld [vmem:[#allocation49_spill] sm:$0xff] }
 0x2dc   : > { %3287 = vrot.lane.b32.xlu0 %v11153_v43, %s5222_s21  ;;  %v8832_v4 = vpop.permute.xlu1 %2637 }
 0x2dd   : > { %11156 = vst [vmem:[#allocation56_spill] sm:$0xff] %v8832_v4 }
 0x2de   : > { %v8830_v21 = vpop.permute.xlu0 %2639  ;;  %2785 = vrot.lane.b32.xlu1 %v11142_v13, %s5222_s21 }
 0x2df   : > { %11155 = vst [vmem:[#allocation10_spill] sm:$0xff] %v8830_v21  ;;  %v5095_v21 = vpack.i.bf16 %v8653_v49, %v8578_v28 }
 0x2e0   : > { %2997 = vrot.lane.b32.xlu0 %v8557_v16, %s5220_s22  ;;  %v2966_v61 = vpop.permute.xlu1 %2965 }
 0x2e1   : > { %v3559_v12 = vsel %vm3411_vm2, %v11163_v11, %v2966_v61  ;;  %v11165_v11 = vld [vmem:[#allocation60_spill] sm:$0xff] }
 0x2e2   : > { %v2968_v32 = vpop.permute.xlu0 %2967  ;;  %2999 = vrot.lane.b32.xlu1 %v8642_v23, %s5220_s22 }
 0x2e4   : > { %3145 = vrot.lane.b32.xlu0 %v11096_v0, %s5221_s19  ;;  %v3114_v8 = vpop.permute.xlu1 %3113 }
 0x2e6   : > { %v3116_v43 = vpop.permute.xlu0 %3115  ;;  %3147 = vrot.lane.b32.xlu1 %v11102_v51, %s5221_s19 }
 0x2e8   : > { %2645 = vrot.lane.b32.xlu0 %v8490_v59, %s5221_s19  ;;  %v8848_v13 = vpop.permute.xlu1 %5056  ;;  %v11158_v59 = vld [vmem:[#allocation171_spill] sm:$0xff] }
 0x2ea   : > { %v3264_v4 = vpop.permute.xlu0 %3263  ;;  %2647 = vrot.lane.b32.xlu1 %v8578_v28, %s5221_s19 }
 0x2ec   : > { %5096 = vrot.lane.b32.xlu0 %v5095_v21, %s5220_s22  ;;  %v3266_v52 = vpop.permute.xlu1 %3265  ;;  %v11162_v21 = vld [vmem:[#allocation120_spill] sm:$0xff] }
 0x2ed   : > { %v3414_v28 = vsel %vm3411_vm2, %v11028_v53, %v11162_v21 }
 0x2ee   : > { %v2762_v9 = vpop.permute.xlu0 %2761  ;;  %3295 = vrot.lane.b32.xlu1 %v11158_v59, %s5222_s21  ;;  %v5058_v59 = vunpack.i.l.bf16 %v8848_v13  ;;  %v3463_v40 = vsel %vm3460_vm4, %v3414_v28, %v2616_v45  ;;  %v5105_v45 = vpack.i.bf16 %v11083_v26, %v11164_v24  ;;  %v3462_v28 = vsel %vm3460_vm4, %v3413_v60, %v2614_v14 }
 0x2f0   : > { %3297 = vrot.lane.b32.xlu0 %v11157_v38, %s5222_s21  ;;  %v2764_v20 = vpop.permute.xlu1 %2763  ;;  %v3560_v38 = vsel %vm3411_vm2, %v11080_v15, %v2968_v32  ;;  %v3607_v32 = vsel %vm3460_vm4, %v3559_v12, %v3114_v8  ;;  %v3511_v8 = vsel %vm3509_vm5, %v3462_v28, %v2762_v9 }
 0x2f1   : > { %v3608_v53 = vsel %vm3460_vm4, %v3560_v38, %v3116_v43  ;;  %v3512_v17 = vsel %vm3509_vm5, %v3463_v40, %v2764_v20  ;;  %v3655_v61 = vsel %vm3509_vm5, %v3607_v32, %v3264_v4  ;;  %v5100_v38 = vpack.i.bf16 %v8528_v30, %v11095_v55  ;;  %v11166_v20 = vld [vmem:[#allocation44_spill] sm:$0xff] }
 0x2f2   : > { %v8857_v35 = vpop.permute.xlu0 %5061  ;;  %2793 = vrot.lane.b32.xlu1 %v11084_v7, %s5222_s21  ;;  %v3656_v15 = vsel %vm3509_vm5, %v3608_v53, %v3266_v52  ;;  %v3412_v7 = vsel %vm3411_vm2, %v11165_v11, %v5018_v6  ;;  %v3558_v40 = vsel %vm3411_vm2, %v11166_v20, %v5058_v59  ;;  %v4688_v53 = vcombine.low %v3511_v8, %v3512_v17 }
 0x2f3   : > { %v5063_v21 = vunpack.i.l.bf16 %v8857_v35  ;;  %v4689_v4 = vcombine.low %v3655_v61, %v3656_v15  ;;  %v3461_v30 = vsel %vm3460_vm4, %v3412_v7, %v5048_v37  ;;  %v5019_v59 = vunpack.i.h.bf16 %v11161_v25 }
 0x2f4   : > { %2795 = vrot.lane.b32.xlu0 %v11095_v55, %s5222_s21  ;;  %v5067_v43 = vpop.permute.xlu1 %5066  ;;  %v5049_v7 = vunpack.i.h.bf16 %v8786_v46  ;;  %v5059_v37 = vunpack.i.h.bf16 %v8848_v13 }
 0x2f5   : > { %v5069_v52 = vunpack.i.h.bf16 %v5067_v43  ;;  %v5068_v12 = vunpack.i.l.bf16 %v5067_v43  ;;  %v3606_v60 = vsel %vm3460_vm4, %v3558_v40, %v5063_v21  ;;  %v3803_v40 = vcombine.high %v3512_v17, %v3656_v15  ;;  %v11169_v17 = vld [vmem:[#allocation86_spill] sm:$0xff] }
 0x2f6   : > { %v2970_v31 = vpop.permute.xlu0 %2969  ;;  %5101 = vrot.lane.b32.xlu1 %v5100_v38, %s5221_s19 }
 0x2f7   : > { %v3654_v6 = vsel %vm3509_vm5, %v3606_v60, %v5068_v12  ;;  %v3510_v9 = vsel %vm3509_vm5, %v3461_v30, %v5069_v52  ;;  %v3561_v61 = vsel %vm3411_vm2, %v11069_v2, %v2970_v31  ;;  %v11168_v2 = vld [vmem:[#allocation155_spill] sm:$0xff]  ;;  %v5110_v60 = vpack.i.bf16 %v8642_v23, %v8619_v41 }
 0x2f8   : > { %5106 = vrot.lane.b32.xlu0 %v5105_v45, %s5222_s21  ;;  %v3118_v32 = vpop.permute.xlu1 %3117  ;;  %v4854_v28 = vpack.c.bf16 %v4689_v4, %v3654_v6  ;;  %v4856_v43 = vpack.c.bf16 %v4688_v53, %v3510_v9  ;;  %v11167_v45 = vld [vmem:[#allocation116_spill] sm:$0xff]  ;;  %v8921_v31 = vrot.slane %v11168_v2, 1 }
 0x2f9   : > { %v3415_v21 = vsel %vm3411_vm2, %v11029_v33, %v11167_v45  ;;  %v5064_v33 = vunpack.i.h.bf16 %v8857_v35  ;;  %v3609_v11 = vsel %vm3460_vm4, %v3561_v61, %v3118_v32  ;;  %v3562_v35 = vsel %vm3411_vm2, %v11077_v50, %v5059_v37  ;;  %v11170_v61 = vld [vmem:[#allocation197_spill] sm:$0xff] }
 0x2fa   : > { %v2766_v14 = vpop.permute.xlu0 %2765  ;;  %3001 = vrot.lane.b32.xlu1 %v8610_v44, %s5220_s22  ;;  %4855 = vmatprep.subr.bf16.mxu0 %v4854_v28  ;;  %v3464_v25 = vsel %vm3460_vm4, %v3415_v21, %v8800_v39  ;;  %v3416_v39 = vsel %vm3411_vm2, %v7297_v42, %v5019_v59 }
 0x2fb   : > { %4857 = vmatpush1.bf16.xpose.msra.mxu0 %v4856_v43  ;;  %v3513_v46 = vsel %vm3509_vm5, %v3464_v25, %v2766_v14  ;;  %v3465_v4 = vsel %vm3460_vm4, %v3416_v39, %v5049_v7  ;;  %v3610_v6 = vsel %vm3460_vm4, %v3562_v35, %v5064_v33 }
 0x2fc   : > { %2649 = vrot.lane.b32.xlu0 %v8557_v16, %s5221_s19  ;;  %v2903_v16 = vrot.slane %v8619_v41, 1  ;;  %v3268_v8 = vpop.permute.xlu1 %3267  ;;  %v4690_v9 = vcombine.low %v3803_v40, %v3513_v46 }
 0x2fd   : > { %v3657_v13 = vsel %vm3509_vm5, %v3609_v11, %v3268_v8 }
 0x2fe   : > { %v5072_v38 = vpop.permute.xlu0 %5071  ;;  %v3805_v20 = vcombine.low %v3513_v46, %v3657_v13  ;;  %3149 = vrot.lane.b32.xlu1 %v11103_v62, %s5221_s19  ;;  %v8938_v50 = vsel %vm2321_vm0, %v2903_v16, %v8921_v31  ;;  %v11171_v16 = vld [vmem:[#allocation196_spill] sm:$0xff] }
 0x2ff   : > { %v5074_v52 = vunpack.i.h.bf16 %v5072_v38  ;;  %v5073_v12 = vunpack.i.l.bf16 %v5072_v38  ;;  %v5115_v59 = vpack.i.bf16 %v11102_v51, %v8938_v50  ;;  %v3418_v38 = vsel %vm3411_vm2, %v11033_v54, %v11170_v61 }
 0x300   : > { %2797 = vrot.lane.b32.xlu0 %v11096_v0, %s5222_s21  ;;  %v4691_v30 = vcombine.high %v3656_v15, %v3805_v20  ;;  %v2978_v14 = vpop.permute.xlu1 %2977 }
 0x301   : > { %v3514_v42 = vsel %vm3509_vm5, %v3465_v4, %v5074_v52  ;;  %v3658_v32 = vsel %vm3509_vm5, %v3610_v6, %v5073_v12  ;;  %v3565_v25 = vsel %vm3411_vm2, %v11121_v22, %v2978_v14  ;;  %v11172_v22 = vld [vmem:[#allocation118_spill] sm:$0xff]  ;;  %v11173_v14 = vld [vmem:[#allocation115_spill] sm:$0xff] }
 0x302   : > { %v2976_v53 = vpop.permute.xlu0 %2975  ;;  %3299 = vrot.lane.b32.xlu1 %v11169_v17, %s5222_s21  ;;  %v4858_v23 = vpack.c.bf16 %v3658_v32, %v4691_v30  ;;  %v4860_v15 = vpack.c.bf16 %v3514_v42, %v4690_v9  ;;  %v3417_v13 = vsel %vm3411_vm2, %v11026_v29, %v11172_v22  ;;  %v3255_v32 = vrot.slane %v11173_v14, 1  ;;  %v11183_v22 = vld [vmem:[#allocation66_spill] sm:$0xff] }
 0x303   : > { %v3466_v39 = vsel %vm3460_vm4, %v3417_v13, %v8798_v57 }
 0x304   : > { %5111 = vrot.lane.b32.xlu0 %v5110_v60, %s5221_s19  ;;  %v3126_v43 = vpop.permute.xlu1 %3125  ;;  %4859 = vmatprep.subr.bf16.mxu0 %v4858_v23 }
 0x305   : > { %4861 = vmatpush1.bf16.xpose.msra.mxu0 %v4860_v15 }
 0x306   : > { %v2774_v28 = vpop.permute.xlu0 %2773  ;;  %5116 = vrot.lane.b32.xlu1 %v5115_v59, %s5222_s21 }
 0x308   : > { %3009 = vrot.lane.b32.xlu0 %v11113_v18, %s5220_s22  ;;  %v2974_v21 = vpop.permute.xlu1 %2973  ;;  %v3564_v18 = vsel %vm3411_vm2, %v11092_v47, %v2976_v53  ;;  %v3419_v47 = vsel %vm3411_vm2, %v11090_v1, %v8385_v5 }
 0x309   : > { %v3468_v12 = vsel %vm3460_vm4, %v3419_v47, %v8806_v10  ;;  %v3563_v1 = vsel %vm3411_vm2, %v11094_v36, %v2974_v21  ;;  %v11174_v21 = vld [vmem:[#allocation87_spill] sm:$0xff] }
 0x30a   : > { %v3124_v45 = vpop.permute.xlu0 %3123  ;;  %2657 = vrot.lane.b32.xlu1 %v8626_v19, %s5221_s19  ;;  %v3517_v5 = vsel %vm3509_vm5, %v3468_v12, %v2774_v28 }
 0x30b   : > { %v3612_v33 = vsel %vm3460_vm4, %v3564_v18, %v3124_v45 }
 0x30c   : > { %3007 = vrot.lane.b32.xlu0 %v8679_v27, %s5220_s22  ;;  %v3276_v37 = vpop.permute.xlu1 %3275  ;;  %v3467_v27 = vsel %vm3460_vm4, %v3418_v38, %v8808_v34  ;;  %v11175_v38 = vld [vmem:[#allocation90_spill] sm:$0xff] }
 0x30d   : > { %v2578_v18 = vrot.slane %v11175_v38, 2 }
 0x30e   : > { %v2772_v7 = vpop.permute.xlu0 %2771  ;;  %3157 = vrot.lane.b32.xlu1 %v11171_v16, %s5221_s19 }
 0x30f   : > { %v3516_v8 = vsel %vm3509_vm5, %v3467_v27, %v2772_v7  ;;  %v9010_v7 = vrot.slane %v11174_v21, 2  ;;  %v11176_v27 = vld [vmem:[#allocation145_spill] sm:$0xff] }
 0x310   : > { %2655 = vrot.lane.b32.xlu0 %v8653_v49, %s5221_s19  ;;  %v3613_v49 = vsel %vm3460_vm4, %v3565_v25, %v3126_v43  ;;  %v3122_v54 = vpop.permute.xlu1 %3121  ;;  %v5053_v25 = vunpack.i.l.bf16 %v11176_v27 }
 0x311   : > { %v3661_v46 = vsel %vm3509_vm5, %v3613_v49, %v3276_v37  ;;  %v3611_v29 = vsel %vm3460_vm4, %v3563_v1, %v3122_v54  ;;  %v11179_v54 = vld [vmem:[#allocation32_spill] sm:$0xff] }
 0x312   : > { %v3274_v11 = vpop.permute.xlu0 %3273  ;;  %2805 = vrot.lane.b32.xlu1 %v11168_v2, %s5222_s21  ;;  %v3813_v35 = vcombine.low %v3517_v5, %v3661_v46 }
 0x313   : > { %v3660_v52 = vsel %vm3509_vm5, %v3612_v33, %v3274_v11  ;;  %v11177_v33 = vld [vmem:[#allocation166_spill] sm:$0xff] }
 0x314   : > { %v3811_v34 = vcombine.high %v3516_v8, %v3660_v52  ;;  %3005 = vrot.lane.b32.xlu0 %v8626_v19, %s5220_s22  ;;  %v3256_v19 = vrot.slane %v11171_v16, 1  ;;  %v3272_v40 = vpop.permute.xlu1 %3271  ;;  %v4695_v4 = vcombine.high %v3660_v52, %v3813_v35  ;;  %v3422_v16 = vsel %vm3411_vm2, %v11114_v56, %v8442_v3  ;;  %v11181_v56 = vld [vmem:[#allocation176_spill] sm:$0xff] }
 0x315   : > { %v3659_v53 = vsel %vm3509_vm5, %v3611_v29, %v3272_v40  ;;  %v11185_v40 = vld [vmem:[#allocation174_spill] sm:$0xff] }
 0x316   : > { %v2770_v20 = vpop.permute.xlu0 %2769  ;;  %v4694_v57 = vcombine.low %v3811_v34, %v3517_v5  ;;  %v4693_v30 = vcombine.low %v3659_v53, %v3660_v52  ;;  %3155 = vrot.lane.b32.xlu1 %v11173_v14, %s5221_s19  ;;  %v3257_v15 = vsel %vm2321_vm0, %v3255_v32, %v3256_v19  ;;  %v11180_v52 = vld [vmem:[#allocation71_spill] sm:$0xff]  ;;  %v2580_v53 = vsel %vm2538_vm1, %v2578_v18, %v9010_v7 }
 0x317   : > { %v3515_v10 = vsel %vm3509_vm5, %v3466_v39, %v2770_v20  ;;  %v11182_v34 = vld [vmem:[#allocation7_spill] sm:$0xff]  ;;  %v11184_v20 = vld [vmem:[#allocation152_spill] sm:$0xff]  ;;  %v5024_v18 = vunpack.i.h.bf16 %v8399_v48 }
 0x318   : > { %v4692_v60 = vcombine.low %v3515_v10, %v3516_v8  ;;  %3307 = vrot.lane.b32.xlu0 %v3256_v19, %s5222_s21  ;;  %v2982_v42 = vpop.permute.xlu1 %2981  ;;  %v4862_v9 = vpack.c.bf16 %v4695_v4, %v4693_v30  ;;  %v11178_v8 = vld [vmem:[#allocation96_spill] sm:$0xff]  ;;  %v3421_v13 = vsel %vm3411_vm2, %v11183_v22, %v11182_v34  ;;  %v2576_v10 = vrot.slane %v11185_v40, 2 }
 0x319   : > { %v3567_v47 = vsel %vm3411_vm2, %v11180_v52, %v2982_v42  ;;  %v3470_v19 = vsel %vm3460_vm4, %v3421_v13, %v11184_v20 }
 0x31a   : > { %v2984_v36 = vpop.permute.xlu0 %2983  ;;  %v4864_v6 = vpack.c.bf16 %v4694_v57, %v4692_v60  ;;  %2803 = vrot.lane.b32.xlu1 %v8619_v41, %s5222_s21  ;;  %4863 = vmatprep.subr.bf16.mxu0 %v4862_v9  ;;  %v11186_v60 = vld [vmem:[#allocation73_spill] sm:$0xff] }
 0x31b   : > { %v3568_v11 = vsel %vm3411_vm2, %v11177_v33, %v2984_v36  ;;  %v11191_v33 = vld [vmem:[#allocation68_spill] sm:$0xff] }
 0x31c   : > { %3153 = vrot.lane.b32.xlu0 %v11168_v2, %s5221_s19  ;;  %4865 = vmatpush1.bf16.xpose.msra.mxu0 %v4864_v6  ;;  %v3130_v28 = vpop.permute.xlu1 %3129  ;;  %v5023_v2 = vunpack.i.l.bf16 %v8399_v48 }
 0x31d   : > { %v3615_v12 = vsel %vm3460_vm4, %v3567_v47, %v3130_v28 }
 0x31e   : > { %v3132_v23 = vpop.permute.xlu0 %3131  ;;  %3305 = vrot.lane.b32.xlu1 %v3257_v15, %s5222_s21  ;;  %v3420_v37 = vsel %vm3411_vm2, %v11037_v63, %v5023_v2  ;;  %v3471_v63 = vsel %vm3460_vm4, %v3422_v16, %v11179_v54  ;;  %v11187_v15 = vld [vmem:[#allocation198_spill] sm:$0xff]  ;;  %v11189_v16 = vld [vmem:[#allocation173_spill] sm:$0xff] }
 0x31f   : > { %v3616_v46 = vsel %vm3460_vm4, %v3568_v11, %v3132_v23  ;;  %v3469_v9 = vsel %vm3460_vm4, %v3420_v37, %v5053_v25  ;;  %v2575_v37 = vrot.slane %v11189_v16, 2  ;;  %v11190_v25 = vld [vmem:[#allocation200_spill] sm:$0xff] }
 0x320   : > { %2653 = vrot.lane.b32.xlu0 %v8610_v44, %s5221_s19  ;;  %v9002_v59 = vpop.permute.xlu1 %5076  ;;  %v3423_v11 = vsel %vm3411_vm2, %v11191_v33, %v11190_v25 }
 0x321   : > { %v5078_v49 = vunpack.i.l.bf16 %v9002_v59  ;;  %v5079_v54 = vunpack.i.h.bf16 %v9002_v59  ;;  %v11194_v59 = vld [vmem:[#allocation72_spill] sm:$0xff] }
 0x322   : > { %v3280_v43 = vpop.permute.xlu0 %3279  ;;  %3303 = vrot.lane.b32.xlu1 %v8921_v31, %s5222_s21 }
 0x323   : > { %v3663_v35 = vsel %vm3509_vm5, %v3615_v12, %v3280_v43  ;;  %v3566_v57 = vsel %vm3411_vm2, %v11186_v60, %v5078_v49  ;;  %v5120_v43 = vpack.i.bf16 %v11187_v15, %v2580_v53  ;;  %v5054_v49 = vunpack.i.h.bf16 %v11176_v27 }
 0x324   : > { %2801 = vrot.lane.b32.xlu0 %v11103_v62, %s5222_s21  ;;  %v3282_v45 = vpop.permute.xlu1 %3281 }
 0x325   : > { %v3664_v39 = vsel %vm3509_vm5, %v3616_v46, %v3282_v45  ;;  %v11193_v46 = vld [vmem:[#allocation148_spill] sm:$0xff] }
 0x326   : > { %v2778_v41 = vpop.permute.xlu0 %2777  ;;  %3013 = vrot.lane.b32.xlu1 %v9010_v7, %s5220_s22  ;;  %v4697_v36 = vcombine.low %v3663_v35, %v3664_v39  ;;  %v3472_v48 = vsel %vm3460_vm4, %v3423_v11, %v11193_v46  ;;  %v11195_v35 = vld [vmem:[#allocation101_spill] sm:$0xff]  ;;  %v11201_v11 = vld [vmem:[#allocation183_spill] sm:$0xff] }
 0x327   : > { %v3519_v4 = vsel %vm3509_vm5, %v3470_v19, %v2778_v41 }
 0x328   : > { %3015 = vrot.lane.b32.xlu0 %v8355_v58, %s5220_s22  ;;  %v2780_v61 = vpop.permute.xlu1 %2779 }
 0x329   : > { %v3520_v5 = vsel %vm3509_vm5, %v3471_v63, %v2780_v61  ;;  %v11188_v61 = vld [vmem:[#allocation93_spill] sm:$0xff]  ;;  %v11192_v63 = vld [vmem:[#allocation47_spill] sm:$0xff] }
 0x32a   : > { %v9016_v44 = vpop.permute.xlu0 %5081  ;;  %3161 = vrot.lane.b32.xlu1 %v11181_v56, %s5221_s19  ;;  %v4696_v6 = vcombine.low %v3519_v4, %v3520_v5  ;;  %v3819_v60 = vcombine.high %v3520_v5, %v3664_v39  ;;  %v11197_v4 = vld [vmem:[#allocation65_spill] sm:$0xff] }
 0x32b   : > { %v5083_v3 = vunpack.i.l.bf16 %v9016_v44 }
 0x32c   : > { %3163 = vrot.lane.b32.xlu0 %v11178_v8, %s5221_s19  ;;  %v5087_v29 = vpop.permute.xlu1 %5086 }
 0x32d   : > { %v5089_v30 = vunpack.i.h.bf16 %v5087_v29  ;;  %v5088_v14 = vunpack.i.l.bf16 %v5087_v29  ;;  %v3614_v42 = vsel %vm3460_vm4, %v3566_v57, %v5083_v3  ;;  %v5084_v3 = vunpack.i.h.bf16 %v9016_v44  ;;  %v11196_v29 = vld [vmem:[#allocation170_spill] sm:$0xff] }
 0x32e   : > { %v2986_v1 = vpop.permute.xlu0 %2985  ;;  %2661 = vrot.lane.b32.xlu1 %v2576_v10, %s5221_s19  ;;  %v2577_v44 = vsel %vm2538_vm1, %v2575_v37, %v2576_v10  ;;  %v11200_v37 = vld [vmem:[#allocation91_spill] sm:$0xff] }
 0x32f   : > { %v3662_v23 = vsel %vm3509_vm5, %v3614_v42, %v5088_v14  ;;  %v3518_v28 = vsel %vm3509_vm5, %v3469_v9, %v5089_v30  ;;  %v3569_v52 = vsel %vm3411_vm2, %v11192_v63, %v2986_v1  ;;  %v3424_v1 = vsel %vm3411_vm2, %v11194_v59, %v5024_v18 }
 0x330   : > { %2663 = vrot.lane.b32.xlu0 %v2580_v53, %s5221_s19  ;;  %v3134_v41 = vpop.permute.xlu1 %3133  ;;  %v4866_v2 = vpack.c.bf16 %v4697_v36, %v3662_v23  ;;  %v4868_v45 = vpack.c.bf16 %v4696_v6, %v3518_v28  ;;  %v3570_v53 = vsel %vm3411_vm2, %v11196_v29, %v5079_v54  ;;  %v5125_v30 = vpack.i.bf16 %v2577_v44, %v11197_v4 }
 0x331   : > { %v3617_v34 = vsel %vm3460_vm4, %v3569_v52, %v3134_v41  ;;  %v3473_v14 = vsel %vm3460_vm4, %v3424_v1, %v5054_v49  ;;  %v3618_v42 = vsel %vm3460_vm4, %v3570_v53, %v5084_v3  ;;  %v11198_v41 = vld [vmem:[#allocation177_spill] sm:$0xff]  ;;  %v11202_v49 = vld [vmem:[#allocation48_spill] sm:$0xff]  ;;  %v11204_v3 = vld [vmem:[#allocation98_spill] sm:$0xff] }
 0x332   : > { %v2782_v32 = vpop.permute.xlu0 %2781  ;;  %5121 = vrot.lane.b32.xlu1 %v5120_v43, %s5220_s22  ;;  %4867 = vmatprep.subr.bf16.mxu0 %v4866_v2  ;;  %v11199_v2 = vld [vmem:[#allocation9_spill] sm:$0xff]  ;;  %v11203_v52 = vld [vmem:[#allocation184_spill] sm:$0xff]  ;;  %v11208_v1 = vld [vmem:[#allocation126_spill] sm:$0xff] }
 0x333   : > { %4869 = vmatpush1.bf16.xpose.msra.mxu0 %v4868_v45  ;;  %v3521_v12 = vsel %vm3509_vm5, %v3472_v48, %v2782_v32 }
 0x334   : > { %3311 = vrot.lane.b32.xlu0 %v11188_v61, %s5222_s21  ;;  %v3284_v22 = vpop.permute.xlu1 %3283  ;;  %v4698_v32 = vcombine.low %v3819_v60, %v3521_v12 }
 0x335   : > { %v3665_v27 = vsel %vm3509_vm5, %v3617_v34, %v3284_v22  ;;  %v11205_v34 = vld [vmem:[#allocation51_spill] sm:$0xff]  ;;  %v11206_v22 = vld [vmem:[#allocation165_spill] sm:$0xff] }
 0x336   : > { %v5092_v47 = vpop.permute.xlu0 %5091  ;;  %v3821_v19 = vcombine.low %v3521_v12, %v3665_v27  ;;  %3313 = vrot.lane.b32.xlu1 %v11195_v35, %s5222_s21 }
 0x337   : > { %v5094_v13 = vunpack.i.h.bf16 %v5092_v47  ;;  %v5093_v20 = vunpack.i.l.bf16 %v5092_v47  ;;  %v5140_v47 = vpack.i.bf16 %v11178_v8, %v11203_v52  ;;  %v11273_v8 = vld [vmem:[#allocation5_spill] sm:$0xff] }
 0x338   : > { %2809 = vrot.lane.b32.xlu0 %v11174_v21, %s5222_s21  ;;  %v4699_v36 = vcombine.high %v3664_v39, %v3821_v19  ;;  %v2994_v6 = vpop.permute.xlu1 %2993  ;;  %v5130_v39 = vpack.i.bf16 %v11175_v38, %v11198_v41  ;;  %v11209_v19 = vld [vmem:[#allocation67_spill] sm:$0xff] }
 0x339   : > { %v3522_v9 = vsel %vm3509_vm5, %v3473_v14, %v5094_v13  ;;  %v3666_v10 = vsel %vm3509_vm5, %v3618_v42, %v5093_v20  ;;  %v3573_v54 = vsel %vm3411_vm2, %v11202_v49, %v2994_v6  ;;  %v3427_v13 = vsel %vm3411_vm2, %v11206_v22, %v11205_v34  ;;  %v11207_v20 = vld [vmem:[#allocation169_spill] sm:$0xff]  ;;  %v11211_v14 = vld [vmem:[#allocation10_spill] sm:$0xff]  ;;  %v11216_v49 = vld [vmem:[#allocation56_spill] sm:$0xff] }
 0x33a   : > { %v2642_v57 = vpop.permute.xlu0 %2641  ;;  %2811 = vrot.lane.b32.xlu1 %v11197_v4, %s5222_s21  ;;  %v4870_v5 = vpack.c.bf16 %v3666_v10, %v4699_v36  ;;  %v4872_v28 = vpack.c.bf16 %v3522_v9, %v4698_v32  ;;  %v3426_v44 = vsel %vm3411_vm2, %v11209_v19, %v11208_v1  ;;  %v11218_v34 = vld [vmem:[#allocation125_spill] sm:$0xff] }
 0x33b   : > { %v3476_v27 = vsel %vm3460_vm4, %v3427_v13, %v2642_v57  ;;  %v3475_v57 = vsel %vm3460_vm4, %v3426_v44, %v11211_v14  ;;  %v11220_v19 = vld [vmem:[#allocation17_spill] sm:$0xff] }
 0x33c   : > { %5126 = vrot.lane.b32.xlu0 %v5125_v30, %s5221_s19  ;;  %v2992_v43 = vpop.permute.xlu1 %2991  ;;  %4871 = vmatprep.subr.bf16.mxu0 %v4870_v5  ;;  %v11212_v5 = vld [vmem:[#allocation26_spill] sm:$0xff] }
 0x33d   : > { %4873 = vmatpush1.bf16.xpose.msra.mxu0 %v4872_v28 }
 0x33e   : > { %v3142_v23 = vpop.permute.xlu0 %3141  ;;  %5131 = vrot.lane.b32.xlu1 %v5130_v39, %s5222_s21  ;;  %v11213_v39 = vld [vmem:[#allocation122_spill] sm:$0xff] }
 0x33f   : > { %v3621_v46 = vsel %vm3460_vm4, %v3573_v54, %v3142_v23 }
 0x340   : > { %3017 = vrot.lane.b32.xlu0 %v11199_v2, %s5220_s22  ;;  %v2790_v18 = vpop.permute.xlu1 %2789 }
 0x341   : > { %v3525_v53 = vsel %vm3509_vm5, %v3476_v27, %v2790_v18  ;;  %v11215_v18 = vld [vmem:[#allocation167_spill] sm:$0xff] }
 0x342   : > { %v2990_v45 = vpop.permute.xlu0 %2989  ;;  %2665 = vrot.lane.b32.xlu1 %v9010_v7, %s5221_s19  ;;  %v5135_v7 = vpack.i.bf16 %v8355_v58, %v11204_v3  ;;  %v11210_v58 = vld [vmem:[#allocation172_spill] sm:$0xff] }
 0x343   : > { %v3571_v59 = vsel %vm3411_vm2, %v11207_v20, %v2990_v45  ;;  %v3572_v29 = vsel %vm3411_vm2, %v11210_v58, %v2992_v43  ;;  %v11214_v45 = vld [vmem:[#allocation201_spill] sm:$0xff]  ;;  %v11219_v20 = vld [vmem:[#allocation178_spill] sm:$0xff] }
 0x344   : > { %3165 = vrot.lane.b32.xlu0 %v11200_v37, %s5221_s19  ;;  %v3140_v33 = vpop.permute.xlu1 %3139 }
 0x345   : > { %v3620_v36 = vsel %vm3460_vm4, %v3572_v29, %v3140_v33  ;;  %v11221_v29 = vld [vmem:[#allocation190_spill] sm:$0xff] }
 0x346   : > { %v3292_v25 = vpop.permute.xlu0 %3291  ;;  %2813 = vrot.lane.b32.xlu1 %v11181_v56, %s5222_s21 }
 0x347   : > { %v3669_v12 = vsel %vm3509_vm5, %v3621_v46, %v3292_v25  ;;  %v3425_v25 = vsel %vm3411_vm2, %v11215_v18, %v11214_v45 }
 0x348   : > { %3315 = vrot.lane.b32.xlu0 %v11201_v11, %s5222_s21  ;;  %v2788_v48 = vpop.permute.xlu1 %2787  ;;  %v3829_v6 = vcombine.low %v3525_v53, %v3669_v12  ;;  %v3474_v54 = vsel %vm3460_vm4, %v3425_v25, %v11216_v49 }
 0x349   : > { %v3524_v32 = vsel %vm3509_vm5, %v3475_v57, %v2788_v48  ;;  %v11217_v48 = vld [vmem:[#allocation97_spill] sm:$0xff]  ;;  %v11223_v57 = vld [vmem:[#allocation203_spill] sm:$0xff] }
 0x34a   : > { %v3138_v63 = vpop.permute.xlu0 %3137  ;;  %5136 = vrot.lane.b32.xlu1 %v5135_v7, %s5221_s19 }
 0x34b   : > { %v3619_v60 = vsel %vm3460_vm4, %v3571_v59, %v3138_v63 }
 0x34c   : > { %5141 = vrot.lane.b32.xlu0 %v5140_v47, %s5222_s21  ;;  %v3290_v42 = vpop.permute.xlu1 %3289 }
 0x34d   : > { %v3668_v10 = vsel %vm3509_vm5, %v3620_v36, %v3290_v42  ;;  %v11224_v36 = vld [vmem:[#allocation74_spill] sm:$0xff]  ;;  %v11225_v42 = vld [vmem:[#allocation127_spill] sm:$0xff] }
 0x34e   : > { %v3288_v30 = vpop.permute.xlu0 %3287  ;;  %v3827_v23 = vcombine.high %v3524_v32, %v3668_v10  ;;  %v4703_v28 = vcombine.high %v3668_v10, %v3829_v6  ;;  %3025 = vrot.lane.b32.xlu1 %v11213_v39, %s5220_s22  ;;  %v3429_v6 = vsel %vm3411_vm2, %v11224_v36, %v11223_v57 }
 0x34f   : > { %v3667_v9 = vsel %vm3509_vm5, %v3619_v60, %v3288_v30  ;;  %v11222_v60 = vld [vmem:[#allocation186_spill] sm:$0xff] }
 0x350   : > { %2673 = vrot.lane.b32.xlu0 %v11212_v5, %s5221_s19  ;;  %v4701_v43 = vcombine.low %v3667_v9, %v3668_v10  ;;  %v2786_v63 = vpop.permute.xlu1 %2785  ;;  %v4702_v22 = vcombine.low %v3827_v23, %v3525_v53  ;;  %v5028_v9 = vunpack.i.l.bf16 %v11225_v42  ;;  %v11227_v23 = vld [vmem:[#allocation182_spill] sm:$0xff] }
 0x351   : > { %v3523_v46 = vsel %vm3509_vm5, %v3474_v54, %v2786_v63 }
 0x352   : > { %v2998_v33 = vpop.permute.xlu0 %2997  ;;  %v4874_v47 = vpack.c.bf16 %v4703_v28, %v4701_v43  ;;  %v4700_v7 = vcombine.low %v3523_v46, %v3524_v32  ;;  %3023 = vrot.lane.b32.xlu1 %v11218_v34, %s5220_s22  ;;  %v11226_v32 = vld [vmem:[#allocation84_spill] sm:$0xff]  ;;  %v11228_v28 = vld [vmem:[#allocation131_spill] sm:$0xff] }
 0x353   : > { %v3575_v10 = vsel %vm3411_vm2, %v11226_v32, %v2998_v33  ;;  %v3430_v43 = vsel %vm3411_vm2, %v11083_v26, %v11228_v28  ;;  %v11233_v28 = vld [vmem:[#allocation204_spill] sm:$0xff] }
 0x354   : > { %3173 = vrot.lane.b32.xlu0 %v11217_v48, %s5221_s19  ;;  %4875 = vmatprep.subr.bf16.mxu0 %v4874_v47  ;;  %v3000_v12 = vpop.permute.xlu1 %2999  ;;  %v4876_v27 = vpack.c.bf16 %v4702_v22, %v4700_v7 }
 0x356   : > { %v3146_v13 = vpop.permute.xlu0 %3145  ;;  %2671 = vrot.lane.b32.xlu1 %v11187_v15, %s5221_s19  ;;  %4877 = vmatpush1.bf16.xpose.msra.mxu0 %v4876_v27  ;;  %v11230_v27 = vld [vmem:[#allocation78_spill] sm:$0xff] }
 0x357   : > { %v3623_v45 = vsel %vm3460_vm4, %v3575_v10, %v3146_v13 }
 0x358   : > { %2821 = vrot.lane.b32.xlu0 %v11219_v20, %s5222_s21  ;;  %v3148_v1 = vpop.permute.xlu1 %3147 }
 0x35a   : > { %v2646_v59 = vpop.permute.xlu0 %2645  ;;  %3021 = vrot.lane.b32.xlu1 %v11212_v5, %s5220_s22  ;;  %v3576_v5 = vsel %vm3411_vm2, %v11164_v24, %v3000_v12 }
 0x35b   : > { %v3624_v18 = vsel %vm3460_vm4, %v3576_v5, %v3148_v1  ;;  %v3478_v33 = vsel %vm3460_vm4, %v3429_v6, %v2646_v59  ;;  %v3428_v59 = vsel %vm3411_vm2, %v11230_v27, %v5028_v9  ;;  %v11231_v1 = vld [vmem:[#allocation83_spill] sm:$0xff]  ;;  %v11232_v9 = vld [vmem:[#allocation189_spill] sm:$0xff] }
 0x35c   : > { %3171 = vrot.lane.b32.xlu0 %v11220_v19, %s5221_s19  ;;  %v2648_v58 = vpop.permute.xlu1 %2647 }
 0x35d   : > { %v3479_v24 = vsel %vm3460_vm4, %v3430_v43, %v2648_v58 }
 0x35e   : > { %v9159_v44 = vpop.permute.xlu0 %5096  ;;  %3323 = vrot.lane.b32.xlu1 %v11221_v29, %s5222_s21  ;;  %v11263_v29 = vld [vmem:[#allocation206_spill] sm:$0xff] }
 0x35f   : > { %v5098_v25 = vunpack.i.l.bf16 %v9159_v44 }
 0x360   : > { %2819 = vrot.lane.b32.xlu0 %v11204_v3, %s5222_s21  ;;  %v3296_v15 = vpop.permute.xlu1 %3295 }
 0x361   : > { %v3671_v49 = vsel %vm3509_vm5, %v3623_v45, %v3296_v15  ;;  %v3574_v58 = vsel %vm3411_vm2, %v11231_v1, %v5098_v25  ;;  %v11235_v25 = vld [vmem:[#allocation132_spill] sm:$0xff] }
 0x362   : > { %v3298_v53 = vpop.permute.xlu0 %3297  ;;  %3169 = vrot.lane.b32.xlu1 %v11219_v20, %s5221_s19  ;;  %v3434_v20 = vsel %vm3411_vm2, %v11102_v51, %v11263_v29 }
 0x363   : > { %v3672_v54 = vsel %vm3509_vm5, %v3624_v18, %v3298_v53  ;;  %v11234_v18 = vld [vmem:[#allocation191_spill] sm:$0xff] }
 0x364   : > { %3321 = vrot.lane.b32.xlu0 %v11222_v60, %s5222_s21  ;;  %v2794_v14 = vpop.permute.xlu1 %2793  ;;  %v4705_v53 = vcombine.low %v3671_v49, %v3672_v54  ;;  %v11237_v49 = vld [vmem:[#allocation171_spill] sm:$0xff] }
 0x365   : > { %v3527_v26 = vsel %vm3509_vm5, %v3478_v33, %v2794_v14  ;;  %v11236_v33 = vld [vmem:[#allocation80_spill] sm:$0xff] }
 0x366   : > { %v2796_v30 = vpop.permute.xlu0 %2795  ;;  %2669 = vrot.lane.b32.xlu1 %v11199_v2, %s5221_s19  ;;  %v11229_v2 = vld [vmem:[#allocation199_spill] sm:$0xff] }
 0x367   : > { %v3528_v47 = vsel %vm3509_vm5, %v3479_v24, %v2796_v30  ;;  %v3431_v24 = vsel %vm3411_vm2, %v11236_v33, %v11235_v25  ;;  %v11242_v25 = vld [vmem:[#allocation102_spill] sm:$0xff] }
 0x368   : > { %3319 = vrot.lane.b32.xlu0 %v11227_v23, %s5222_s21  ;;  %v5102_v46 = vpop.permute.xlu1 %5101  ;;  %v4704_v15 = vcombine.low %v3527_v26, %v3528_v47 }
 0x369   : > { %v5104_v13 = vunpack.i.h.bf16 %v5102_v46  ;;  %v5103_v12 = vunpack.i.l.bf16 %v5102_v46  ;;  %v11238_v46 = vld [vmem:[#allocation123_spill] sm:$0xff] }
 0x36a   : > { %v5107_v63 = vpop.permute.xlu0 %5106  ;;  %2817 = vrot.lane.b32.xlu1 %v11200_v37, %s5222_s21 }
 0x36b   : > { %v5109_v7 = vunpack.i.h.bf16 %v5107_v63  ;;  %v5108_v22 = vunpack.i.l.bf16 %v5107_v63  ;;  %v3622_v14 = vsel %vm3460_vm4, %v3574_v58, %v5103_v12  ;;  %v3477_v57 = vsel %vm3460_vm4, %v3428_v59, %v5104_v13 }
 0x36c   : > { %3029 = vrot.lane.b32.xlu0 %v11229_v2, %s5220_s22  ;;  %v3002_v36 = vpop.permute.xlu1 %3001  ;;  %v5099_v59 = vunpack.i.h.bf16 %v9159_v44  ;;  %v11240_v44 = vld [vmem:[#allocation49_spill] sm:$0xff] }
 0x36d   : > { %v3670_v6 = vsel %vm3509_vm5, %v3622_v14, %v5108_v22  ;;  %v3526_v32 = vsel %vm3509_vm5, %v3477_v57, %v5109_v7  ;;  %v3577_v63 = vsel %vm3411_vm2, %v11237_v49, %v3002_v36  ;;  %v11239_v7 = vld [vmem:[#allocation119_spill] sm:$0xff]  ;;  %v3835_v57 = vcombine.high %v3528_v47, %v3672_v54 }
 0x36e   : > { %v2650_v30 = vpop.permute.xlu0 %2649  ;;  %v4878_v10 = vpack.c.bf16 %v4705_v53, %v3670_v6  ;;  %v4880_v5 = vpack.c.bf16 %v4704_v15, %v3526_v32  ;;  %3031 = vrot.lane.b32.xlu1 %v11233_v28, %s5220_s22  ;;  %v5145_v22 = vpack.i.bf16 %v11239_v7, %v11238_v46  ;;  %v3578_v6 = vsel %vm3411_vm2, %v11240_v44, %v5099_v59  ;;  %v11245_v59 = vld [vmem:[#allocation34_spill] sm:$0xff] }
 0x36f   : > { %v3480_v13 = vsel %vm3460_vm4, %v3431_v24, %v2650_v30  ;;  %v11243_v24 = vld [vmem:[#allocation187_spill] sm:$0xff] }
 0x370   : > { %3177 = vrot.lane.b32.xlu0 %v11232_v9, %s5221_s19  ;;  %4879 = vmatprep.subr.bf16.mxu0 %v4878_v10  ;;  %v3150_v45 = vpop.permute.xlu1 %3149 }
 0x371   : > { %4881 = vmatpush1.bf16.xpose.msra.mxu0 %v4880_v5  ;;  %v3625_v12 = vsel %vm3460_vm4, %v3577_v63, %v3150_v45  ;;  %v11241_v5 = vld [vmem:[#allocation18_spill] sm:$0xff] }
 0x372   : > { %v2798_v43 = vpop.permute.xlu0 %2797  ;;  %3179 = vrot.lane.b32.xlu1 %v11234_v18, %s5221_s19 }
 0x373   : > { %v3529_v1 = vsel %vm3509_vm5, %v3480_v13, %v2798_v43 }
 0x374   : > { %2677 = vrot.lane.b32.xlu0 %v11213_v39, %s5221_s19  ;;  %v3300_v27 = vpop.permute.xlu1 %3299  ;;  %v5029_v39 = vunpack.i.h.bf16 %v11225_v42  ;;  %v4706_v43 = vcombine.low %v3835_v57, %v3529_v1  ;;  %v11248_v57 = vld [vmem:[#allocation35_spill] sm:$0xff] }
 0x375   : > { %v3673_v58 = vsel %vm3509_vm5, %v3625_v12, %v3300_v27 }
 0x376   : > { %v5112_v26 = vpop.permute.xlu0 %5111  ;;  %v3837_v53 = vcombine.low %v3529_v1, %v3673_v58  ;;  %2679 = vrot.lane.b32.xlu1 %v11238_v46, %s5221_s19  ;;  %v3432_v42 = vsel %vm3411_vm2, %v11095_v55, %v5029_v39  ;;  %v9244_v55 = vld [vmem:[%s9958_s1 + $0x1] ss:$0 sm:$0xff]  ;;  %v11244_v46 = vld [vmem:[#allocation188_spill] sm:$0xff]  ;;  %v9257_v39 = vld [vmem:[%s9958_s1] ss:$0 sm:$0xff] }
 0x377   : > { %v5114_v15 = vunpack.i.h.bf16 %v5112_v26  ;;  %v5113_v14 = vunpack.i.l.bf16 %v5112_v26  ;;  %v944_v49 = vmul.f32 %v9244_v55, %v11243_v24  ;;  %v603_v1 = vmul.f32 %v9257_v39, %v11245_v59  ;;  %v9264_v58 = vld [vmem:[%s9958_s1 + $0x2] ss:$0 sm:$0xff] }
 0x378   : > { %5146 = vrot.lane.b32.xlu0 %v5145_v22, %s5220_s22  ;;  %v5117_v36 = vpop.permute.xlu1 %5116  ;;  %v4707_v45 = vcombine.high %v3672_v54, %v3837_v53  ;;  %v943_v22 = vmul.f32 %v9244_v55, %v11244_v46  ;;  %v11246_v53 = vld [vmem:[#allocation85_spill] sm:$0xff] }
 0x379   : > { %v5119_v32 = vunpack.i.h.bf16 %v5117_v36  ;;  %v5118_v10 = vunpack.i.l.bf16 %v5117_v36  ;;  %v3626_v33 = vsel %vm3460_vm4, %v3578_v6, %v5113_v14  ;;  %v3481_v47 = vsel %vm3460_vm4, %v3432_v42, %v5114_v15  ;;  %v11247_v14 = vld [vmem:[#allocation104_spill] sm:$0xff]  ;;  %v11249_v42 = vld [vmem:[#allocation81_spill] sm:$0xff] }
 0x37a   : > { %v9229_v30 = vpop.permute.xlu0 %3009  ;;  %3327 = vrot.lane.b32.xlu1 %v11242_v25, %s5222_s21  ;;  %v1285_v15 = vmul.f32 %v9264_v58, %v11246_v53  ;;  %v602_v36 = vmul.f32 %v9257_v39, %v11248_v57  ;;  %v1284_v44 = vmul.f32 %v9264_v58, %v11249_v42  ;;  %v1000_v6 = vadd.f32 %v944_v49, %v603_v1  ;;  %v9285_v49 = vld [vmem:[%s9958_s1 + $0x3] ss:$0 sm:$0xff]  ;;  %v11253_v53 = vld [vmem:[#allocation124_spill] sm:$0xff] }
 0x37b   : > { %v3674_v26 = vsel %vm3509_vm5, %v3626_v33, %v5118_v10  ;;  %v3530_v54 = vsel %vm3509_vm5, %v3481_v47, %v5119_v32  ;;  %v11250_v10 = vld [vmem:[#allocation103_spill] sm:$0xff]  ;;  %v5150_v47 = vpack.i.bf16 %v11218_v34, %v11247_v14  ;;  %v11254_v57 = vld [vmem:[#allocation146_spill] sm:$0xff]  ;;  %v3581_v56 = vsel %vm3411_vm2, %v8921_v31, %v9229_v30 }
 0x37c   : > { %3329 = vrot.lane.b32.xlu0 %v11241_v5, %s5222_s21  ;;  %v9252_v13 = vpop.permute.xlu1 %2657  ;;  %v4882_v12 = vpack.c.bf16 %v3674_v26, %v4707_v45  ;;  %v4884_v27 = vpack.c.bf16 %v3530_v54, %v4706_v43  ;;  %v5155_v43 = vpack.i.bf16 %v11220_v19, %v11250_v10  ;;  %v999_v45 = vadd.f32 %v943_v22, %v602_v36  ;;  %v11251_v54 = vld [vmem:[#allocation36_spill] sm:$0xff]  ;;  %v11252_v22 = vld [vmem:[#allocation37_spill] sm:$0xff]  ;;  %v11261_v19 = vld [vmem:[#allocation106_spill] sm:$0xff] }
 0x37d   : > { %v1341_v24 = vadd.f32 %v1285_v15, %v1000_v6  ;;  %v1424_v46 = vmul.f32 %v9285_v49, %v11251_v54  ;;  %v9298_v15 = vld [vmem:[%s9958_s1 + $0x4] ss:$0 sm:$0xff]  ;;  %v11258_v5 = vld [vmem:[#allocation192_spill] sm:$0xff] }
 0x37e   : > { %v3008_v63 = vpop.permute.xlu0 %3007  ;;  %2825 = vrot.lane.b32.xlu1 %v11217_v48, %s5222_s21  ;;  %4883 = vmatprep.subr.bf16.mxu0 %v4882_v12  ;;  %v1340_v26 = vadd.f32 %v1284_v44, %v999_v45  ;;  %v1557_v36 = vmul.f32 %v9298_v15, %v11254_v57  ;;  %v11255_v44 = vld [vmem:[#allocation194_spill] sm:$0xff]  ;;  %v11256_v45 = vld [vmem:[#allocation175_spill] sm:$0xff] }
 0x37f   : > { %4885 = vmatpush1.bf16.xpose.msra.mxu0 %v4884_v27  ;;  %v1423_v27 = vmul.f32 %v9285_v49, %v11252_v22  ;;  %v1480_v34 = vadd.f32 %v1424_v46, %v1341_v24  ;;  %v1556_v6 = vmul.f32 %v9298_v15, %v11255_v44  ;;  %v11259_v48 = vld [vmem:[#allocation94_spill] sm:$0xff] }
 0x380   : > { %2827 = vrot.lane.b32.xlu0 %v11247_v14, %s5222_s21  ;;  %v3158_v33 = vpop.permute.xlu1 %3157  ;;  %v9320_v14 = vld [vmem:[%s9958_s1 + $0x6] ss:$0 sm:$0xff] }
 0x381   : > { %v1479_v1 = vadd.f32 %v1423_v27, %v1340_v26  ;;  %v1613_v24 = vadd.f32 %v1557_v36, %v1480_v34  ;;  %v11257_v26 = vld [vmem:[#allocation54_spill] sm:$0xff]  ;;  %v1829_v25 = vmul.f32 %v9320_v14, %v11259_v48  ;;  %v11260_v34 = vld [vmem:[#allocation92_spill] sm:$0xff] }
 0x382   : > { %v2656_v32 = vpop.permute.xlu0 %2655  ;;  %5151 = vrot.lane.b32.xlu1 %v5150_v47, %s5221_s19  ;;  %v1828_v36 = vmul.f32 %v9320_v14, %v11260_v34 }
 0x383   : > { %v1612_v27 = vadd.f32 %v1556_v6, %v1479_v1  ;;  %v11262_v6 = vld [vmem:[#allocation205_spill] sm:$0xff] }
 0x384   : > { %5156 = vrot.lane.b32.xlu0 %v5155_v43, %s5222_s21  ;;  %v2806_v59 = vpop.permute.xlu1 %2805 }
 0x386   : > { %v3006_v12 = vpop.permute.xlu0 %3005  ;;  %3033 = vrot.lane.b32.xlu1 %v11253_v53, %s5220_s22 }
 0x388   : > { %2681 = vrot.lane.b32.xlu0 %v11229_v2, %s5221_s19  ;;  %v3156_v43 = vpop.permute.xlu1 %3155  ;;  %v9307_v2 = vld [vmem:[%s9958_s1 + $0x5] ss:$0 sm:$0xff] }
 0x389   : > { %v1690_v47 = vmul.f32 %v9307_v2, %v11256_v45  ;;  %v1689_v46 = vmul.f32 %v9307_v2, %v11257_v26 }
 0x38a   : > { %v3308_v42 = vpop.permute.xlu0 %3307  ;;  %3181 = vrot.lane.b32.xlu1 %v11258_v5, %s5221_s19  ;;  %v3580_v5 = vsel %vm3411_vm2, %v8938_v50, %v3008_v63  ;;  %v11265_v50 = vld [vmem:[#allocation207_spill] sm:$0xff]  ;;  %v11267_v63 = vld [vmem:[#allocation29_spill] sm:$0xff] }
 0x38b   : > { %v1746_v3 = vadd.f32 %v1690_v47, %v1613_v24  ;;  %v1745_v1 = vadd.f32 %v1689_v46, %v1612_v27  ;;  %v3483_v46 = vsel %vm3460_vm4, %v3434_v20, %v2656_v32  ;;  %v3628_v27 = vsel %vm3460_vm4, %v3580_v5, %v3156_v43  ;;  %v11266_v20 = vld [vmem:[#allocation99_spill] sm:$0xff]  ;;  %v11268_v32 = vld [vmem:[#allocation130_spill] sm:$0xff] }
 0x38c   : > { %2829 = vrot.lane.b32.xlu0 %v11232_v9, %s5222_s21  ;;  %v2804_v9 = vpop.permute.xlu1 %2803 }
 0x38d   : > { %v1885_v10 = vadd.f32 %v1829_v25, %v1746_v3  ;;  %v1884_v24 = vadd.f32 %v1828_v36, %v1745_v1  ;;  %v11264_v25 = vld [vmem:[#allocation138_spill] sm:$0xff]  ;;  %v3532_v31 = vsel %vm3509_vm5, %v3483_v46, %v2804_v9  ;;  %v3579_v36 = vsel %vm3411_vm2, %v11169_v17, %v3006_v12 }
 0x38e   : > { %v3154_v60 = vpop.permute.xlu0 %3153  ;;  %3049 = vrot.lane.b32.xlu1 %v11262_v6, %s5220_s22  ;;  %v3435_v51 = vsel %vm3411_vm2, %v11103_v62, %v11264_v25  ;;  %v3433_v62 = vsel %vm3411_vm2, %v11096_v0, %v11267_v63  ;;  %v9372_v0 = vld [vmem:[%s9958_s1 + $0x8] ss:$0 sm:$0xff]  ;;  %v11271_v63 = vld [vmem:[#allocation181_spill] sm:$0xff] }
 0x38f   : > { %v3627_v25 = vsel %vm3460_vm4, %v3579_v36, %v3154_v60  ;;  %v2094_v17 = vmul.f32 %v9372_v0, %v11271_v63 }
 0x390   : > { %3331 = vrot.lane.b32.xlu0 %v11261_v19, %s5222_s21  ;;  %v3629_v19 = vsel %vm3460_vm4, %v3581_v56, %v3158_v33  ;;  %v3306_v3 = vpop.permute.xlu1 %3305  ;;  %v9352_v56 = vld [vmem:[%s9958_s1 + $0x7] ss:$0 sm:$0xff]  ;;  %v11269_v33 = vld [vmem:[#allocation179_spill] sm:$0xff] }
 0x391   : > { %v3677_v29 = vsel %vm3509_vm5, %v3629_v19, %v3308_v42  ;;  %v3676_v30 = vsel %vm3509_vm5, %v3628_v27, %v3306_v3  ;;  %v1962_v5 = vmul.f32 %v9352_v56, %v11266_v20  ;;  %v3484_v19 = vsel %vm3460_vm4, %v3435_v51, %v9252_v13  ;;  %v11270_v13 = vld [vmem:[#allocation23_spill] sm:$0xff] }
 0x392   : > { %v2654_v47 = vpop.permute.xlu0 %2653  ;;  %v3843_v9 = vcombine.high %v3532_v31, %v3676_v30  ;;  %2697 = vrot.lane.b32.xlu1 %v11268_v32, %s5221_s19  ;;  %v1961_v42 = vmul.f32 %v9352_v56, %v11269_v33  ;;  %v3533_v43 = vsel %vm3509_vm5, %v3484_v19, %v2806_v59  ;;  %v2095_v27 = vmul.f32 %v9372_v0, %v11270_v13 }
 0x393   : > { %v3482_v1 = vsel %vm3460_vm4, %v3433_v62, %v2654_v47  ;;  %v3845_v3 = vcombine.low %v3533_v43, %v3677_v29  ;;  %v11272_v62 = vld [vmem:[#allocation128_spill] sm:$0xff]  ;;  %v2018_v29 = vadd.f32 %v1962_v5, %v1885_v10  ;;  %v9392_v10 = vld [vmem:[%s9959_s2] ss:$0 sm:$0xff] }
 0x394   : > { %3047 = vrot.lane.b32.xlu0 %v11265_v50, %s5220_s22  ;;  %v3304_v51 = vpop.permute.xlu1 %3303  ;;  %v4710_v19 = vcombine.low %v3843_v9, %v3533_v43  ;;  %v2017_v60 = vadd.f32 %v1961_v42, %v1884_v24  ;;  %v11276_v5 = vld [vmem:[#allocation134_spill] sm:$0xff] }
 0x395   : > { %v3675_v12 = vsel %vm3509_vm5, %v3627_v25, %v3304_v51  ;;  %v4711_v32 = vcombine.high %v3676_v30, %v3845_v3  ;;  %v2151_v52 = vadd.f32 %v2095_v27, %v2018_v29  ;;  %v11274_v25 = vld [vmem:[#allocation193_spill] sm:$0xff] }
 0x396   : > { %v2802_v46 = vpop.permute.xlu0 %2801  ;;  %v4709_v6 = vcombine.low %v3675_v12, %v3676_v30  ;;  %3197 = vrot.lane.b32.xlu1 %v11273_v8, %s5221_s19  ;;  %v2150_v37 = vadd.f32 %v2094_v17, %v2017_v60  ;;  %v11282_v29 = vld [vmem:[#allocation137_spill] sm:$0xff] }
 0x397   : > { %v3531_v59 = vsel %vm3509_vm5, %v3482_v1, %v2802_v46  ;;  %v2214_v24 = vadd.f32 %v9392_v10, %v2151_v52  ;;  %v11280_v52 = vld [vmem:[#allocation111_spill] sm:$0xff] }
 0x398   : > { %v4708_v47 = vcombine.low %v3531_v59, %v3532_v31  ;;  %2695 = vrot.lane.b32.xlu0 %v11272_v62, %s5221_s19  ;;  %v3014_v1 = vpop.permute.xlu1 %3013  ;;  %v4886_v46 = vpack.c.bf16 %v4711_v32, %v4709_v6  ;;  %v11275_v31 = vld [vmem:[#allocation108_spill] sm:$0xff]  ;;  %v2213_v6 = vadd.f32 %v9392_v10, %v2150_v37  ;;  %v11277_v32 = vld [vmem:[#allocation195_spill] sm:$0xff]  ;;  %v11279_v59 = vld [vmem:[#allocation110_spill] sm:$0xff]  ;;  %v5165_v17 = vpack.i.bf16 %v11234_v18, %v11280_v52 }
 0x399   : > { %v9402_v3 = vmax.f32 %v2214_v24, 0.0  ;;  %v11285_v52 = vld [vmem:[#allocation208_spill] sm:$0xff]  ;;  %v11287_v62 = vld [vmem:[#allocation95_spill] sm:$0xff] }
 0x39a   : > { %v3016_v36 = vpop.permute.xlu0 %3015  ;;  %v4888_v11 = vpack.c.bf16 %v4710_v19, %v4708_v47  ;;  %2845 = vrot.lane.b32.xlu1 %v11275_v31, %s5222_s21  ;;  %4887 = vmatprep.subr.bf16.mxu0 %v4886_v46  ;;  %v9404_v51 = vmax.f32 %v2213_v6, 0.0  ;;  %v9421_v19 = vld [vmem:[%s9960_s3 + $0x10] sm:$0xff]  ;;  %v946_v46 = vmul.f32 %v9244_v55, %v11254_v57  ;;  %v1287_v57 = vmul.f32 %v9264_v58, %v11256_v45  ;;  %v11288_v45 = vld [vmem:[#allocation202_spill] sm:$0xff] }
 0x39b   : > { %11281 = vst [vmem:[#allocation4_spill] sm:$0xff] %v9421_v19  ;;  %4824 = vmatprep.mubr.msk.f32.mxu1 %vm3411_vm2, %v9421_v19 }
 0x39c   : > { %3195 = vrot.lane.b32.xlu0 %v11274_v25, %s5221_s19  ;;  %4889 = vmatpush1.bf16.xpose.msra.mxu0 %v4888_v11  ;;  %v3162_v9 = vpop.permute.xlu1 %3161  ;;  %v11278_v11 = vld [vmem:[#allocation162_spill] sm:$0xff]  ;;  %v2906_v47 = vrot.slane %v9404_v51, 1  ;;  %v5170_v6 = vpack.i.bf16 %v11265_v50, %v9404_v51 }
 0x39d   : > { %v5160_v27 = vpack.i.bf16 %v11233_v28, %v11278_v11  ;;  %v9416_v28 = vrot.slane %v9402_v3, 1  ;;  %4825 = vmatmul.mubr.msk.f32.vlgmr.msra.gmra.mrb[0].mxu1 %vm3411_vm2, %v9421_v19 }
 0x39e   : > { %v3164_v30 = vpop.permute.xlu0 %3163  ;;  %3347 = vrot.lane.b32.xlu1 %v11277_v32, %s5222_s21  ;;  %v605_v32 = vmul.f32 %v9257_v39, %v11251_v54  ;;  %v3583_v54 = vsel %vm3411_vm2, %v11287_v62, %v3014_v1 }
 0x39f   : > { %v3631_v1 = vsel %vm3460_vm4, %v3583_v54, %v3162_v9 }
 0x3a0   : > { %2843 = vrot.lane.b32.xlu0 %v11276_v5, %s5222_s21  ;;  %v2662_v43 = vpop.permute.xlu1 %2661  ;;  %v1002_v18 = vadd.f32 %v946_v46, %v605_v32 }
 0x3a2   : > { %v2664_v42 = vpop.permute.xlu0 %2663  ;;  %5161 = vrot.lane.b32.xlu1 %v5160_v27, %s5221_s19  ;;  %v11283_v27 = vld [vmem:[#allocation129_spill] sm:$0xff] }
 0x3a4   : > { %3345 = vrot.lane.b32.xlu0 %v11279_v59, %s5222_s21  ;;  %v9411_v12 = vpop.permute.xlu1 %5121  ;;  %v5033_v59 = vunpack.i.l.bf16 %v11285_v52 }
 0x3a5   : > { %v5123_v32 = vunpack.i.l.bf16 %v9411_v12 }
 0x3a6   : > { %v3312_v37 = vpop.permute.xlu0 %3311  ;;  %3051 = vrot.lane.b32.xlu1 %v11282_v29, %s5220_s22 }
 0x3a8   : > { %5166 = vrot.lane.b32.xlu0 %v5165_v17, %s5222_s21  ;;  %v3314_v24 = vpop.permute.xlu1 %3313  ;;  %v9437_v17 = vsel %vm2321_vm0, %v2906_v47, %v9416_v28 }
 0x3a9   : > { %11284 = vst [vmem:[#allocation31_spill] sm:$0xff] %v9437_v17  ;;  %v5175_v5 = vpack.i.bf16 %v11274_v25, %v9437_v17 }
 0x3aa   : > { %v2810_v60 = vpop.permute.xlu0 %2809  ;;  %5171 = vrot.lane.b32.xlu1 %v5170_v6, %s5221_s19  ;;  %v3584_v6 = vsel %vm3411_vm2, %v11198_v41, %v3016_v36 }
 0x3ab   : > { %v3632_v46 = vsel %vm3460_vm4, %v3584_v6, %v3164_v30  ;;  %v1426_v30 = vmul.f32 %v9285_v49, %v11259_v48 }
 0x3ac   : > { %3041 = vrot.lane.b32.xlu0 %v11283_v27, %s5220_s22  ;;  %v2812_v50 = vpop.permute.xlu1 %2811  ;;  %v11286_v27 = vld [vmem:[#allocation50_spill] sm:$0xff]  ;;  %v9465_v41 = vsel %vm3509_vm5, %v3632_v46, %v3314_v24  ;;  %v1343_v46 = vadd.f32 %v1287_v57, %v1002_v18  ;;  %v945_v18 = vmul.f32 %v9244_v55, %v11255_v44  ;;  %v604_v44 = vmul.f32 %v9257_v39, %v11252_v22 }
 0x3ad   : > { %v3438_v47 = vsel %vm3411_vm2, %v11175_v38, %v11286_v27  ;;  %v11289_v38 = vld [vmem:[#allocation135_spill] sm:$0xff] }
 0x3ae   : > { %v5127_v19 = vpop.permute.xlu0 %5126  ;;  %v3487_v31 = vsel %vm3460_vm4, %v3438_v47, %v2664_v42  ;;  %5176 = vrot.lane.b32.xlu1 %v5175_v5, %s5222_s21  ;;  %v3437_v62 = vsel %vm3411_vm2, %v11185_v40, %v11289_v38  ;;  %v3436_v42 = vsel %vm3411_vm2, %v11189_v16, %v5033_v59  ;;  %v11290_v47 = vld [vmem:[#allocation100_spill] sm:$0xff]  ;;  %v1559_v38 = vmul.f32 %v9298_v15, %v11266_v20  ;;  %v11294_v20 = vld [vmem:[#allocation209_spill] sm:$0xff] }
 0x3af   : > { %v5129_v17 = vunpack.i.h.bf16 %v5127_v19  ;;  %v5128_v25 = vunpack.i.l.bf16 %v5127_v19  ;;  %v9468_v36 = vsel %vm3509_vm5, %v3487_v31, %v2812_v50  ;;  %v3486_v5 = vsel %vm3460_vm4, %v3437_v62, %v2662_v43  ;;  %v11291_v50 = vld [vmem:[#allocation107_spill] sm:$0xff]  ;;  %v11292_v16 = vld [vmem:[#allocation28_spill] sm:$0xff] }
 0x3b0   : > { %2689 = vrot.lane.b32.xlu0 %v11288_v45, %s5221_s19  ;;  %v3679_v19 = vsel %vm3509_vm5, %v3631_v1, %v3312_v37  ;;  %v5132_v40 = vpop.permute.xlu1 %5131  ;;  %v3582_v9 = vsel %vm3411_vm2, %v11290_v47, %v5123_v32  ;;  %v3535_v24 = vsel %vm3509_vm5, %v3486_v5, %v2810_v60  ;;  %v3439_v57 = vsel %vm3411_vm2, %v11174_v21, %v11294_v20 }
 0x3b1   : > { %v5134_v54 = vunpack.i.h.bf16 %v5132_v40  ;;  %v5133_v31 = vunpack.i.l.bf16 %v5132_v40  ;;  %v4713_v48 = vcombine.low %v3679_v19, %v9465_v41  ;;  %v4712_v6 = vcombine.low %v3535_v24, %v9468_v36  ;;  %v11293_v19 = vld [vmem:[#allocation133_spill] sm:$0xff] }
 0x3b2   : > { %v3018_v27 = vpop.permute.xlu0 %3017  ;;  %3039 = vrot.lane.b32.xlu1 %v11292_v16, %s5220_s22  ;;  %v3630_v43 = vsel %vm3460_vm4, %v3582_v9, %v5128_v25  ;;  %v3485_v59 = vsel %vm3460_vm4, %v3436_v42, %v5129_v17  ;;  %v1482_v40 = vadd.f32 %v1426_v30, %v1343_v46  ;;  %v1692_v25 = vmul.f32 %v9307_v2, %v11270_v13 }
 0x3b3   : > { %v3678_v32 = vsel %vm3509_vm5, %v3630_v43, %v5133_v31  ;;  %v3534_v60 = vsel %vm3509_vm5, %v3485_v59, %v5134_v54  ;;  %v3585_v17 = vsel %vm3411_vm2, %v11188_v61, %v3018_v27  ;;  %v9506_v13 = vrot.slane %v9402_v3, 2  ;;  %v11295_v61 = vld [vmem:[#allocation161_spill] sm:$0xff]  ;;  %v11296_v31 = vld [vmem:[#allocation6_spill] sm:$0xff] }
 0x3b4   : > { %3189 = vrot.lane.b32.xlu0 %v11291_v50, %s5221_s19  ;;  %v2666_v62 = vpop.permute.xlu1 %2665  ;;  %v4890_v1 = vpack.c.bf16 %v4713_v48, %v3678_v32  ;;  %v4892_v5 = vpack.c.bf16 %v4712_v6, %v3534_v60  ;;  %v1615_v47 = vadd.f32 %v1559_v38, %v1482_v40  ;;  %v1831_v27 = vmul.f32 %v9320_v14, %v11295_v61 }
 0x3b5   : > { %v1286_v21 = vmul.f32 %v9264_v58, %v11257_v26  ;;  %v1964_v48 = vmul.f32 %v9352_v56, %v11296_v31  ;;  %v5034_v6 = vunpack.i.h.bf16 %v11285_v52  ;;  %v5124_v43 = vunpack.i.h.bf16 %v9411_v12  ;;  %v11297_v26 = vld [vmem:[#allocation25_spill] sm:$0xff]  ;;  %v11298_v12 = vld [vmem:[#allocation2_spill] sm:$0xff] }
 0x3b6   : > { %v3166_v37 = vpop.permute.xlu0 %3165  ;;  %2687 = vrot.lane.b32.xlu1 %v11239_v7, %s5221_s19  ;;  %4891 = vmatprep.subr.bf16.mxu0 %v4890_v1  ;;  %v3488_v7 = vsel %vm3460_vm4, %v3439_v57, %v2666_v62  ;;  %v1748_v54 = vadd.f32 %v1692_v25, %v1615_v47  ;;  %v1001_v39 = vadd.f32 %v945_v18, %v604_v44 }
 0x3b7   : > { %v3633_v42 = vsel %vm3460_vm4, %v3585_v17, %v3166_v37  ;;  %4893 = vmatpush1.bf16.xpose.msra.mxu0 %v4892_v5  ;;  %v2097_v37 = vmul.f32 %v9372_v0, %v11297_v26  ;;  %v3851_v62 = vcombine.high %v9468_v36, %v9465_v41  ;;  %v3440_v40 = vsel %vm3411_vm2, %v11197_v4, %v5034_v6  ;;  %v11299_v17 = vld [vmem:[#allocation109_spill] sm:$0xff] }
 0x3b8   : > { %2837 = vrot.lane.b32.xlu0 %v11293_v19, %s5222_s21  ;;  %v2814_v9 = vpop.permute.xlu1 %2813  ;;  %v1887_v58 = vadd.f32 %v1831_v27, %v1748_v54  ;;  %v1342_v38 = vadd.f32 %v1286_v21, %v1001_v39  ;;  %v3586_v25 = vsel %vm3411_vm2, %v11195_v35, %v5124_v43  ;;  %v11303_v43 = vld [vmem:[#allocation117_spill] sm:$0xff] }
 0x3b9   : > { %v3537_v24 = vsel %vm3509_vm5, %v3488_v7, %v2814_v9  ;;  %v1691_v7 = vmul.f32 %v9307_v2, %v11271_v63  ;;  %v11300_v9 = vld [vmem:[#allocation136_spill] sm:$0xff]  ;;  %v11302_v63 = vld [vmem:[#allocation113_spill] sm:$0xff]  ;;  %v2096_v39 = vmul.f32 %v9372_v0, %v11303_v43  ;;  %v9621_v43 = vld [vmem:[%s9960_s3 + $0x28] sm:$0xff] }
 0x3ba   : > { %v3316_v30 = vpop.permute.xlu0 %3315  ;;  %3037 = vrot.lane.b32.xlu1 %v11288_v45, %s5220_s22  ;;  %v1425_v45 = vmul.f32 %v9285_v49, %v11260_v34  ;;  %v2020_v5 = vadd.f32 %v1964_v48, %v1887_v58  ;;  %v4714_v18 = vcombine.low %v3851_v62, %v3537_v24  ;;  %v1558_v49 = vmul.f32 %v9298_v15, %v11269_v33 }
 0x3bb   : > { %v3681_v55 = vsel %vm3509_vm5, %v3633_v42, %v3316_v30  ;;  %v1963_v31 = vmul.f32 %v9352_v56, %v11302_v63  ;;  %v11314_v63 = vld [vmem:[#allocation176_spill] sm:$0xff]  ;;  %4826 = vmatprep.mubr.msk.f32.mxu1 %vm3411_vm2, %v9621_v43 }
 0x3bc   : > { %3057 = vrot.lane.b32.xlu0 %v9506_v13, %s5220_s22  ;;  %v3853_v22 = vcombine.low %v3537_v24, %v3681_v55  ;;  %v5137_v32 = vpop.permute.xlu1 %5136  ;;  %v2153_v34 = vadd.f32 %v2097_v37, %v2020_v5  ;;  %v1481_v27 = vadd.f32 %v1425_v45, %v1342_v38  ;;  %v11301_v55 = vld [vmem:[#allocation185_spill] sm:$0xff]  ;;  %4827 = vmatmul.mubr.msk.f32.gmra.mrb[2].mxu1 %vm3411_vm2, %v9621_v43 }
 0x3bd   : > { %v5139_v52 = vunpack.i.h.bf16 %v5137_v32  ;;  %v5138_v1 = vunpack.i.l.bf16 %v5137_v32  ;;  %v1830_v44 = vmul.f32 %v9320_v14, %v11301_v55 }
 0x3be   : > { %v5142_v59 = vpop.permute.xlu0 %5141  ;;  %3187 = vrot.lane.b32.xlu1 %v11299_v17, %s5221_s19  ;;  %v4715_v36 = vcombine.high %v9465_v41, %v3853_v22  ;;  %v2960_v41 = vrot.slane %v9404_v51, 2  ;;  %v1614_v33 = vadd.f32 %v1558_v49, %v1481_v27  ;;  %v2216_v21 = vadd.f32 %v9392_v10, %v2153_v34 }
 0x3bf   : > { %v5144_v60 = vunpack.i.h.bf16 %v5142_v59  ;;  %v5143_v46 = vunpack.i.l.bf16 %v5142_v59  ;;  %v3634_v57 = vsel %vm3460_vm4, %v3586_v25, %v5138_v1  ;;  %v3489_v42 = vsel %vm3460_vm4, %v3440_v40, %v5139_v52  ;;  %v11304_v59 = vld [vmem:[#allocation112_spill] sm:$0xff]  ;;  %v11305_v1 = vld [vmem:[#allocation139_spill] sm:$0xff] }
 0x3c0   : > { %3339 = vrot.lane.b32.xlu0 %v11298_v12, %s5222_s21  ;;  %v3026_v30 = vpop.permute.xlu1 %3025  ;;  %v9558_v54 = vsel %vm2538_vm1, %v2960_v41, %v9506_v13  ;;  %v1747_v2 = vadd.f32 %v1691_v7, %v1614_v33  ;;  %v9566_v6 = vmax.f32 %v2216_v21, 0.0  ;;  %v11312_v21 = vld [vmem:[#allocation192_spill] sm:$0xff] }
 0x3c1   : > { %v3682_v4 = vsel %vm3509_vm5, %v3634_v57, %v5143_v46  ;;  %v3538_v35 = vsel %vm3509_vm5, %v3489_v42, %v5144_v60  ;;  %v3589_v46 = vsel %vm3411_vm2, %v11227_v23, %v3026_v30  ;;  %v11309_v42 = vld [vmem:[#allocation183_spill] sm:$0xff]  ;;  %v11310_v30 = vld [vmem:[#allocation30_spill] sm:$0xff] }
 0x3c2   : > { %v2674_v20 = vpop.permute.xlu0 %2673  ;;  %v4894_v47 = vpack.c.bf16 %v3682_v4, %v4715_v36  ;;  %v4896_v61 = vpack.c.bf16 %v3538_v35, %v4714_v18  ;;  %2705 = vrot.lane.b32.xlu1 %v11300_v9, %s5221_s19  ;;  %v1886_v14 = vadd.f32 %v1830_v44, %v1747_v2  ;;  %v11308_v36 = vld [vmem:[#allocation24_spill] sm:$0xff]  ;;  %v11313_v2 = vld [vmem:[#allocation210_spill] sm:$0xff] }
 0x3c3   : > { %v11311_v4 = vld [vmem:[#allocation96_spill] sm:$0xff] }
 0x3c4   : > { %2835 = vrot.lane.b32.xlu0 %v11278_v11, %s5222_s21  ;;  %4895 = vmatprep.subr.bf16.mxu0 %v4894_v47  ;;  %v3024_v24 = vpop.permute.xlu1 %3023  ;;  %v2019_v58 = vadd.f32 %v1963_v31, %v1886_v14  ;;  %v3442_v35 = vsel %vm3411_vm2, %v11311_v4, %v11310_v30  ;;  %v3441_v31 = vsel %vm3411_vm2, %v11314_v63, %v11313_v2  ;;  %v11321_v4 = vld [vmem:[#allocation105_spill] sm:$0xff] }
 0x3c5   : > { %4897 = vmatpush1.bf16.xpose.msra.mxu0 %v4896_v61 }
 0x3c6   : > { %v3174_v15 = vpop.permute.xlu0 %3173  ;;  %3055 = vrot.lane.b32.xlu1 %v9558_v54, %s5220_s22  ;;  %v2152_v56 = vadd.f32 %v2096_v39, %v2019_v58 }
 0x3c7   : > { %v3637_v38 = vsel %vm3460_vm4, %v3589_v46, %v3174_v15  ;;  %v3259_v15 = vrot.slane %v9566_v6, 1 }
 0x3c8   : > { %3185 = vrot.lane.b32.xlu0 %v11293_v19, %s5221_s19  ;;  %v2672_v22 = vpop.permute.xlu1 %2671  ;;  %v2215_v0 = vadd.f32 %v9392_v10, %v2152_v56  ;;  %v11307_v10 = vld [vmem:[#allocation184_spill] sm:$0xff] }
 0x3c9   : > { %v3588_v5 = vsel %vm3411_vm2, %v11307_v10, %v3024_v24  ;;  %v3491_v41 = vsel %vm3460_vm4, %v3442_v35, %v2672_v22  ;;  %v5185_v35 = vpack.i.bf16 %v11299_v17, %v11321_v4 }
 0x3ca   : > { %v2822_v48 = vpop.permute.xlu0 %2821  ;;  %3205 = vrot.lane.b32.xlu1 %v9566_v6, %s5221_s19  ;;  %v9586_v52 = vmax.f32 %v2215_v0, 0.0 }
 0x3cc   : > { %3337 = vrot.lane.b32.xlu0 %v11304_v59, %s5222_s21  ;;  %v3022_v37 = vpop.permute.xlu1 %3021 }
 0x3cd   : > { %v3587_v49 = vsel %vm3411_vm2, %v11309_v42, %v3022_v37 }
 0x3ce   : > { %v3172_v26 = vpop.permute.xlu0 %3171  ;;  %2685 = vrot.lane.b32.xlu1 %v11253_v53, %s5221_s19  ;;  %v11306_v53 = vld [vmem:[#allocation91_spill] sm:$0xff] }
 0x3cf   : > { %v3443_v45 = vsel %vm3411_vm2, %v11306_v53, %v11305_v1  ;;  %v3636_v18 = vsel %vm3460_vm4, %v3588_v5, %v3172_v26  ;;  %v3258_v26 = vrot.slane %v9586_v52, 1  ;;  %v3895_v53 = vld [vmem:[%s9960_s3 + $0x8] sm:$0xff]  ;;  %v11316_v5 = vld [vmem:[#allocation108_spill] sm:$0xff] }
 0x3d0   : > { %2703 = vrot.lane.b32.xlu0 %v11282_v29, %s5221_s19  ;;  %v3324_v60 = vpop.permute.xlu1 %3323  ;;  %v3492_v23 = vsel %vm3460_vm4, %v3443_v45, %v2674_v20  ;;  %4258 = vmatprep.mubr.f32.mxu0 %v3895_v53 }
 0x3d1   : > { %v3685_v40 = vsel %vm3509_vm5, %v3637_v38, %v3324_v60  ;;  %v3541_v57 = vsel %vm3509_vm5, %v3492_v23, %v2822_v48  ;;  %v3260_v46 = vsel %vm2321_vm0, %v3258_v26, %v3259_v15  ;;  %v11315_v38 = vld [vmem:[#allocation205_spill] sm:$0xff] }
 0x3d2   : > { %v2820_v32 = vpop.permute.xlu0 %2819  ;;  %2853 = vrot.lane.b32.xlu1 %v9402_v3, %s5222_s21  ;;  %v3861_v20 = vcombine.low %v3541_v57, %v3685_v40  ;;  %v11317_v40 = vld [vmem:[#allocation130_spill] sm:$0xff] }
 0x3d3   : > { %v3540_v33 = vsel %vm3509_vm5, %v3491_v41, %v2820_v32  ;;  %v9637_v32 = vld [vmem:[%s9960_s3 + $0x40] sm:$0xff]  ;;  %v11324_v41 = vld [vmem:[#allocation8_spill] sm:$0xff] }
 0x3d4   : > { %3053 = vrot.lane.b32.xlu0 %v11300_v9, %s5220_s22  ;;  %v3170_v25 = vpop.permute.xlu1 %3169  ;;  %4828 = vmatprep.mubr.msk.f32.mxu1 %vm3411_vm2, %v9637_v32 }
 0x3d5   : > { %v3635_v47 = vsel %vm3460_vm4, %v3587_v49, %v3170_v25  ;;  %4829 = vmatmul.mubr.msk.f32.gmra.mrb[4].mxu1 %vm3411_vm2, %v9637_v32 }
 0x3d6   : > { %v3322_v62 = vpop.permute.xlu0 %3321  ;;  %3203 = vrot.lane.b32.xlu1 %v9586_v52, %s5221_s19 }
 0x3d7   : > { %v3684_v34 = vsel %vm3509_vm5, %v3636_v18, %v3322_v62  ;;  %v11318_v18 = vld [vmem:[#allocation128_spill] sm:$0xff] }
 0x3d8   : > { %3335 = vrot.lane.b32.xlu0 %v11308_v36, %s5222_s21  ;;  %v2670_v27 = vpop.permute.xlu1 %2669  ;;  %v4719_v55 = vcombine.high %v3684_v34, %v3861_v20  ;;  %v3859_v24 = vcombine.high %v3540_v33, %v3684_v34  ;;  %v11322_v20 = vld [vmem:[#allocation211_spill] sm:$0xff] }
 0x3d9   : > { %v3490_v39 = vsel %vm3460_vm4, %v3441_v31, %v2670_v27  ;;  %v5038_v27 = vunpack.i.l.bf16 %v11324_v41 }
 0x3da   : > { %v3320_v61 = vpop.permute.xlu0 %3319  ;;  %3355 = vrot.lane.b32.xlu1 %v3259_v15, %s5222_s21  ;;  %v4718_v37 = vcombine.low %v3859_v24, %v3541_v57  ;;  %v11319_v57 = vld [vmem:[#allocation129_spill] sm:$0xff] }
 0x3db   : > { %v3683_v7 = vsel %vm3509_vm5, %v3635_v47, %v3320_v61  ;;  %v11323_v47 = vld [vmem:[#allocation178_spill] sm:$0xff] }
 0x3dc   : > { %v4717_v44 = vcombine.low %v3683_v7, %v3684_v34  ;;  %2833 = vrot.lane.b32.xlu0 %v11312_v21, %s5222_s21  ;;  %v2818_v22 = vpop.permute.xlu1 %2817  ;;  %v11320_v34 = vld [vmem:[#allocation134_spill] sm:$0xff]  ;;  %v3445_v61 = vsel %vm3411_vm2, %v11323_v47, %v11322_v20 }
 0x3dd   : > { %v3539_v58 = vsel %vm3509_vm5, %v3490_v39, %v2818_v22  ;;  %v5180_v30 = vpack.i.bf16 %v11292_v16, %v11320_v34  ;;  %v11325_v7 = vld [vmem:[#allocation190_spill] sm:$0xff]  ;;  %v11328_v16 = vld [vmem:[#allocation17_spill] sm:$0xff] }
 0x3de   : > { %v3030_v48 = vpop.permute.xlu0 %3029  ;;  %v4898_v14 = vpack.c.bf16 %v4719_v55, %v4717_v44  ;;  %v4716_v56 = vcombine.low %v3539_v58, %v3540_v33  ;;  %2851 = vrot.lane.b32.xlu1 %v9404_v51, %s5222_s21  ;;  %v9647_v51 = vld [vmem:[%s9960_s3 + $0x58] sm:$0xff]  ;;  %v11326_v33 = vld [vmem:[#allocation103_spill] sm:$0xff]  ;;  %v11327_v44 = vld [vmem:[#allocation142_spill] sm:$0xff] }
 0x3df   : > { %4830 = vmatprep.mubr.msk.f32.mxu1 %vm3411_vm2, %v9647_v51  ;;  %v3591_v15 = vsel %vm3411_vm2, %v11325_v7, %v3030_v48  ;;  %v3446_v24 = vsel %vm3411_vm2, %v11328_v16, %v11327_v44  ;;  %v5223_v16 = vmov 0  }
 0x3e0   : > { %3201 = vrot.lane.b32.xlu0 %v9402_v3, %s5221_s19  ;;  %4899 = vmatprep.subr.bf16.mxu0 %v4898_v14  ;;  %v3032_v3 = vpop.permute.xlu1 %3031  ;;  %v4900_v60 = vpack.c.bf16 %v4718_v37, %v4716_v56  ;;  %v11329_v14 = vld [vmem:[#allocation147_spill] sm:$0xff] }
 0x3e1   : > { %4831 = vmatmul.mubr.msk.f32.gmra.mrb[6].mxu1 %vm3411_vm2, %v9647_v51  ;;  %v3592_v55 = vsel %vm3411_vm2, %v11326_v33, %v3032_v3  ;;  %v3906_v33 = vld [vmem:[%s9961_s4] sm:$0xff]  ;;  %5190 = vset.pattern.permute.xlu1 %v5223_v16 }
 0x3e2   : > { %v3178_v0 = vpop.permute.xlu0 %3177  ;;  %3353 = vrot.lane.b32.xlu1 %v3260_v46, %s5222_s21  ;;  %4901 = vmatpush1.bf16.xpose.msra.mxu0 %v4900_v60 }
 0x3e3   : > { %4436 = vmatprep.mubr.f32.mxu1 %v3895_v53  ;;  %v3639_v2 = vsel %vm3460_vm4, %v3591_v15, %v3178_v0  ;;  %v11331_v53 = vld [vmem:[#allocation186_spill] sm:$0xff]  ;;  %5191 = vset.pattern.permute.xlu0 %v5223_v16 }
 0x3e4   : > { %2701 = vrot.lane.b32.xlu0 %v11315_v38, %s5221_s19  ;;  %v3180_v1 = vpop.permute.xlu1 %3179 }
 0x3e5   : > { %v3640_v63 = vsel %vm3460_vm4, %v3592_v55, %v3180_v1  ;;  %v3907_v55 = vld [vmem:[%s9961_s4 + $0x8] sm:$0xff] }
 0x3e6   : > { %v2678_v62 = vpop.permute.xlu0 %2677  ;;  %3351 = vrot.lane.b32.xlu1 %v9416_v28, %s5222_s21 }
 0x3e7   : > { %v3494_v48 = vsel %vm3460_vm4, %v3445_v61, %v2678_v62  ;;  %v11330_v62 = vld [vmem:[#allocation98_spill] sm:$0xff] }
 0x3e8   : > { %2849 = vrot.lane.b32.xlu0 %v11273_v8, %s5222_s21  ;;  %v2680_v10 = vpop.permute.xlu1 %2679  ;;  %v3444_v1 = vsel %vm3411_vm2, %v11330_v62, %v5038_v27 }
 0x3e9   : > { %v3495_v39 = vsel %vm3460_vm4, %v3446_v24, %v2680_v10  ;;  %v3908_v24 = vld [vmem:[%s9961_s4 + $0x10] sm:$0xff] }
 0x3ea   : > { %v9661_v45 = vpop.permute.xlu0 %5146  ;;  %3045 = vrot.lane.b32.xlu1 %v11317_v40, %s5220_s22 }
 0x3eb   : > { %v5148_v31 = vunpack.i.l.bf16 %v9661_v45 }
 0x3ec   : > { %3193 = vrot.lane.b32.xlu0 %v11316_v5, %s5221_s19  ;;  %v3328_v23 = vpop.permute.xlu1 %3327 }
 0x3ed   : > { %v3687_v22 = vsel %vm3509_vm5, %v3639_v2, %v3328_v23  ;;  %v3590_v10 = vsel %vm3411_vm2, %v11331_v53, %v5148_v31  ;;  %v3909_v31 = vld [vmem:[%s9961_s4 + $0x18] sm:$0xff] }
 0x3ee   : > { %v3330_v25 = vpop.permute.xlu0 %3329  ;;  %2693 = vrot.lane.b32.xlu1 %v11319_v57, %s5221_s19 }
 0x3ef   : > { %v9699_v58 = vsel %vm3509_vm5, %v3640_v63, %v3330_v25 }
 0x3f0   : > { %3043 = vrot.lane.b32.xlu0 %v11318_v18, %s5220_s22  ;;  %v2826_v49 = vpop.permute.xlu1 %2825  ;;  %v4721_v40 = vcombine.low %v3687_v22, %v9699_v58 }
 0x3f1   : > { %v3543_v56 = vsel %vm3509_vm5, %v3494_v48, %v2826_v49 }
 0x3f2   : > { %v2828_v42 = vpop.permute.xlu0 %2827  ;;  %3343 = vrot.lane.b32.xlu1 %v11329_v14, %s5222_s21 }
 0x3f3   : > { %v9703_v37 = vsel %vm3509_vm5, %v3495_v39, %v2828_v42 }
 0x3f4   : > { %2841 = vrot.lane.b32.xlu0 %v11291_v50, %s5222_s21  ;;  %v5152_v0 = vpop.permute.xlu1 %5151  ;;  %v4720_v25 = vcombine.low %v3543_v56, %v9703_v37 }
 0x3f5   : > { %v5154_v46 = vunpack.i.h.bf16 %v5152_v0  ;;  %v5153_v38 = vunpack.i.l.bf16 %v5152_v0 }
 0x3f6   : > { %v5157_v26 = vpop.permute.xlu0 %5156  ;;  %5181 = vrot.lane.b32.xlu1 %v5180_v30, %s5221_s19 }
 0x3f7   : > { %v5159_v3 = vunpack.i.h.bf16 %v5157_v26  ;;  %v5158_v60 = vunpack.i.l.bf16 %v5157_v26  ;;  %v3493_v23 = vsel %vm3460_vm4, %v3444_v1, %v5154_v46  ;;  %v3638_v18 = vsel %vm3460_vm4, %v3590_v10, %v5153_v38  ;;  %v11332_v26 = vld [vmem:[#allocation102_spill] sm:$0xff]  ;;  %v11334_v46 = vld [vmem:[#allocation97_spill] sm:$0xff] }
 0x3f8   : > { %5186 = vrot.lane.b32.xlu0 %v5185_v35, %s5222_s21  ;;  %v3034_v42 = vpop.permute.xlu1 %3033  ;;  %v5039_v1 = vunpack.i.h.bf16 %v11324_v41  ;;  %s9914_s21 = scalar_lea.vmem %s9962_s5, %s4791_s7 }
 0x3f9   : > { %v3686_v49 = vsel %vm3509_vm5, %v3638_v18, %v5158_v60  ;;  %v3542_v35 = vsel %vm3509_vm5, %v3493_v23, %v5159_v3  ;;  %v3593_v56 = vsel %vm3411_vm2, %v11332_v26, %v3034_v42  ;;  %v11333_v60 = vld [vmem:[#allocation53_spill] sm:$0xff] }
 0x3fa   : > { %v2682_v57 = vpop.permute.xlu0 %2681  ;;  %v4902_v20 = vpack.c.bf16 %v4721_v40, %v3686_v49  ;;  %v4904_v47 = vpack.c.bf16 %v4720_v25, %v3542_v35  ;;  %3912 = vperm.xlu1 %5190, %v3906_v33   ;;  %v3447_v38 = vsel %vm3411_vm2, %v11334_v46, %v11333_v60  ;;  %v5149_v40 = vunpack.i.h.bf16 %v9661_v45 }
 0x3fb   : > { %v3496_v53 = vsel %vm3460_vm4, %v3447_v38, %v2682_v57  ;;  %v3867_v35 = vcombine.high %v9703_v37, %v9699_v58 }
 0x3fc   : > { %4903 = vmatprep.subr.bf16.mxu0 %v4902_v20  ;;  %v3182_v27 = vpop.permute.xlu1 %3181  ;;  %3917 = vperm.xlu0 %5191, %v3907_v55   ;;  %v11335_v20 = vld [vmem:[#allocation104_spill] sm:$0xff] }
 0x3fd   : > { %4905 = vmatpush1.bf16.xpose.msra.mxu0 %v4904_v47  ;;  %v3641_v3 = vsel %vm3460_vm4, %v3593_v56, %v3182_v27  ;;  %v3448_v47 = vsel %vm3411_vm2, %v11335_v20, %v5039_v1 }
 0x3fe   : > { %v2830_v61 = vpop.permute.xlu0 %2829  ;;  %3922 = vperm.xlu1 %5190, %v3908_v24  }
 0x3ff   : > { %v3545_v25 = vsel %vm3509_vm5, %v3496_v53, %v2830_v61  ;;  %v11338_v53 = vld [vmem:[#allocation55_spill] sm:$0xff] }
 0x400   : > { %v3050_v7 = vpop.permute.xlu1 %3049  ;;  %v4722_v57 = vcombine.low %v3867_v35, %v3545_v25 }
 0x402   : > { %v3332_v30 = vpop.permute.xlu0 %3331  ;;  %3927 = vperm.xlu1 %5190, %v3909_v31   ;;  %v11337_v31 = vld [vmem:[#allocation144_spill] sm:$0xff] }
 0x403   : > { %v3689_v62 = vsel %vm3509_vm5, %v3641_v3, %v3332_v30  ;;  %v11336_v30 = vld [vmem:[#allocation18_spill] sm:$0xff]  ;;  %v3454_v26 = vsel %vm3411_vm2, %v11299_v17, %v11337_v31 }
 0x404   : > { %v2698_v44 = vpop.permute.xlu1 %2697  ;;  %v3869_v18 = vcombine.low %v3545_v25, %v3689_v62  ;;  %v3594_v41 = vsel %vm3411_vm2, %v11336_v30, %v5149_v40  ;;  %v11339_v40 = vld [vmem:[#allocation151_spill] sm:$0xff] }
 0x405   : > { %v3455_v25 = vsel %vm3411_vm2, %v11291_v50, %v11339_v40 }
 0x406   : > { %v3048_v15 = vpop.permute.xlu0 %3047  ;;  %v4723_v61 = vcombine.high %v9699_v58, %v3869_v18  ;;  %v3601_v58 = vsel %vm3411_vm2, %v11329_v14, %v3050_v7  ;;  %v3504_v7 = vsel %vm3460_vm4, %v3455_v25, %v2698_v44  ;;  %v11341_v25 = vld [vmem:[#allocation143_spill] sm:$0xff] }
 0x407   : > { %v3600_v16 = vsel %vm3411_vm2, %v11321_v4, %v3048_v15 }
 0x408   : > { %v3198_v63 = vpop.permute.xlu1 %3197 }
 0x409   : > { %v3649_v62 = vsel %vm3460_vm4, %v3601_v58, %v3198_v63 }
 0x40a   : > { %v2696_v2 = vpop.permute.xlu0 %2695 }
 0x40b   : > { %v3503_v1 = vsel %vm3460_vm4, %v3454_v26, %v2696_v2 }
 0x40c   : > { %v2846_v39 = vpop.permute.xlu1 %2845 }
 0x40d   : > { %v3553_v18 = vsel %vm3509_vm5, %v3504_v7, %v2846_v39  ;;  %v11342_v7 = vld [vmem:[#allocation111_spill] sm:$0xff] }
 0x40e   : > { %v3196_v48 = vpop.permute.xlu0 %3195 }
 0x40f   : > { %v3648_v56 = vsel %vm3460_vm4, %v3600_v16, %v3196_v48  ;;  %v5044_v48 = vunpack.i.h.bf16 %v11338_v53 }
 0x410   : > { %v3348_v0 = vpop.permute.xlu1 %3347 }
 0x411   : > { %v3456_v50 = vsel %vm3411_vm2, %v11320_v34, %v5044_v48 }
 0x412   : > { %v2844_v22 = vpop.permute.xlu0 %2843 }
 0x413   : > { %v9770_v14 = vsel %vm3509_vm5, %v3503_v1, %v2844_v22 }
 0x414   : > { %v5162_v23 = vpop.permute.xlu1 %5161 }
 0x415   : > { %v5164_v42 = vunpack.i.h.bf16 %v5162_v23  ;;  %v5163_v49 = vunpack.i.l.bf16 %v5162_v23  ;;  %v3697_v23 = vsel %vm3509_vm5, %v3649_v62, %v3348_v0  ;;  %v11340_v0 = vld [vmem:[#allocation110_spill] sm:$0xff] }
 0x416   : > { %v3346_v10 = vpop.permute.xlu0 %3345 }
 0x417   : > { %v3497_v24 = vsel %vm3460_vm4, %v3448_v47, %v5164_v42  ;;  %v3642_v37 = vsel %vm3460_vm4, %v3594_v41, %v5163_v49  ;;  %v9760_v46 = vsel %vm3509_vm5, %v3648_v56, %v3346_v10  ;;  %v3885_v49 = vcombine.low %v3553_v18, %v3697_v23 }
 0x418   : > { %v3052_v33 = vpop.permute.xlu1 %3051  ;;  %v3883_v63 = vcombine.high %v9770_v14, %v9760_v46  ;;  %v3451_v23 = vsel %vm3411_vm2, %v11312_v21, %v11341_v25  ;;  %v11348_v25 = vld [vmem:[#allocation214_spill] sm:$0xff] }
 0x419   : > { %v3602_v22 = vsel %vm3411_vm2, %v11340_v0, %v3052_v33  ;;  %v11345_v0 = vld [vmem:[#allocation106_spill] sm:$0xff] }
 0x41a   : > { %v5167_v27 = vpop.permute.xlu0 %5166  ;;  %v4730_v44 = vcombine.low %v3883_v63, %v3553_v18 }
 0x41b   : > { %v5169_v55 = vunpack.i.h.bf16 %v5167_v27  ;;  %v5168_v45 = vunpack.i.l.bf16 %v5167_v27  ;;  %v4731_v27 = vcombine.high %v9760_v46, %v3885_v49 }
 0x41c   : > { %v5172_v17 = vpop.permute.xlu1 %5171 }
 0x41d   : > { %v3690_v3 = vsel %vm3509_vm5, %v3642_v37, %v5168_v45  ;;  %v3546_v60 = vsel %vm3509_vm5, %v3497_v24, %v5169_v55  ;;  %v5174_v10 = vunpack.i.h.bf16 %v5172_v17  ;;  %v5173_v2 = vunpack.i.l.bf16 %v5172_v17 }
 0x41e   : > { %v3042_v4 = vpop.permute.xlu0 %3041  ;;  %v4906_v15 = vpack.c.bf16 %v3690_v3, %v4723_v61  ;;  %v4908_v38 = vpack.c.bf16 %v3546_v60, %v4722_v57 }
 0x41f   : > { %v3505_v30 = vsel %vm3460_vm4, %v3456_v50, %v5174_v10  ;;  %v3650_v41 = vsel %vm3460_vm4, %v3602_v22, %v5173_v2  ;;  %v3597_v17 = vsel %vm3411_vm2, %v11308_v36, %v3042_v4  ;;  %v11344_v50 = vld [vmem:[#allocation191_spill] sm:$0xff] }
 0x420   : > { %4907 = vmatprep.subr.bf16.mxu0 %v4906_v15  ;;  %v5177_v35 = vpop.permute.xlu1 %5176 }
 0x421   : > { %4909 = vmatpush1.bf16.xpose.msra.mxu0 %v4908_v38  ;;  %v5179_v20 = vunpack.i.h.bf16 %v5177_v35  ;;  %v5178_v47 = vunpack.i.l.bf16 %v5177_v35  ;;  %v11343_v35 = vld [vmem:[#allocation212_spill] sm:$0xff] }
 0x422   : > { %v2690_v42 = vpop.permute.xlu0 %2689  ;;  %v3450_v36 = vsel %vm3411_vm2, %v11344_v50, %v11343_v35 }
 0x423   : > { %v3554_v39 = vsel %vm3509_vm5, %v3505_v30, %v5179_v20  ;;  %v3698_v55 = vsel %vm3509_vm5, %v3650_v41, %v5178_v47  ;;  %v3500_v18 = vsel %vm3460_vm4, %v3451_v23, %v2690_v42  ;;  %v11349_v23 = vld [vmem:[#allocation193_spill] sm:$0xff] }
 0x424   : > { %v4968_v45 = vpack.c.bf16 %v3554_v39, %v4730_v44  ;;  %v3040_v61 = vpop.permute.xlu1 %3039  ;;  %v4966_v34 = vpack.c.bf16 %v3698_v55, %v4731_v27 }
 0x425   : > { %v3596_v63 = vsel %vm3411_vm2, %v11342_v7, %v3040_v61  ;;  %v11347_v61 = vld [vmem:[#allocation189_spill] sm:$0xff]  ;;  %v3458_v7 = vsel %vm3411_vm2, %v11349_v23, %v11348_v25  ;;  %v3894_v25 = vld [vmem:[%s9960_s3] sm:$0xff] }
 0x426   : > { %v3190_v57 = vpop.permute.xlu0 %3189  ;;  %4967 = vmatprep.subr.bf16.mxu1 %v4966_v34 }
 0x427   : > { %4969 = vmatpush1.bf16.xpose.msra.mxu1 %v4968_v45  ;;  %v3645_v48 = vsel %vm3460_vm4, %v3597_v17, %v3190_v57  ;;  %v11346_v45 = vld [vmem:[#allocation141_spill] sm:$0xff] }
 0x428   : > { %v2688_v16 = vpop.permute.xlu1 %2687  ;;  %v3449_v34 = vsel %vm3411_vm2, %v11347_v61, %v11346_v45 }
 0x429   : > { %v3499_v20 = vsel %vm3460_vm4, %v3450_v36, %v2688_v16 }
 0x42a   : > { %v2838_v33 = vpop.permute.xlu0 %2837 }
 0x42b   : > { %v3549_v4 = vsel %vm3509_vm5, %v3500_v18, %v2838_v33 }
 0x42c   : > { %v3038_v37 = vpop.permute.xlu1 %3037 }
 0x42d   : > { %v3595_v22 = vsel %vm3411_vm2, %v11345_v0, %v3038_v37  ;;  %v11351_v0 = vld [vmem:[#allocation140_spill] sm:$0xff] }
 0x42e   : > { %v3058_v24 = vpop.permute.xlu0 %3057 }
 0x430   : > { %v3188_v26 = vpop.permute.xlu1 %3187 }
 0x431   : > { %v3644_v49 = vsel %vm3460_vm4, %v3596_v63, %v3188_v26  ;;  %v3605_v63 = vsel %vm3411_vm2, %v9416_v28, %v3058_v24 }
 0x432   : > { %v3340_v31 = vpop.permute.xlu0 %3339 }
 0x433   : > { %v3693_v10 = vsel %vm3509_vm5, %v3645_v48, %v3340_v31 }
 0x434   : > { %v2706_v3 = vpop.permute.xlu1 %2705  ;;  %v3877_v47 = vcombine.low %v3549_v4, %v3693_v10 }
 0x436   : > { %v2836_v56 = vpop.permute.xlu0 %2835 }
 0x437   : > { %v3548_v42 = vsel %vm3509_vm5, %v3499_v20, %v2836_v56 }
 0x438   : > { %v3056_v58 = vpop.permute.xlu1 %3055 }
 0x43a   : > { %v3186_v60 = vpop.permute.xlu0 %3185 }
 0x43b   : > { %v3643_v44 = vsel %vm3460_vm4, %v3595_v22, %v3186_v60  ;;  %v3459_v22 = vsel %vm3411_vm2, %v11273_v8, %v11351_v0 }
 0x43c   : > { %v3206_v38 = vpop.permute.xlu1 %3205 }
 0x43d   : > { %v3653_v35 = vsel %vm3460_vm4, %v3605_v63, %v3206_v38  ;;  %v3888_v38 = vcombine.high %v9558_v54, %v9558_v54  ;;  %v3898_v63 = vld [vmem:[%s9960_s3 + $0x20] sm:$0xff] }
 0x43e   : > { %v3338_v15 = vpop.permute.xlu0 %3337 }
 0x43f   : > { %v3692_v21 = vsel %vm3509_vm5, %v3644_v49, %v3338_v15  ;;  %v3409_v49 = vrot.slane %v9566_v6, 2 }
 0x440   : > { %v2686_v1 = vpop.permute.xlu1 %2685  ;;  %v3875_v39 = vcombine.high %v3548_v42, %v3692_v21  ;;  %v4727_v57 = vcombine.high %v3692_v21, %v3877_v47  ;;  %v3408_v47 = vrot.slane %v9586_v52, 2 }
 0x441   : > { %v3498_v33 = vsel %vm3460_vm4, %v3449_v34, %v2686_v1  ;;  %v11350_v1 = vld [vmem:[#allocation31_spill] sm:$0xff] }
 0x442   : > { %v2704_v62 = vpop.permute.xlu0 %2703  ;;  %v4726_v56 = vcombine.low %v3875_v39, %v3549_v4  ;;  %v3604_v10 = vsel %vm3411_vm2, %v11350_v1, %v3056_v58  ;;  %v11352_v58 = vld [vmem:[#allocation213_spill] sm:$0xff]  ;;  %v5043_v1 = vunpack.i.l.bf16 %v11338_v53 }
 0x443   : > { %v3507_v50 = vsel %vm3460_vm4, %v3458_v7, %v2704_v62  ;;  %v3457_v6 = vsel %vm3411_vm2, %v11316_v5, %v11352_v58  ;;  %v3508_v62 = vsel %vm3460_vm4, %v3459_v22, %v2706_v3  ;;  %v3884_v3 = vcombine.high %v11282_v29, %v11282_v29  ;;  %v3901_v22 = vld [vmem:[%s9960_s3 + $0x38] sm:$0xff] }
 0x444   : > { %v2854_v2 = vpop.permute.xlu1 %2853 }
 0x445   : > { %v3557_v8 = vsel %vm3509_vm5, %v3508_v62, %v2854_v2  ;;  %v4031_v2 = vcombine.low %v9558_v54, %v3888_v38 }
 0x446   : > { %v3054_v40 = vpop.permute.xlu0 %3053 }
 0x448   : > { %v3204_v30 = vpop.permute.xlu1 %3203 }
 0x449   : > { %v3652_v36 = vsel %vm3460_vm4, %v3604_v10, %v3204_v30  ;;  %v11355_v10 = vld [vmem:[#allocation52_spill] sm:$0xff] }
 0x44a   : > { %v3336_v27 = vpop.permute.xlu0 %3335 }
 0x44b   : > { %v3691_v41 = vsel %vm3509_vm5, %v3643_v44, %v3336_v27  ;;  %v11353_v44 = vld [vmem:[#allocation195_spill] sm:$0xff] }
 0x44c   : > { %v4725_v55 = vcombine.low %v3691_v41, %v3692_v21  ;;  %v3356_v31 = vpop.permute.xlu1 %3355  ;;  %v3603_v27 = vsel %vm3411_vm2, %v11353_v44, %v3054_v40 }
 0x44d   : > { %v3701_v21 = vsel %vm3509_vm5, %v3653_v35, %v3356_v31 }
 0x44e   : > { %v2834_v37 = vpop.permute.xlu0 %2833  ;;  %v4910_v16 = vpack.c.bf16 %v4727_v57, %v4725_v55  ;;  %v3893_v41 = vcombine.low %v3557_v8, %v3701_v21 }
 0x44f   : > { %v3547_v26 = vsel %vm3509_vm5, %v3498_v33, %v2834_v37  ;;  %v3410_v37 = vsel %vm2538_vm1, %v3408_v47, %v3409_v49  ;;  %v3900_v47 = vld [vmem:[%s9960_s3 + $0x30] sm:$0xff] }
 0x450   : > { %v4724_v60 = vcombine.low %v3547_v26, %v3548_v42  ;;  %4911 = vmatprep.subr.bf16.mxu0 %v4910_v16  ;;  %v2852_v48 = vpop.permute.xlu1 %2851  ;;  %v4028_v26 = vcombine.low %v3884_v3, %v11300_v9  ;;  %v4034_v9 = vcombine.low %v9506_v13, %v3410_v37 }
 0x451   : > { %v3556_v28 = vsel %vm3509_vm5, %v3507_v50, %v2852_v48 }
 0x452   : > { %v3202_v15 = vpop.permute.xlu0 %3201  ;;  %v4912_v17 = vpack.c.bf16 %v4726_v56, %v4724_v60  ;;  %v4974_v60 = vpack.c.bf16 %v4031_v2, %v4028_v26  ;;  %v3892_v56 = vcombine.high %v3410_v37, %v3410_v37 }
 0x453   : > { %v3651_v39 = vsel %vm3460_vm4, %v3603_v27, %v3202_v15  ;;  %v11356_v27 = vld [vmem:[#allocation4_spill] sm:$0xff] }
 0x454   : > { %4913 = vmatpush1.bf16.xpose.msra.mxu0 %v4912_v17  ;;  %v3354_v4 = vpop.permute.xlu1 %3353  ;;  %v4037_v54 = vcombine.low %v3892_v56, %v3409_v49 }
 0x455   : > { %v3700_v24 = vsel %vm3509_vm5, %v3652_v36, %v3354_v4 }
 0x456   : > { %v2702_v18 = vpop.permute.xlu0 %2701  ;;  %v3891_v20 = vcombine.high %v3556_v28, %v3700_v24  ;;  %v4735_v61 = vcombine.high %v3700_v24, %v3893_v41  ;;  %v4980_v49 = vpack.c.bf16 %v4037_v54, %v4034_v9 }
 0x457   : > { %v3506_v42 = vsel %vm3460_vm4, %v3457_v6, %v2702_v18  ;;  %v3453_v18 = vsel %vm3411_vm2, %v11293_v19, %v11355_v10 }
 0x458   : > { %v3352_v5 = vpop.permute.xlu1 %3351  ;;  %v4734_v55 = vcombine.low %v3891_v20, %v3557_v8 }
 0x459   : > { %v3699_v52 = vsel %vm3509_vm5, %v3651_v39, %v3352_v5 }
 0x45a   : > { %v2850_v30 = vpop.permute.xlu0 %2849  ;;  %v4733_v40 = vcombine.low %v3699_v52, %v3700_v24  ;;  %v3452_v24 = vsel %vm3411_vm2, %v11278_v11, %v5043_v1 }
 0x45b   : > { %v3555_v57 = vsel %vm3509_vm5, %v3506_v42, %v2850_v30 }
 0x45c   : > { %v4732_v45 = vcombine.low %v3555_v57, %v3556_v28  ;;  %v3046_v16 = vpop.permute.xlu1 %3045  ;;  %v4970_v31 = vpack.c.bf16 %v4735_v61, %v4733_v40 }
 0x45d   : > { %v3599_v23 = vsel %vm3411_vm2, %v11298_v12, %v3046_v16  ;;  %v3897_v12 = vld [vmem:[%s9960_s3 + $0x18] sm:$0xff] }
 0x45e   : > { %v4972_v34 = vpack.c.bf16 %v4734_v55, %v4732_v45  ;;  %v3194_v33 = vpop.permute.xlu0 %3193  ;;  %4971 = vmatprep.subr.bf16.mxu1 %v4970_v31 }
 0x45f   : > { %v3647_v35 = vsel %vm3460_vm4, %v3599_v23, %v3194_v33 }
 0x460   : > { %4973 = vmatpush1.bf16.xpose.msra.mxu1 %v4972_v34  ;;  %v2694_v15 = vpop.permute.xlu1 %2693 }
 0x461   : > { %4976 = vmatprep.subr.msk.bf16.mxu1 %vm8371_vm3, %v4974_v60  ;;  %v3502_v50 = vsel %vm3460_vm4, %v3453_v18, %v2694_v15 }
 0x462   : > { %v3044_v29 = vpop.permute.xlu0 %3043 }
 0x463   : > { %v3598_v58 = vsel %vm3411_vm2, %v11304_v59, %v3044_v29 }
 0x464   : > { %v3344_v7 = vpop.permute.xlu1 %3343 }
 0x465   : > { %v3695_v53 = vsel %vm3509_vm5, %v3647_v35, %v3344_v7 }
 0x466   : > { %v2842_v48 = vpop.permute.xlu0 %2841  ;;  %v4729_v6 = vcombine.low %v3695_v53, %v9760_v46  ;;  %v3904_v46 = vld [vmem:[%s9960_s3 + $0x50] sm:$0xff] }
 0x467   : > { %4437 = vmatmul.mubr.f32.vlgmr.msra.gmra.mrb[8].mxu1 %v3894_v25  ;;  %v3551_v36 = vsel %vm3509_vm5, %v3502_v50, %v2842_v48 }
 0x468   : > { %4979 = vmatpush3.bf16.xpose.msk.msra.mxu1 %vm8371_vm3, %v4974_v60  ;;  %4441 = vmatprep.mubr.f32.mxu1 %v3898_v63  ;;  %v5182_v19 = vpop.permute.xlu1 %5181  ;;  %v4728_v38 = vcombine.low %v3551_v36, %v9770_v14  ;;  %v3903_v14 = vld [vmem:[%s9960_s3 + $0x48] sm:$0xff] }
 0x469   : > { %4982 = vmatprep.subr.msk.bf16.mxu1 %vm8371_vm3, %v4980_v49  ;;  %v5184_v21 = vunpack.i.h.bf16 %v5182_v19  ;;  %v5183_v28 = vunpack.i.l.bf16 %v5182_v19 }
 0x46a   : > { %v5187_v13 = vpop.permute.xlu0 %5186 }
 0x46b   : > { %v5189_v4 = vunpack.i.h.bf16 %v5187_v13  ;;  %v5188_v0 = vunpack.i.l.bf16 %v5187_v13  ;;  %4442 = vmatmul.mubr.f32.gmra.mrb[10].mxu1 %v3897_v12  ;;  %v3501_v62 = vsel %vm3460_vm4, %v3452_v24, %v5184_v21  ;;  %v3646_v20 = vsel %vm3460_vm4, %v3598_v58, %v5183_v28 }
 0x46c   : > { %4446 = vmatprep.mubr.f32.mxu1 %v3901_v22 }
 0x46d   : > { %v3694_v8 = vsel %vm3509_vm5, %v3646_v20, %v5188_v0  ;;  %v3550_v11 = vsel %vm3509_vm5, %v3501_v62, %v5189_v4 }
 0x46e   : > { %v4914_v44 = vpack.c.bf16 %v4729_v6, %v3694_v8  ;;  %v4916_v59 = vpack.c.bf16 %v4728_v38, %v3550_v11 }
 0x46f   : > { %4447 = vmatmul.mubr.f32.gmra.mrb[12].mxu1 %v3900_v47 }
 0x470   : > { %4915 = vmatprep.subr.bf16.mxu0 %v4914_v44  ;;  %4985 = vmatpush3.bf16.xpose.msk.msra.mxu1 %vm8371_vm3, %v4980_v49  ;;  %v4349_v42 = vpop.f32.mrb[0].mxu1 }
 0x471   : > { %4917 = vmatpush1.bf16.xpose.msra.mxu0 %v4916_v59  ;;  %4451 = vmatprep.mubr.f32.mxu1 %v3904_v46  ;;  %v4351_v30 = vpop.f32.mrb[1].mxu1 }
 0x473   : > { %4452 = vmatmul.mubr.f32.gmra.mrb[14].mxu1 %v3903_v14 }
 0x474   : > { %4848 = vmatprep.mubr.msk.f32.mxu1 %vm3411_vm2, %v11356_v27 }
 0x477   : > { %4849 = vmatmul.mubr.msk.f32.vlgmr.msra.gmra.mrb[16].mxu1 %vm3411_vm2, %v9621_v43 }
 0x478   : > { %4259 = vmatmul.mubr.f32.vlgmr.msra.gmra.mrb[0].mxu0 %v3894_v25  ;;  %4851 = vmatprep.mubr.msk.f32.mxu1 %vm3411_vm2, %v9637_v32 }
 0x479   : > { %4264 = vmatprep.mubr.f32.mxu0 %v3898_v63  ;;  %v3913_v45 = vpop.permute.xlu1 %3912 }
 0x47b   : > { %4852 = vmatmul.mubr.msk.f32.gmra.mrb[18].mxu1 %vm3411_vm2, %v9647_v51  ;;  %v3918_v34 = vpop.permute.xlu0 %3917 }
 0x47c   : > { %4265 = vmatmul.mubr.f32.gmra.mrb[2].mxu0 %v3897_v12 }
 0x47d   : > { %4270 = vmatprep.mubr.f32.mxu0 %v3901_v22  ;;  %v3923_v40 = vpop.permute.xlu1 %3922 }
 0x480   : > { %4271 = vmatmul.mubr.f32.gmra.mrb[4].mxu0 %v3900_v47 }
 0x481   : > { %4276 = vmatprep.mubr.f32.mxu0 %v3904_v46  ;;  %v3928_v31 = vpop.permute.xlu1 %3927 }
 0x484   : > { %4277 = vmatmul.mubr.f32.gmra.mrb[6].mxu0 %v3903_v14 }
 0x48f   : > { %v4355_v41 = vpop.f32.mrb[2].mxu1 }
 0x490   : > { %v4357_v39 = vpop.f32.mrb[3].mxu1 }
 0x4a8   : > { %v4361_v5 = vpop.f32.mrb[4].mxu1 }
 0x4a9   : > { %v4363_v57 = vpop.f32.mrb[5].mxu1 }
 0x4b4   : > { %v9906_v43 = vpop.f32.mrb[6].mxu1 }
 0x4b5   : > { %v9908_v3 = vpop.f32.mrb[7].mxu1 }
 0x53a   : > { %v4438_v32 = vpop.f32.mrb[8].mxu1 }
 0x53b   : > { %v4440_v55 = vpop.f32.mrb[9].mxu1  ;;  %v4439_v60 = vadd.f32 %v4438_v32, %v3913_v45 }
 0x53e   : > { %v4443_v52 = vpop.f32.mrb[10].mxu1 }
 0x53f   : > { %v4445_v51 = vpop.f32.mrb[11].mxu1  ;;  %v4444_v16 = vadd.f32 %v4443_v52, %v3918_v34 }
 0x542   : > { %v4448_v2 = vpop.f32.mrb[12].mxu1 }
 0x543   : > { %v4450_v61 = vpop.f32.mrb[13].mxu1  ;;  %v4449_v1 = vadd.f32 %v4448_v2, %v3923_v40 }
 0x546   : > { %v4453_v33 = vpop.f32.mrb[14].mxu1 }
 0x547   : > { %v4455_v37 = vpop.f32.mrb[15].mxu1  ;;  %v4454_v23 = vadd.f32 %v4453_v33, %v3928_v31 }
 0x54a   : > { %v4850_v26 = vpop.f32.mrb[16].mxu1 }
 0x54b   : > { %v4529_v56 = vadd.f32 %v4850_v26, %v4444_v16  ;;  %v4260_v29 = vpop.f32.mrb[0].mxu0  ;;  %v4523_v15 = vpop.f32.mrb[17].mxu1 }
 0x54c   : > { %v4261_v17 = vadd.f32 %v4260_v29, %v3913_v45  ;;  %v4524_v54 = vadd.f32 %v4523_v15, %v4439_v60  ;;  %v4262_v48 = vpop.f32.mrb[1].mxu0 }
 0x54d   : > { %v4263_v25 = vadd.f32 %v4262_v48, %v3913_v45  ;;  %v4547_v4 = vmax.f32 %v4529_v56, 0.0 }
 0x54e   : > { %v4350_v7 = vadd.f32 %v4349_v42, %v4261_v17  ;;  %v4544_v9 = vmax.f32 %v4524_v54, 0.0  ;;  %v4853_v63 = vpop.f32.mrb[18].mxu1 }
 0x54f   : > { %v4352_v10 = vadd.f32 %v4351_v30, %v4263_v25  ;;  %v4539_v18 = vadd.f32 %v4853_v63, %v4454_v23  ;;  %v4266_v49 = vpop.f32.mrb[2].mxu0  ;;  %v4533_v35 = vpop.f32.mrb[19].mxu1 }
 0x550   : > { %v4542_v50 = vmax.f32 %v4350_v7, 0.0  ;;  %v4267_v13 = vadd.f32 %v4266_v49, %v3918_v34  ;;  %v4534_v12 = vadd.f32 %v4533_v35, %v4449_v1  ;;  %4573 = vrot.lane.b32.xlu1 %v4544_v9, %s5224_s20  ;;  %v4268_v53 = vpop.f32.mrb[3].mxu0 }
 0x551   : > { %v4543_v36 = vmax.f32 %v4352_v10, 0.0  ;;  %v4269_v19 = vadd.f32 %v4268_v53, %v3918_v34  ;;  %v4553_v27 = vmax.f32 %v4539_v18, 0.0 }
 0x552   : > { %4554 = vst [vmem:[%s9914_s21] sm:$0xff] %v4542_v50  ;;  %v4356_v0 = vadd.f32 %v4355_v41, %v4267_v13  ;;  %v4550_v62 = vmax.f32 %v4534_v12, 0.0 }
 0x553   : > { %v4358_v22 = vadd.f32 %v4357_v39, %v4269_v19  ;;  %v4272_v21 = vpop.f32.mrb[4].mxu0  ;;  %4571 = vrot.lane.b32.xlu0 %v4543_v36, %s5224_s20  ;;  %4556 = vst.msk [vmem:[%s9914_s21 + $0x8] sm:$0xff] %vm4555_vm6, %v4543_v36 }
 0x554   : > { %v4545_v28 = vmax.f32 %v4356_v0, 0.0  ;;  %v4273_v24 = vadd.f32 %v4272_v21, %v3923_v40  ;;  %4577 = vrot.lane.b32.xlu1 %v4547_v4, %s5224_s20  ;;  %v4274_v58 = vpop.f32.mrb[5].mxu0 }
 0x555   : > { %v4546_v6 = vmax.f32 %v4358_v22, 0.0  ;;  %v4275_v38 = vadd.f32 %v4274_v58, %v3923_v40 }
 0x556   : > { %4557 = vst [vmem:[%s9914_s21 + $0x10] sm:$0xff] %v4545_v28  ;;  %v4362_v20 = vadd.f32 %v4361_v5, %v4273_v24 }
 0x557   : > { %v4364_v47 = vadd.f32 %v4363_v57, %v4275_v38  ;;  %v4278_v8 = vpop.f32.mrb[6].mxu0  ;;  %4575 = vrot.lane.b32.xlu0 %v4546_v6, %s5224_s20  ;;  %4558 = vst.msk [vmem:[%s9914_s21 + $0x18] sm:$0xff] %vm4555_vm6, %v4546_v6 }
 0x558   : > { %v4548_v11 = vmax.f32 %v4362_v20, 0.0  ;;  %v4279_v44 = vadd.f32 %v4278_v8, %v3928_v31  ;;  %4581 = vrot.lane.b32.xlu1 %v4550_v62, %s5224_s20  ;;  %v4280_v59 = vpop.f32.mrb[7].mxu0 }
 0x559   : > { %v4549_v46 = vmax.f32 %v4364_v47, 0.0  ;;  %v4281_v14 = vadd.f32 %v4280_v59, %v3928_v31 }
 0x55a   : > { %4559 = vst [vmem:[%s9914_s21 + $0x20] sm:$0xff] %v4548_v11  ;;  %v4368_v42 = vadd.f32 %v9906_v43, %v4279_v44 }
 0x55b   : > { %v4370_v30 = vadd.f32 %v9908_v3, %v4281_v14  ;;  %4579 = vrot.lane.b32.xlu0 %v4549_v46, %s5224_s20  ;;  %4560 = vst.msk [vmem:[%s9914_s21 + $0x28] sm:$0xff] %vm4555_vm6, %v4549_v46 }
 0x55c   : > { %v4551_v41 = vmax.f32 %v4368_v42, 0.0  ;;  %4585 = vrot.lane.b32.xlu1 %v4553_v27, %s5224_s20 }
 0x55d   : > { %v4552_v39 = vmax.f32 %v4370_v30, 0.0 }
 0x55e   : > { %4561 = vst [vmem:[%s9914_s21 + $0x30] sm:$0xff] %v4551_v41 }
 0x55f   : > { %4583 = vrot.lane.b32.xlu0 %v4552_v39, %s5224_s20  ;;  %4562 = vst.msk [vmem:[%s9914_s21 + $0x38] sm:$0xff] %vm4555_vm6, %v4552_v39 }
 0x5c2   : > { %v4574_v5 = vpop.permute.xlu1 %4573 }
 0x5c3   : > { %4781 = vst.msk [vmem:[%s9914_s21 + $0x48] sm:$0xff] %vm4555_vm6, %v4574_v5 }
 0x5c5   : > { %v4572_v57 = vpop.permute.xlu0 %4571 }
 0x5c6   : > { %v4588_v43 = vsel %vm4587_vm7, %v4572_v57, %v4574_v5  ;;  %v4578_v3 = vpop.permute.xlu1 %4577 }
 0x5c7   : > { %4780 = vst [vmem:[%s9914_s21 + $0x40] sm:$0xff] %v4588_v43  ;;  %4783 = vst.msk [vmem:[%s9914_s21 + $0x58] sm:$0xff] %vm4555_vm6, %v4578_v3 }
 0x5c9   : > { %v4576_v32 = vpop.permute.xlu0 %4575 }
 0x5ca   : > { %v4589_v55 = vsel %vm4587_vm7, %v4576_v32, %v4578_v3  ;;  %v4582_v52 = vpop.permute.xlu1 %4581 }
 0x5cb   : > { %4782 = vst [vmem:[%s9914_s21 + $0x50] sm:$0xff] %v4589_v55  ;;  %4785 = vst.msk [vmem:[%s9914_s21 + $0x68] sm:$0xff] %vm4555_vm6, %v4582_v52 }
 0x5cd   : > { %v4580_v51 = vpop.permute.xlu0 %4579 }
 0x5ce   : > { %v4590_v45 = vsel %vm4587_vm7, %v4580_v51, %v4582_v52  ;;  %v4586_v2 = vpop.permute.xlu1 %4585 }
 0x5cf   : > { %4784 = vst [vmem:[%s9914_s21 + $0x60] sm:$0xff] %v4590_v45  ;;  %4787 = vst.msk [vmem:[%s9914_s21 + $0x78] sm:$0xff] %vm4555_vm6, %v4586_v2 }
 0x5d1   : > { %v4584_v61 = vpop.permute.xlu0 %4583 }
 0x5d2   : > { %v4591_v40 = vsel %vm4587_vm7, %v4584_v61, %v4586_v2 }
 0x5d3   : > { %4786 = vst [vmem:[%s9914_s21 + $0x70] sm:$0xff] %v4591_v40 }
 0x5d4 PF: > { %s15_s18 = sadd.s32 1, %s5218_s18  }
 0x5d5   : > { %p12_p4 = scmp.ge.s32.totalorder %s15_s18, 4  }
 0x5d7   :  { %14 = sbr.rel (!%p12_p4) target bundleno = 1 (0x1), region = 71 }

</bundles_post_ra>
